<compile_context>
chip_gen: v7x
topology: tpu7x:2x2x1
jax: 0.10.0
libtpu: 0.0.40
codegen_flags: <defaults>
</compile_context>

<pallas_src>
import functools

import jax
import jax.numpy as jnp
from jax import lax
from jax.experimental import pallas as pl
from jax.experimental.pallas import tpu as pltpu

LANE = 128  # TPU lane width; hidden dim is padded up to a multiple of this.


def _round_up(x, m):
    return (x + m - 1) // m * m


# ----------------------------------------------------------------------------
# Pallas kernels
# ----------------------------------------------------------------------------
def _bilstm_layer_kernel(x_ref, wih_ref, whh_ref, bias_ref, out_ref, gx_ref,
                         *, seq_len, batch, hp, emit_mean):
    """One direction (grid axis 0) of one bidirectional LSTM layer.

    x_ref   : (T*B, D_in)      bf16  time-major rows (row = t*B + b), shared
    wih_ref : (1, D_in, 4*Hp)  bf16  this direction's input->gate weights
    whh_ref : (1, Hp,   4*Hp)  bf16  this direction's hidden->gate weights
    bias_ref: (1, 1,    4*Hp)  f32   b_ih + b_hh (zero in padded lanes)
    out_ref : emit_mean=False -> (T*B, Hp) bf16 : this direction's half of the
                                                  layer output (next layer in)
              emit_mean=True  -> (B,   Hp) f32  : time-mean of h (head input)
    gx_ref  : (T*B, 4*Hp) f32 VMEM scratch for the hoisted input projection.

    Gate order matches PyTorch (i, f, g, o); each gate occupies its own
    128-lane-aligned block of width Hp (real weights in [:H], zeros beyond),
    so the padded tail of h/c stays exactly 0 through the recurrence.
    """
    T, B, H = seq_len, batch, hp

    # Hoisted input projection: ONE big MXU matmul + single bias add, off the
    # serial recurrence.
    gx_ref[...] = (
        jnp.dot(x_ref[...], wih_ref[0], preferred_element_type=jnp.float32)
        + bias_ref[0]
    )
    inv_t = 1.0 / T  # static -> constant multiply, no runtime divide

    def run(reverse):
        h = jnp.zeros((B, H), jnp.float32)
        c = jnp.zeros((B, H), jnp.float32)
        acc = jnp.zeros((B, H), jnp.float32) if emit_mean else None
        # T is a small compile-time constant: fully unrolled recurrence
        # (== lax.fori_loop(..., unroll=True)) with static row indices.
        for s in range(T):
            t = (T - 1 - s) if reverse else s      # in-kernel time reversal
            row = t * B
            gates = gx_ref[pl.ds(row, B), :] + jnp.dot(
                h.astype(jnp.bfloat16), whh_ref[0],
                preferred_element_type=jnp.float32)
            # 128-lane-aligned gate slices (H == Hp == 128).
            i_g = jax.nn.sigmoid(gates[:, 0 * H:1 * H])
            f_g = jax.nn.sigmoid(gates[:, 1 * H:2 * H])
            g_g = jnp.tanh(gates[:, 2 * H:3 * H])
            o_g = jax.nn.sigmoid(gates[:, 3 * H:4 * H])
            c = f_g * c + i_g * g_g
            h = o_g * jnp.tanh(c)
            if emit_mean:
                acc = acc + h
            else:
                # Lane-dense (B, 128) store of this step's hidden state.
                out_ref[pl.ds(row, B), :] = h.astype(out_ref.dtype)
        if emit_mean:
            out_ref[...] = (acc * inv_t).astype(out_ref.dtype)

    direction = pl.program_id(0)

    @pl.when(direction == 0)
    def _fwd():
        run(reverse=False)

    @pl.when(direction == 1)
    def _bwd():
        run(reverse=True)


def _fc_kernel(m_ref, w_ref, b_ref, out_ref):
    """(B, 2*Hp) mean -> (B, num_classes) logits."""
    out_ref[...] = (
        jnp.dot(m_ref[...], w_ref[...], preferred_element_type=jnp.float32)
        + b_ref[...]
    ).astype(out_ref.dtype)


# ----------------------------------------------------------------------------
# pallas_call wrappers
# ----------------------------------------------------------------------------
def _bilstm_layer(x2d, w_ih, w_hh, bias, *, seq_len, batch, hp, emit_mean):
    n_rows, d_in = x2d.shape
    assert n_rows == seq_len * batch

    if emit_mean:
        out_shape = jax.ShapeDtypeStruct((batch, 2 * hp), jnp.float32)
        out_spec = pl.BlockSpec((batch, hp), lambda d: (0, d))
    else:
        out_shape = jax.ShapeDtypeStruct((n_rows, 2 * hp), jnp.bfloat16)
        out_spec = pl.BlockSpec((n_rows, hp), lambda d: (0, d))

    kernel = functools.partial(_bilstm_layer_kernel, seq_len=seq_len,
                               batch=batch, hp=hp, emit_mean=emit_mean)
    return pl.pallas_call(
        kernel,
        out_shape=out_shape,
        grid_spec=pltpu.PrefetchScalarGridSpec(
            num_scalar_prefetch=0,
            grid=(2,),  # fwd / bwd direction
            in_specs=[
                pl.BlockSpec((n_rows, d_in), lambda d: (0, 0)),
                pl.BlockSpec((1, d_in, 4 * hp), lambda d: (d, 0, 0)),
                pl.BlockSpec((1, hp, 4 * hp), lambda d: (d, 0, 0)),
                pl.BlockSpec((1, 1, 4 * hp), lambda d: (d, 0, 0)),
            ],
            out_specs=out_spec,
            scratch_shapes=[pltpu.VMEM((n_rows, 4 * hp), jnp.float32)],
        ),
        compiler_params=pltpu.CompilerParams(
            dimension_semantics=("parallel",)),  # v7x: one direction per TC
    )(x2d, w_ih, w_hh, bias)


def _fc(mean, fc_w, fc_b):
    b = mean.shape[0]
    c = fc_w.shape[1]
    return pl.pallas_call(
        _fc_kernel,
        out_shape=jax.ShapeDtypeStruct((b, c), jnp.float32),
        in_specs=[pl.BlockSpec(memory_space=pltpu.MemorySpace.VMEM)] * 3,
        out_specs=pl.BlockSpec(memory_space=pltpu.MemorySpace.VMEM),
    )(mean, fc_w, fc_b)


def bilstm_classifier_forward(tokens, params):
    """tokens: (B, T) int32 ids -> logits (B, num_classes)."""
    batch, seq_len = tokens.shape
    hp = params["fc_w"].shape[0] // 2

    # Embedding lookup is a gather: glue in plain JAX.
    emb = params["embedding"][tokens]                       # (B, T, E) f32
    x = jnp.transpose(emb, (1, 0, 2))                       # (T, B, E) time-major
    x = x.reshape(seq_len * batch, -1).astype(jnp.bfloat16)  # rows = (t, b)

    layers = params["lstm"]
    for layer in layers[:-1]:
        x = _bilstm_layer(x, layer["w_ih"], layer["w_hh"], layer["bias"],
                          seq_len=seq_len, batch=batch, hp=hp, emit_mean=False)
    last = layers[-1]
    mean = _bilstm_layer(x, last["w_ih"], last["w_hh"], last["bias"],
                         seq_len=seq_len, batch=batch, hp=hp, emit_mean=True)

    # nn.Dropout(0.3) is the identity in eval/inference mode.
    return _fc(mean, params["fc_w"], params["fc_b"])


# ----------------------------------------------------------------------------
# Parameters: raw PyTorch-shaped f32 params + packed/padded kernel params
# ----------------------------------------------------------------------------
def init_raw_params(seed, num_categories, embedding_dim, hidden_dim,
                    num_layers, num_classes):
    key = jax.random.PRNGKey(seed)

    def nxt():
        nonlocal key
        key, sub = jax.random.split(key)
        return sub

    h = hidden_dim
    k = 1.0 / (h ** 0.5)
    raw = {"embedding": jax.random.normal(
        nxt(), (num_categories, embedding_dim), jnp.float32)}
    layers = []
    for l in range(num_layers):
        d_in = embedding_dim if l == 0 else 2 * h
        layer = {}
        for name in ("fwd", "bwd"):
            layer[name] = {
                "w_ih": jax.random.uniform(nxt(), (4 * h, d_in), jnp.float32, -k, k),
                "w_hh": jax.random.uniform(nxt(), (4 * h, h), jnp.float32, -k, k),
                "b_ih": jax.random.uniform(nxt(), (4 * h,), jnp.float32, -k, k),
                "b_hh": jax.random.uniform(nxt(), (4 * h,), jnp.float32, -k, k),
            }
        layers.append(layer)
    raw["lstm"] = layers
    kf = 1.0 / ((2 * h) ** 0.5)
    raw["fc_w"] = jax.random.uniform(nxt(), (num_classes, 2 * h), jnp.float32, -kf, kf)
    raw["fc_b"] = jax.random.uniform(nxt(), (num_classes,), jnp.float32, -kf, kf)
    return raw


def _pad_gate_cols(w_t, h, hp):
    """(rows, 4h) -> (rows, 4hp); gate g's real columns land at [g*hp, g*hp+h)."""
    out = jnp.zeros((w_t.shape[0], 4 * hp), w_t.dtype)
    for g in range(4):
        out = out.at[:, g * hp:g * hp + h].set(w_t[:, g * h:(g + 1) * h])
    return out


def _pad_hidden_rows(w, h, hp, num_chunks):
    """(num_chunks*h, cols) -> (num_chunks*hp, cols); chunk d at rows [d*hp, d*hp+h)."""
    out = jnp.zeros((num_chunks * hp, w.shape[1]), w.dtype)
    for d in range(num_chunks):
        out = out.at[d * hp:d * hp + h, :].set(w[d * h:(d + 1) * h, :])
    return out


def pack_params(raw, hidden_dim):
    """Pad hidden dim to 128 lanes, transpose for right-multiplication, fuse the
    two biases, stack the two directions, cast MXU operands to bf16."""
    h = hidden_dim
    hp = _round_up(h, LANE)
    packed = {"embedding": raw["embedding"]}

    layers = []
    for l, layer in enumerate(raw["lstm"]):
        w_ih, w_hh, bias = [], [], []
        for name in ("fwd", "bwd"):
            p = layer[name]
            wi = _pad_gate_cols(p["w_ih"].T, h, hp)              # (d_in, 4hp)
            if l > 0:
                # this layer consumes the padded (.., 2*hp) output of layer l-1
                wi = _pad_hidden_rows(wi, h, hp, num_chunks=2)   # (2hp, 4hp)
            wh = _pad_hidden_rows(_pad_gate_cols(p["w_hh"].T, h, hp), h, hp, 1)
            b = _pad_gate_cols((p["b_ih"] + p["b_hh"])[None, :], h, hp)
            w_ih.append(wi.astype(jnp.bfloat16))
            w_hh.append(wh.astype(jnp.bfloat16))
            bias.append(b.astype(jnp.float32))
        layers.append({
            "w_ih": jnp.stack(w_ih, 0),   # (2, d_in[_pad], 4*hp) bf16
            "w_hh": jnp.stack(w_hh, 0),   # (2, hp, 4*hp)         bf16
            "bias": jnp.stack(bias, 0),   # (2, 1, 4*hp)          f32
        })
    packed["lstm"] = layers
    packed["fc_w"] = _pad_hidden_rows(raw["fc_w"].T, h, hp, num_chunks=2)  # (2hp, C)
    packed["fc_b"] = raw["fc_b"][None, :]                                  # (1, C)
    return packed


# ----------------------------------------------------------------------------
# Pure-JAX f32 reference (PyTorch semantics) for verification
# ----------------------------------------------------------------------------
def _ref_lstm_dir(x_tmaj, p):
    _, b, _ = x_tmaj.shape
    h_dim = p["w_hh"].shape[1]
    w_ih_t, w_hh_t = p["w_ih"].T, p["w_hh"].T
    bias = p["b_ih"] + p["b_hh"]

    def step(carry, x_t):
        h, c = carry
        gates = x_t @ w_ih_t + h @ w_hh_t + bias
        i_g, f_g, g_g, o_g = jnp.split(gates, 4, axis=-1)
        i_g, f_g, o_g = jax.nn.sigmoid(i_g), jax.nn.sigmoid(f_g), jax.nn.sigmoid(o_g)
        g_g = jnp.tanh(g_g)
        c = f_g * c + i_g * g_g
        h = o_g * jnp.tanh(c)
        return (h, c), h

    init = (jnp.zeros((b, h_dim), jnp.float32), jnp.zeros((b, h_dim), jnp.float32))
    _, ys = lax.scan(step, init, x_tmaj)
    return ys


def reference_forward(tokens, raw):
    emb = raw["embedding"][tokens]
    x = jnp.transpose(emb, (1, 0, 2))
    for layer in raw["lstm"]:
        fwd = _ref_lstm_dir(x, layer["fwd"])
        bwd = _ref_lstm_dir(x[::-1], layer["bwd"])[::-1]
        x = jnp.concatenate([fwd, bwd], axis=-1)
    m = jnp.mean(x, axis=0)
    return m @ raw["fc_w"].T + raw["fc_b"]


# ----------------------------------------------------------------------------
if __name__ == "__main__":
    NUM_CATEGORIES = 16
    EMBEDDING_DIM = 16
    HIDDEN_DIM = 32
    NUM_LAYERS = 2
    NUM_CLASSES = 4
    BATCH = 2
    SEQ = 8

    raw = init_raw_params(0, NUM_CATEGORIES, EMBEDDING_DIM, HIDDEN_DIM,
                          NUM_LAYERS, NUM_CLASSES)
    params = pack_params(raw, HIDDEN_DIM)

    tokens = jax.random.randint(jax.random.PRNGKey(0), (BATCH, SEQ),
                                0, NUM_CATEGORIES, dtype=jnp.int32)

    forward = jax.jit(bilstm_classifier_forward)
    logits = jax.block_until_ready(forward(tokens, params))
    assert logits.shape == (BATCH, NUM_CLASSES)

    ref = reference_forward(tokens, raw)
    # Kernel uses bf16 MXU operands with f32 accumulation; reference is pure f32,
    # hence the loose (but still meaningful) tolerance.
    err = jnp.max(jnp.abs(logits - ref))
    assert jnp.allclose(logits, ref, atol=2e-2, rtol=2e-2), (err, logits, ref)

    print("KERNEL_OK")
</pallas_src>

<mosaic_0001>
module attributes {stable_mosaic.version = 11 : i64} {
  func.func @_fc_kernel(%arg0: memref<2x256xf32, #tpu.memory_space<vmem>>, %arg1: memref<256x4xf32, #tpu.memory_space<vmem>>, %arg2: memref<1x4xf32, #tpu.memory_space<vmem>>, %arg3: memref<2x4xf32, #tpu.memory_space<vmem>>) attributes {dimension_semantics = [], scalar_prefetch = 0 : i64, scratch_operands = 0 : i64, tpu.core_type = #tpu.core_type<tc>} {
    %c0 = arith.constant 0 : index
    %c0_0 = arith.constant 0 : index
    %0 = vector.load %arg0[%c0, %c0_0] : memref<2x256xf32, #tpu.memory_space<vmem>>, vector<2x256xf32>
    %c0_1 = arith.constant 0 : index
    %c0_2 = arith.constant 0 : index
    %1 = vector.load %arg1[%c0_1, %c0_2] : memref<256x4xf32, #tpu.memory_space<vmem>>, vector<256x4xf32>
    %cst = arith.constant dense<0.000000e+00> : vector<2x4xf32>
    %2 = tpu.matmul %0, %1, %cst {dimension_numbers = #tpu.dot_dimension_numbers<[1], [0], [0], [1], [0, 0, 1, 1], [], []>} : vector<2x256xf32>, vector<256x4xf32>, vector<2x4xf32> -> vector<2x4xf32>
    %c0_3 = arith.constant 0 : index
    %c0_4 = arith.constant 0 : index
    %3 = vector.load %arg2[%c0_3, %c0_4] : memref<1x4xf32, #tpu.memory_space<vmem>>, vector<1x4xf32>
    %4 = vector.broadcast %3 : vector<1x4xf32> to vector<2x4xf32>
    %5 = arith.addf %2, %4 : vector<2x4xf32>
    %c0_5 = arith.constant 0 : index
    %c0_6 = arith.constant 0 : index
    %6 = vector.load %arg3[%c0_5, %c0_6] : memref<2x4xf32, #tpu.memory_space<vmem>>, vector<2x4xf32>
    tpu.vector_store %arg3[%c0_5, %c0_6], %5 {strides = array<i32>} : memref<2x4xf32, #tpu.memory_space<vmem>>, vector<2x4xf32>,
    return
  }
}

module attributes {stable_mosaic.version = 11 : i64} {
  func.func @_bilstm_layer_kernel(%arg0: i32, %arg1: memref<16x256xbf16, #tpu.memory_space<vmem>>, %arg2: memref<1x256x512xbf16, #tpu.memory_space<vmem>>, %arg3: memref<1x128x512xbf16, #tpu.memory_space<vmem>>, %arg4: memref<1x1x512xf32, #tpu.memory_space<vmem>>, %arg5: memref<2x128xf32, #tpu.memory_space<vmem>>, %arg6: memref<16x512xf32, #tpu.memory_space<vmem>>) attributes {dimension_semantics = [#tpu.dimension_semantics<parallel>], iteration_bounds = array<i64: 2>, scalar_prefetch = 0 : i64, scratch_operands = 1 : i64, tpu.core_type = #tpu.core_type<tc>, window_params = [{pipeline_mode = #tpu.pipeline_mode<synchronous>, transform_indices = @transform_0, window_bounds = array<i64: 16, 256>}, {transform_indices = @transform_1, window_bounds = array<i64: 1, 256, 512>}, {transform_indices = @transform_2, window_bounds = array<i64: 1, 128, 512>}, {transform_indices = @transform_3, window_bounds = array<i64: 1, 1, 512>}, {transform_indices = @transform_4, window_bounds = array<i64: 2, 128>}]} {
    %c0 = arith.constant 0 : index
    %c0_0 = arith.constant 0 : index
    %0 = vector.load %arg1[%c0, %c0_0] : memref<16x256xbf16, #tpu.memory_space<vmem>>, vector<16x256xbf16>
    %c0_1 = arith.constant 0 : index
    %c0_2 = arith.constant 0 : index
    %c0_3 = arith.constant 0 : index
    %1 = vector.load %arg2[%c0_1, %c0_2, %c0_3] : memref<1x256x512xbf16, #tpu.memory_space<vmem>>, vector<1x256x512xbf16>
    %2 = vector.shape_cast %1 : vector<1x256x512xbf16> to vector<256x512xbf16>
    %cst = arith.constant dense<0.000000e+00> : vector<16x512xf32>
    %3 = tpu.matmul %0, %2, %cst {dimension_numbers = #tpu.dot_dimension_numbers<[1], [0], [0], [1], [0, 0, 1, 1], [], []>} : vector<16x256xbf16>, vector<256x512xbf16>, vector<16x512xf32> -> vector<16x512xf32>
    %c0_4 = arith.constant 0 : index
    %c0_5 = arith.constant 0 : index
    %c0_6 = arith.constant 0 : index
    %4 = vector.load %arg4[%c0_4, %c0_5, %c0_6] : memref<1x1x512xf32, #tpu.memory_space<vmem>>, vector<1x1x512xf32>
    %5 = vector.shape_cast %4 : vector<1x1x512xf32> to vector<1x512xf32>
    %6 = vector.broadcast %5 : vector<1x512xf32> to vector<16x512xf32>
    %7 = arith.addf %3, %6 : vector<16x512xf32>
    %c0_7 = arith.constant 0 : index
    %c0_8 = arith.constant 0 : index
    %8 = vector.load %arg6[%c0_7, %c0_8] : memref<16x512xf32, #tpu.memory_space<vmem>>, vector<16x512xf32>
    tpu.vector_store %arg6[%c0_7, %c0_8], %7 {strides = array<i32>} : memref<16x512xf32, #tpu.memory_space<vmem>>, vector<16x512xf32>,
    %c0_i32 = arith.constant 0 : i32
    %9 = arith.cmpi eq, %arg0, %c0_i32 : i32
    %10 = arith.extui %9 : i1 to i32
    %c0_i32_9 = arith.constant 0 : i32
    %11 = arith.cmpi ne, %10, %c0_i32_9 : i32
    scf.if %11 {
      %cst_11 = arith.constant 0.000000e+00 : f32
      %15 = vector.broadcast %cst_11 : f32 to vector<2x128xf32>
      %cst_12 = arith.constant 0.000000e+00 : f32
      %16 = vector.broadcast %cst_12 : f32 to vector<2x128xf32>
      %cst_13 = arith.constant 0.000000e+00 : f32
      %17 = vector.broadcast %cst_13 : f32 to vector<2x128xf32>
      %c0_14 = arith.constant 0 : index
      %c0_15 = arith.constant 0 : index
      %18 = vector.load %arg6[%c0_14, %c0_15] : memref<16x512xf32, #tpu.memory_space<vmem>>, vector<2x512xf32>
      %19 = arith.truncf %15 : vector<2x128xf32> to vector<2x128xbf16>
      %c0_16 = arith.constant 0 : index
      %c0_17 = arith.constant 0 : index
      %c0_18 = arith.constant 0 : index
      %20 = vector.load %arg3[%c0_16, %c0_17, %c0_18] : memref<1x128x512xbf16, #tpu.memory_space<vmem>>, vector<1x128x512xbf16>
      %21 = vector.shape_cast %20 : vector<1x128x512xbf16> to vector<128x512xbf16>
      %cst_19 = arith.constant dense<0.000000e+00> : vector<2x512xf32>
      %22 = tpu.matmul %19, %21, %cst_19 {dimension_numbers = #tpu.dot_dimension_numbers<[1], [0], [0], [1], [0, 0, 1, 1], [], []>} : vector<2x128xbf16>, vector<128x512xbf16>, vector<2x512xf32> -> vector<2x512xf32>
      %23 = arith.addf %18, %22 : vector<2x512xf32>
      %24 = vector.extract_strided_slice %23 {offsets = [0, 0], sizes = [2, 128], strides = [1, 1]} : vector<2x512xf32> to vector<2x128xf32>
      %25 = arith.negf %24 : vector<2x128xf32>
      %26 = math.exp %25 : vector<2x128xf32>
      %cst_20 = arith.constant 1.000000e+00 : f32
      %27 = vector.broadcast %cst_20 : f32 to vector<2x128xf32>
      %28 = arith.addf %27, %26 : vector<2x128xf32>
      %29 = arith.divf %27, %28 : vector<2x128xf32>
      %30 = vector.extract_strided_slice %23 {offsets = [0, 128], sizes = [2, 128], strides = [1, 1]} : vector<2x512xf32> to vector<2x128xf32>
      %31 = arith.negf %30 : vector<2x128xf32>
      %32 = math.exp %31 : vector<2x128xf32>
      %cst_21 = arith.constant 1.000000e+00 : f32
      %33 = vector.broadcast %cst_21 : f32 to vector<2x128xf32>
      %34 = arith.addf %33, %32 : vector<2x128xf32>
      %35 = arith.divf %33, %34 : vector<2x128xf32>
      %36 = vector.extract_strided_slice %23 {offsets = [0, 256], sizes = [2, 128], strides = [1, 1]} : vector<2x512xf32> to vector<2x128xf32>
      %37 = math.tanh %36 : vector<2x128xf32>
      %38 = vector.extract_strided_slice %23 {offsets = [0, 384], sizes = [2, 128], strides = [1, 1]} : vector<2x512xf32> to vector<2x128xf32>
      %39 = arith.negf %38 : vector<2x128xf32>
      %40 = math.exp %39 : vector<2x128xf32>
      %cst_22 = arith.constant 1.000000e+00 : f32
      %41 = vector.broadcast %cst_22 : f32 to vector<2x128xf32>
      %42 = arith.addf %41, %40 : vector<2x128xf32>
      %43 = arith.divf %41, %42 : vector<2x128xf32>
      %44 = arith.mulf %35, %16 : vector<2x128xf32>
      %45 = arith.mulf %29, %37 : vector<2x128xf32>
      %46 = arith.addf %44, %45 : vector<2x128xf32>
      %47 = math.tanh %46 : vector<2x128xf32>
      %48 = arith.mulf %43, %47 : vector<2x128xf32>
      %49 = arith.addf %17, %48 : vector<2x128xf32>
      %c2 = arith.constant 2 : index
      %c0_23 = arith.constant 0 : index
      %50 = vector.load %arg6[%c2, %c0_23] : memref<16x512xf32, #tpu.memory_space<vmem>>, vector<2x512xf32>
      %51 = arith.truncf %48 : vector<2x128xf32> to vector<2x128xbf16>
      %c0_24 = arith.constant 0 : index
      %c0_25 = arith.constant 0 : index
      %c0_26 = arith.constant 0 : index
      %52 = vector.load %arg3[%c0_24, %c0_25, %c0_26] : memref<1x128x512xbf16, #tpu.memory_space<vmem>>, vector<1x128x512xbf16>
      %53 = vector.shape_cast %52 : vector<1x128x512xbf16> to vector<128x512xbf16>
      %cst_27 = arith.constant dense<0.000000e+00> : vector<2x512xf32>
      %54 = tpu.matmul %51, %53, %cst_27 {dimension_numbers = #tpu.dot_dimension_numbers<[1], [0], [0], [1], [0, 0, 1, 1], [], []>} : vector<2x128xbf16>, vector<128x512xbf16>, vector<2x512xf32> -> vector<2x512xf32>
      %55 = arith.addf %50, %54 : vector<2x512xf32>
      %56 = vector.extract_strided_slice %55 {offsets = [0, 0], sizes = [2, 128], strides = [1, 1]} : vector<2x512xf32> to vector<2x128xf32>
      %57 = arith.negf %56 : vector<2x128xf32>
      %58 = math.exp %57 : vector<2x128xf32>
      %cst_28 = arith.constant 1.000000e+00 : f32
      %59 = vector.broadcast %cst_28 : f32 to vector<2x128xf32>
      %60 = arith.addf %59, %58 : vector<2x128xf32>
      %61 = arith.divf %59, %60 : vector<2x128xf32>
      %62 = vector.extract_strided_slice %55 {offsets = [0, 128], sizes = [2, 128], strides = [1, 1]} : vector<2x512xf32> to vector<2x128xf32>
      %63 = arith.negf %62 : vector<2x128xf32>
      %64 = math.exp %63 : vector<2x128xf32>
      %cst_29 = arith.constant 1.000000e+00 : f32
      %65 = vector.broadcast %cst_29 : f32 to vector<2x128xf32>
      %66 = arith.addf %65, %64 : vector<2x128xf32>
      %67 = arith.divf %65, %66 : vector<2x128xf32>
      %68 = vector.extract_strided_slice %55 {offsets = [0, 256], sizes = [2, 128], strides = [1, 1]} : vector<2x512xf32> to vector<2x128xf32>
      %69 = math.tanh %68 : vector<2x128xf32>
      %70 = vector.extract_strided_slice %55 {offsets = [0, 384], sizes = [2, 128], strides = [1, 1]} : vector<2x512xf32> to vector<2x128xf32>
      %71 = arith.negf %70 : vector<2x128xf32>
      %72 = math.exp %71 : vector<2x128xf32>
      %cst_30 = arith.constant 1.000000e+00 : f32
      %73 = vector.broadcast %cst_30 : f32 to vector<2x128xf32>
      %74 = arith.addf %73, %72 : vector<2x128xf32>
      %75 = arith.divf %73, %74 : vector<2x128xf32>
      %76 = arith.mulf %67, %46 : vector<2x128xf32>
      %77 = arith.mulf %61, %69 : vector<2x128xf32>
      %78 = arith.addf %76, %77 : vector<2x128xf32>
      %79 = math.tanh %78 : vector<2x128xf32>
      %80 = arith.mulf %75, %79 : vector<2x128xf32>
      %81 = arith.addf %49, %80 : vector<2x128xf32>
      %c4 = arith.constant 4 : index
      %c0_31 = arith.constant 0 : index
      %82 = vector.load %arg6[%c4, %c0_31] : memref<16x512xf32, #tpu.memory_space<vmem>>, vector<2x512xf32>
      %83 = arith.truncf %80 : vector<2x128xf32> to vector<2x128xbf16>
      %c0_32 = arith.constant 0 : index
      %c0_33 = arith.constant 0 : index
      %c0_34 = arith.constant 0 : index
      %84 = vector.load %arg3[%c0_32, %c0_33, %c0_34] : memref<1x128x512xbf16, #tpu.memory_space<vmem>>, vector<1x128x512xbf16>
      %85 = vector.shape_cast %84 : vector<1x128x512xbf16> to vector<128x512xbf16>
      %cst_35 = arith.constant dense<0.000000e+00> : vector<2x512xf32>
      %86 = tpu.matmul %83, %85, %cst_35 {dimension_numbers = #tpu.dot_dimension_numbers<[1], [0], [0], [1], [0, 0, 1, 1], [], []>} : vector<2x128xbf16>, vector<128x512xbf16>, vector<2x512xf32> -> vector<2x512xf32>
      %87 = arith.addf %82, %86 : vector<2x512xf32>
      %88 = vector.extract_strided_slice %87 {offsets = [0, 0], sizes = [2, 128], strides = [1, 1]} : vector<2x512xf32> to vector<2x128xf32>
      %89 = arith.negf %88 : vector<2x128xf32>
      %90 = math.exp %89 : vector<2x128xf32>
      %cst_36 = arith.constant 1.000000e+00 : f32
      %91 = vector.broadcast %cst_36 : f32 to vector<2x128xf32>
      %92 = arith.addf %91, %90 : vector<2x128xf32>
      %93 = arith.divf %91, %92 : vector<2x128xf32>
      %94 = vector.extract_strided_slice %87 {offsets = [0, 128], sizes = [2, 128], strides = [1, 1]} : vector<2x512xf32> to vector<2x128xf32>
      %95 = arith.negf %94 : vector<2x128xf32>
      %96 = math.exp %95 : vector<2x128xf32>
      %cst_37 = arith.constant 1.000000e+00 : f32
      %97 = vector.broadcast %cst_37 : f32 to vector<2x128xf32>
      %98 = arith.addf %97, %96 : vector<2x128xf32>
      %99 = arith.divf %97, %98 : vector<2x128xf32>
      %100 = vector.extract_strided_slice %87 {offsets = [0, 256], sizes = [2, 128], strides = [1, 1]} : vector<2x512xf32> to vector<2x128xf32>
      %101 = math.tanh %100 : vector<2x128xf32>
      %102 = vector.extract_strided_slice %87 {offsets = [0, 384], sizes = [2, 128], strides = [1, 1]} : vector<2x512xf32> to vector<2x128xf32>
      %103 = arith.negf %102 : vector<2x128xf32>
      %104 = math.exp %103 : vector<2x128xf32>
      %cst_38 = arith.constant 1.000000e+00 : f32
      %105 = vector.broadcast %cst_38 : f32 to vector<2x128xf32>
      %106 = arith.addf %105, %104 : vector<2x128xf32>
      %107 = arith.divf %105, %106 : vector<2x128xf32>
      %108 = arith.mulf %99, %78 : vector<2x128xf32>
      %109 = arith.mulf %93, %101 : vector<2x128xf32>
      %110 = arith.addf %108, %109 : vector<2x128xf32>
      %111 = math.tanh %110 : vector<2x128xf32>
      %112 = arith.mulf %107, %111 : vector<2x128xf32>
      %113 = arith.addf %81, %112 : vector<2x128xf32>
      %c6 = arith.constant 6 : index
      %c0_39 = arith.constant 0 : index
      %114 = vector.load %arg6[%c6, %c0_39] : memref<16x512xf32, #tpu.memory_space<vmem>>, vector<2x512xf32>
      %115 = arith.truncf %112 : vector<2x128xf32> to vector<2x128xbf16>
      %c0_40 = arith.constant 0 : index
      %c0_41 = arith.constant 0 : index
      %c0_42 = arith.constant 0 : index
      %116 = vector.load %arg3[%c0_40, %c0_41, %c0_42] : memref<1x128x512xbf16, #tpu.memory_space<vmem>>, vector<1x128x512xbf16>
      %117 = vector.shape_cast %116 : vector<1x128x512xbf16> to vector<128x512xbf16>
      %cst_43 = arith.constant dense<0.000000e+00> : vector<2x512xf32>
      %118 = tpu.matmul %115, %117, %cst_43 {dimension_numbers = #tpu.dot_dimension_numbers<[1], [0], [0], [1], [0, 0, 1, 1], [], []>} : vector<2x128xbf16>, vector<128x512xbf16>, vector<2x512xf32> -> vector<2x512xf32>
      %119 = arith.addf %114, %118 : vector<2x512xf32>
      %120 = vector.extract_strided_slice %119 {offsets = [0, 0], sizes = [2, 128], strides = [1, 1]} : vector<2x512xf32> to vector<2x128xf32>
      %121 = arith.negf %120 : vector<2x128xf32>
      %122 = math.exp %121 : vector<2x128xf32>
      %cst_44 = arith.constant 1.000000e+00 : f32
      %123 = vector.broadcast %cst_44 : f32 to vector<2x128xf32>
      %124 = arith.addf %123, %122 : vector<2x128xf32>
      %125 = arith.divf %123, %124 : vector<2x128xf32>
      %126 = vector.extract_strided_slice %119 {offsets = [0, 128], sizes = [2, 128], strides = [1, 1]} : vector<2x512xf32> to vector<2x128xf32>
      %127 = arith.negf %126 : vector<2x128xf32>
      %128 = math.exp %127 : vector<2x128xf32>
      %cst_45 = arith.constant 1.000000e+00 : f32
      %129 = vector.broadcast %cst_45 : f32 to vector<2x128xf32>
      %130 = arith.addf %129, %128 : vector<2x128xf32>
      %131 = arith.divf %129, %130 : vector<2x128xf32>
      %132 = vector.extract_strided_slice %119 {offsets = [0, 256], sizes = [2, 128], strides = [1, 1]} : vector<2x512xf32> to vector<2x128xf32>
      %133 = math.tanh %132 : vector<2x128xf32>
      %134 = vector.extract_strided_slice %119 {offsets = [0, 384], sizes = [2, 128], strides = [1, 1]} : vector<2x512xf32> to vector<2x128xf32>
      %135 = arith.negf %134 : vector<2x128xf32>
      %136 = math.exp %135 : vector<2x128xf32>
      %cst_46 = arith.constant 1.000000e+00 : f32
      %137 = vector.broadcast %cst_46 : f32 to vector<2x128xf32>
      %138 = arith.addf %137, %136 : vector<2x128xf32>
      %139 = arith.divf %137, %138 : vector<2x128xf32>
      %140 = arith.mulf %131, %110 : vector<2x128xf32>
      %141 = arith.mulf %125, %133 : vector<2x128xf32>
      %142 = arith.addf %140, %141 : vector<2x128xf32>
      %143 = math.tanh %142 : vector<2x128xf32>
      %144 = arith.mulf %139, %143 : vector<2x128xf32>
      %145 = arith.addf %113, %144 : vector<2x128xf32>
      %c8 = arith.constant 8 : index
      %c0_47 = arith.constant 0 : index
      %146 = vector.load %arg6[%c8, %c0_47] : memref<16x512xf32, #tpu.memory_space<vmem>>, vector<2x512xf32>
      %147 = arith.truncf %144 : vector<2x128xf32> to vector<2x128xbf16>
      %c0_48 = arith.constant 0 : index
      %c0_49 = arith.constant 0 : index
      %c0_50 = arith.constant 0 : index
      %148 = vector.load %arg3[%c0_48, %c0_49, %c0_50] : memref<1x128x512xbf16, #tpu.memory_space<vmem>>, vector<1x128x512xbf16>
      %149 = vector.shape_cast %148 : vector<1x128x512xbf16> to vector<128x512xbf16>
      %cst_51 = arith.constant dense<0.000000e+00> : vector<2x512xf32>
      %150 = tpu.matmul %147, %149, %cst_51 {dimension_numbers = #tpu.dot_dimension_numbers<[1], [0], [0], [1], [0, 0, 1, 1], [], []>} : vector<2x128xbf16>, vector<128x512xbf16>, vector<2x512xf32> -> vector<2x512xf32>
      %151 = arith.addf %146, %150 : vector<2x512xf32>
      %152 = vector.extract_strided_slice %151 {offsets = [0, 0], sizes = [2, 128], strides = [1, 1]} : vector<2x512xf32> to vector<2x128xf32>
      %153 = arith.negf %152 : vector<2x128xf32>
      %154 = math.exp %153 : vector<2x128xf32>
      %cst_52 = arith.constant 1.000000e+00 : f32
      %155 = vector.broadcast %cst_52 : f32 to vector<2x128xf32>
      %156 = arith.addf %155, %154 : vector<2x128xf32>
      %157 = arith.divf %155, %156 : vector<2x128xf32>
      %158 = vector.extract_strided_slice %151 {offsets = [0, 128], sizes = [2, 128], strides = [1, 1]} : vector<2x512xf32> to vector<2x128xf32>
      %159 = arith.negf %158 : vector<2x128xf32>
      %160 = math.exp %159 : vector<2x128xf32>
      %cst_53 = arith.constant 1.000000e+00 : f32
      %161 = vector.broadcast %cst_53 : f32 to vector<2x128xf32>
      %162 = arith.addf %161, %160 : vector<2x128xf32>
      %163 = arith.divf %161, %162 : vector<2x128xf32>
      %164 = vector.extract_strided_slice %151 {offsets = [0, 256], sizes = [2, 128], strides = [1, 1]} : vector<2x512xf32> to vector<2x128xf32>
      %165 = math.tanh %164 : vector<2x128xf32>
      %166 = vector.extract_strided_slice %151 {offsets = [0, 384], sizes = [2, 128], strides = [1, 1]} : vector<2x512xf32> to vector<2x128xf32>
      %167 = arith.negf %166 : vector<2x128xf32>
      %168 = math.exp %167 : vector<2x128xf32>
      %cst_54 = arith.constant 1.000000e+00 : f32
      %169 = vector.broadcast %cst_54 : f32 to vector<2x128xf32>
      %170 = arith.addf %169, %168 : vector<2x128xf32>
      %171 = arith.divf %169, %170 : vector<2x128xf32>
      %172 = arith.mulf %163, %142 : vector<2x128xf32>
      %173 = arith.mulf %157, %165 : vector<2x128xf32>
      %174 = arith.addf %172, %173 : vector<2x128xf32>
      %175 = math.tanh %174 : vector<2x128xf32>
      %176 = arith.mulf %171, %175 : vector<2x128xf32>
      %177 = arith.addf %145, %176 : vector<2x128xf32>
      %c10 = arith.constant 10 : index
      %c0_55 = arith.constant 0 : index
      %178 = vector.load %arg6[%c10, %c0_55] : memref<16x512xf32, #tpu.memory_space<vmem>>, vector<2x512xf32>
      %179 = arith.truncf %176 : vector<2x128xf32> to vector<2x128xbf16>
      %c0_56 = arith.constant 0 : index
      %c0_57 = arith.constant 0 : index
      %c0_58 = arith.constant 0 : index
      %180 = vector.load %arg3[%c0_56, %c0_57, %c0_58] : memref<1x128x512xbf16, #tpu.memory_space<vmem>>, vector<1x128x512xbf16>
      %181 = vector.shape_cast %180 : vector<1x128x512xbf16> to vector<128x512xbf16>
      %cst_59 = arith.constant dense<0.000000e+00> : vector<2x512xf32>
      %182 = tpu.matmul %179, %181, %cst_59 {dimension_numbers = #tpu.dot_dimension_numbers<[1], [0], [0], [1], [0, 0, 1, 1], [], []>} : vector<2x128xbf16>, vector<128x512xbf16>, vector<2x512xf32> -> vector<2x512xf32>
      %183 = arith.addf %178, %182 : vector<2x512xf32>
      %184 = vector.extract_strided_slice %183 {offsets = [0, 0], sizes = [2, 128], strides = [1, 1]} : vector<2x512xf32> to vector<2x128xf32>
      %185 = arith.negf %184 : vector<2x128xf32>
      %186 = math.exp %185 : vector<2x128xf32>
      %cst_60 = arith.constant 1.000000e+00 : f32
      %187 = vector.broadcast %cst_60 : f32 to vector<2x128xf32>
      %188 = arith.addf %187, %186 : vector<2x128xf32>
      %189 = arith.divf %187, %188 : vector<2x128xf32>
      %190 = vector.extract_strided_slice %183 {offsets = [0, 128], sizes = [2, 128], strides = [1, 1]} : vector<2x512xf32> to vector<2x128xf32>
      %191 = arith.negf %190 : vector<2x128xf32>
      %192 = math.exp %191 : vector<2x128xf32>
      %cst_61 = arith.constant 1.000000e+00 : f32
      %193 = vector.broadcast %cst_61 : f32 to vector<2x128xf32>
      %194 = arith.addf %193, %192 : vector<2x128xf32>
      %195 = arith.divf %193, %194 : vector<2x128xf32>
      %196 = vector.extract_strided_slice %183 {offsets = [0, 256], sizes = [2, 128], strides = [1, 1]} : vector<2x512xf32> to vector<2x128xf32>
      %197 = math.tanh %196 : vector<2x128xf32>
      %198 = vector.extract_strided_slice %183 {offsets = [0, 384], sizes = [2, 128], strides = [1, 1]} : vector<2x512xf32> to vector<2x128xf32>
      %199 = arith.negf %198 : vector<2x128xf32>
      %200 = math.exp %199 : vector<2x128xf32>
      %cst_62 = arith.constant 1.000000e+00 : f32
      %201 = vector.broadcast %cst_62 : f32 to vector<2x128xf32>
      %202 = arith.addf %201, %200 : vector<2x128xf32>
      %203 = arith.divf %201, %202 : vector<2x128xf32>
      %204 = arith.mulf %195, %174 : vector<2x128xf32>
      %205 = arith.mulf %189, %197 : vector<2x128xf32>
      %206 = arith.addf %204, %205 : vector<2x128xf32>
      %207 = math.tanh %206 : vector<2x128xf32>
      %208 = arith.mulf %203, %207 : vector<2x128xf32>
      %209 = arith.addf %177, %208 : vector<2x128xf32>
      %c12 = arith.constant 12 : index
      %c0_63 = arith.constant 0 : index
      %210 = vector.load %arg6[%c12, %c0_63] : memref<16x512xf32, #tpu.memory_space<vmem>>, vector<2x512xf32>
      %211 = arith.truncf %208 : vector<2x128xf32> to vector<2x128xbf16>
      %c0_64 = arith.constant 0 : index
      %c0_65 = arith.constant 0 : index
      %c0_66 = arith.constant 0 : index
      %212 = vector.load %arg3[%c0_64, %c0_65, %c0_66] : memref<1x128x512xbf16, #tpu.memory_space<vmem>>, vector<1x128x512xbf16>
      %213 = vector.shape_cast %212 : vector<1x128x512xbf16> to vector<128x512xbf16>
      %cst_67 = arith.constant dense<0.000000e+00> : vector<2x512xf32>
      %214 = tpu.matmul %211, %213, %cst_67 {dimension_numbers = #tpu.dot_dimension_numbers<[1], [0], [0], [1], [0, 0, 1, 1], [], []>} : vector<2x128xbf16>, vector<128x512xbf16>, vector<2x512xf32> -> vector<2x512xf32>
      %215 = arith.addf %210, %214 : vector<2x512xf32>
      %216 = vector.extract_strided_slice %215 {offsets = [0, 0], sizes = [2, 128], strides = [1, 1]} : vector<2x512xf32> to vector<2x128xf32>
      %217 = arith.negf %216 : vector<2x128xf32>
      %218 = math.exp %217 : vector<2x128xf32>
      %cst_68 = arith.constant 1.000000e+00 : f32
      %219 = vector.broadcast %cst_68 : f32 to vector<2x128xf32>
      %220 = arith.addf %219, %218 : vector<2x128xf32>
      %221 = arith.divf %219, %220 : vector<2x128xf32>
      %222 = vector.extract_strided_slice %215 {offsets = [0, 128], sizes = [2, 128], strides = [1, 1]} : vector<2x512xf32> to vector<2x128xf32>
      %223 = arith.negf %222 : vector<2x128xf32>
      %224 = math.exp %223 : vector<2x128xf32>
      %cst_69 = arith.constant 1.000000e+00 : f32
      %225 = vector.broadcast %cst_69 : f32 to vector<2x128xf32>
      %226 = arith.addf %225, %224 : vector<2x128xf32>
      %227 = arith.divf %225, %226 : vector<2x128xf32>
      %228 = vector.extract_strided_slice %215 {offsets = [0, 256], sizes = [2, 128], strides = [1, 1]} : vector<2x512xf32> to vector<2x128xf32>
      %229 = math.tanh %228 : vector<2x128xf32>
      %230 = vector.extract_strided_slice %215 {offsets = [0, 384], sizes = [2, 128], strides = [1, 1]} : vector<2x512xf32> to vector<2x128xf32>
      %231 = arith.negf %230 : vector<2x128xf32>
      %232 = math.exp %231 : vector<2x128xf32>
      %cst_70 = arith.constant 1.000000e+00 : f32
      %233 = vector.broadcast %cst_70 : f32 to vector<2x128xf32>
      %234 = arith.addf %233, %232 : vector<2x128xf32>
      %235 = arith.divf %233, %234 : vector<2x128xf32>
      %236 = arith.mulf %227, %206 : vector<2x128xf32>
      %237 = arith.mulf %221, %229 : vector<2x128xf32>
      %238 = arith.addf %236, %237 : vector<2x128xf32>
      %239 = math.tanh %238 : vector<2x128xf32>
      %240 = arith.mulf %235, %239 : vector<2x128xf32>
      %241 = arith.addf %209, %240 : vector<2x128xf32>
      %c14 = arith.constant 14 : index
      %c0_71 = arith.constant 0 : index
      %242 = vector.load %arg6[%c14, %c0_71] : memref<16x512xf32, #tpu.memory_space<vmem>>, vector<2x512xf32>
      %243 = arith.truncf %240 : vector<2x128xf32> to vector<2x128xbf16>
      %c0_72 = arith.constant 0 : index
      %c0_73 = arith.constant 0 : index
      %c0_74 = arith.constant 0 : index
      %244 = vector.load %arg3[%c0_72, %c0_73, %c0_74] : memref<1x128x512xbf16, #tpu.memory_space<vmem>>, vector<1x128x512xbf16>
      %245 = vector.shape_cast %244 : vector<1x128x512xbf16> to vector<128x512xbf16>
      %cst_75 = arith.constant dense<0.000000e+00> : vector<2x512xf32>
      %246 = tpu.matmul %243, %245, %cst_75 {dimension_numbers = #tpu.dot_dimension_numbers<[1], [0], [0], [1], [0, 0, 1, 1], [], []>} : vector<2x128xbf16>, vector<128x512xbf16>, vector<2x512xf32> -> vector<2x512xf32>
      %247 = arith.addf %242, %246 : vector<2x512xf32>
      %248 = vector.extract_strided_slice %247 {offsets = [0, 0], sizes = [2, 128], strides = [1, 1]} : vector<2x512xf32> to vector<2x128xf32>
      %249 = arith.negf %248 : vector<2x128xf32>
      %250 = math.exp %249 : vector<2x128xf32>
      %cst_76 = arith.constant 1.000000e+00 : f32
      %251 = vector.broadcast %cst_76 : f32 to vector<2x128xf32>
      %252 = arith.addf %251, %250 : vector<2x128xf32>
      %253 = arith.divf %251, %252 : vector<2x128xf32>
      %254 = vector.extract_strided_slice %247 {offsets = [0, 128], sizes = [2, 128], strides = [1, 1]} : vector<2x512xf32> to vector<2x128xf32>
      %255 = arith.negf %254 : vector<2x128xf32>
      %256 = math.exp %255 : vector<2x128xf32>
      %cst_77 = arith.constant 1.000000e+00 : f32
      %257 = vector.broadcast %cst_77 : f32 to vector<2x128xf32>
      %258 = arith.addf %257, %256 : vector<2x128xf32>
      %259 = arith.divf %257, %258 : vector<2x128xf32>
      %260 = vector.extract_strided_slice %247 {offsets = [0, 256], sizes = [2, 128], strides = [1, 1]} : vector<2x512xf32> to vector<2x128xf32>
      %261 = math.tanh %260 : vector<2x128xf32>
      %262 = vector.extract_strided_slice %247 {offsets = [0, 384], sizes = [2, 128], strides = [1, 1]} : vector<2x512xf32> to vector<2x128xf32>
      %263 = arith.negf %262 : vector<2x128xf32>
      %264 = math.exp %263 : vector<2x128xf32>
      %cst_78 = arith.constant 1.000000e+00 : f32
      %265 = vector.broadcast %cst_78 : f32 to vector<2x128xf32>
      %266 = arith.addf %265, %264 : vector<2x128xf32>
      %267 = arith.divf %265, %266 : vector<2x128xf32>
      %268 = arith.mulf %259, %238 : vector<2x128xf32>
      %269 = arith.mulf %253, %261 : vector<2x128xf32>
      %270 = arith.addf %268, %269 : vector<2x128xf32>
      %271 = math.tanh %270 : vector<2x128xf32>
      %272 = arith.mulf %267, %271 : vector<2x128xf32>
      %273 = arith.addf %241, %272 : vector<2x128xf32>
      %cst_79 = arith.constant 1.250000e-01 : f32
      %274 = vector.broadcast %cst_79 : f32 to vector<2x128xf32>
      %275 = arith.mulf %273, %274 : vector<2x128xf32>
      %c0_80 = arith.constant 0 : index
      %c0_81 = arith.constant 0 : index
      %276 = vector.load %arg5[%c0_80, %c0_81] : memref<2x128xf32, #tpu.memory_space<vmem>>, vector<2x128xf32>
      tpu.vector_store %arg5[%c0_80, %c0_81], %275 {strides = array<i32>} : memref<2x128xf32, #tpu.memory_space<vmem>>, vector<2x128xf32>,
    } else {
    }
    %c1_i32 = arith.constant 1 : i32
    %12 = arith.cmpi eq, %arg0, %c1_i32 : i32
    %13 = arith.extui %12 : i1 to i32
    %c0_i32_10 = arith.constant 0 : i32
    %14 = arith.cmpi ne, %13, %c0_i32_10 : i32
    scf.if %14 {
      %cst_11 = arith.constant 0.000000e+00 : f32
      %15 = vector.broadcast %cst_11 : f32 to vector<2x128xf32>
      %cst_12 = arith.constant 0.000000e+00 : f32
      %16 = vector.broadcast %cst_12 : f32 to vector<2x128xf32>
      %cst_13 = arith.constant 0.000000e+00 : f32
      %17 = vector.broadcast %cst_13 : f32 to vector<2x128xf32>
      %c14 = arith.constant 14 : index
      %c0_14 = arith.constant 0 : index
      %18 = vector.load %arg6[%c14, %c0_14] : memref<16x512xf32, #tpu.memory_space<vmem>>, vector<2x512xf32>
      %19 = arith.truncf %15 : vector<2x128xf32> to vector<2x128xbf16>
      %c0_15 = arith.constant 0 : index
      %c0_16 = arith.constant 0 : index
      %c0_17 = arith.constant 0 : index
      %20 = vector.load %arg3[%c0_15, %c0_16, %c0_17] : memref<1x128x512xbf16, #tpu.memory_space<vmem>>, vector<1x128x512xbf16>
      %21 = vector.shape_cast %20 : vector<1x128x512xbf16> to vector<128x512xbf16>
      %cst_18 = arith.constant dense<0.000000e+00> : vector<2x512xf32>
      %22 = tpu.matmul %19, %21, %cst_18 {dimension_numbers = #tpu.dot_dimension_numbers<[1], [0], [0], [1], [0, 0, 1, 1], [], []>} : vector<2x128xbf16>, vector<128x512xbf16>, vector<2x512xf32> -> vector<2x512xf32>
      %23 = arith.addf %18, %22 : vector<2x512xf32>
      %24 = vector.extract_strided_slice %23 {offsets = [0, 0], sizes = [2, 128], strides = [1, 1]} : vector<2x512xf32> to vector<2x128xf32>
      %25 = arith.negf %24 : vector<2x128xf32>
      %26 = math.exp %25 : vector<2x128xf32>
      %cst_19 = arith.constant 1.000000e+00 : f32
      %27 = vector.broadcast %cst_19 : f32 to vector<2x128xf32>
      %28 = arith.addf %27, %26 : vector<2x128xf32>
      %29 = arith.divf %27, %28 : vector<2x128xf32>
      %30 = vector.extract_strided_slice %23 {offsets = [0, 128], sizes = [2, 128], strides = [1, 1]} : vector<2x512xf32> to vector<2x128xf32>
      %31 = arith.negf %30 : vector<2x128xf32>
      %32 = math.exp %31 : vector<2x128xf32>
      %cst_20 = arith.constant 1.000000e+00 : f32
      %33 = vector.broadcast %cst_20 : f32 to vector<2x128xf32>
      %34 = arith.addf %33, %32 : vector<2x128xf32>
      %35 = arith.divf %33, %34 : vector<2x128xf32>
      %36 = vector.extract_strided_slice %23 {offsets = [0, 256], sizes = [2, 128], strides = [1, 1]} : vector<2x512xf32> to vector<2x128xf32>
      %37 = math.tanh %36 : vector<2x128xf32>
      %38 = vector.extract_strided_slice %23 {offsets = [0, 384], sizes = [2, 128], strides = [1, 1]} : vector<2x512xf32> to vector<2x128xf32>
      %39 = arith.negf %38 : vector<2x128xf32>
      %40 = math.exp %39 : vector<2x128xf32>
      %cst_21 = arith.constant 1.000000e+00 : f32
      %41 = vector.broadcast %cst_21 : f32 to vector<2x128xf32>
      %42 = arith.addf %41, %40 : vector<2x128xf32>
      %43 = arith.divf %41, %42 : vector<2x128xf32>
      %44 = arith.mulf %35, %16 : vector<2x128xf32>
      %45 = arith.mulf %29, %37 : vector<2x128xf32>
      %46 = arith.addf %44, %45 : vector<2x128xf32>
      %47 = math.tanh %46 : vector<2x128xf32>
      %48 = arith.mulf %43, %47 : vector<2x128xf32>
      %49 = arith.addf %17, %48 : vector<2x128xf32>
      %c12 = arith.constant 12 : index
      %c0_22 = arith.constant 0 : index
      %50 = vector.load %arg6[%c12, %c0_22] : memref<16x512xf32, #tpu.memory_space<vmem>>, vector<2x512xf32>
      %51 = arith.truncf %48 : vector<2x128xf32> to vector<2x128xbf16>
      %c0_23 = arith.constant 0 : index
      %c0_24 = arith.constant 0 : index
      %c0_25 = arith.constant 0 : index
      %52 = vector.load %arg3[%c0_23, %c0_24, %c0_25] : memref<1x128x512xbf16, #tpu.memory_space<vmem>>, vector<1x128x512xbf16>
      %53 = vector.shape_cast %52 : vector<1x128x512xbf16> to vector<128x512xbf16>
      %cst_26 = arith.constant dense<0.000000e+00> : vector<2x512xf32>
      %54 = tpu.matmul %51, %53, %cst_26 {dimension_numbers = #tpu.dot_dimension_numbers<[1], [0], [0], [1], [0, 0, 1, 1], [], []>} : vector<2x128xbf16>, vector<128x512xbf16>, vector<2x512xf32> -> vector<2x512xf32>
      %55 = arith.addf %50, %54 : vector<2x512xf32>
      %56 = vector.extract_strided_slice %55 {offsets = [0, 0], sizes = [2, 128], strides = [1, 1]} : vector<2x512xf32> to vector<2x128xf32>
      %57 = arith.negf %56 : vector<2x128xf32>
      %58 = math.exp %57 : vector<2x128xf32>
      %cst_27 = arith.constant 1.000000e+00 : f32
      %59 = vector.broadcast %cst_27 : f32 to vector<2x128xf32>
      %60 = arith.addf %59, %58 : vector<2x128xf32>
      %61 = arith.divf %59, %60 : vector<2x128xf32>
      %62 = vector.extract_strided_slice %55 {offsets = [0, 128], sizes = [2, 128], strides = [1, 1]} : vector<2x512xf32> to vector<2x128xf32>
      %63 = arith.negf %62 : vector<2x128xf32>
      %64 = math.exp %63 : vector<2x128xf32>
      %cst_28 = arith.constant 1.000000e+00 : f32
      %65 = vector.broadcast %cst_28 : f32 to vector<2x128xf32>
      %66 = arith.addf %65, %64 : vector<2x128xf32>
      %67 = arith.divf %65, %66 : vector<2x128xf32>
      %68 = vector.extract_strided_slice %55 {offsets = [0, 256], sizes = [2, 128], strides = [1, 1]} : vector<2x512xf32> to vector<2x128xf32>
      %69 = math.tanh %68 : vector<2x128xf32>
      %70 = vector.extract_strided_slice %55 {offsets = [0, 384], sizes = [2, 128], strides = [1, 1]} : vector<2x512xf32> to vector<2x128xf32>
      %71 = arith.negf %70 : vector<2x128xf32>
      %72 = math.exp %71 : vector<2x128xf32>
      %cst_29 = arith.constant 1.000000e+00 : f32
      %73 = vector.broadcast %cst_29 : f32 to vector<2x128xf32>
      %74 = arith.addf %73, %72 : vector<2x128xf32>
      %75 = arith.divf %73, %74 : vector<2x128xf32>
      %76 = arith.mulf %67, %46 : vector<2x128xf32>
      %77 = arith.mulf %61, %69 : vector<2x128xf32>
      %78 = arith.addf %76, %77 : vector<2x128xf32>
      %79 = math.tanh %78 : vector<2x128xf32>
      %80 = arith.mulf %75, %79 : vector<2x128xf32>
      %81 = arith.addf %49, %80 : vector<2x128xf32>
      %c10 = arith.constant 10 : index
      %c0_30 = arith.constant 0 : index
      %82 = vector.load %arg6[%c10, %c0_30] : memref<16x512xf32, #tpu.memory_space<vmem>>, vector<2x512xf32>
      %83 = arith.truncf %80 : vector<2x128xf32> to vector<2x128xbf16>
      %c0_31 = arith.constant 0 : index
      %c0_32 = arith.constant 0 : index
      %c0_33 = arith.constant 0 : index
      %84 = vector.load %arg3[%c0_31, %c0_32, %c0_33] : memref<1x128x512xbf16, #tpu.memory_space<vmem>>, vector<1x128x512xbf16>
      %85 = vector.shape_cast %84 : vector<1x128x512xbf16> to vector<128x512xbf16>
      %cst_34 = arith.constant dense<0.000000e+00> : vector<2x512xf32>
      %86 = tpu.matmul %83, %85, %cst_34 {dimension_numbers = #tpu.dot_dimension_numbers<[1], [0], [0], [1], [0, 0, 1, 1], [], []>} : vector<2x128xbf16>, vector<128x512xbf16>, vector<2x512xf32> -> vector<2x512xf32>
      %87 = arith.addf %82, %86 : vector<2x512xf32>
      %88 = vector.extract_strided_slice %87 {offsets = [0, 0], sizes = [2, 128], strides = [1, 1]} : vector<2x512xf32> to vector<2x128xf32>
      %89 = arith.negf %88 : vector<2x128xf32>
      %90 = math.exp %89 : vector<2x128xf32>
      %cst_35 = arith.constant 1.000000e+00 : f32
      %91 = vector.broadcast %cst_35 : f32 to vector<2x128xf32>
      %92 = arith.addf %91, %90 : vector<2x128xf32>
      %93 = arith.divf %91, %92 : vector<2x128xf32>
      %94 = vector.extract_strided_slice %87 {offsets = [0, 128], sizes = [2, 128], strides = [1, 1]} : vector<2x512xf32> to vector<2x128xf32>
      %95 = arith.negf %94 : vector<2x128xf32>
      %96 = math.exp %95 : vector<2x128xf32>
      %cst_36 = arith.constant 1.000000e+00 : f32
      %97 = vector.broadcast %cst_36 : f32 to vector<2x128xf32>
      %98 = arith.addf %97, %96 : vector<2x128xf32>
      %99 = arith.divf %97, %98 : vector<2x128xf32>
      %100 = vector.extract_strided_slice %87 {offsets = [0, 256], sizes = [2, 128], strides = [1, 1]} : vector<2x512xf32> to vector<2x128xf32>
      %101 = math.tanh %100 : vector<2x128xf32>
      %102 = vector.extract_strided_slice %87 {offsets = [0, 384], sizes = [2, 128], strides = [1, 1]} : vector<2x512xf32> to vector<2x128xf32>
      %103 = arith.negf %102 : vector<2x128xf32>
      %104 = math.exp %103 : vector<2x128xf32>
      %cst_37 = arith.constant 1.000000e+00 : f32
      %105 = vector.broadcast %cst_37 : f32 to vector<2x128xf32>
      %106 = arith.addf %105, %104 : vector<2x128xf32>
      %107 = arith.divf %105, %106 : vector<2x128xf32>
      %108 = arith.mulf %99, %78 : vector<2x128xf32>
      %109 = arith.mulf %93, %101 : vector<2x128xf32>
      %110 = arith.addf %108, %109 : vector<2x128xf32>
      %111 = math.tanh %110 : vector<2x128xf32>
      %112 = arith.mulf %107, %111 : vector<2x128xf32>
      %113 = arith.addf %81, %112 : vector<2x128xf32>
      %c8 = arith.constant 8 : index
      %c0_38 = arith.constant 0 : index
      %114 = vector.load %arg6[%c8, %c0_38] : memref<16x512xf32, #tpu.memory_space<vmem>>, vector<2x512xf32>
      %115 = arith.truncf %112 : vector<2x128xf32> to vector<2x128xbf16>
      %c0_39 = arith.constant 0 : index
      %c0_40 = arith.constant 0 : index
      %c0_41 = arith.constant 0 : index
      %116 = vector.load %arg3[%c0_39, %c0_40, %c0_41] : memref<1x128x512xbf16, #tpu.memory_space<vmem>>, vector<1x128x512xbf16>
      %117 = vector.shape_cast %116 : vector<1x128x512xbf16> to vector<128x512xbf16>
      %cst_42 = arith.constant dense<0.000000e+00> : vector<2x512xf32>
      %118 = tpu.matmul %115, %117, %cst_42 {dimension_numbers = #tpu.dot_dimension_numbers<[1], [0], [0], [1], [0, 0, 1, 1], [], []>} : vector<2x128xbf16>, vector<128x512xbf16>, vector<2x512xf32> -> vector<2x512xf32>
      %119 = arith.addf %114, %118 : vector<2x512xf32>
      %120 = vector.extract_strided_slice %119 {offsets = [0, 0], sizes = [2, 128], strides = [1, 1]} : vector<2x512xf32> to vector<2x128xf32>
      %121 = arith.negf %120 : vector<2x128xf32>
      %122 = math.exp %121 : vector<2x128xf32>
      %cst_43 = arith.constant 1.000000e+00 : f32
      %123 = vector.broadcast %cst_43 : f32 to vector<2x128xf32>
      %124 = arith.addf %123, %122 : vector<2x128xf32>
      %125 = arith.divf %123, %124 : vector<2x128xf32>
      %126 = vector.extract_strided_slice %119 {offsets = [0, 128], sizes = [2, 128], strides = [1, 1]} : vector<2x512xf32> to vector<2x128xf32>
      %127 = arith.negf %126 : vector<2x128xf32>
      %128 = math.exp %127 : vector<2x128xf32>
      %cst_44 = arith.constant 1.000000e+00 : f32
      %129 = vector.broadcast %cst_44 : f32 to vector<2x128xf32>
      %130 = arith.addf %129, %128 : vector<2x128xf32>
      %131 = arith.divf %129, %130 : vector<2x128xf32>
      %132 = vector.extract_strided_slice %119 {offsets = [0, 256], sizes = [2, 128], strides = [1, 1]} : vector<2x512xf32> to vector<2x128xf32>
      %133 = math.tanh %132 : vector<2x128xf32>
      %134 = vector.extract_strided_slice %119 {offsets = [0, 384], sizes = [2, 128], strides = [1, 1]} : vector<2x512xf32> to vector<2x128xf32>
      %135 = arith.negf %134 : vector<2x128xf32>
      %136 = math.exp %135 : vector<2x128xf32>
      %cst_45 = arith.constant 1.000000e+00 : f32
      %137 = vector.broadcast %cst_45 : f32 to vector<2x128xf32>
      %138 = arith.addf %137, %136 : vector<2x128xf32>
      %139 = arith.divf %137, %138 : vector<2x128xf32>
      %140 = arith.mulf %131, %110 : vector<2x128xf32>
      %141 = arith.mulf %125, %133 : vector<2x128xf32>
      %142 = arith.addf %140, %141 : vector<2x128xf32>
      %143 = math.tanh %142 : vector<2x128xf32>
      %144 = arith.mulf %139, %143 : vector<2x128xf32>
      %145 = arith.addf %113, %144 : vector<2x128xf32>
      %c6 = arith.constant 6 : index
      %c0_46 = arith.constant 0 : index
      %146 = vector.load %arg6[%c6, %c0_46] : memref<16x512xf32, #tpu.memory_space<vmem>>, vector<2x512xf32>
      %147 = arith.truncf %144 : vector<2x128xf32> to vector<2x128xbf16>
      %c0_47 = arith.constant 0 : index
      %c0_48 = arith.constant 0 : index
      %c0_49 = arith.constant 0 : index
      %148 = vector.load %arg3[%c0_47, %c0_48, %c0_49] : memref<1x128x512xbf16, #tpu.memory_space<vmem>>, vector<1x128x512xbf16>
      %149 = vector.shape_cast %148 : vector<1x128x512xbf16> to vector<128x512xbf16>
      %cst_50 = arith.constant dense<0.000000e+00> : vector<2x512xf32>
      %150 = tpu.matmul %147, %149, %cst_50 {dimension_numbers = #tpu.dot_dimension_numbers<[1], [0], [0], [1], [0, 0, 1, 1], [], []>} : vector<2x128xbf16>, vector<128x512xbf16>, vector<2x512xf32> -> vector<2x512xf32>
      %151 = arith.addf %146, %150 : vector<2x512xf32>
      %152 = vector.extract_strided_slice %151 {offsets = [0, 0], sizes = [2, 128], strides = [1, 1]} : vector<2x512xf32> to vector<2x128xf32>
      %153 = arith.negf %152 : vector<2x128xf32>
      %154 = math.exp %153 : vector<2x128xf32>
      %cst_51 = arith.constant 1.000000e+00 : f32
      %155 = vector.broadcast %cst_51 : f32 to vector<2x128xf32>
      %156 = arith.addf %155, %154 : vector<2x128xf32>
      %157 = arith.divf %155, %156 : vector<2x128xf32>
      %158 = vector.extract_strided_slice %151 {offsets = [0, 128], sizes = [2, 128], strides = [1, 1]} : vector<2x512xf32> to vector<2x128xf32>
      %159 = arith.negf %158 : vector<2x128xf32>
      %160 = math.exp %159 : vector<2x128xf32>
      %cst_52 = arith.constant 1.000000e+00 : f32
      %161 = vector.broadcast %cst_52 : f32 to vector<2x128xf32>
      %162 = arith.addf %161, %160 : vector<2x128xf32>
      %163 = arith.divf %161, %162 : vector<2x128xf32>
      %164 = vector.extract_strided_slice %151 {offsets = [0, 256], sizes = [2, 128], strides = [1, 1]} : vector<2x512xf32> to vector<2x128xf32>
      %165 = math.tanh %164 : vector<2x128xf32>
      %166 = vector.extract_strided_slice %151 {offsets = [0, 384], sizes = [2, 128], strides = [1, 1]} : vector<2x512xf32> to vector<2x128xf32>
      %167 = arith.negf %166 : vector<2x128xf32>
      %168 = math.exp %167 : vector<2x128xf32>
      %cst_53 = arith.constant 1.000000e+00 : f32
      %169 = vector.broadcast %cst_53 : f32 to vector<2x128xf32>
      %170 = arith.addf %169, %168 : vector<2x128xf32>
      %171 = arith.divf %169, %170 : vector<2x128xf32>
      %172 = arith.mulf %163, %142 : vector<2x128xf32>
      %173 = arith.mulf %157, %165 : vector<2x128xf32>
      %174 = arith.addf %172, %173 : vector<2x128xf32>
      %175 = math.tanh %174 : vector<2x128xf32>
      %176 = arith.mulf %171, %175 : vector<2x128xf32>
      %177 = arith.addf %145, %176 : vector<2x128xf32>
      %c4 = arith.constant 4 : index
      %c0_54 = arith.constant 0 : index
      %178 = vector.load %arg6[%c4, %c0_54] : memref<16x512xf32, #tpu.memory_space<vmem>>, vector<2x512xf32>
      %179 = arith.truncf %176 : vector<2x128xf32> to vector<2x128xbf16>
      %c0_55 = arith.constant 0 : index
      %c0_56 = arith.constant 0 : index
      %c0_57 = arith.constant 0 : index
      %180 = vector.load %arg3[%c0_55, %c0_56, %c0_57] : memref<1x128x512xbf16, #tpu.memory_space<vmem>>, vector<1x128x512xbf16>
      %181 = vector.shape_cast %180 : vector<1x128x512xbf16> to vector<128x512xbf16>
      %cst_58 = arith.constant dense<0.000000e+00> : vector<2x512xf32>
      %182 = tpu.matmul %179, %181, %cst_58 {dimension_numbers = #tpu.dot_dimension_numbers<[1], [0], [0], [1], [0, 0, 1, 1], [], []>} : vector<2x128xbf16>, vector<128x512xbf16>, vector<2x512xf32> -> vector<2x512xf32>
      %183 = arith.addf %178, %182 : vector<2x512xf32>
      %184 = vector.extract_strided_slice %183 {offsets = [0, 0], sizes = [2, 128], strides = [1, 1]} : vector<2x512xf32> to vector<2x128xf32>
      %185 = arith.negf %184 : vector<2x128xf32>
      %186 = math.exp %185 : vector<2x128xf32>
      %cst_59 = arith.constant 1.000000e+00 : f32
      %187 = vector.broadcast %cst_59 : f32 to vector<2x128xf32>
      %188 = arith.addf %187, %186 : vector<2x128xf32>
      %189 = arith.divf %187, %188 : vector<2x128xf32>
      %190 = vector.extract_strided_slice %183 {offsets = [0, 128], sizes = [2, 128], strides = [1, 1]} : vector<2x512xf32> to vector<2x128xf32>
      %191 = arith.negf %190 : vector<2x128xf32>
      %192 = math.exp %191 : vector<2x128xf32>
      %cst_60 = arith.constant 1.000000e+00 : f32
      %193 = vector.broadcast %cst_60 : f32 to vector<2x128xf32>
      %194 = arith.addf %193, %192 : vector<2x128xf32>
      %195 = arith.divf %193, %194 : vector<2x128xf32>
      %196 = vector.extract_strided_slice %183 {offsets = [0, 256], sizes = [2, 128], strides = [1, 1]} : vector<2x512xf32> to vector<2x128xf32>
      %197 = math.tanh %196 : vector<2x128xf32>
      %198 = vector.extract_strided_slice %183 {offsets = [0, 384], sizes = [2, 128], strides = [1, 1]} : vector<2x512xf32> to vector<2x128xf32>
      %199 = arith.negf %198 : vector<2x128xf32>
      %200 = math.exp %199 : vector<2x128xf32>
      %cst_61 = arith.constant 1.000000e+00 : f32
      %201 = vector.broadcast %cst_61 : f32 to vector<2x128xf32>
      %202 = arith.addf %201, %200 : vector<2x128xf32>
      %203 = arith.divf %201, %202 : vector<2x128xf32>
      %204 = arith.mulf %195, %174 : vector<2x128xf32>
      %205 = arith.mulf %189, %197 : vector<2x128xf32>
      %206 = arith.addf %204, %205 : vector<2x128xf32>
      %207 = math.tanh %206 : vector<2x128xf32>
      %208 = arith.mulf %203, %207 : vector<2x128xf32>
      %209 = arith.addf %177, %208 : vector<2x128xf32>
      %c2 = arith.constant 2 : index
      %c0_62 = arith.constant 0 : index
      %210 = vector.load %arg6[%c2, %c0_62] : memref<16x512xf32, #tpu.memory_space<vmem>>, vector<2x512xf32>
      %211 = arith.truncf %208 : vector<2x128xf32> to vector<2x128xbf16>
      %c0_63 = arith.constant 0 : index
      %c0_64 = arith.constant 0 : index
      %c0_65 = arith.constant 0 : index
      %212 = vector.load %arg3[%c0_63, %c0_64, %c0_65] : memref<1x128x512xbf16, #tpu.memory_space<vmem>>, vector<1x128x512xbf16>
      %213 = vector.shape_cast %212 : vector<1x128x512xbf16> to vector<128x512xbf16>
      %cst_66 = arith.constant dense<0.000000e+00> : vector<2x512xf32>
      %214 = tpu.matmul %211, %213, %cst_66 {dimension_numbers = #tpu.dot_dimension_numbers<[1], [0], [0], [1], [0, 0, 1, 1], [], []>} : vector<2x128xbf16>, vector<128x512xbf16>, vector<2x512xf32> -> vector<2x512xf32>
      %215 = arith.addf %210, %214 : vector<2x512xf32>
      %216 = vector.extract_strided_slice %215 {offsets = [0, 0], sizes = [2, 128], strides = [1, 1]} : vector<2x512xf32> to vector<2x128xf32>
      %217 = arith.negf %216 : vector<2x128xf32>
      %218 = math.exp %217 : vector<2x128xf32>
      %cst_67 = arith.constant 1.000000e+00 : f32
      %219 = vector.broadcast %cst_67 : f32 to vector<2x128xf32>
      %220 = arith.addf %219, %218 : vector<2x128xf32>
      %221 = arith.divf %219, %220 : vector<2x128xf32>
      %222 = vector.extract_strided_slice %215 {offsets = [0, 128], sizes = [2, 128], strides = [1, 1]} : vector<2x512xf32> to vector<2x128xf32>
      %223 = arith.negf %222 : vector<2x128xf32>
      %224 = math.exp %223 : vector<2x128xf32>
      %cst_68 = arith.constant 1.000000e+00 : f32
      %225 = vector.broadcast %cst_68 : f32 to vector<2x128xf32>
      %226 = arith.addf %225, %224 : vector<2x128xf32>
      %227 = arith.divf %225, %226 : vector<2x128xf32>
      %228 = vector.extract_strided_slice %215 {offsets = [0, 256], sizes = [2, 128], strides = [1, 1]} : vector<2x512xf32> to vector<2x128xf32>
      %229 = math.tanh %228 : vector<2x128xf32>
      %230 = vector.extract_strided_slice %215 {offsets = [0, 384], sizes = [2, 128], strides = [1, 1]} : vector<2x512xf32> to vector<2x128xf32>
      %231 = arith.negf %230 : vector<2x128xf32>
      %232 = math.exp %231 : vector<2x128xf32>
      %cst_69 = arith.constant 1.000000e+00 : f32
      %233 = vector.broadcast %cst_69 : f32 to vector<2x128xf32>
      %234 = arith.addf %233, %232 : vector<2x128xf32>
      %235 = arith.divf %233, %234 : vector<2x128xf32>
      %236 = arith.mulf %227, %206 : vector<2x128xf32>
      %237 = arith.mulf %221, %229 : vector<2x128xf32>
      %238 = arith.addf %236, %237 : vector<2x128xf32>
      %239 = math.tanh %238 : vector<2x128xf32>
      %240 = arith.mulf %235, %239 : vector<2x128xf32>
      %241 = arith.addf %209, %240 : vector<2x128xf32>
      %c0_70 = arith.constant 0 : index
      %c0_71 = arith.constant 0 : index
      %242 = vector.load %arg6[%c0_70, %c0_71] : memref<16x512xf32, #tpu.memory_space<vmem>>, vector<2x512xf32>
      %243 = arith.truncf %240 : vector<2x128xf32> to vector<2x128xbf16>
      %c0_72 = arith.constant 0 : index
      %c0_73 = arith.constant 0 : index
      %c0_74 = arith.constant 0 : index
      %244 = vector.load %arg3[%c0_72, %c0_73, %c0_74] : memref<1x128x512xbf16, #tpu.memory_space<vmem>>, vector<1x128x512xbf16>
      %245 = vector.shape_cast %244 : vector<1x128x512xbf16> to vector<128x512xbf16>
      %cst_75 = arith.constant dense<0.000000e+00> : vector<2x512xf32>
      %246 = tpu.matmul %243, %245, %cst_75 {dimension_numbers = #tpu.dot_dimension_numbers<[1], [0], [0], [1], [0, 0, 1, 1], [], []>} : vector<2x128xbf16>, vector<128x512xbf16>, vector<2x512xf32> -> vector<2x512xf32>
      %247 = arith.addf %242, %246 : vector<2x512xf32>
      %248 = vector.extract_strided_slice %247 {offsets = [0, 0], sizes = [2, 128], strides = [1, 1]} : vector<2x512xf32> to vector<2x128xf32>
      %249 = arith.negf %248 : vector<2x128xf32>
      %250 = math.exp %249 : vector<2x128xf32>
      %cst_76 = arith.constant 1.000000e+00 : f32
      %251 = vector.broadcast %cst_76 : f32 to vector<2x128xf32>
      %252 = arith.addf %251, %250 : vector<2x128xf32>
      %253 = arith.divf %251, %252 : vector<2x128xf32>
      %254 = vector.extract_strided_slice %247 {offsets = [0, 128], sizes = [2, 128], strides = [1, 1]} : vector<2x512xf32> to vector<2x128xf32>
      %255 = arith.negf %254 : vector<2x128xf32>
      %256 = math.exp %255 : vector<2x128xf32>
      %cst_77 = arith.constant 1.000000e+00 : f32
      %257 = vector.broadcast %cst_77 : f32 to vector<2x128xf32>
      %258 = arith.addf %257, %256 : vector<2x128xf32>
      %259 = arith.divf %257, %258 : vector<2x128xf32>
      %260 = vector.extract_strided_slice %247 {offsets = [0, 256], sizes = [2, 128], strides = [1, 1]} : vector<2x512xf32> to vector<2x128xf32>
      %261 = math.tanh %260 : vector<2x128xf32>
      %262 = vector.extract_strided_slice %247 {offsets = [0, 384], sizes = [2, 128], strides = [1, 1]} : vector<2x512xf32> to vector<2x128xf32>
      %263 = arith.negf %262 : vector<2x128xf32>
      %264 = math.exp %263 : vector<2x128xf32>
      %cst_78 = arith.constant 1.000000e+00 : f32
      %265 = vector.broadcast %cst_78 : f32 to vector<2x128xf32>
      %266 = arith.addf %265, %264 : vector<2x128xf32>
      %267 = arith.divf %265, %266 : vector<2x128xf32>
      %268 = arith.mulf %259, %238 : vector<2x128xf32>
      %269 = arith.mulf %253, %261 : vector<2x128xf32>
      %270 = arith.addf %268, %269 : vector<2x128xf32>
      %271 = math.tanh %270 : vector<2x128xf32>
      %272 = arith.mulf %267, %271 : vector<2x128xf32>
      %273 = arith.addf %241, %272 : vector<2x128xf32>
      %cst_79 = arith.constant 1.250000e-01 : f32
      %274 = vector.broadcast %cst_79 : f32 to vector<2x128xf32>
      %275 = arith.mulf %273, %274 : vector<2x128xf32>
      %c0_80 = arith.constant 0 : index
      %c0_81 = arith.constant 0 : index
      %276 = vector.load %arg5[%c0_80, %c0_81] : memref<2x128xf32, #tpu.memory_space<vmem>>, vector<2x128xf32>
      tpu.vector_store %arg5[%c0_80, %c0_81], %275 {strides = array<i32>} : memref<2x128xf32, #tpu.memory_space<vmem>>, vector<2x128xf32>,
    } else {
    }
    return
  }
  func.func @transform_0(%arg0: i32) -> (i32, i32) {
    %c0_i32 = arith.constant 0 : i32
    %c0_i32_0 = arith.constant 0 : i32
    %c0_i32_1 = arith.constant 0 : i32
    return %c0_i32, %c0_i32_0 : i32, i32
  }
  func.func @transform_1(%arg0: i32) -> (i32, i32, i32) {
    %c0_i32 = arith.constant 0 : i32
    %c0_i32_0 = arith.constant 0 : i32
    %c0_i32_1 = arith.constant 0 : i32
    return %arg0, %c0_i32, %c0_i32_0 : i32, i32, i32
  }
  func.func @transform_2(%arg0: i32) -> (i32, i32, i32) {
    %c0_i32 = arith.constant 0 : i32
    %c0_i32_0 = arith.constant 0 : i32
    %c0_i32_1 = arith.constant 0 : i32
    return %arg0, %c0_i32, %c0_i32_0 : i32, i32, i32
  }
  func.func @transform_3(%arg0: i32) -> (i32, i32, i32) {
    %c0_i32 = arith.constant 0 : i32
    %c0_i32_0 = arith.constant 0 : i32
    %c0_i32_1 = arith.constant 0 : i32
    return %arg0, %c0_i32, %c0_i32_0 : i32, i32, i32
  }
  func.func @transform_4(%arg0: i32) -> (i32, i32) {
    %c0_i32 = arith.constant 0 : i32
    %c0_i32_0 = arith.constant 0 : i32
    return %c0_i32, %arg0 : i32, i32
  }
}

module attributes {stable_mosaic.version = 11 : i64} {
  func.func @_bilstm_layer_kernel(%arg0: i32, %arg1: memref<16x16xbf16, #tpu.memory_space<vmem>>, %arg2: memref<1x16x512xbf16, #tpu.memory_space<vmem>>, %arg3: memref<1x128x512xbf16, #tpu.memory_space<vmem>>, %arg4: memref<1x1x512xf32, #tpu.memory_space<vmem>>, %arg5: memref<16x128xbf16, #tpu.memory_space<vmem>>, %arg6: memref<16x512xf32, #tpu.memory_space<vmem>>) attributes {dimension_semantics = [#tpu.dimension_semantics<parallel>], iteration_bounds = array<i64: 2>, scalar_prefetch = 0 : i64, scratch_operands = 1 : i64, tpu.core_type = #tpu.core_type<tc>, window_params = [{pipeline_mode = #tpu.pipeline_mode<synchronous>, transform_indices = @transform_0, window_bounds = array<i64: 16, 16>}, {transform_indices = @transform_1, window_bounds = array<i64: 1, 16, 512>}, {transform_indices = @transform_2, window_bounds = array<i64: 1, 128, 512>}, {transform_indices = @transform_3, window_bounds = array<i64: 1, 1, 512>}, {transform_indices = @transform_4, window_bounds = array<i64: 16, 128>}]} {
    %c0 = arith.constant 0 : index
    %c0_0 = arith.constant 0 : index
    %0 = vector.load %arg1[%c0, %c0_0] : memref<16x16xbf16, #tpu.memory_space<vmem>>, vector<16x16xbf16>
    %c0_1 = arith.constant 0 : index
    %c0_2 = arith.constant 0 : index
    %c0_3 = arith.constant 0 : index
    %1 = vector.load %arg2[%c0_1, %c0_2, %c0_3] : memref<1x16x512xbf16, #tpu.memory_space<vmem>>, vector<1x16x512xbf16>
    %2 = vector.shape_cast %1 : vector<1x16x512xbf16> to vector<16x512xbf16>
    %cst = arith.constant dense<0.000000e+00> : vector<16x512xf32>
    %3 = tpu.matmul %0, %2, %cst {dimension_numbers = #tpu.dot_dimension_numbers<[1], [0], [0], [1], [0, 0, 1, 1], [], []>} : vector<16x16xbf16>, vector<16x512xbf16>, vector<16x512xf32> -> vector<16x512xf32>
    %c0_4 = arith.constant 0 : index
    %c0_5 = arith.constant 0 : index
    %c0_6 = arith.constant 0 : index
    %4 = vector.load %arg4[%c0_4, %c0_5, %c0_6] : memref<1x1x512xf32, #tpu.memory_space<vmem>>, vector<1x1x512xf32>
    %5 = vector.shape_cast %4 : vector<1x1x512xf32> to vector<1x512xf32>
    %6 = vector.broadcast %5 : vector<1x512xf32> to vector<16x512xf32>
    %7 = arith.addf %3, %6 : vector<16x512xf32>
    %c0_7 = arith.constant 0 : index
    %c0_8 = arith.constant 0 : index
    %8 = vector.load %arg6[%c0_7, %c0_8] : memref<16x512xf32, #tpu.memory_space<vmem>>, vector<16x512xf32>
    tpu.vector_store %arg6[%c0_7, %c0_8], %7 {strides = array<i32>} : memref<16x512xf32, #tpu.memory_space<vmem>>, vector<16x512xf32>,
    %c0_i32 = arith.constant 0 : i32
    %9 = arith.cmpi eq, %arg0, %c0_i32 : i32
    %10 = arith.extui %9 : i1 to i32
    %c0_i32_9 = arith.constant 0 : i32
    %11 = arith.cmpi ne, %10, %c0_i32_9 : i32
    scf.if %11 {
      %cst_11 = arith.constant 0.000000e+00 : f32
      %15 = vector.broadcast %cst_11 : f32 to vector<2x128xf32>
      %cst_12 = arith.constant 0.000000e+00 : f32
      %16 = vector.broadcast %cst_12 : f32 to vector<2x128xf32>
      %c0_13 = arith.constant 0 : index
      %c0_14 = arith.constant 0 : index
      %17 = vector.load %arg6[%c0_13, %c0_14] : memref<16x512xf32, #tpu.memory_space<vmem>>, vector<2x512xf32>
      %18 = arith.truncf %15 : vector<2x128xf32> to vector<2x128xbf16>
      %c0_15 = arith.constant 0 : index
      %c0_16 = arith.constant 0 : index
      %c0_17 = arith.constant 0 : index
      %19 = vector.load %arg3[%c0_15, %c0_16, %c0_17] : memref<1x128x512xbf16, #tpu.memory_space<vmem>>, vector<1x128x512xbf16>
      %20 = vector.shape_cast %19 : vector<1x128x512xbf16> to vector<128x512xbf16>
      %cst_18 = arith.constant dense<0.000000e+00> : vector<2x512xf32>
      %21 = tpu.matmul %18, %20, %cst_18 {dimension_numbers = #tpu.dot_dimension_numbers<[1], [0], [0], [1], [0, 0, 1, 1], [], []>} : vector<2x128xbf16>, vector<128x512xbf16>, vector<2x512xf32> -> vector<2x512xf32>
      %22 = arith.addf %17, %21 : vector<2x512xf32>
      %23 = vector.extract_strided_slice %22 {offsets = [0, 0], sizes = [2, 128], strides = [1, 1]} : vector<2x512xf32> to vector<2x128xf32>
      %24 = arith.negf %23 : vector<2x128xf32>
      %25 = math.exp %24 : vector<2x128xf32>
      %cst_19 = arith.constant 1.000000e+00 : f32
      %26 = vector.broadcast %cst_19 : f32 to vector<2x128xf32>
      %27 = arith.addf %26, %25 : vector<2x128xf32>
      %28 = arith.divf %26, %27 : vector<2x128xf32>
      %29 = vector.extract_strided_slice %22 {offsets = [0, 128], sizes = [2, 128], strides = [1, 1]} : vector<2x512xf32> to vector<2x128xf32>
      %30 = arith.negf %29 : vector<2x128xf32>
      %31 = math.exp %30 : vector<2x128xf32>
      %cst_20 = arith.constant 1.000000e+00 : f32
      %32 = vector.broadcast %cst_20 : f32 to vector<2x128xf32>
      %33 = arith.addf %32, %31 : vector<2x128xf32>
      %34 = arith.divf %32, %33 : vector<2x128xf32>
      %35 = vector.extract_strided_slice %22 {offsets = [0, 256], sizes = [2, 128], strides = [1, 1]} : vector<2x512xf32> to vector<2x128xf32>
      %36 = math.tanh %35 : vector<2x128xf32>
      %37 = vector.extract_strided_slice %22 {offsets = [0, 384], sizes = [2, 128], strides = [1, 1]} : vector<2x512xf32> to vector<2x128xf32>
      %38 = arith.negf %37 : vector<2x128xf32>
      %39 = math.exp %38 : vector<2x128xf32>
      %cst_21 = arith.constant 1.000000e+00 : f32
      %40 = vector.broadcast %cst_21 : f32 to vector<2x128xf32>
      %41 = arith.addf %40, %39 : vector<2x128xf32>
      %42 = arith.divf %40, %41 : vector<2x128xf32>
      %43 = arith.mulf %34, %16 : vector<2x128xf32>
      %44 = arith.mulf %28, %36 : vector<2x128xf32>
      %45 = arith.addf %43, %44 : vector<2x128xf32>
      %46 = math.tanh %45 : vector<2x128xf32>
      %47 = arith.mulf %42, %46 : vector<2x128xf32>
      %48 = arith.truncf %47 : vector<2x128xf32> to vector<2x128xbf16>
      %c0_22 = arith.constant 0 : index
      %c0_23 = arith.constant 0 : index
      %49 = vector.load %arg5[%c0_22, %c0_23] : memref<16x128xbf16, #tpu.memory_space<vmem>>, vector<2x128xbf16>
      tpu.vector_store %arg5[%c0_22, %c0_23], %48 {strides = array<i32>} : memref<16x128xbf16, #tpu.memory_space<vmem>>, vector<2x128xbf16>,
      %c2 = arith.constant 2 : index
      %c0_24 = arith.constant 0 : index
      %50 = vector.load %arg6[%c2, %c0_24] : memref<16x512xf32, #tpu.memory_space<vmem>>, vector<2x512xf32>
      %51 = arith.truncf %47 : vector<2x128xf32> to vector<2x128xbf16>
      %c0_25 = arith.constant 0 : index
      %c0_26 = arith.constant 0 : index
      %c0_27 = arith.constant 0 : index
      %52 = vector.load %arg3[%c0_25, %c0_26, %c0_27] : memref<1x128x512xbf16, #tpu.memory_space<vmem>>, vector<1x128x512xbf16>
      %53 = vector.shape_cast %52 : vector<1x128x512xbf16> to vector<128x512xbf16>
      %cst_28 = arith.constant dense<0.000000e+00> : vector<2x512xf32>
      %54 = tpu.matmul %51, %53, %cst_28 {dimension_numbers = #tpu.dot_dimension_numbers<[1], [0], [0], [1], [0, 0, 1, 1], [], []>} : vector<2x128xbf16>, vector<128x512xbf16>, vector<2x512xf32> -> vector<2x512xf32>
      %55 = arith.addf %50, %54 : vector<2x512xf32>
      %56 = vector.extract_strided_slice %55 {offsets = [0, 0], sizes = [2, 128], strides = [1, 1]} : vector<2x512xf32> to vector<2x128xf32>
      %57 = arith.negf %56 : vector<2x128xf32>
      %58 = math.exp %57 : vector<2x128xf32>
      %cst_29 = arith.constant 1.000000e+00 : f32
      %59 = vector.broadcast %cst_29 : f32 to vector<2x128xf32>
      %60 = arith.addf %59, %58 : vector<2x128xf32>
      %61 = arith.divf %59, %60 : vector<2x128xf32>
      %62 = vector.extract_strided_slice %55 {offsets = [0, 128], sizes = [2, 128], strides = [1, 1]} : vector<2x512xf32> to vector<2x128xf32>
      %63 = arith.negf %62 : vector<2x128xf32>
      %64 = math.exp %63 : vector<2x128xf32>
      %cst_30 = arith.constant 1.000000e+00 : f32
      %65 = vector.broadcast %cst_30 : f32 to vector<2x128xf32>
      %66 = arith.addf %65, %64 : vector<2x128xf32>
      %67 = arith.divf %65, %66 : vector<2x128xf32>
      %68 = vector.extract_strided_slice %55 {offsets = [0, 256], sizes = [2, 128], strides = [1, 1]} : vector<2x512xf32> to vector<2x128xf32>
      %69 = math.tanh %68 : vector<2x128xf32>
      %70 = vector.extract_strided_slice %55 {offsets = [0, 384], sizes = [2, 128], strides = [1, 1]} : vector<2x512xf32> to vector<2x128xf32>
      %71 = arith.negf %70 : vector<2x128xf32>
      %72 = math.exp %71 : vector<2x128xf32>
      %cst_31 = arith.constant 1.000000e+00 : f32
      %73 = vector.broadcast %cst_31 : f32 to vector<2x128xf32>
      %74 = arith.addf %73, %72 : vector<2x128xf32>
      %75 = arith.divf %73, %74 : vector<2x128xf32>
      %76 = arith.mulf %67, %45 : vector<2x128xf32>
      %77 = arith.mulf %61, %69 : vector<2x128xf32>
      %78 = arith.addf %76, %77 : vector<2x128xf32>
      %79 = math.tanh %78 : vector<2x128xf32>
      %80 = arith.mulf %75, %79 : vector<2x128xf32>
      %81 = arith.truncf %80 : vector<2x128xf32> to vector<2x128xbf16>
      %c2_32 = arith.constant 2 : index
      %c0_33 = arith.constant 0 : index
      %82 = vector.load %arg5[%c2_32, %c0_33] : memref<16x128xbf16, #tpu.memory_space<vmem>>, vector<2x128xbf16>
      tpu.vector_store %arg5[%c2_32, %c0_33], %81 {strides = array<i32>} : memref<16x128xbf16, #tpu.memory_space<vmem>>, vector<2x128xbf16>,
      %c4 = arith.constant 4 : index
      %c0_34 = arith.constant 0 : index
      %83 = vector.load %arg6[%c4, %c0_34] : memref<16x512xf32, #tpu.memory_space<vmem>>, vector<2x512xf32>
      %84 = arith.truncf %80 : vector<2x128xf32> to vector<2x128xbf16>
      %c0_35 = arith.constant 0 : index
      %c0_36 = arith.constant 0 : index
      %c0_37 = arith.constant 0 : index
      %85 = vector.load %arg3[%c0_35, %c0_36, %c0_37] : memref<1x128x512xbf16, #tpu.memory_space<vmem>>, vector<1x128x512xbf16>
      %86 = vector.shape_cast %85 : vector<1x128x512xbf16> to vector<128x512xbf16>
      %cst_38 = arith.constant dense<0.000000e+00> : vector<2x512xf32>
      %87 = tpu.matmul %84, %86, %cst_38 {dimension_numbers = #tpu.dot_dimension_numbers<[1], [0], [0], [1], [0, 0, 1, 1], [], []>} : vector<2x128xbf16>, vector<128x512xbf16>, vector<2x512xf32> -> vector<2x512xf32>
      %88 = arith.addf %83, %87 : vector<2x512xf32>
      %89 = vector.extract_strided_slice %88 {offsets = [0, 0], sizes = [2, 128], strides = [1, 1]} : vector<2x512xf32> to vector<2x128xf32>
      %90 = arith.negf %89 : vector<2x128xf32>
      %91 = math.exp %90 : vector<2x128xf32>
      %cst_39 = arith.constant 1.000000e+00 : f32
      %92 = vector.broadcast %cst_39 : f32 to vector<2x128xf32>
      %93 = arith.addf %92, %91 : vector<2x128xf32>
      %94 = arith.divf %92, %93 : vector<2x128xf32>
      %95 = vector.extract_strided_slice %88 {offsets = [0, 128], sizes = [2, 128], strides = [1, 1]} : vector<2x512xf32> to vector<2x128xf32>
      %96 = arith.negf %95 : vector<2x128xf32>
      %97 = math.exp %96 : vector<2x128xf32>
      %cst_40 = arith.constant 1.000000e+00 : f32
      %98 = vector.broadcast %cst_40 : f32 to vector<2x128xf32>
      %99 = arith.addf %98, %97 : vector<2x128xf32>
      %100 = arith.divf %98, %99 : vector<2x128xf32>
      %101 = vector.extract_strided_slice %88 {offsets = [0, 256], sizes = [2, 128], strides = [1, 1]} : vector<2x512xf32> to vector<2x128xf32>
      %102 = math.tanh %101 : vector<2x128xf32>
      %103 = vector.extract_strided_slice %88 {offsets = [0, 384], sizes = [2, 128], strides = [1, 1]} : vector<2x512xf32> to vector<2x128xf32>
      %104 = arith.negf %103 : vector<2x128xf32>
      %105 = math.exp %104 : vector<2x128xf32>
      %cst_41 = arith.constant 1.000000e+00 : f32
      %106 = vector.broadcast %cst_41 : f32 to vector<2x128xf32>
      %107 = arith.addf %106, %105 : vector<2x128xf32>
      %108 = arith.divf %106, %107 : vector<2x128xf32>
      %109 = arith.mulf %100, %78 : vector<2x128xf32>
      %110 = arith.mulf %94, %102 : vector<2x128xf32>
      %111 = arith.addf %109, %110 : vector<2x128xf32>
      %112 = math.tanh %111 : vector<2x128xf32>
      %113 = arith.mulf %108, %112 : vector<2x128xf32>
      %114 = arith.truncf %113 : vector<2x128xf32> to vector<2x128xbf16>
      %c4_42 = arith.constant 4 : index
      %c0_43 = arith.constant 0 : index
      %115 = vector.load %arg5[%c4_42, %c0_43] : memref<16x128xbf16, #tpu.memory_space<vmem>>, vector<2x128xbf16>
      tpu.vector_store %arg5[%c4_42, %c0_43], %114 {strides = array<i32>} : memref<16x128xbf16, #tpu.memory_space<vmem>>, vector<2x128xbf16>,
      %c6 = arith.constant 6 : index
      %c0_44 = arith.constant 0 : index
      %116 = vector.load %arg6[%c6, %c0_44] : memref<16x512xf32, #tpu.memory_space<vmem>>, vector<2x512xf32>
      %117 = arith.truncf %113 : vector<2x128xf32> to vector<2x128xbf16>
      %c0_45 = arith.constant 0 : index
      %c0_46 = arith.constant 0 : index
      %c0_47 = arith.constant 0 : index
      %118 = vector.load %arg3[%c0_45, %c0_46, %c0_47] : memref<1x128x512xbf16, #tpu.memory_space<vmem>>, vector<1x128x512xbf16>
      %119 = vector.shape_cast %118 : vector<1x128x512xbf16> to vector<128x512xbf16>
      %cst_48 = arith.constant dense<0.000000e+00> : vector<2x512xf32>
      %120 = tpu.matmul %117, %119, %cst_48 {dimension_numbers = #tpu.dot_dimension_numbers<[1], [0], [0], [1], [0, 0, 1, 1], [], []>} : vector<2x128xbf16>, vector<128x512xbf16>, vector<2x512xf32> -> vector<2x512xf32>
      %121 = arith.addf %116, %120 : vector<2x512xf32>
      %122 = vector.extract_strided_slice %121 {offsets = [0, 0], sizes = [2, 128], strides = [1, 1]} : vector<2x512xf32> to vector<2x128xf32>
      %123 = arith.negf %122 : vector<2x128xf32>
      %124 = math.exp %123 : vector<2x128xf32>
      %cst_49 = arith.constant 1.000000e+00 : f32
      %125 = vector.broadcast %cst_49 : f32 to vector<2x128xf32>
      %126 = arith.addf %125, %124 : vector<2x128xf32>
      %127 = arith.divf %125, %126 : vector<2x128xf32>
      %128 = vector.extract_strided_slice %121 {offsets = [0, 128], sizes = [2, 128], strides = [1, 1]} : vector<2x512xf32> to vector<2x128xf32>
      %129 = arith.negf %128 : vector<2x128xf32>
      %130 = math.exp %129 : vector<2x128xf32>
      %cst_50 = arith.constant 1.000000e+00 : f32
      %131 = vector.broadcast %cst_50 : f32 to vector<2x128xf32>
      %132 = arith.addf %131, %130 : vector<2x128xf32>
      %133 = arith.divf %131, %132 : vector<2x128xf32>
      %134 = vector.extract_strided_slice %121 {offsets = [0, 256], sizes = [2, 128], strides = [1, 1]} : vector<2x512xf32> to vector<2x128xf32>
      %135 = math.tanh %134 : vector<2x128xf32>
      %136 = vector.extract_strided_slice %121 {offsets = [0, 384], sizes = [2, 128], strides = [1, 1]} : vector<2x512xf32> to vector<2x128xf32>
      %137 = arith.negf %136 : vector<2x128xf32>
      %138 = math.exp %137 : vector<2x128xf32>
      %cst_51 = arith.constant 1.000000e+00 : f32
      %139 = vector.broadcast %cst_51 : f32 to vector<2x128xf32>
      %140 = arith.addf %139, %138 : vector<2x128xf32>
      %141 = arith.divf %139, %140 : vector<2x128xf32>
      %142 = arith.mulf %133, %111 : vector<2x128xf32>
      %143 = arith.mulf %127, %135 : vector<2x128xf32>
      %144 = arith.addf %142, %143 : vector<2x128xf32>
      %145 = math.tanh %144 : vector<2x128xf32>
      %146 = arith.mulf %141, %145 : vector<2x128xf32>
      %147 = arith.truncf %146 : vector<2x128xf32> to vector<2x128xbf16>
      %c6_52 = arith.constant 6 : index
      %c0_53 = arith.constant 0 : index
      %148 = vector.load %arg5[%c6_52, %c0_53] : memref<16x128xbf16, #tpu.memory_space<vmem>>, vector<2x128xbf16>
      tpu.vector_store %arg5[%c6_52, %c0_53], %147 {strides = array<i32>} : memref<16x128xbf16, #tpu.memory_space<vmem>>, vector<2x128xbf16>,
      %c8 = arith.constant 8 : index
      %c0_54 = arith.constant 0 : index
      %149 = vector.load %arg6[%c8, %c0_54] : memref<16x512xf32, #tpu.memory_space<vmem>>, vector<2x512xf32>
      %150 = arith.truncf %146 : vector<2x128xf32> to vector<2x128xbf16>
      %c0_55 = arith.constant 0 : index
      %c0_56 = arith.constant 0 : index
      %c0_57 = arith.constant 0 : index
      %151 = vector.load %arg3[%c0_55, %c0_56, %c0_57] : memref<1x128x512xbf16, #tpu.memory_space<vmem>>, vector<1x128x512xbf16>
      %152 = vector.shape_cast %151 : vector<1x128x512xbf16> to vector<128x512xbf16>
      %cst_58 = arith.constant dense<0.000000e+00> : vector<2x512xf32>
      %153 = tpu.matmul %150, %152, %cst_58 {dimension_numbers = #tpu.dot_dimension_numbers<[1], [0], [0], [1], [0, 0, 1, 1], [], []>} : vector<2x128xbf16>, vector<128x512xbf16>, vector<2x512xf32> -> vector<2x512xf32>
      %154 = arith.addf %149, %153 : vector<2x512xf32>
      %155 = vector.extract_strided_slice %154 {offsets = [0, 0], sizes = [2, 128], strides = [1, 1]} : vector<2x512xf32> to vector<2x128xf32>
      %156 = arith.negf %155 : vector<2x128xf32>
      %157 = math.exp %156 : vector<2x128xf32>
      %cst_59 = arith.constant 1.000000e+00 : f32
      %158 = vector.broadcast %cst_59 : f32 to vector<2x128xf32>
      %159 = arith.addf %158, %157 : vector<2x128xf32>
      %160 = arith.divf %158, %159 : vector<2x128xf32>
      %161 = vector.extract_strided_slice %154 {offsets = [0, 128], sizes = [2, 128], strides = [1, 1]} : vector<2x512xf32> to vector<2x128xf32>
      %162 = arith.negf %161 : vector<2x128xf32>
      %163 = math.exp %162 : vector<2x128xf32>
      %cst_60 = arith.constant 1.000000e+00 : f32
      %164 = vector.broadcast %cst_60 : f32 to vector<2x128xf32>
      %165 = arith.addf %164, %163 : vector<2x128xf32>
      %166 = arith.divf %164, %165 : vector<2x128xf32>
      %167 = vector.extract_strided_slice %154 {offsets = [0, 256], sizes = [2, 128], strides = [1, 1]} : vector<2x512xf32> to vector<2x128xf32>
      %168 = math.tanh %167 : vector<2x128xf32>
      %169 = vector.extract_strided_slice %154 {offsets = [0, 384], sizes = [2, 128], strides = [1, 1]} : vector<2x512xf32> to vector<2x128xf32>
      %170 = arith.negf %169 : vector<2x128xf32>
      %171 = math.exp %170 : vector<2x128xf32>
      %cst_61 = arith.constant 1.000000e+00 : f32
      %172 = vector.broadcast %cst_61 : f32 to vector<2x128xf32>
      %173 = arith.addf %172, %171 : vector<2x128xf32>
      %174 = arith.divf %172, %173 : vector<2x128xf32>
      %175 = arith.mulf %166, %144 : vector<2x128xf32>
      %176 = arith.mulf %160, %168 : vector<2x128xf32>
      %177 = arith.addf %175, %176 : vector<2x128xf32>
      %178 = math.tanh %177 : vector<2x128xf32>
      %179 = arith.mulf %174, %178 : vector<2x128xf32>
      %180 = arith.truncf %179 : vector<2x128xf32> to vector<2x128xbf16>
      %c8_62 = arith.constant 8 : index
      %c0_63 = arith.constant 0 : index
      %181 = vector.load %arg5[%c8_62, %c0_63] : memref<16x128xbf16, #tpu.memory_space<vmem>>, vector<2x128xbf16>
      tpu.vector_store %arg5[%c8_62, %c0_63], %180 {strides = array<i32>} : memref<16x128xbf16, #tpu.memory_space<vmem>>, vector<2x128xbf16>,
      %c10 = arith.constant 10 : index
      %c0_64 = arith.constant 0 : index
      %182 = vector.load %arg6[%c10, %c0_64] : memref<16x512xf32, #tpu.memory_space<vmem>>, vector<2x512xf32>
      %183 = arith.truncf %179 : vector<2x128xf32> to vector<2x128xbf16>
      %c0_65 = arith.constant 0 : index
      %c0_66 = arith.constant 0 : index
      %c0_67 = arith.constant 0 : index
      %184 = vector.load %arg3[%c0_65, %c0_66, %c0_67] : memref<1x128x512xbf16, #tpu.memory_space<vmem>>, vector<1x128x512xbf16>
      %185 = vector.shape_cast %184 : vector<1x128x512xbf16> to vector<128x512xbf16>
      %cst_68 = arith.constant dense<0.000000e+00> : vector<2x512xf32>
      %186 = tpu.matmul %183, %185, %cst_68 {dimension_numbers = #tpu.dot_dimension_numbers<[1], [0], [0], [1], [0, 0, 1, 1], [], []>} : vector<2x128xbf16>, vector<128x512xbf16>, vector<2x512xf32> -> vector<2x512xf32>
      %187 = arith.addf %182, %186 : vector<2x512xf32>
      %188 = vector.extract_strided_slice %187 {offsets = [0, 0], sizes = [2, 128], strides = [1, 1]} : vector<2x512xf32> to vector<2x128xf32>
      %189 = arith.negf %188 : vector<2x128xf32>
      %190 = math.exp %189 : vector<2x128xf32>
      %cst_69 = arith.constant 1.000000e+00 : f32
      %191 = vector.broadcast %cst_69 : f32 to vector<2x128xf32>
      %192 = arith.addf %191, %190 : vector<2x128xf32>
      %193 = arith.divf %191, %192 : vector<2x128xf32>
      %194 = vector.extract_strided_slice %187 {offsets = [0, 128], sizes = [2, 128], strides = [1, 1]} : vector<2x512xf32> to vector<2x128xf32>
      %195 = arith.negf %194 : vector<2x128xf32>
      %196 = math.exp %195 : vector<2x128xf32>
      %cst_70 = arith.constant 1.000000e+00 : f32
      %197 = vector.broadcast %cst_70 : f32 to vector<2x128xf32>
      %198 = arith.addf %197, %196 : vector<2x128xf32>
      %199 = arith.divf %197, %198 : vector<2x128xf32>
      %200 = vector.extract_strided_slice %187 {offsets = [0, 256], sizes = [2, 128], strides = [1, 1]} : vector<2x512xf32> to vector<2x128xf32>
      %201 = math.tanh %200 : vector<2x128xf32>
      %202 = vector.extract_strided_slice %187 {offsets = [0, 384], sizes = [2, 128], strides = [1, 1]} : vector<2x512xf32> to vector<2x128xf32>
      %203 = arith.negf %202 : vector<2x128xf32>
      %204 = math.exp %203 : vector<2x128xf32>
      %cst_71 = arith.constant 1.000000e+00 : f32
      %205 = vector.broadcast %cst_71 : f32 to vector<2x128xf32>
      %206 = arith.addf %205, %204 : vector<2x128xf32>
      %207 = arith.divf %205, %206 : vector<2x128xf32>
      %208 = arith.mulf %199, %177 : vector<2x128xf32>
      %209 = arith.mulf %193, %201 : vector<2x128xf32>
      %210 = arith.addf %208, %209 : vector<2x128xf32>
      %211 = math.tanh %210 : vector<2x128xf32>
      %212 = arith.mulf %207, %211 : vector<2x128xf32>
      %213 = arith.truncf %212 : vector<2x128xf32> to vector<2x128xbf16>
      %c10_72 = arith.constant 10 : index
      %c0_73 = arith.constant 0 : index
      %214 = vector.load %arg5[%c10_72, %c0_73] : memref<16x128xbf16, #tpu.memory_space<vmem>>, vector<2x128xbf16>
      tpu.vector_store %arg5[%c10_72, %c0_73], %213 {strides = array<i32>} : memref<16x128xbf16, #tpu.memory_space<vmem>>, vector<2x128xbf16>,
      %c12 = arith.constant 12 : index
      %c0_74 = arith.constant 0 : index
      %215 = vector.load %arg6[%c12, %c0_74] : memref<16x512xf32, #tpu.memory_space<vmem>>, vector<2x512xf32>
      %216 = arith.truncf %212 : vector<2x128xf32> to vector<2x128xbf16>
      %c0_75 = arith.constant 0 : index
      %c0_76 = arith.constant 0 : index
      %c0_77 = arith.constant 0 : index
      %217 = vector.load %arg3[%c0_75, %c0_76, %c0_77] : memref<1x128x512xbf16, #tpu.memory_space<vmem>>, vector<1x128x512xbf16>
      %218 = vector.shape_cast %217 : vector<1x128x512xbf16> to vector<128x512xbf16>
      %cst_78 = arith.constant dense<0.000000e+00> : vector<2x512xf32>
      %219 = tpu.matmul %216, %218, %cst_78 {dimension_numbers = #tpu.dot_dimension_numbers<[1], [0], [0], [1], [0, 0, 1, 1], [], []>} : vector<2x128xbf16>, vector<128x512xbf16>, vector<2x512xf32> -> vector<2x512xf32>
      %220 = arith.addf %215, %219 : vector<2x512xf32>
      %221 = vector.extract_strided_slice %220 {offsets = [0, 0], sizes = [2, 128], strides = [1, 1]} : vector<2x512xf32> to vector<2x128xf32>
      %222 = arith.negf %221 : vector<2x128xf32>
      %223 = math.exp %222 : vector<2x128xf32>
      %cst_79 = arith.constant 1.000000e+00 : f32
      %224 = vector.broadcast %cst_79 : f32 to vector<2x128xf32>
      %225 = arith.addf %224, %223 : vector<2x128xf32>
      %226 = arith.divf %224, %225 : vector<2x128xf32>
      %227 = vector.extract_strided_slice %220 {offsets = [0, 128], sizes = [2, 128], strides = [1, 1]} : vector<2x512xf32> to vector<2x128xf32>
      %228 = arith.negf %227 : vector<2x128xf32>
      %229 = math.exp %228 : vector<2x128xf32>
      %cst_80 = arith.constant 1.000000e+00 : f32
      %230 = vector.broadcast %cst_80 : f32 to vector<2x128xf32>
      %231 = arith.addf %230, %229 : vector<2x128xf32>
      %232 = arith.divf %230, %231 : vector<2x128xf32>
      %233 = vector.extract_strided_slice %220 {offsets = [0, 256], sizes = [2, 128], strides = [1, 1]} : vector<2x512xf32> to vector<2x128xf32>
      %234 = math.tanh %233 : vector<2x128xf32>
      %235 = vector.extract_strided_slice %220 {offsets = [0, 384], sizes = [2, 128], strides = [1, 1]} : vector<2x512xf32> to vector<2x128xf32>
      %236 = arith.negf %235 : vector<2x128xf32>
      %237 = math.exp %236 : vector<2x128xf32>
      %cst_81 = arith.constant 1.000000e+00 : f32
      %238 = vector.broadcast %cst_81 : f32 to vector<2x128xf32>
      %239 = arith.addf %238, %237 : vector<2x128xf32>
      %240 = arith.divf %238, %239 : vector<2x128xf32>
      %241 = arith.mulf %232, %210 : vector<2x128xf32>
      %242 = arith.mulf %226, %234 : vector<2x128xf32>
      %243 = arith.addf %241, %242 : vector<2x128xf32>
      %244 = math.tanh %243 : vector<2x128xf32>
      %245 = arith.mulf %240, %244 : vector<2x128xf32>
      %246 = arith.truncf %245 : vector<2x128xf32> to vector<2x128xbf16>
      %c12_82 = arith.constant 12 : index
      %c0_83 = arith.constant 0 : index
      %247 = vector.load %arg5[%c12_82, %c0_83] : memref<16x128xbf16, #tpu.memory_space<vmem>>, vector<2x128xbf16>
      tpu.vector_store %arg5[%c12_82, %c0_83], %246 {strides = array<i32>} : memref<16x128xbf16, #tpu.memory_space<vmem>>, vector<2x128xbf16>,
      %c14 = arith.constant 14 : index
      %c0_84 = arith.constant 0 : index
      %248 = vector.load %arg6[%c14, %c0_84] : memref<16x512xf32, #tpu.memory_space<vmem>>, vector<2x512xf32>
      %249 = arith.truncf %245 : vector<2x128xf32> to vector<2x128xbf16>
      %c0_85 = arith.constant 0 : index
      %c0_86 = arith.constant 0 : index
      %c0_87 = arith.constant 0 : index
      %250 = vector.load %arg3[%c0_85, %c0_86, %c0_87] : memref<1x128x512xbf16, #tpu.memory_space<vmem>>, vector<1x128x512xbf16>
      %251 = vector.shape_cast %250 : vector<1x128x512xbf16> to vector<128x512xbf16>
      %cst_88 = arith.constant dense<0.000000e+00> : vector<2x512xf32>
      %252 = tpu.matmul %249, %251, %cst_88 {dimension_numbers = #tpu.dot_dimension_numbers<[1], [0], [0], [1], [0, 0, 1, 1], [], []>} : vector<2x128xbf16>, vector<128x512xbf16>, vector<2x512xf32> -> vector<2x512xf32>
      %253 = arith.addf %248, %252 : vector<2x512xf32>
      %254 = vector.extract_strided_slice %253 {offsets = [0, 0], sizes = [2, 128], strides = [1, 1]} : vector<2x512xf32> to vector<2x128xf32>
      %255 = arith.negf %254 : vector<2x128xf32>
      %256 = math.exp %255 : vector<2x128xf32>
      %cst_89 = arith.constant 1.000000e+00 : f32
      %257 = vector.broadcast %cst_89 : f32 to vector<2x128xf32>
      %258 = arith.addf %257, %256 : vector<2x128xf32>
      %259 = arith.divf %257, %258 : vector<2x128xf32>
      %260 = vector.extract_strided_slice %253 {offsets = [0, 128], sizes = [2, 128], strides = [1, 1]} : vector<2x512xf32> to vector<2x128xf32>
      %261 = arith.negf %260 : vector<2x128xf32>
      %262 = math.exp %261 : vector<2x128xf32>
      %cst_90 = arith.constant 1.000000e+00 : f32
      %263 = vector.broadcast %cst_90 : f32 to vector<2x128xf32>
      %264 = arith.addf %263, %262 : vector<2x128xf32>
      %265 = arith.divf %263, %264 : vector<2x128xf32>
      %266 = vector.extract_strided_slice %253 {offsets = [0, 256], sizes = [2, 128], strides = [1, 1]} : vector<2x512xf32> to vector<2x128xf32>
      %267 = math.tanh %266 : vector<2x128xf32>
      %268 = vector.extract_strided_slice %253 {offsets = [0, 384], sizes = [2, 128], strides = [1, 1]} : vector<2x512xf32> to vector<2x128xf32>
      %269 = arith.negf %268 : vector<2x128xf32>
      %270 = math.exp %269 : vector<2x128xf32>
      %cst_91 = arith.constant 1.000000e+00 : f32
      %271 = vector.broadcast %cst_91 : f32 to vector<2x128xf32>
      %272 = arith.addf %271, %270 : vector<2x128xf32>
      %273 = arith.divf %271, %272 : vector<2x128xf32>
      %274 = arith.mulf %265, %243 : vector<2x128xf32>
      %275 = arith.mulf %259, %267 : vector<2x128xf32>
      %276 = arith.addf %274, %275 : vector<2x128xf32>
      %277 = math.tanh %276 : vector<2x128xf32>
      %278 = arith.mulf %273, %277 : vector<2x128xf32>
      %279 = arith.truncf %278 : vector<2x128xf32> to vector<2x128xbf16>
      %c14_92 = arith.constant 14 : index
      %c0_93 = arith.constant 0 : index
      %280 = vector.load %arg5[%c14_92, %c0_93] : memref<16x128xbf16, #tpu.memory_space<vmem>>, vector<2x128xbf16>
      tpu.vector_store %arg5[%c14_92, %c0_93], %279 {strides = array<i32>} : memref<16x128xbf16, #tpu.memory_space<vmem>>, vector<2x128xbf16>,
    } else {
    }
    %c1_i32 = arith.constant 1 : i32
    %12 = arith.cmpi eq, %arg0, %c1_i32 : i32
    %13 = arith.extui %12 : i1 to i32
    %c0_i32_10 = arith.constant 0 : i32
    %14 = arith.cmpi ne, %13, %c0_i32_10 : i32
    scf.if %14 {
      %cst_11 = arith.constant 0.000000e+00 : f32
      %15 = vector.broadcast %cst_11 : f32 to vector<2x128xf32>
      %cst_12 = arith.constant 0.000000e+00 : f32
      %16 = vector.broadcast %cst_12 : f32 to vector<2x128xf32>
      %c14 = arith.constant 14 : index
      %c0_13 = arith.constant 0 : index
      %17 = vector.load %arg6[%c14, %c0_13] : memref<16x512xf32, #tpu.memory_space<vmem>>, vector<2x512xf32>
      %18 = arith.truncf %15 : vector<2x128xf32> to vector<2x128xbf16>
      %c0_14 = arith.constant 0 : index
      %c0_15 = arith.constant 0 : index
      %c0_16 = arith.constant 0 : index
      %19 = vector.load %arg3[%c0_14, %c0_15, %c0_16] : memref<1x128x512xbf16, #tpu.memory_space<vmem>>, vector<1x128x512xbf16>
      %20 = vector.shape_cast %19 : vector<1x128x512xbf16> to vector<128x512xbf16>
      %cst_17 = arith.constant dense<0.000000e+00> : vector<2x512xf32>
      %21 = tpu.matmul %18, %20, %cst_17 {dimension_numbers = #tpu.dot_dimension_numbers<[1], [0], [0], [1], [0, 0, 1, 1], [], []>} : vector<2x128xbf16>, vector<128x512xbf16>, vector<2x512xf32> -> vector<2x512xf32>
      %22 = arith.addf %17, %21 : vector<2x512xf32>
      %23 = vector.extract_strided_slice %22 {offsets = [0, 0], sizes = [2, 128], strides = [1, 1]} : vector<2x512xf32> to vector<2x128xf32>
      %24 = arith.negf %23 : vector<2x128xf32>
      %25 = math.exp %24 : vector<2x128xf32>
      %cst_18 = arith.constant 1.000000e+00 : f32
      %26 = vector.broadcast %cst_18 : f32 to vector<2x128xf32>
      %27 = arith.addf %26, %25 : vector<2x128xf32>
      %28 = arith.divf %26, %27 : vector<2x128xf32>
      %29 = vector.extract_strided_slice %22 {offsets = [0, 128], sizes = [2, 128], strides = [1, 1]} : vector<2x512xf32> to vector<2x128xf32>
      %30 = arith.negf %29 : vector<2x128xf32>
      %31 = math.exp %30 : vector<2x128xf32>
      %cst_19 = arith.constant 1.000000e+00 : f32
      %32 = vector.broadcast %cst_19 : f32 to vector<2x128xf32>
      %33 = arith.addf %32, %31 : vector<2x128xf32>
      %34 = arith.divf %32, %33 : vector<2x128xf32>
      %35 = vector.extract_strided_slice %22 {offsets = [0, 256], sizes = [2, 128], strides = [1, 1]} : vector<2x512xf32> to vector<2x128xf32>
      %36 = math.tanh %35 : vector<2x128xf32>
      %37 = vector.extract_strided_slice %22 {offsets = [0, 384], sizes = [2, 128], strides = [1, 1]} : vector<2x512xf32> to vector<2x128xf32>
      %38 = arith.negf %37 : vector<2x128xf32>
      %39 = math.exp %38 : vector<2x128xf32>
      %cst_20 = arith.constant 1.000000e+00 : f32
      %40 = vector.broadcast %cst_20 : f32 to vector<2x128xf32>
      %41 = arith.addf %40, %39 : vector<2x128xf32>
      %42 = arith.divf %40, %41 : vector<2x128xf32>
      %43 = arith.mulf %34, %16 : vector<2x128xf32>
      %44 = arith.mulf %28, %36 : vector<2x128xf32>
      %45 = arith.addf %43, %44 : vector<2x128xf32>
      %46 = math.tanh %45 : vector<2x128xf32>
      %47 = arith.mulf %42, %46 : vector<2x128xf32>
      %48 = arith.truncf %47 : vector<2x128xf32> to vector<2x128xbf16>
      %c14_21 = arith.constant 14 : index
      %c0_22 = arith.constant 0 : index
      %49 = vector.load %arg5[%c14_21, %c0_22] : memref<16x128xbf16, #tpu.memory_space<vmem>>, vector<2x128xbf16>
      tpu.vector_store %arg5[%c14_21, %c0_22], %48 {strides = array<i32>} : memref<16x128xbf16, #tpu.memory_space<vmem>>, vector<2x128xbf16>,
      %c12 = arith.constant 12 : index
      %c0_23 = arith.constant 0 : index
      %50 = vector.load %arg6[%c12, %c0_23] : memref<16x512xf32, #tpu.memory_space<vmem>>, vector<2x512xf32>
      %51 = arith.truncf %47 : vector<2x128xf32> to vector<2x128xbf16>
      %c0_24 = arith.constant 0 : index
      %c0_25 = arith.constant 0 : index
      %c0_26 = arith.constant 0 : index
      %52 = vector.load %arg3[%c0_24, %c0_25, %c0_26] : memref<1x128x512xbf16, #tpu.memory_space<vmem>>, vector<1x128x512xbf16>
      %53 = vector.shape_cast %52 : vector<1x128x512xbf16> to vector<128x512xbf16>
      %cst_27 = arith.constant dense<0.000000e+00> : vector<2x512xf32>
      %54 = tpu.matmul %51, %53, %cst_27 {dimension_numbers = #tpu.dot_dimension_numbers<[1], [0], [0], [1], [0, 0, 1, 1], [], []>} : vector<2x128xbf16>, vector<128x512xbf16>, vector<2x512xf32> -> vector<2x512xf32>
      %55 = arith.addf %50, %54 : vector<2x512xf32>
      %56 = vector.extract_strided_slice %55 {offsets = [0, 0], sizes = [2, 128], strides = [1, 1]} : vector<2x512xf32> to vector<2x128xf32>
      %57 = arith.negf %56 : vector<2x128xf32>
      %58 = math.exp %57 : vector<2x128xf32>
      %cst_28 = arith.constant 1.000000e+00 : f32
      %59 = vector.broadcast %cst_28 : f32 to vector<2x128xf32>
      %60 = arith.addf %59, %58 : vector<2x128xf32>
      %61 = arith.divf %59, %60 : vector<2x128xf32>
      %62 = vector.extract_strided_slice %55 {offsets = [0, 128], sizes = [2, 128], strides = [1, 1]} : vector<2x512xf32> to vector<2x128xf32>
      %63 = arith.negf %62 : vector<2x128xf32>
      %64 = math.exp %63 : vector<2x128xf32>
      %cst_29 = arith.constant 1.000000e+00 : f32
      %65 = vector.broadcast %cst_29 : f32 to vector<2x128xf32>
      %66 = arith.addf %65, %64 : vector<2x128xf32>
      %67 = arith.divf %65, %66 : vector<2x128xf32>
      %68 = vector.extract_strided_slice %55 {offsets = [0, 256], sizes = [2, 128], strides = [1, 1]} : vector<2x512xf32> to vector<2x128xf32>
      %69 = math.tanh %68 : vector<2x128xf32>
      %70 = vector.extract_strided_slice %55 {offsets = [0, 384], sizes = [2, 128], strides = [1, 1]} : vector<2x512xf32> to vector<2x128xf32>
      %71 = arith.negf %70 : vector<2x128xf32>
      %72 = math.exp %71 : vector<2x128xf32>
      %cst_30 = arith.constant 1.000000e+00 : f32
      %73 = vector.broadcast %cst_30 : f32 to vector<2x128xf32>
      %74 = arith.addf %73, %72 : vector<2x128xf32>
      %75 = arith.divf %73, %74 : vector<2x128xf32>
      %76 = arith.mulf %67, %45 : vector<2x128xf32>
      %77 = arith.mulf %61, %69 : vector<2x128xf32>
      %78 = arith.addf %76, %77 : vector<2x128xf32>
      %79 = math.tanh %78 : vector<2x128xf32>
      %80 = arith.mulf %75, %79 : vector<2x128xf32>
      %81 = arith.truncf %80 : vector<2x128xf32> to vector<2x128xbf16>
      %c12_31 = arith.constant 12 : index
      %c0_32 = arith.constant 0 : index
      %82 = vector.load %arg5[%c12_31, %c0_32] : memref<16x128xbf16, #tpu.memory_space<vmem>>, vector<2x128xbf16>
      tpu.vector_store %arg5[%c12_31, %c0_32], %81 {strides = array<i32>} : memref<16x128xbf16, #tpu.memory_space<vmem>>, vector<2x128xbf16>,
      %c10 = arith.constant 10 : index
      %c0_33 = arith.constant 0 : index
      %83 = vector.load %arg6[%c10, %c0_33] : memref<16x512xf32, #tpu.memory_space<vmem>>, vector<2x512xf32>
      %84 = arith.truncf %80 : vector<2x128xf32> to vector<2x128xbf16>
      %c0_34 = arith.constant 0 : index
      %c0_35 = arith.constant 0 : index
      %c0_36 = arith.constant 0 : index
      %85 = vector.load %arg3[%c0_34, %c0_35, %c0_36] : memref<1x128x512xbf16, #tpu.memory_space<vmem>>, vector<1x128x512xbf16>
      %86 = vector.shape_cast %85 : vector<1x128x512xbf16> to vector<128x512xbf16>
      %cst_37 = arith.constant dense<0.000000e+00> : vector<2x512xf32>
      %87 = tpu.matmul %84, %86, %cst_37 {dimension_numbers = #tpu.dot_dimension_numbers<[1], [0], [0], [1], [0, 0, 1, 1], [], []>} : vector<2x128xbf16>, vector<128x512xbf16>, vector<2x512xf32> -> vector<2x512xf32>
      %88 = arith.addf %83, %87 : vector<2x512xf32>
      %89 = vector.extract_strided_slice %88 {offsets = [0, 0], sizes = [2, 128], strides = [1, 1]} : vector<2x512xf32> to vector<2x128xf32>
      %90 = arith.negf %89 : vector<2x128xf32>
      %91 = math.exp %90 : vector<2x128xf32>
      %cst_38 = arith.constant 1.000000e+00 : f32
      %92 = vector.broadcast %cst_38 : f32 to vector<2x128xf32>
      %93 = arith.addf %92, %91 : vector<2x128xf32>
      %94 = arith.divf %92, %93 : vector<2x128xf32>
      %95 = vector.extract_strided_slice %88 {offsets = [0, 128], sizes = [2, 128], strides = [1, 1]} : vector<2x512xf32> to vector<2x128xf32>
      %96 = arith.negf %95 : vector<2x128xf32>
      %97 = math.exp %96 : vector<2x128xf32>
      %cst_39 = arith.constant 1.000000e+00 : f32
      %98 = vector.broadcast %cst_39 : f32 to vector<2x128xf32>
      %99 = arith.addf %98, %97 : vector<2x128xf32>
      %100 = arith.divf %98, %99 : vector<2x128xf32>
      %101 = vector.extract_strided_slice %88 {offsets = [0, 256], sizes = [2, 128], strides = [1, 1]} : vector<2x512xf32> to vector<2x128xf32>
      %102 = math.tanh %101 : vector<2x128xf32>
      %103 = vector.extract_strided_slice %88 {offsets = [0, 384], sizes = [2, 128], strides = [1, 1]} : vector<2x512xf32> to vector<2x128xf32>
      %104 = arith.negf %103 : vector<2x128xf32>
      %105 = math.exp %104 : vector<2x128xf32>
      %cst_40 = arith.constant 1.000000e+00 : f32
      %106 = vector.broadcast %cst_40 : f32 to vector<2x128xf32>
      %107 = arith.addf %106, %105 : vector<2x128xf32>
      %108 = arith.divf %106, %107 : vector<2x128xf32>
      %109 = arith.mulf %100, %78 : vector<2x128xf32>
      %110 = arith.mulf %94, %102 : vector<2x128xf32>
      %111 = arith.addf %109, %110 : vector<2x128xf32>
      %112 = math.tanh %111 : vector<2x128xf32>
      %113 = arith.mulf %108, %112 : vector<2x128xf32>
      %114 = arith.truncf %113 : vector<2x128xf32> to vector<2x128xbf16>
      %c10_41 = arith.constant 10 : index
      %c0_42 = arith.constant 0 : index
      %115 = vector.load %arg5[%c10_41, %c0_42] : memref<16x128xbf16, #tpu.memory_space<vmem>>, vector<2x128xbf16>
      tpu.vector_store %arg5[%c10_41, %c0_42], %114 {strides = array<i32>} : memref<16x128xbf16, #tpu.memory_space<vmem>>, vector<2x128xbf16>,
      %c8 = arith.constant 8 : index
      %c0_43 = arith.constant 0 : index
      %116 = vector.load %arg6[%c8, %c0_43] : memref<16x512xf32, #tpu.memory_space<vmem>>, vector<2x512xf32>
      %117 = arith.truncf %113 : vector<2x128xf32> to vector<2x128xbf16>
      %c0_44 = arith.constant 0 : index
      %c0_45 = arith.constant 0 : index
      %c0_46 = arith.constant 0 : index
      %118 = vector.load %arg3[%c0_44, %c0_45, %c0_46] : memref<1x128x512xbf16, #tpu.memory_space<vmem>>, vector<1x128x512xbf16>
      %119 = vector.shape_cast %118 : vector<1x128x512xbf16> to vector<128x512xbf16>
      %cst_47 = arith.constant dense<0.000000e+00> : vector<2x512xf32>
      %120 = tpu.matmul %117, %119, %cst_47 {dimension_numbers = #tpu.dot_dimension_numbers<[1], [0], [0], [1], [0, 0, 1, 1], [], []>} : vector<2x128xbf16>, vector<128x512xbf16>, vector<2x512xf32> -> vector<2x512xf32>
      %121 = arith.addf %116, %120 : vector<2x512xf32>
      %122 = vector.extract_strided_slice %121 {offsets = [0, 0], sizes = [2, 128], strides = [1, 1]} : vector<2x512xf32> to vector<2x128xf32>
      %123 = arith.negf %122 : vector<2x128xf32>
      %124 = math.exp %123 : vector<2x128xf32>
      %cst_48 = arith.constant 1.000000e+00 : f32
      %125 = vector.broadcast %cst_48 : f32 to vector<2x128xf32>
      %126 = arith.addf %125, %124 : vector<2x128xf32>
      %127 = arith.divf %125, %126 : vector<2x128xf32>
      %128 = vector.extract_strided_slice %121 {offsets = [0, 128], sizes = [2, 128], strides = [1, 1]} : vector<2x512xf32> to vector<2x128xf32>
      %129 = arith.negf %128 : vector<2x128xf32>
      %130 = math.exp %129 : vector<2x128xf32>
      %cst_49 = arith.constant 1.000000e+00 : f32
      %131 = vector.broadcast %cst_49 : f32 to vector<2x128xf32>
      %132 = arith.addf %131, %130 : vector<2x128xf32>
      %133 = arith.divf %131, %132 : vector<2x128xf32>
      %134 = vector.extract_strided_slice %121 {offsets = [0, 256], sizes = [2, 128], strides = [1, 1]} : vector<2x512xf32> to vector<2x128xf32>
      %135 = math.tanh %134 : vector<2x128xf32>
      %136 = vector.extract_strided_slice %121 {offsets = [0, 384], sizes = [2, 128], strides = [1, 1]} : vector<2x512xf32> to vector<2x128xf32>
      %137 = arith.negf %136 : vector<2x128xf32>
      %138 = math.exp %137 : vector<2x128xf32>
      %cst_50 = arith.constant 1.000000e+00 : f32
      %139 = vector.broadcast %cst_50 : f32 to vector<2x128xf32>
      %140 = arith.addf %139, %138 : vector<2x128xf32>
      %141 = arith.divf %139, %140 : vector<2x128xf32>
      %142 = arith.mulf %133, %111 : vector<2x128xf32>
      %143 = arith.mulf %127, %135 : vector<2x128xf32>
      %144 = arith.addf %142, %143 : vector<2x128xf32>
      %145 = math.tanh %144 : vector<2x128xf32>
      %146 = arith.mulf %141, %145 : vector<2x128xf32>
      %147 = arith.truncf %146 : vector<2x128xf32> to vector<2x128xbf16>
      %c8_51 = arith.constant 8 : index
      %c0_52 = arith.constant 0 : index
      %148 = vector.load %arg5[%c8_51, %c0_52] : memref<16x128xbf16, #tpu.memory_space<vmem>>, vector<2x128xbf16>
      tpu.vector_store %arg5[%c8_51, %c0_52], %147 {strides = array<i32>} : memref<16x128xbf16, #tpu.memory_space<vmem>>, vector<2x128xbf16>,
      %c6 = arith.constant 6 : index
      %c0_53 = arith.constant 0 : index
      %149 = vector.load %arg6[%c6, %c0_53] : memref<16x512xf32, #tpu.memory_space<vmem>>, vector<2x512xf32>
      %150 = arith.truncf %146 : vector<2x128xf32> to vector<2x128xbf16>
      %c0_54 = arith.constant 0 : index
      %c0_55 = arith.constant 0 : index
      %c0_56 = arith.constant 0 : index
      %151 = vector.load %arg3[%c0_54, %c0_55, %c0_56] : memref<1x128x512xbf16, #tpu.memory_space<vmem>>, vector<1x128x512xbf16>
      %152 = vector.shape_cast %151 : vector<1x128x512xbf16> to vector<128x512xbf16>
      %cst_57 = arith.constant dense<0.000000e+00> : vector<2x512xf32>
      %153 = tpu.matmul %150, %152, %cst_57 {dimension_numbers = #tpu.dot_dimension_numbers<[1], [0], [0], [1], [0, 0, 1, 1], [], []>} : vector<2x128xbf16>, vector<128x512xbf16>, vector<2x512xf32> -> vector<2x512xf32>
      %154 = arith.addf %149, %153 : vector<2x512xf32>
      %155 = vector.extract_strided_slice %154 {offsets = [0, 0], sizes = [2, 128], strides = [1, 1]} : vector<2x512xf32> to vector<2x128xf32>
      %156 = arith.negf %155 : vector<2x128xf32>
      %157 = math.exp %156 : vector<2x128xf32>
      %cst_58 = arith.constant 1.000000e+00 : f32
      %158 = vector.broadcast %cst_58 : f32 to vector<2x128xf32>
      %159 = arith.addf %158, %157 : vector<2x128xf32>
      %160 = arith.divf %158, %159 : vector<2x128xf32>
      %161 = vector.extract_strided_slice %154 {offsets = [0, 128], sizes = [2, 128], strides = [1, 1]} : vector<2x512xf32> to vector<2x128xf32>
      %162 = arith.negf %161 : vector<2x128xf32>
      %163 = math.exp %162 : vector<2x128xf32>
      %cst_59 = arith.constant 1.000000e+00 : f32
      %164 = vector.broadcast %cst_59 : f32 to vector<2x128xf32>
      %165 = arith.addf %164, %163 : vector<2x128xf32>
      %166 = arith.divf %164, %165 : vector<2x128xf32>
      %167 = vector.extract_strided_slice %154 {offsets = [0, 256], sizes = [2, 128], strides = [1, 1]} : vector<2x512xf32> to vector<2x128xf32>
      %168 = math.tanh %167 : vector<2x128xf32>
      %169 = vector.extract_strided_slice %154 {offsets = [0, 384], sizes = [2, 128], strides = [1, 1]} : vector<2x512xf32> to vector<2x128xf32>
      %170 = arith.negf %169 : vector<2x128xf32>
      %171 = math.exp %170 : vector<2x128xf32>
      %cst_60 = arith.constant 1.000000e+00 : f32
      %172 = vector.broadcast %cst_60 : f32 to vector<2x128xf32>
      %173 = arith.addf %172, %171 : vector<2x128xf32>
      %174 = arith.divf %172, %173 : vector<2x128xf32>
      %175 = arith.mulf %166, %144 : vector<2x128xf32>
      %176 = arith.mulf %160, %168 : vector<2x128xf32>
      %177 = arith.addf %175, %176 : vector<2x128xf32>
      %178 = math.tanh %177 : vector<2x128xf32>
      %179 = arith.mulf %174, %178 : vector<2x128xf32>
      %180 = arith.truncf %179 : vector<2x128xf32> to vector<2x128xbf16>
      %c6_61 = arith.constant 6 : index
      %c0_62 = arith.constant 0 : index
      %181 = vector.load %arg5[%c6_61, %c0_62] : memref<16x128xbf16, #tpu.memory_space<vmem>>, vector<2x128xbf16>
      tpu.vector_store %arg5[%c6_61, %c0_62], %180 {strides = array<i32>} : memref<16x128xbf16, #tpu.memory_space<vmem>>, vector<2x128xbf16>,
      %c4 = arith.constant 4 : index
      %c0_63 = arith.constant 0 : index
      %182 = vector.load %arg6[%c4, %c0_63] : memref<16x512xf32, #tpu.memory_space<vmem>>, vector<2x512xf32>
      %183 = arith.truncf %179 : vector<2x128xf32> to vector<2x128xbf16>
      %c0_64 = arith.constant 0 : index
      %c0_65 = arith.constant 0 : index
      %c0_66 = arith.constant 0 : index
      %184 = vector.load %arg3[%c0_64, %c0_65, %c0_66] : memref<1x128x512xbf16, #tpu.memory_space<vmem>>, vector<1x128x512xbf16>
      %185 = vector.shape_cast %184 : vector<1x128x512xbf16> to vector<128x512xbf16>
      %cst_67 = arith.constant dense<0.000000e+00> : vector<2x512xf32>
      %186 = tpu.matmul %183, %185, %cst_67 {dimension_numbers = #tpu.dot_dimension_numbers<[1], [0], [0], [1], [0, 0, 1, 1], [], []>} : vector<2x128xbf16>, vector<128x512xbf16>, vector<2x512xf32> -> vector<2x512xf32>
      %187 = arith.addf %182, %186 : vector<2x512xf32>
      %188 = vector.extract_strided_slice %187 {offsets = [0, 0], sizes = [2, 128], strides = [1, 1]} : vector<2x512xf32> to vector<2x128xf32>
      %189 = arith.negf %188 : vector<2x128xf32>
      %190 = math.exp %189 : vector<2x128xf32>
      %cst_68 = arith.constant 1.000000e+00 : f32
      %191 = vector.broadcast %cst_68 : f32 to vector<2x128xf32>
      %192 = arith.addf %191, %190 : vector<2x128xf32>
      %193 = arith.divf %191, %192 : vector<2x128xf32>
      %194 = vector.extract_strided_slice %187 {offsets = [0, 128], sizes = [2, 128], strides = [1, 1]} : vector<2x512xf32> to vector<2x128xf32>
      %195 = arith.negf %194 : vector<2x128xf32>
      %196 = math.exp %195 : vector<2x128xf32>
      %cst_69 = arith.constant 1.000000e+00 : f32
      %197 = vector.broadcast %cst_69 : f32 to vector<2x128xf32>
      %198 = arith.addf %197, %196 : vector<2x128xf32>
      %199 = arith.divf %197, %198 : vector<2x128xf32>
      %200 = vector.extract_strided_slice %187 {offsets = [0, 256], sizes = [2, 128], strides = [1, 1]} : vector<2x512xf32> to vector<2x128xf32>
      %201 = math.tanh %200 : vector<2x128xf32>
      %202 = vector.extract_strided_slice %187 {offsets = [0, 384], sizes = [2, 128], strides = [1, 1]} : vector<2x512xf32> to vector<2x128xf32>
      %203 = arith.negf %202 : vector<2x128xf32>
      %204 = math.exp %203 : vector<2x128xf32>
      %cst_70 = arith.constant 1.000000e+00 : f32
      %205 = vector.broadcast %cst_70 : f32 to vector<2x128xf32>
      %206 = arith.addf %205, %204 : vector<2x128xf32>
      %207 = arith.divf %205, %206 : vector<2x128xf32>
      %208 = arith.mulf %199, %177 : vector<2x128xf32>
      %209 = arith.mulf %193, %201 : vector<2x128xf32>
      %210 = arith.addf %208, %209 : vector<2x128xf32>
      %211 = math.tanh %210 : vector<2x128xf32>
      %212 = arith.mulf %207, %211 : vector<2x128xf32>
      %213 = arith.truncf %212 : vector<2x128xf32> to vector<2x128xbf16>
      %c4_71 = arith.constant 4 : index
      %c0_72 = arith.constant 0 : index
      %214 = vector.load %arg5[%c4_71, %c0_72] : memref<16x128xbf16, #tpu.memory_space<vmem>>, vector<2x128xbf16>
      tpu.vector_store %arg5[%c4_71, %c0_72], %213 {strides = array<i32>} : memref<16x128xbf16, #tpu.memory_space<vmem>>, vector<2x128xbf16>,
      %c2 = arith.constant 2 : index
      %c0_73 = arith.constant 0 : index
      %215 = vector.load %arg6[%c2, %c0_73] : memref<16x512xf32, #tpu.memory_space<vmem>>, vector<2x512xf32>
      %216 = arith.truncf %212 : vector<2x128xf32> to vector<2x128xbf16>
      %c0_74 = arith.constant 0 : index
      %c0_75 = arith.constant 0 : index
      %c0_76 = arith.constant 0 : index
      %217 = vector.load %arg3[%c0_74, %c0_75, %c0_76] : memref<1x128x512xbf16, #tpu.memory_space<vmem>>, vector<1x128x512xbf16>
      %218 = vector.shape_cast %217 : vector<1x128x512xbf16> to vector<128x512xbf16>
      %cst_77 = arith.constant dense<0.000000e+00> : vector<2x512xf32>
      %219 = tpu.matmul %216, %218, %cst_77 {dimension_numbers = #tpu.dot_dimension_numbers<[1], [0], [0], [1], [0, 0, 1, 1], [], []>} : vector<2x128xbf16>, vector<128x512xbf16>, vector<2x512xf32> -> vector<2x512xf32>
      %220 = arith.addf %215, %219 : vector<2x512xf32>
      %221 = vector.extract_strided_slice %220 {offsets = [0, 0], sizes = [2, 128], strides = [1, 1]} : vector<2x512xf32> to vector<2x128xf32>
      %222 = arith.negf %221 : vector<2x128xf32>
      %223 = math.exp %222 : vector<2x128xf32>
      %cst_78 = arith.constant 1.000000e+00 : f32
      %224 = vector.broadcast %cst_78 : f32 to vector<2x128xf32>
      %225 = arith.addf %224, %223 : vector<2x128xf32>
      %226 = arith.divf %224, %225 : vector<2x128xf32>
      %227 = vector.extract_strided_slice %220 {offsets = [0, 128], sizes = [2, 128], strides = [1, 1]} : vector<2x512xf32> to vector<2x128xf32>
      %228 = arith.negf %227 : vector<2x128xf32>
      %229 = math.exp %228 : vector<2x128xf32>
      %cst_79 = arith.constant 1.000000e+00 : f32
      %230 = vector.broadcast %cst_79 : f32 to vector<2x128xf32>
      %231 = arith.addf %230, %229 : vector<2x128xf32>
      %232 = arith.divf %230, %231 : vector<2x128xf32>
      %233 = vector.extract_strided_slice %220 {offsets = [0, 256], sizes = [2, 128], strides = [1, 1]} : vector<2x512xf32> to vector<2x128xf32>
      %234 = math.tanh %233 : vector<2x128xf32>
      %235 = vector.extract_strided_slice %220 {offsets = [0, 384], sizes = [2, 128], strides = [1, 1]} : vector<2x512xf32> to vector<2x128xf32>
      %236 = arith.negf %235 : vector<2x128xf32>
      %237 = math.exp %236 : vector<2x128xf32>
      %cst_80 = arith.constant 1.000000e+00 : f32
      %238 = vector.broadcast %cst_80 : f32 to vector<2x128xf32>
      %239 = arith.addf %238, %237 : vector<2x128xf32>
      %240 = arith.divf %238, %239 : vector<2x128xf32>
      %241 = arith.mulf %232, %210 : vector<2x128xf32>
      %242 = arith.mulf %226, %234 : vector<2x128xf32>
      %243 = arith.addf %241, %242 : vector<2x128xf32>
      %244 = math.tanh %243 : vector<2x128xf32>
      %245 = arith.mulf %240, %244 : vector<2x128xf32>
      %246 = arith.truncf %245 : vector<2x128xf32> to vector<2x128xbf16>
      %c2_81 = arith.constant 2 : index
      %c0_82 = arith.constant 0 : index
      %247 = vector.load %arg5[%c2_81, %c0_82] : memref<16x128xbf16, #tpu.memory_space<vmem>>, vector<2x128xbf16>
      tpu.vector_store %arg5[%c2_81, %c0_82], %246 {strides = array<i32>} : memref<16x128xbf16, #tpu.memory_space<vmem>>, vector<2x128xbf16>,
      %c0_83 = arith.constant 0 : index
      %c0_84 = arith.constant 0 : index
      %248 = vector.load %arg6[%c0_83, %c0_84] : memref<16x512xf32, #tpu.memory_space<vmem>>, vector<2x512xf32>
      %249 = arith.truncf %245 : vector<2x128xf32> to vector<2x128xbf16>
      %c0_85 = arith.constant 0 : index
      %c0_86 = arith.constant 0 : index
      %c0_87 = arith.constant 0 : index
      %250 = vector.load %arg3[%c0_85, %c0_86, %c0_87] : memref<1x128x512xbf16, #tpu.memory_space<vmem>>, vector<1x128x512xbf16>
      %251 = vector.shape_cast %250 : vector<1x128x512xbf16> to vector<128x512xbf16>
      %cst_88 = arith.constant dense<0.000000e+00> : vector<2x512xf32>
      %252 = tpu.matmul %249, %251, %cst_88 {dimension_numbers = #tpu.dot_dimension_numbers<[1], [0], [0], [1], [0, 0, 1, 1], [], []>} : vector<2x128xbf16>, vector<128x512xbf16>, vector<2x512xf32> -> vector<2x512xf32>
      %253 = arith.addf %248, %252 : vector<2x512xf32>
      %254 = vector.extract_strided_slice %253 {offsets = [0, 0], sizes = [2, 128], strides = [1, 1]} : vector<2x512xf32> to vector<2x128xf32>
      %255 = arith.negf %254 : vector<2x128xf32>
      %256 = math.exp %255 : vector<2x128xf32>
      %cst_89 = arith.constant 1.000000e+00 : f32
      %257 = vector.broadcast %cst_89 : f32 to vector<2x128xf32>
      %258 = arith.addf %257, %256 : vector<2x128xf32>
      %259 = arith.divf %257, %258 : vector<2x128xf32>
      %260 = vector.extract_strided_slice %253 {offsets = [0, 128], sizes = [2, 128], strides = [1, 1]} : vector<2x512xf32> to vector<2x128xf32>
      %261 = arith.negf %260 : vector<2x128xf32>
      %262 = math.exp %261 : vector<2x128xf32>
      %cst_90 = arith.constant 1.000000e+00 : f32
      %263 = vector.broadcast %cst_90 : f32 to vector<2x128xf32>
      %264 = arith.addf %263, %262 : vector<2x128xf32>
      %265 = arith.divf %263, %264 : vector<2x128xf32>
      %266 = vector.extract_strided_slice %253 {offsets = [0, 256], sizes = [2, 128], strides = [1, 1]} : vector<2x512xf32> to vector<2x128xf32>
      %267 = math.tanh %266 : vector<2x128xf32>
      %268 = vector.extract_strided_slice %253 {offsets = [0, 384], sizes = [2, 128], strides = [1, 1]} : vector<2x512xf32> to vector<2x128xf32>
      %269 = arith.negf %268 : vector<2x128xf32>
      %270 = math.exp %269 : vector<2x128xf32>
      %cst_91 = arith.constant 1.000000e+00 : f32
      %271 = vector.broadcast %cst_91 : f32 to vector<2x128xf32>
      %272 = arith.addf %271, %270 : vector<2x128xf32>
      %273 = arith.divf %271, %272 : vector<2x128xf32>
      %274 = arith.mulf %265, %243 : vector<2x128xf32>
      %275 = arith.mulf %259, %267 : vector<2x128xf32>
      %276 = arith.addf %274, %275 : vector<2x128xf32>
      %277 = math.tanh %276 : vector<2x128xf32>
      %278 = arith.mulf %273, %277 : vector<2x128xf32>
      %279 = arith.truncf %278 : vector<2x128xf32> to vector<2x128xbf16>
      %c0_92 = arith.constant 0 : index
      %c0_93 = arith.constant 0 : index
      %280 = vector.load %arg5[%c0_92, %c0_93] : memref<16x128xbf16, #tpu.memory_space<vmem>>, vector<2x128xbf16>
      tpu.vector_store %arg5[%c0_92, %c0_93], %279 {strides = array<i32>} : memref<16x128xbf16, #tpu.memory_space<vmem>>, vector<2x128xbf16>,
    } else {
    }
    return
  }
  func.func @transform_0(%arg0: i32) -> (i32, i32) {
    %c0_i32 = arith.constant 0 : i32
    %c0_i32_0 = arith.constant 0 : i32
    %c0_i32_1 = arith.constant 0 : i32
    return %c0_i32, %c0_i32_0 : i32, i32
  }
  func.func @transform_1(%arg0: i32) -> (i32, i32, i32) {
    %c0_i32 = arith.constant 0 : i32
    %c0_i32_0 = arith.constant 0 : i32
    %c0_i32_1 = arith.constant 0 : i32
    return %arg0, %c0_i32, %c0_i32_0 : i32, i32, i32
  }
  func.func @transform_2(%arg0: i32) -> (i32, i32, i32) {
    %c0_i32 = arith.constant 0 : i32
    %c0_i32_0 = arith.constant 0 : i32
    %c0_i32_1 = arith.constant 0 : i32
    return %arg0, %c0_i32, %c0_i32_0 : i32, i32, i32
  }
  func.func @transform_3(%arg0: i32) -> (i32, i32, i32) {
    %c0_i32 = arith.constant 0 : i32
    %c0_i32_0 = arith.constant 0 : i32
    %c0_i32_1 = arith.constant 0 : i32
    return %arg0, %c0_i32, %c0_i32_0 : i32, i32, i32
  }
  func.func @transform_4(%arg0: i32) -> (i32, i32) {
    %c0_i32 = arith.constant 0 : i32
    %c0_i32_0 = arith.constant 0 : i32
    return %c0_i32, %arg0 : i32, i32
  }
}

</mosaic_0001>

<bundles_post_ra>
// kernel: bilstm_classifier_forward.5
= control target key start
LH: loop header
LB: loop body
LE: loop exit
PB: predicated region body
PF: predicated region fallthrough
CT: control target
= control target key end

     0   :  { %s381_s0 = inlined_call_operand.vmem [shape: f32[2,256], index: 0, kind: input, shape index: {}]   ;;  %s382_s1 = inlined_call_operand.vmem [shape: f32[256,4], index: 1, kind: input, shape index: {}]   ;;  %s383_s2 = inlined_call_operand.vmem [shape: f32[1,4], index: 2, kind: input, shape index: {}]   ;;  %s384_s3 = inlined_call_operand.hbm [shape: f32[2,4], index: 3, kind: output, shape index: {}]  }
   0x1   :  { %v32_v0 = vld [vmem:[%s382_s1 + $0x80] sm:$0xff]  ;;  %v33_v1 = vld [vmem:[%s382_s1 + $0x88] sm:$0xff]  ;;  %v34_v5 = vld [vmem:[%s382_s1 + $0x90] sm:$0xff] }
   0x2   :  { %v16_v2 = vld [vmem:[%s382_s1] sm:$0xff]  ;;  %v189_v3 = vpack.c.bf16 %v33_v1, %v32_v0  ;;  %v17_v4 = vld [vmem:[%s382_s1 + $0x8] sm:$0xff]  ;;  %v35_v6 = vld [vmem:[%s382_s1 + $0x98] sm:$0xff] }
   0x3   :  { %v191_v7 = vpack.c.bf16 %v17_v4, %v16_v2  ;;  %v193_v8 = vpack.c.bf16 %v35_v6, %v34_v5  ;;  %v18_v9 = vld [vmem:[%s382_s1 + $0x10] sm:$0xff]  ;;  %v19_v10 = vld [vmem:[%s382_s1 + $0x18] sm:$0xff]  ;;  %v36_v11 = vld [vmem:[%s382_s1 + $0xa0] sm:$0xff] }
   0x4   :  { %190 = vmatprep.subr.bf16.mxu0 %v189_v3  ;;  %v37_v12 = vld [vmem:[%s382_s1 + $0xa8] sm:$0xff]  ;;  %v195_v13 = vpack.c.bf16 %v19_v10, %v18_v9  ;;  %v20_v15 = vld [vmem:[%s382_s1 + $0x20] sm:$0xff]  ;;  %v38_v17 = vld [vmem:[%s382_s1 + $0xb0] sm:$0xff] }
   0x5   :  { %192 = vmatpush3.bf16.msra.mxu0 %v191_v7  ;;  %v197_v14 = vpack.c.bf16 %v37_v12, %v36_v11  ;;  %v21_v16 = vld [vmem:[%s382_s1 + $0x28] sm:$0xff]  ;;  %v39_v18 = vld [vmem:[%s382_s1 + $0xb8] sm:$0xff]  ;;  %v22_v21 = vld [vmem:[%s382_s1 + $0x30] sm:$0xff] }
   0x6   :  { %194 = vmatprep.subr.bf16.mxu0 %v193_v8  ;;  %v199_v19 = vpack.c.bf16 %v21_v16, %v20_v15  ;;  %v201_v20 = vpack.c.bf16 %v39_v18, %v38_v17  ;;  %v23_v22 = vld [vmem:[%s382_s1 + $0x38] sm:$0xff]  ;;  %v40_v23 = vld [vmem:[%s382_s1 + $0xc0] sm:$0xff]  ;;  %v41_v24 = vld [vmem:[%s382_s1 + $0xc8] sm:$0xff] }
   0x7   :  { %v153_v25 = vld.sshfl [vmem:[%s381_s0] sm:$0x33 pattern:$0x76325410] }
   0x8   :  { %v63_v26 = vcombine.high %v153_v25, %v153_v25 }
   0x9   :  { %196 = vmatpush3.bf16.msra.mxu0 %v195_v13 }
   0xa   :  { %198 = vmatprep.subr.bf16.mxu0 %v197_v14 }
   0xb   :  { %8 = vsyncpa [#allocation3], 0  ;;  %v203_v27 = vpack.c.bf16 %v23_v22, %v22_v21  ;;  %v205_v28 = vpack.c.bf16 %v41_v24, %v40_v23  ;;  %v24_v29 = vld [vmem:[%s382_s1 + $0x40] sm:$0xff]  ;;  %v25_v30 = vld [vmem:[%s382_s1 + $0x48] sm:$0xff]  ;;  %130 = vmatprep.mubr.f32.mxu0 %v63_v26  ;;  %s246_s25 = smov [#allocation2]   ;;  %vm136_vm0 = vcmask 25600  }
   0xc   :  { %v42_v31 = vld [vmem:[%s382_s1 + $0xd0] sm:$0xff]  ;;  %v43_v32 = vld [vmem:[%s382_s1 + $0xd8] sm:$0xff]  ;;  %v207_v33 = vpack.c.bf16 %v25_v30, %v24_v29  ;;  %v44_v37 = vld [vmem:[%s382_s1 + $0xe0] sm:$0xff]  ;;  %s144_s26 = sshll.u32 %s246_s25, 4  ;;  %s145_s26 = int_to_ptr.vmem [resolvable:$true] %s144_s26 }
   0xd   :  { %200 = vmatpush3.bf16.msra.mxu0 %v199_v19  ;;  %v209_v34 = vpack.c.bf16 %v43_v32, %v42_v31  ;;  %v26_v35 = vld [vmem:[%s382_s1 + $0x50] sm:$0xff]  ;;  %v27_v36 = vld [vmem:[%s382_s1 + $0x58] sm:$0xff]  ;;  %v45_v38 = vld [vmem:[%s382_s1 + $0xe8] sm:$0xff]  ;;  %s222_s27 = scalar_lea.vmem %s145_s26, 32  ;;  %p227_p1 = scmp.lt.s32.totalorder %s145_s26, %s145_s26 }
   0xe   :  { %202 = vmatprep.subr.bf16.mxu0 %v201_v20  ;;  %v211_v39 = vpack.c.bf16 %v27_v36, %v26_v35  ;;  %v213_v40 = vpack.c.bf16 %v45_v38, %v44_v37  ;;  %v28_v41 = vld [vmem:[%s382_s1 + $0x60] sm:$0xff]  ;;  %v29_v42 = vld [vmem:[%s382_s1 + $0x68] sm:$0xff]  ;;  %v46_v43 = vld [vmem:[%s382_s1 + $0xf0] sm:$0xff]  ;;  %p223_p0 = scmp.ne.s32.totalorder %s145_s26, %s222_s27  ;;  %p228_p2 = scmp.lt.s32.totalorder %s222_s27, %s222_s27 }
   0xf   :  { %v47_v44 = vld [vmem:[%s382_s1 + $0xf8] sm:$0xff]  ;;  %v215_v45 = vpack.c.bf16 %v29_v42, %v28_v41  ;;  %v30_v47 = vld [vmem:[%s382_s1 + $0x70] sm:$0xff]  ;;  %v152_v51 = vld [vmem:[%s383_s2] ss:$0 sm:$0xff] }
  0x10   :  { %v217_v46 = vpack.c.bf16 %v47_v44, %v46_v43  ;;  %v31_v48 = vld [vmem:[%s382_s1 + $0x78] sm:$0xff]  ;;  %p229_p3 = por %p228_p2, %p227_p1 }
  0x11   :  { %204 = vmatpush3.bf16.msra.mxu0 %v203_v27  ;;  %v219_v49 = vpack.c.bf16 %v31_v48, %v30_v47 }
  0x12   :  { %206 = vmatprep.subr.bf16.mxu0 %v205_v28  ;;  %p230_p4 = pnand %p229_p3, %p223_p0 }
  0x15   :  { %208 = vmatpush3.bf16.msra.mxu0 %v207_v33 }
  0x16   :  { %210 = vmatprep.subr.bf16.mxu0 %v209_v34 }
  0x19   :  { %212 = vmatpush3.bf16.msra.mxu0 %v211_v39 }
  0x1a   :  { %214 = vmatprep.subr.bf16.mxu0 %v213_v40 }
  0x1d   :  { %216 = vmatpush3.bf16.msra.mxu0 %v215_v45 }
  0x1e   :  { %218 = vmatprep.subr.bf16.mxu0 %v217_v46 }
  0x21   :  { %220 = vmatpush3.bf16.msra.mxu0 %v219_v49 }
  0x24   :  { %131 = vmatmul.mubr.f32.vlgmr.msra.gmra.mrb[0].mxu0 %v153_v25 }
  0xf7   :  { %v186_v50 = vpop.f32.mrb[0].mxu0 }
  0xf8   :  { %v187_v52 = vpop.f32.mrb[1].mxu0 }
  0xf9   :  { %v188_v53 = vadd.f32 %v187_v52, %v186_v50 }
  0xfb   :  { %v133_v54 = vadd.f32 %v188_v53, %v152_v51 }
  0xfd   :  { %137 = vst.msk [vmem:[#allocation2] sm:$0x3] %vm136_vm0, %v133_v54 }
  0xfe   :  { %233 = shalt.err (!%p230_p4)
}
  0xff   :  { %s234_s0 = scalar_lea.hbm %s384_s3, 32 }
 0x100   :  { %p235_p5 = scmp.ne.s32.totalorder %s384_s3, %s234_s0  ;;  %p238_p6 = scmp.lt.u32.totalorder %s234_s0, %s384_s3 }
 0x102   :  { %p240_p7 = pnand %p238_p6, %p235_p5 }
 0x104   :  { %243 = shalt.err (!%p240_p7)
}
 0x105   :  { %147 = dma.vmem_to_hbm [thread:$0]  %s145_s26, 32, %s384_s3, [#allocation3]  }
 0x106   :  { %244 = dma.done.wait [#allocation3], 32  }
 0x107   :  { %245 = vsyncadd [#allocation3], 4294967264 }
 0x108   :  { %151 = vsyncpa [#allocation3], 1 }

// kernel: bilstm_classifier_forward.4
= control target key start
LH: loop header
LB: loop body
LE: loop exit
PB: predicated region body
PF: predicated region fallthrough
CT: control target
= control target key end

     0   :  { %9 = vsyncpa [#allocation4], 0  ;;  %s5268_s0 = inlined_call_operand.vmem [shape: bf16[16,256], index: 0, kind: input, shape index: {}]   ;;  %s5269_s1 = inlined_call_operand.hbm [shape: bf16[2,256,512], index: 1, kind: input, shape index: {}]   ;;  %s5270_s2 = inlined_call_operand.vmem [shape: bf16[2,128,512], index: 2, kind: input, shape index: {}]   ;;  %s5271_s3 = inlined_call_operand.vmem [shape: f32[2,1,512], index: 3, kind: input, shape index: {}]   ;;  %s5272_s4 = inlined_call_operand.vmem [shape: f32[2,256], index: 4, kind: output, shape index: {}]  }
   0x1   :  { %11 = vsyncpa [#allocation4 + $0x1], 0  ;;  %s4210_s15 = smov 0   ;;  %s4212_s16 = smov 0  }
   0x2   :  { %s4214_s17 = smov 0   ;;  %s4216_s18 = smov 0  }
   0x3 LB: > { %s4229_s19 = sadd.s32 4294967295, %s4178_s18   ;;  %s4232_s20 = sadd.s32 1, %s4178_s18   ;;  %s4178_s18 = sphi %s4216_s18, %s5279_s18   ;;  %s4174_s17 = sphi %s4214_s17, %s5278_s17   ;;  %s4170_s16 = sphi %s4212_s16, %s5277_s16   ;;  %s4166_s15 = sphi %s4210_s15, %s5276_s15  }
   0x4   : > { %s42_s21 = ssub.s32 %s4178_s18, %s4232_s20  ;;  %s45_s22 = sadd.s32 1, %s4174_s17 }
   0x5   : > { %p43_p0 = scmp.eq.s32.totalorder %s42_s21, 0  ;;  %p52_p1 = scmp.ne.s32.totalorder %s4174_s17, %s4170_s16 }
   0x6   : > { %p53_p2 = scmp.eq.s32.totalorder %s4178_s18, 0  ;;  %p58_p3 = scmp.ne.s32.totalorder %s4170_s16, %s4166_s15 }
   0x7   : > { %s4242_s23 = scalar_select %p43_p0, %s4174_s17, %s45_s22  }
   0x8   : > { %p54_p4 = por %p53_p2, %p52_p1  ;;  %p59_p5 = scmp.eq.s32.totalorder %s4229_s19, 0 }
   0x9   : > { %p3562_p6 = scmp.lt.s32.totalorder %s4178_s18, 2  ;;  %s163_s25 = sand.u32 1, %s4174_s17  }
   0xa   : > { %p4246_p7 = por %p59_p5, %p58_p3  ;;  %s3363_s26 = sshll.u32 %s163_s25, 9 }
   0xb   : > { %s3554_s27 = sshll.u32 %s4178_s18, 13  ;;  %s167_s5 = scalar_lea.vmem [#allocation3], %s3363_s26 }
   0xc   : > { %s4255_s30 = scalar_lea.hbm %s5269_s1, %s3554_s27  ;;  %s174_s6 = sshll.u32 %s167_s5, 4  ;;  %s4257_s6 = int_to_ptr.vmem [resolvable:$true] %s174_s6 }
   0xd   : > { %p4259_p8 = pnand %p3562_p6, %p54_p4  ;;  %s4264_s8 = scalar_lea.sflag [#allocation4], %s163_s25 }
   0xe   : > { %s4114_s9 = scalar_lea.hbm %s4255_s30, 8192  ;;  %s4119_s12 = scalar_lea.hbm %s5269_s1, 16384 }
   0xf   : > { %p4115_p10 = scmp.ne.s32.totalorder %s4255_s30, %s4114_s9  ;;  %p4116_p11 = pneg %p4259_p8 }
  0x10   : > { %p4120_p0 = scmp.lt.u32.totalorder %s4255_s30, %s5269_s1  ;;  %p4121_p1 = scmp.lt.u32.totalorder %s4119_s12, %s4114_s9 }
  0x11   : > { %p4117_p12 = pnand %p4116_p11, %p4115_p10  ;;  %p4123_p3 = scmp.lt.u32.totalorder %s4114_s9, %s4255_s30 }
  0x12   : > { %p4122_p2 = por %p4121_p1, %p4120_p0 }
  0x13   : > { %p4118_p13 = pneg %p4117_p12 }
  0x14   : > { %p4124_p4 = por %p4123_p3, %p4122_p2 }
  0x16   : > { %p4125_p5 = pnand %p4124_p4, %p4118_p13 }
  0x18   : > { %4128 = shalt.err (!%p4125_p5)
}
  0x19   : > { %s4129_s15 = scalar_lea.vmem %s4257_s6, 8192  ;;  %s4180_s21 = smov [#allocation3]  }
  0x1a   : > { %p4130_p6 = scmp.ne.s32.totalorder %s4257_s6, %s4129_s15  ;;  %s4134_s22 = sshll.u32 %s4180_s21, 4  ;;  %s4135_s22 = int_to_ptr.vmem [resolvable:$false] %s4134_s22 }
  0x1b   : > { %s4136_s25 = scalar_lea.vmem %s4135_s22, 16384  ;;  %p4137_p9 = scmp.lt.s32.totalorder %s4257_s6, %s4135_s22 }
  0x1c   : > { %p4132_p10 = pnand %p4130_p6, %p4116_p11  ;;  %p4138_p0 = scmp.lt.s32.totalorder %s4136_s25, %s4129_s15 }
  0x1e   : > { %p4133_p12 = pneg %p4132_p10  ;;  %p4139_p1 = por %p4138_p0, %p4137_p9 }
  0x20   : > { %p4140_p2 = pnand %p4139_p1, %p4133_p12 }
  0x22   : > { %4143 = shalt.err (!%p4140_p2)
}
  0x23   : > { %s4181_s26 = smov 256   ;;  %s4182_s27 = smov 16  }
  0x24   : > { %3561 = dma.hbm_to_vmem [thread:$0]  (!%p4259_p8), %s4255_s30, 8192, %s4257_s6, %s4264_s8, %s4181_s26, %s4181_s26, %s4182_s27  }
  0x25   : > { %p197_p11 = scmp.lt.s32.totalorder %s4178_s18, 3  ;;  %p5275_p13 = scmp.ge.s32.totalorder %s4178_s18, 1 }
  0x27   : > { %p198_p3 = pnand %p5275_p13, %p197_p11 }
  0x28   : > { %s203_s28 = sand.u32 (!%p198_p3), 1, %s4170_s16  }
  0x29   : > { %201 = sbr.rel (%p198_p3) target bundleno = 4579 (0x11e3), region = 36  ;;  %s3367_s29 = sshll.u32 (!%p198_p3), %s203_s28, 9 }
  0x2a   : > { %s204_s5 = scalar_lea.sflag (!%p198_p3), [#allocation4], %s203_s28  ;;  %s4296_s9 = scalar_lea.vmem (!%p198_p3), [#allocation3], %s3367_s29 }
  0x30   : > { %4161 = dma.done.wait (%p4246_p7), %s204_s5, 8192  }
  0x31   : > { %4163 = vsyncadd (%p4246_p7), %s204_s5, 4294959104  ;;  %p240_p8 = scmp.lt.s32.totalorder %s4229_s19, 1  ;;  %v3599_v0 = vld [vmem:[%s4296_s9 + $0x4] ss:$16 sps:$4 sm:$0xff]   ;;  %v3601_v1 = vld [vmem:[%s4296_s9 + $0xc] ss:$16 sps:$4 sm:$0xff]  }
  0x32   : > { %672 = vmatprep.subr.bf16.mxu0 %v3599_v0  ;;  %v3603_v2 = vld [vmem:[%s4296_s9] ss:$16 sps:$4 sm:$0xff]   ;;  %v3604_v3 = vld [vmem:[%s4296_s9 + $0x8] ss:$16 sps:$4 sm:$0xff]   ;;  %715 = vmatprep.subr.bf16.mxu1 %v3601_v1  ;;  %v3605_v4 = vld [vmem:[%s4296_s9 + $0x24] ss:$16 sps:$4 sm:$0xff]  }
  0x33   : > { %s4304_s18 = scalar_select %p240_p8, %s4229_s19, 1  ;;  %673 = vmatpush1.bf16.msra.mxu0 %v3603_v2  ;;  %716 = vmatpush1.bf16.msra.mxu1 %v3604_v3  ;;  %v3607_v5 = vld [vmem:[%s4296_s9 + $0x2c] ss:$16 sps:$4 sm:$0xff]   ;;  %v3609_v6 = vld [vmem:[%s4296_s9 + $0x20] ss:$16 sps:$4 sm:$0xff]   ;;  %v322_v2 = vlaneseq }
  0x34   : > { %674 = vmatprep.subr.bf16.mxu0 %v3605_v4  ;;  %v3610_v7 = vld [vmem:[%s4296_s9 + $0x28] ss:$16 sps:$4 sm:$0xff]   ;;  %717 = vmatprep.subr.bf16.mxu1 %v3607_v5  ;;  %v3611_v8 = vld [vmem:[%s4296_s9 + $0x44] ss:$16 sps:$4 sm:$0xff]   ;;  %v3613_v9 = vld [vmem:[%s4296_s9 + $0x4c] ss:$16 sps:$4 sm:$0xff]  }
  0x35   : > { %s3555_s30 = sshll.u32 %s4304_s18, 8  ;;  %s3371_s8 = sshll.u32 %s4304_s18, 1  ;;  %v3615_v10 = vld [vmem:[%s4296_s9 + $0x40] ss:$16 sps:$4 sm:$0xff]   ;;  %v3616_v11 = vld [vmem:[%s4296_s9 + $0x48] ss:$16 sps:$4 sm:$0xff]  }
  0x36   : > { %s4310_s24 = scalar_lea.vmem %s5270_s2, %s3555_s30  ;;  %s4317_s12 = scalar_lea.vmem %s5272_s4, %s3371_s8  ;;  %v3617_v12 = vld [vmem:[%s4296_s9 + $0x64] ss:$16 sps:$4 sm:$0xff]   ;;  %v3619_v13 = vld [vmem:[%s4296_s9 + $0x6c] ss:$16 sps:$4 sm:$0xff]   ;;  %v3621_v14 = vld [vmem:[%s4296_s9 + $0x60] ss:$16 sps:$4 sm:$0xff]  }
  0x37   : > { %675 = vmatpush1.bf16.msra.mxu0 %v3609_v6  ;;  %718 = vmatpush1.bf16.msra.mxu1 %v3610_v7  ;;  %v3622_v15 = vld [vmem:[%s4296_s9 + $0x68] ss:$16 sps:$4 sm:$0xff]   ;;  %v3623_v16 = vld [vmem:[%s4296_s9 + $0x84] ss:$16 sps:$4 sm:$0xff]   ;;  %v3625_v17 = vld [vmem:[%s4296_s9 + $0x8c] ss:$16 sps:$4 sm:$0xff]  }
  0x38   : > { %676 = vmatprep.subr.bf16.mxu0 %v3611_v8  ;;  %719 = vmatprep.subr.bf16.mxu1 %v3613_v9  ;;  %v3627_v18 = vld [vmem:[%s4296_s9 + $0x80] ss:$16 sps:$4 sm:$0xff]   ;;  %v3628_v19 = vld [vmem:[%s4296_s9 + $0x88] ss:$16 sps:$4 sm:$0xff]   ;;  %v3629_v20 = vld [vmem:[%s4296_s9 + $0xa4] ss:$16 sps:$4 sm:$0xff]  }
  0x39   : > { %v3631_v21 = vld [vmem:[%s4296_s9 + $0xac] ss:$16 sps:$4 sm:$0xff]   ;;  %v3633_v22 = vld [vmem:[%s4296_s9 + $0xa0] ss:$16 sps:$4 sm:$0xff]   ;;  %v3634_v23 = vld [vmem:[%s4296_s9 + $0xa8] ss:$16 sps:$4 sm:$0xff]  }
  0x3a   : > { %v3635_v24 = vld [vmem:[%s4296_s9 + $0xc4] ss:$16 sps:$4 sm:$0xff]   ;;  %v3637_v25 = vld [vmem:[%s4296_s9 + $0xcc] ss:$16 sps:$4 sm:$0xff]   ;;  %v3639_v26 = vld [vmem:[%s4296_s9 + $0xc0] ss:$16 sps:$4 sm:$0xff]  }
  0x3b   : > { %677 = vmatpush1.bf16.msra.mxu0 %v3615_v10  ;;  %720 = vmatpush1.bf16.msra.mxu1 %v3616_v11  ;;  %v3640_v27 = vld [vmem:[%s4296_s9 + $0xc8] ss:$16 sps:$4 sm:$0xff]   ;;  %v3641_v28 = vld [vmem:[%s4296_s9 + $0xe4] ss:$16 sps:$4 sm:$0xff]   ;;  %v3643_v29 = vld [vmem:[%s4296_s9 + $0xec] ss:$16 sps:$4 sm:$0xff]  }
  0x3c   : > { %678 = vmatprep.subr.bf16.mxu0 %v3617_v12  ;;  %721 = vmatprep.subr.bf16.mxu1 %v3619_v13  ;;  %v3645_v30 = vld [vmem:[%s4296_s9 + $0xe0] ss:$16 sps:$4 sm:$0xff]   ;;  %v3646_v31 = vld [vmem:[%s4296_s9 + $0xe8] ss:$16 sps:$4 sm:$0xff]   ;;  %v3647_v32 = vld [vmem:[%s4296_s9 + $0x104] ss:$16 sps:$4 sm:$0xff]  }
  0x3d   : > { %v3649_v33 = vld [vmem:[%s4296_s9 + $0x10c] ss:$16 sps:$4 sm:$0xff]   ;;  %v3651_v34 = vld [vmem:[%s4296_s9 + $0x100] ss:$16 sps:$4 sm:$0xff]   ;;  %v3652_v35 = vld [vmem:[%s4296_s9 + $0x108] ss:$16 sps:$4 sm:$0xff]  }
  0x3e   : > { %v3653_v36 = vld [vmem:[%s4296_s9 + $0x124] ss:$16 sps:$4 sm:$0xff]   ;;  %v3655_v37 = vld [vmem:[%s4296_s9 + $0x12c] ss:$16 sps:$4 sm:$0xff]   ;;  %v3657_v38 = vld [vmem:[%s4296_s9 + $0x120] ss:$16 sps:$4 sm:$0xff]  }
  0x3f   : > { %679 = vmatpush1.bf16.msra.mxu0 %v3621_v14  ;;  %722 = vmatpush1.bf16.msra.mxu1 %v3622_v15  ;;  %v3658_v39 = vld [vmem:[%s4296_s9 + $0x128] ss:$16 sps:$4 sm:$0xff]   ;;  %v3659_v40 = vld [vmem:[%s4296_s9 + $0x144] ss:$16 sps:$4 sm:$0xff]   ;;  %v3661_v41 = vld [vmem:[%s4296_s9 + $0x14c] ss:$16 sps:$4 sm:$0xff]  }
  0x40   : > { %680 = vmatprep.subr.bf16.mxu0 %v3623_v16  ;;  %723 = vmatprep.subr.bf16.mxu1 %v3625_v17  ;;  %v3663_v42 = vld [vmem:[%s4296_s9 + $0x140] ss:$16 sps:$4 sm:$0xff]   ;;  %v3664_v43 = vld [vmem:[%s4296_s9 + $0x148] ss:$16 sps:$4 sm:$0xff]   ;;  %v3665_v44 = vld [vmem:[%s4296_s9 + $0x164] ss:$16 sps:$4 sm:$0xff]  }
  0x41   : > { %v3667_v45 = vld [vmem:[%s4296_s9 + $0x16c] ss:$16 sps:$4 sm:$0xff]   ;;  %v3669_v47 = vld [vmem:[%s4296_s9 + $0x160] ss:$16 sps:$4 sm:$0xff]   ;;  %v3670_v48 = vld [vmem:[%s4296_s9 + $0x168] ss:$16 sps:$4 sm:$0xff]  }
  0x42   : > { %v3697_v46 = vld [vmem:[%s5268_s0 + $0x4] ss:$8 sps:$4 sm:$0xff]   ;;  %v3675_v51 = vld [vmem:[%s4296_s9 + $0x180] ss:$16 sps:$4 sm:$0xff]   ;;  %v3676_v52 = vld [vmem:[%s4296_s9 + $0x188] ss:$16 sps:$4 sm:$0xff]  }
  0x43   : > { %681 = vmatpush1.bf16.msra.mxu0 %v3627_v18  ;;  %724 = vmatpush1.bf16.msra.mxu1 %v3628_v19  ;;  %v3671_v49 = vld [vmem:[%s4296_s9 + $0x184] ss:$16 sps:$4 sm:$0xff]   ;;  %v3673_v50 = vld [vmem:[%s4296_s9 + $0x18c] ss:$16 sps:$4 sm:$0xff]   ;;  %v3681_v55 = vld [vmem:[%s4296_s9 + $0x1a0] ss:$16 sps:$4 sm:$0xff]  }
  0x44   : > { %682 = vmatprep.subr.bf16.mxu0 %v3629_v20  ;;  %725 = vmatprep.subr.bf16.mxu1 %v3631_v21  ;;  %v3677_v53 = vld [vmem:[%s4296_s9 + $0x1a4] ss:$16 sps:$4 sm:$0xff]   ;;  %v3679_v54 = vld [vmem:[%s4296_s9 + $0x1ac] ss:$16 sps:$4 sm:$0xff]   ;;  %v3682_v56 = vld [vmem:[%s4296_s9 + $0x1a8] ss:$16 sps:$4 sm:$0xff]  }
  0x45   : > { %704 = vmatprep.mubr.bf16.mxu0 %v3697_v46  ;;  %747 = vmatprep.mubr.bf16.mxu1 %v3697_v46  ;;  %v3683_v57 = vld [vmem:[%s4296_s9 + $0x1c4] ss:$16 sps:$4 sm:$0xff]   ;;  %v3685_v58 = vld [vmem:[%s4296_s9 + $0x1cc] ss:$16 sps:$4 sm:$0xff]   ;;  %v3687_v59 = vld [vmem:[%s4296_s9 + $0x1c0] ss:$16 sps:$4 sm:$0xff]  }
  0x46   : > { %v3688_v60 = vld [vmem:[%s4296_s9 + $0x1c8] ss:$16 sps:$4 sm:$0xff]   ;;  %v3689_v61 = vld [vmem:[%s4296_s9 + $0x1e4] ss:$16 sps:$4 sm:$0xff]   ;;  %v3691_v62 = vld [vmem:[%s4296_s9 + $0x1ec] ss:$16 sps:$4 sm:$0xff]  }
  0x47   : > { %683 = vmatpush1.bf16.msra.mxu0 %v3633_v22  ;;  %726 = vmatpush1.bf16.msra.mxu1 %v3634_v23  ;;  %v3693_v63 = vld [vmem:[%s4296_s9 + $0x1e0] ss:$16 sps:$4 sm:$0xff]   ;;  %v3694_v0 = vld [vmem:[%s4296_s9 + $0x1e8] ss:$16 sps:$4 sm:$0xff]   ;;  %s3370_s22 = sshll.u32 %s4304_s18, 2  ;;  %v323_v3 = vshrl.u32 %v322_v2, 7 }
  0x48   : > { %684 = vmatprep.subr.bf16.mxu0 %v3635_v24  ;;  %727 = vmatprep.subr.bf16.mxu1 %v3637_v25  ;;  %v3695_v1 = vld [vmem:[%s5268_s0] ss:$8 sps:$4 sm:$0xff]   ;;  %s248_s27 = scalar_lea.vmem %s5271_s3, %s3370_s22  ;;  %p3438_p7 = scmp.ne.s32.totalorder %s4229_s19, 0 }
  0x49   : > { %v324_v4 = vsub.s32 0, %v323_v3  ;;  %v332_v5 = vsub.s32 2, %v323_v3  ;;  %v320_v6 = vld [vmem:[%s248_s27] sm:$0xf]  ;;  %v328_v7 = vsub.s32 1, %v323_v3  ;;  %v336_v8 = vsub.s32 3, %v323_v3 }
  0x4a   : > { %v4457_v46 = vld [vmem:[%s4310_s24 + $0x80] ss:$16 sps:$4 sm:$0xff] (!%p3438_p7)  }
  0x4b   : > { %685 = vmatpush1.bf16.msra.mxu0 %v3639_v26  ;;  %728 = vmatpush1.bf16.msra.mxu1 %v3640_v27  ;;  %v325_v9 = vrot.slane %v320_v6, %v324_v4  ;;  %v333_v10 = vrot.slane %v320_v6, %v332_v5  ;;  %v329_v11 = vrot.slane %v320_v6, %v328_v7 }
  0x4c   : > { %686 = vmatprep.subr.bf16.mxu0 %v3641_v28  ;;  %729 = vmatprep.subr.bf16.mxu1 %v3643_v29  ;;  %v337_v12 = vrot.slane %v320_v6, %v336_v8  ;;  %v4394_v29 = vld [vmem:[%s4310_s24 + $0x4] ss:$16 sps:$4 sm:$0xff] (!%p3438_p7)  }
  0x4f   : > { %687 = vmatpush1.bf16.msra.mxu0 %v3645_v30  ;;  %730 = vmatpush1.bf16.msra.mxu1 %v3646_v31  ;;  %v4397_v30 = vld [vmem:[%s4310_s24] ss:$16 sps:$4 sm:$0xff] (!%p3438_p7)   ;;  %v4183_v31 = vmov (!%p3438_p7), 0  }
  0x50   : > { %688 = vmatprep.subr.bf16.mxu0 %v3647_v32  ;;  %731 = vmatprep.subr.bf16.mxu1 %v3649_v33  ;;  %v4403_v32 = vld [vmem:[%s4310_s24 + $0x24] ss:$16 sps:$4 sm:$0xff] (!%p3438_p7)   ;;  %v4407_v33 = vld [vmem:[%s4310_s24 + $0x20] ss:$16 sps:$4 sm:$0xff] (!%p3438_p7)  }
  0x53   : > { %689 = vmatpush1.bf16.msra.mxu0 %v3651_v34  ;;  %732 = vmatpush1.bf16.msra.mxu1 %v3652_v35  ;;  %v4411_v34 = vld [vmem:[%s4310_s24 + $0x44] ss:$16 sps:$4 sm:$0xff] (!%p3438_p7)   ;;  %v4414_v35 = vld [vmem:[%s4310_s24 + $0xc] ss:$16 sps:$4 sm:$0xff] (!%p3438_p7)  }
  0x54   : > { %690 = vmatprep.subr.bf16.mxu0 %v3653_v36  ;;  %733 = vmatprep.subr.bf16.mxu1 %v3655_v37  ;;  %v4417_v36 = vld [vmem:[%s4310_s24 + $0x8] ss:$16 sps:$4 sm:$0xff] (!%p3438_p7)   ;;  %v4421_v37 = vld [vmem:[%s4310_s24 + $0x40] ss:$16 sps:$4 sm:$0xff] (!%p3438_p7)  }
  0x57   : > { %691 = vmatpush1.bf16.msra.mxu0 %v3657_v38  ;;  %734 = vmatpush1.bf16.msra.mxu1 %v3658_v39  ;;  %v4426_v38 = vld [vmem:[%s4310_s24 + $0x64] ss:$16 sps:$4 sm:$0xff] (!%p3438_p7)   ;;  %v4430_v39 = vld [vmem:[%s4310_s24 + $0x2c] ss:$16 sps:$4 sm:$0xff] (!%p3438_p7)  }
  0x58   : > { %692 = vmatprep.subr.bf16.mxu0 %v3659_v40  ;;  %735 = vmatprep.subr.bf16.mxu1 %v3661_v41  ;;  %v4433_v40 = vld [vmem:[%s4310_s24 + $0x28] ss:$16 sps:$4 sm:$0xff] (!%p3438_p7)   ;;  %v4438_v41 = vld [vmem:[%s4310_s24 + $0x60] ss:$16 sps:$4 sm:$0xff] (!%p3438_p7)  }
  0x5b   : > { %693 = vmatpush1.bf16.msra.mxu0 %v3663_v42  ;;  %736 = vmatpush1.bf16.msra.mxu1 %v3664_v43  ;;  %v4441_v42 = vld [vmem:[%s4310_s24 + $0x84] ss:$16 sps:$4 sm:$0xff] (!%p3438_p7)   ;;  %v4444_v43 = vld [vmem:[%s4310_s24 + $0x4c] ss:$16 sps:$4 sm:$0xff] (!%p3438_p7)  }
  0x5c   : > { %694 = vmatprep.subr.bf16.mxu0 %v3665_v44  ;;  %737 = vmatprep.subr.bf16.mxu1 %v3667_v45  ;;  %v4449_v44 = vld [vmem:[%s4310_s24 + $0x48] ss:$16 sps:$4 sm:$0xff] (!%p3438_p7)   ;;  %v4453_v45 = vld [vmem:[%s4310_s24 + $0x6c] ss:$16 sps:$4 sm:$0xff] (!%p3438_p7)  }
  0x5f   : > { %695 = vmatpush1.bf16.msra.mxu0 %v3669_v47  ;;  %738 = vmatpush1.bf16.msra.mxu1 %v3670_v48  ;;  %v4461_v47 = vld [vmem:[%s4310_s24 + $0xa4] ss:$16 sps:$4 sm:$0xff] (!%p3438_p7)   ;;  %v4465_v48 = vld [vmem:[%s4310_s24 + $0x68] ss:$16 sps:$4 sm:$0xff] (!%p3438_p7)  }
  0x60   : > { %696 = vmatprep.subr.bf16.mxu0 %v3671_v49  ;;  %739 = vmatprep.subr.bf16.mxu1 %v3673_v50  ;;  %v4469_v49 = vld [vmem:[%s4310_s24 + $0x8c] ss:$16 sps:$4 sm:$0xff] (!%p3438_p7)   ;;  %v4473_v50 = vld [vmem:[%s4310_s24 + $0xa0] ss:$16 sps:$4 sm:$0xff] (!%p3438_p7)  }
  0x63   : > { %697 = vmatpush1.bf16.msra.mxu0 %v3675_v51  ;;  %740 = vmatpush1.bf16.msra.mxu1 %v3676_v52  ;;  %v4476_v51 = vld [vmem:[%s4310_s24 + $0xc4] ss:$16 sps:$4 sm:$0xff] (!%p3438_p7)   ;;  %v4481_v52 = vld [vmem:[%s4310_s24 + $0x88] ss:$16 sps:$4 sm:$0xff] (!%p3438_p7)  }
  0x64   : > { %698 = vmatprep.subr.bf16.mxu0 %v3677_v53  ;;  %741 = vmatprep.subr.bf16.mxu1 %v3679_v54  ;;  %v4485_v53 = vld [vmem:[%s4310_s24 + $0xac] ss:$16 sps:$4 sm:$0xff] (!%p3438_p7)   ;;  %v4489_v54 = vld [vmem:[%s4310_s24 + $0xc0] ss:$16 sps:$4 sm:$0xff] (!%p3438_p7)  }
  0x67   : > { %699 = vmatpush1.bf16.msra.mxu0 %v3681_v55  ;;  %742 = vmatpush1.bf16.msra.mxu1 %v3682_v56  ;;  %v4493_v55 = vld [vmem:[%s4310_s24 + $0xe4] ss:$16 sps:$4 sm:$0xff] (!%p3438_p7)   ;;  %v4497_v56 = vld [vmem:[%s4310_s24 + $0xa8] ss:$16 sps:$4 sm:$0xff] (!%p3438_p7)  }
  0x68   : > { %700 = vmatprep.subr.bf16.mxu0 %v3683_v57  ;;  %743 = vmatprep.subr.bf16.mxu1 %v3685_v58  ;;  %v4501_v57 = vld [vmem:[%s4310_s24 + $0xcc] ss:$16 sps:$4 sm:$0xff] (!%p3438_p7)   ;;  %v4505_v58 = vld [vmem:[%s4310_s24 + $0xe0] ss:$16 sps:$4 sm:$0xff] (!%p3438_p7)  }
  0x6b   : > { %701 = vmatpush1.bf16.msra.mxu0 %v3687_v59  ;;  %744 = vmatpush1.bf16.msra.mxu1 %v3688_v60  ;;  %v4510_v59 = vld [vmem:[%s4310_s24 + $0xc8] ss:$16 sps:$4 sm:$0xff] (!%p3438_p7)   ;;  %v4514_v60 = vld [vmem:[%s4310_s24 + $0xec] ss:$16 sps:$4 sm:$0xff] (!%p3438_p7)  }
  0x6c   : > { %702 = vmatprep.subr.bf16.mxu0 %v3689_v61  ;;  %745 = vmatprep.subr.bf16.mxu1 %v3691_v62  ;;  %v4519_v61 = vld [vmem:[%s4310_s24 + $0xe8] ss:$16 sps:$4 sm:$0xff] (!%p3438_p7)  }
  0x6f   : > { %703 = vmatpush1.bf16.msra.mxu0 %v3693_v63  ;;  %746 = vmatpush1.bf16.msra.mxu1 %v3694_v0 }
  0x70   : > { %966 = vmatprep.subr.bf16.mxu0 (!%p3438_p7), %v4394_v29  ;;  %1007 = vmatprep.subr.bf16.mxu1 (!%p3438_p7), %v4414_v35 }
  0x72   : > { %705 = vmatmul.mubr.bf16.vlgmr.msra.gmra.mrb[0].mxu0 %v3695_v1  ;;  %748 = vmatmul.mubr.bf16.vlgmr.msra.gmra.mrb[0].mxu1 %v3695_v1 }
  0x73   : > { %998 = vmatprep.mubr.bf16.mxu0 (!%p3438_p7), %v4183_v31  ;;  %1039 = vmatprep.mubr.bf16.mxu1 (!%p3438_p7), %v4183_v31 }
  0x74   : > { %967 = vmatpush1.bf16.msra.mxu0 (!%p3438_p7), %v4397_v30  ;;  %1008 = vmatpush1.bf16.msra.mxu1 (!%p3438_p7), %v4417_v36 }
  0x75   : > { %968 = vmatprep.subr.bf16.mxu0 (!%p3438_p7), %v4403_v32  ;;  %1009 = vmatprep.subr.bf16.mxu1 (!%p3438_p7), %v4430_v39 }
  0x78   : > { %969 = vmatpush1.bf16.msra.mxu0 (!%p3438_p7), %v4407_v33  ;;  %1010 = vmatpush1.bf16.msra.mxu1 (!%p3438_p7), %v4433_v40 }
  0x79   : > { %970 = vmatprep.subr.bf16.mxu0 (!%p3438_p7), %v4411_v34  ;;  %1011 = vmatprep.subr.bf16.mxu1 (!%p3438_p7), %v4444_v43 }
  0x7c   : > { %971 = vmatpush1.bf16.msra.mxu0 (!%p3438_p7), %v4421_v37  ;;  %1012 = vmatpush1.bf16.msra.mxu1 (!%p3438_p7), %v4449_v44 }
  0x7d   : > { %972 = vmatprep.subr.bf16.mxu0 (!%p3438_p7), %v4426_v38  ;;  %1013 = vmatprep.subr.bf16.mxu1 (!%p3438_p7), %v4453_v45 }
  0x80   : > { %973 = vmatpush1.bf16.msra.mxu0 (!%p3438_p7), %v4438_v41  ;;  %1014 = vmatpush1.bf16.msra.mxu1 (!%p3438_p7), %v4465_v48 }
  0x81   : > { %974 = vmatprep.subr.bf16.mxu0 (!%p3438_p7), %v4441_v42  ;;  %1015 = vmatprep.subr.bf16.mxu1 (!%p3438_p7), %v4469_v49 }
  0x84   : > { %975 = vmatpush1.bf16.msra.mxu0 (!%p3438_p7), %v4457_v46  ;;  %1016 = vmatpush1.bf16.msra.mxu1 (!%p3438_p7), %v4481_v52 }
  0x85   : > { %976 = vmatprep.subr.bf16.mxu0 (!%p3438_p7), %v4461_v47  ;;  %1017 = vmatprep.subr.bf16.mxu1 (!%p3438_p7), %v4485_v53 }
  0x88   : > { %977 = vmatpush1.bf16.msra.mxu0 (!%p3438_p7), %v4473_v50  ;;  %1018 = vmatpush1.bf16.msra.mxu1 (!%p3438_p7), %v4497_v56 }
  0x89   : > { %978 = vmatprep.subr.bf16.mxu0 (!%p3438_p7), %v4476_v51  ;;  %1019 = vmatprep.subr.bf16.mxu1 (!%p3438_p7), %v4501_v57 }
  0x8c   : > { %979 = vmatpush1.bf16.msra.mxu0 (!%p3438_p7), %v4489_v54  ;;  %1020 = vmatpush1.bf16.msra.mxu1 (!%p3438_p7), %v4510_v59 }
  0x8d   : > { %980 = vmatprep.subr.bf16.mxu0 (!%p3438_p7), %v4493_v55  ;;  %1021 = vmatprep.subr.bf16.mxu1 (!%p3438_p7), %v4514_v60 }
  0x90   : > { %981 = vmatpush1.bf16.msra.mxu0 (!%p3438_p7), %v4505_v58  ;;  %1022 = vmatpush1.bf16.msra.mxu1 (!%p3438_p7), %v4519_v61 }
  0x91   : > { %1082 = vmatprep.subr.bf16.mxu0 (!%p3438_p7), %v4394_v29  ;;  %1123 = vmatprep.subr.bf16.mxu1 (!%p3438_p7), %v4414_v35 }
 0x145   : > { %v706_v13 = vpop.f32.mrb[0].mxu0  ;;  %v749_v14 = vpop.f32.mrb[0].mxu1  ;;  %769 = sbr.rel (%p3438_p7) target bundleno = 2435 (0x983), region = 44 }
 0x146   : > { %v707_v15 = vadd.f32 %v706_v13, %v325_v9  ;;  %v750_v16 = vadd.f32 %v749_v14, %v333_v10  ;;  %v708_v17 = vpop.f32.mrb[1].mxu0  ;;  %v751_v18 = vpop.f32.mrb[1].mxu1 }
 0x147   : > { %v709_v19 = vadd.f32 %v708_v17, %v329_v11  ;;  %v752_v20 = vadd.f32 %v751_v18, %v337_v12  ;;  %v710_v21 = vpop.f32.mrb[2].mxu0  ;;  %v753_v22 = vpop.f32.mrb[2].mxu1 }
 0x148   : > { %758 = vst [vmem:[#allocation2] sm:$0xff] %v707_v15  ;;  %760 = vst [vmem:[#allocation2 + $0x10] sm:$0xff] %v750_v16  ;;  %v711_v23 = vadd.f32 %v710_v21, %v325_v9  ;;  %v754_v24 = vadd.f32 %v753_v22, %v333_v10  ;;  %v712_v25 = vpop.f32.mrb[3].mxu0  ;;  %v755_v26 = vpop.f32.mrb[3].mxu1  ;;  %999 = vmatmul.mubr.bf16.vlgmr.msra.gmra.mrb[0].mxu0 (!%p3438_p7), %v4183_v31  ;;  %1040 = vmatmul.mubr.bf16.vlgmr.msra.gmra.mrb[0].mxu1 (!%p3438_p7), %v4183_v31 }
 0x149   : > { %759 = vst [vmem:[#allocation2 + $0x8] sm:$0xff] %v709_v19  ;;  %761 = vst [vmem:[#allocation2 + $0x18] sm:$0xff] %v752_v20  ;;  %v713_v27 = vadd.f32 %v712_v25, %v329_v11  ;;  %v756_v28 = vadd.f32 %v755_v26, %v337_v12  ;;  %1083 = vmatpush1.bf16.msra.mxu0 (!%p3438_p7), %v4397_v30  ;;  %1114 = vmatprep.mubr.bf16.mxu0 (!%p3438_p7), %v4183_v31 }
 0x14a   : > { %762 = vst [vmem:[#allocation2 + $0x20] sm:$0xff] %v711_v23  ;;  %764 = vst [vmem:[#allocation2 + $0x30] sm:$0xff] %v754_v24  ;;  %1084 = vmatprep.subr.bf16.mxu0 (!%p3438_p7), %v4403_v32  ;;  %1124 = vmatpush1.bf16.msra.mxu1 (!%p3438_p7), %v4417_v36 }
 0x14b   : > { %763 = vst [vmem:[#allocation2 + $0x28] sm:$0xff] %v713_v27  ;;  %765 = vst [vmem:[#allocation2 + $0x38] sm:$0xff] %v756_v28  ;;  %1125 = vmatprep.subr.bf16.mxu1 (!%p3438_p7), %v4430_v39  ;;  %1155 = vmatprep.mubr.bf16.mxu1 (!%p3438_p7), %v4183_v31 }
 0x14d   : > { %1085 = vmatpush1.bf16.msra.mxu0 %v4407_v33 }
 0x14e   : > { %1086 = vmatprep.subr.bf16.mxu0 %v4411_v34  ;;  %1126 = vmatpush1.bf16.msra.mxu1 %v4433_v40 }
 0x14f   : > { %1127 = vmatprep.subr.bf16.mxu1 %v4444_v43  ;;  %v770_v62 = vld [vmem:[#allocation2] sm:$0x3]  ;;  %v772_v14 = vld [vmem:[#allocation2 + $0x10] sm:$0x3] }
 0x150   : > { %v771_v63 = vld [vmem:[#allocation2 + $0x8] sm:$0x3]  ;;  %v773_v8 = vld [vmem:[#allocation2 + $0x18] sm:$0x3] }
 0x151   : > { %1087 = vmatpush1.bf16.msra.mxu0 %v4421_v37 }
 0x152   : > { %1088 = vmatprep.subr.bf16.mxu0 %v4426_v38  ;;  %1128 = vmatpush1.bf16.msra.mxu1 %v4449_v44 }
 0x153   : > { %1129 = vmatprep.subr.bf16.mxu1 %v4453_v45 }
 0x155   : > { %1089 = vmatpush1.bf16.msra.mxu0 %v4438_v41 }
 0x156   : > { %1090 = vmatprep.subr.bf16.mxu0 %v4441_v42  ;;  %1130 = vmatpush1.bf16.msra.mxu1 %v4465_v48 }
 0x157   : > { %1131 = vmatprep.subr.bf16.mxu1 %v4469_v49 }
 0x159   : > { %1091 = vmatpush1.bf16.msra.mxu0 %v4457_v46 }
 0x15a   : > { %1092 = vmatprep.subr.bf16.mxu0 %v4461_v47  ;;  %1132 = vmatpush1.bf16.msra.mxu1 %v4481_v52 }
 0x15b   : > { %1133 = vmatprep.subr.bf16.mxu1 %v4485_v53 }
 0x15d   : > { %1093 = vmatpush1.bf16.msra.mxu0 %v4473_v50 }
 0x15e   : > { %1094 = vmatprep.subr.bf16.mxu0 %v4476_v51  ;;  %1134 = vmatpush1.bf16.msra.mxu1 %v4497_v56 }
 0x15f   : > { %1135 = vmatprep.subr.bf16.mxu1 %v4501_v57 }
 0x161   : > { %1095 = vmatpush1.bf16.msra.mxu0 %v4489_v54 }
 0x162   : > { %1096 = vmatprep.subr.bf16.mxu0 %v4493_v55  ;;  %1136 = vmatpush1.bf16.msra.mxu1 %v4510_v59 }
 0x163   : > { %1137 = vmatprep.subr.bf16.mxu1 %v4514_v60 }
 0x165   : > { %1097 = vmatpush1.bf16.msra.mxu0 %v4505_v58 }
 0x166   : > { %1219 = vmatprep.subr.bf16.mxu0 %v4394_v29  ;;  %1138 = vmatpush1.bf16.msra.mxu1 %v4519_v61 }
 0x167   : > { %1260 = vmatprep.subr.bf16.mxu1 %v4414_v35 }
 0x21b   : > { %v1000_v0 = vpop.f32.mrb[0].mxu0  ;;  %v1041_v9 = vpop.f32.mrb[0].mxu1 }
 0x21c   : > { %v1048_v1 = vadd.f32 %v1000_v0, %v770_v62  ;;  %v1002_v2 = vpop.f32.mrb[1].mxu0  ;;  %v1043_v10 = vpop.f32.mrb[1].mxu1  ;;  %v1050_v16 = vadd.f32 %v1041_v9, %v772_v14 }
 0x21d   : > { %v1049_v3 = vadd.f32 %v1002_v2, %v771_v63  ;;  %v1004_v4 = vpop.f32.mrb[2].mxu0  ;;  %v1051_v11 = vadd.f32 %v1043_v10, %v773_v8  ;;  %v1045_v12 = vpop.f32.mrb[2].mxu1  ;;  %v1077_v2 = vld [vmem:[#allocation2] sm:$0xc] }
 0x21e   : > { %v3471_v5 = vmul.f32 -1.442695, %v1048_v1  ;;  %v1005_v6 = vpop.f32.mrb[3].mxu0  ;;  %v1046_v13 = vpop.f32.mrb[3].mxu1 }
 0x21f   : > { %v3472_v7 = vmul.f32 -1.442695, %v1049_v3  ;;  %v3473_v15 = vmul.f32 -1.442695, %v1051_v11  ;;  %v1078_v6 = vld [vmem:[#allocation2 + $0x8] sm:$0xc] }
 0x220   : > { %3746 = vpow2.f32 %v3471_v5 }
 0x221   : > { %3748 = vpow2.f32 %v3472_v7 }
 0x222   : > { %3750 = vpow2.f32 %v3473_v15 }
 0x223   : > { %3752 = vtanh.f32 %v1050_v16 }
 0x22a   : > { %v3747_v17 = vpop.eup %3746 }
 0x22b   : > { %v3749_v18 = vpop.eup %3748  ;;  %v1055_v19 = vadd.f32 1.0, %v3747_v17 }
 0x22c   : > { %v1061_v20 = vadd.f32 1.0, %v3749_v18  ;;  %v3751_v21 = vpop.eup %3750 }
 0x22d   : > { %3754 = vrcp.f32 %v1055_v19  ;;  %v3753_v22 = vpop.eup %3752  ;;  %v1068_v24 = vadd.f32 1.0, %v3751_v21  ;;  %v1080_v19 = vld [vmem:[#allocation2 + $0x18] sm:$0xc] }
 0x22e   : > { %3756 = vrcp.f32 %v1061_v20 }
 0x22f   : > { %3758 = vrcp.f32 %v1068_v24 }
 0x237   : > { %v3755_v23 = vpop.eup %3754 }
 0x238   : > { %v3757_v25 = vpop.eup %3756  ;;  %v1072_v26 = vmul.f32 %v3755_v23, %v3753_v22  ;;  %v1079_v22 = vld [vmem:[#allocation2 + $0x10] sm:$0xc] }
 0x239   : > { %v1071_v27 = vmul.f32 0.0, %v3757_v25  ;;  %v3759_v62 = vpop.eup %3758 }
 0x23b   : > { %v4561_v28 = vadd.f32 %v1072_v26, %v1071_v27 }
 0x23d   : > { %3760 = vtanh.f32 %v4561_v28 }
 0x247   : > { %v3761_v63 = vpop.eup %3760 }
 0x248   : > { %v4564_v0 = vmul.f32 %v3761_v63, %v3759_v62 }
 0x24a   : > { %v1081_v1 = vpack.c.bf16 %v4564_v0, %v4564_v0 }
 0x24c   : > { %1115 = vmatmul.mubr.bf16.vlgmr.msra.gmra.mrb[4].mxu0 %v1081_v1  ;;  %1156 = vmatmul.mubr.bf16.vlgmr.msra.gmra.mrb[4].mxu1 %v1081_v1 }
 0x24d   : > { %1220 = vmatpush1.bf16.msra.mxu0 %v4397_v30  ;;  %1261 = vmatpush1.bf16.msra.mxu1 %v4417_v36 }
 0x24e   : > { %1221 = vmatprep.subr.bf16.mxu0 %v4403_v32  ;;  %1262 = vmatprep.subr.bf16.mxu1 %v4430_v39 }
 0x24f   : > { %1251 = vmatprep.mubr.bf16.mxu0 %v4183_v31  ;;  %1292 = vmatprep.mubr.bf16.mxu1 %v4183_v31 }
 0x251   : > { %1222 = vmatpush1.bf16.msra.mxu0 %v4407_v33  ;;  %1263 = vmatpush1.bf16.msra.mxu1 %v4433_v40 }
 0x252   : > { %1223 = vmatprep.subr.bf16.mxu0 %v4411_v34  ;;  %1264 = vmatprep.subr.bf16.mxu1 %v4444_v43 }
 0x255   : > { %1224 = vmatpush1.bf16.msra.mxu0 %v4421_v37  ;;  %1265 = vmatpush1.bf16.msra.mxu1 %v4449_v44 }
 0x256   : > { %1225 = vmatprep.subr.bf16.mxu0 %v4426_v38  ;;  %1266 = vmatprep.subr.bf16.mxu1 %v4453_v45 }
 0x259   : > { %1226 = vmatpush1.bf16.msra.mxu0 %v4438_v41  ;;  %1267 = vmatpush1.bf16.msra.mxu1 %v4465_v48 }
 0x25a   : > { %1227 = vmatprep.subr.bf16.mxu0 %v4441_v42  ;;  %1268 = vmatprep.subr.bf16.mxu1 %v4469_v49 }
 0x25d   : > { %1228 = vmatpush1.bf16.msra.mxu0 %v4457_v46  ;;  %1269 = vmatpush1.bf16.msra.mxu1 %v4481_v52 }
 0x25e   : > { %1229 = vmatprep.subr.bf16.mxu0 %v4461_v47  ;;  %1270 = vmatprep.subr.bf16.mxu1 %v4485_v53 }
 0x261   : > { %1230 = vmatpush1.bf16.msra.mxu0 %v4473_v50  ;;  %1271 = vmatpush1.bf16.msra.mxu1 %v4497_v56 }
 0x262   : > { %1231 = vmatprep.subr.bf16.mxu0 %v4476_v51  ;;  %1272 = vmatprep.subr.bf16.mxu1 %v4501_v57 }
 0x265   : > { %1232 = vmatpush1.bf16.msra.mxu0 %v4489_v54  ;;  %1273 = vmatpush1.bf16.msra.mxu1 %v4510_v59 }
 0x266   : > { %1233 = vmatprep.subr.bf16.mxu0 %v4493_v55  ;;  %1274 = vmatprep.subr.bf16.mxu1 %v4514_v60 }
 0x269   : > { %1234 = vmatpush1.bf16.msra.mxu0 %v4505_v58  ;;  %1275 = vmatpush1.bf16.msra.mxu1 %v4519_v61 }
 0x26a   : > { %1356 = vmatprep.subr.bf16.mxu0 %v4394_v29  ;;  %1397 = vmatprep.subr.bf16.mxu1 %v4414_v35 }
 0x31f   : > { %v1116_v3 = vpop.f32.mrb[4].mxu0  ;;  %v1157_v4 = vpop.f32.mrb[4].mxu1 }
 0x320   : > { %v1168_v5 = vrot.slane %v1116_v3, 6  ;;  %v1118_v7 = vpop.f32.mrb[5].mxu0  ;;  %v1159_v8 = vpop.f32.mrb[5].mxu1  ;;  %v1170_v21 = vrot.slane %v1157_v4, 6  ;;  %v1200_v3 = vrot.slane %v4561_v28, 6 }
 0x321   : > { %v1169_v9 = vrot.slane %v1118_v7, 6  ;;  %v1120_v10 = vpop.f32.mrb[6].mxu0  ;;  %v1161_v11 = vpop.f32.mrb[6].mxu1  ;;  %v1171_v18 = vrot.slane %v1159_v8, 6  ;;  %v1211_v28 = vld [vmem:[#allocation2] sm:$0x30] }
 0x322   : > { %v1176_v12 = vadd.f32 %v1168_v5, %v1077_v2  ;;  %v1121_v13 = vpop.f32.mrb[7].mxu0  ;;  %v1162_v14 = vpop.f32.mrb[7].mxu1  ;;  %v1178_v24 = vadd.f32 %v1170_v21, %v1079_v22 }
 0x323   : > { %v1177_v15 = vadd.f32 %v1169_v9, %v1078_v6  ;;  %v1179_v20 = vadd.f32 %v1171_v18, %v1080_v19 }
 0x324   : > { %v3474_v16 = vmul.f32 -1.442695, %v1176_v12 }
 0x325   : > { %v3475_v17 = vmul.f32 -1.442695, %v1177_v15  ;;  %v3476_v23 = vmul.f32 -1.442695, %v1179_v20 }
 0x326   : > { %3762 = vpow2.f32 %v3474_v16 }
 0x327   : > { %3764 = vpow2.f32 %v3475_v17  ;;  %v1212_v17 = vld [vmem:[#allocation2 + $0x8] sm:$0x30] }
 0x328   : > { %3766 = vpow2.f32 %v3476_v23 }
 0x329   : > { %3768 = vtanh.f32 %v1178_v24 }
 0x330   : > { %v3763_v25 = vpop.eup %3762 }
 0x331   : > { %v3765_v26 = vpop.eup %3764  ;;  %v1183_v27 = vadd.f32 1.0, %v3763_v25 }
 0x332   : > { %v1189_v62 = vadd.f32 1.0, %v3765_v26  ;;  %v3767_v63 = vpop.eup %3766 }
 0x333   : > { %3770 = vrcp.f32 %v1183_v27  ;;  %v3769_v1 = vpop.eup %3768  ;;  %v1196_v7 = vadd.f32 1.0, %v3767_v63 }
 0x334   : > { %3772 = vrcp.f32 %v1189_v62 }
 0x335   : > { %3774 = vrcp.f32 %v1196_v7 }
 0x33d   : > { %v3771_v2 = vpop.eup %3770 }
 0x33e   : > { %v3773_v5 = vpop.eup %3772  ;;  %v1203_v6 = vmul.f32 %v3771_v2, %v3769_v1  ;;  %v1214_v1 = vld [vmem:[#allocation2 + $0x18] sm:$0x30] }
 0x33f   : > { %v1202_v4 = vmul.f32 %v3773_v5, %v1200_v3  ;;  %v3775_v9 = vpop.eup %3774  ;;  %v1213_v5 = vld [vmem:[#allocation2 + $0x10] sm:$0x30] }
 0x341   : > { %v4603_v8 = vadd.f32 %v1203_v6, %v1202_v4 }
 0x343   : > { %3776 = vtanh.f32 %v4603_v8 }
 0x34d   : > { %v3777_v10 = vpop.eup %3776 }
 0x34e   : > { %v4606_v11 = vmul.f32 %v3777_v10, %v3775_v9 }
 0x350   : > { %v1215_v12 = vpack.c.bf16 %v4606_v11, %v4606_v11 }
 0x352   : > { %v1217_v13 = vrot.slane %v1215_v12, 1 }
 0x354   : > { %1252 = vmatmul.mubr.bf16.vlgmr.msra.gmra.mrb[8].mxu0 %v1217_v13  ;;  %1293 = vmatmul.mubr.bf16.vlgmr.msra.gmra.mrb[8].mxu1 %v1217_v13 }
 0x355   : > { %1357 = vmatpush1.bf16.msra.mxu0 %v4397_v30  ;;  %1398 = vmatpush1.bf16.msra.mxu1 %v4417_v36 }
 0x356   : > { %1358 = vmatprep.subr.bf16.mxu0 %v4403_v32  ;;  %1399 = vmatprep.subr.bf16.mxu1 %v4430_v39 }
 0x357   : > { %1388 = vmatprep.mubr.bf16.mxu0 %v4183_v31  ;;  %1429 = vmatprep.mubr.bf16.mxu1 %v4183_v31 }
 0x359   : > { %1359 = vmatpush1.bf16.msra.mxu0 %v4407_v33  ;;  %1400 = vmatpush1.bf16.msra.mxu1 %v4433_v40 }
 0x35a   : > { %1360 = vmatprep.subr.bf16.mxu0 %v4411_v34  ;;  %1401 = vmatprep.subr.bf16.mxu1 %v4444_v43 }
 0x35d   : > { %1361 = vmatpush1.bf16.msra.mxu0 %v4421_v37  ;;  %1402 = vmatpush1.bf16.msra.mxu1 %v4449_v44 }
 0x35e   : > { %1362 = vmatprep.subr.bf16.mxu0 %v4426_v38  ;;  %1403 = vmatprep.subr.bf16.mxu1 %v4453_v45 }
 0x361   : > { %1363 = vmatpush1.bf16.msra.mxu0 %v4438_v41  ;;  %1404 = vmatpush1.bf16.msra.mxu1 %v4465_v48 }
 0x362   : > { %1364 = vmatprep.subr.bf16.mxu0 %v4441_v42  ;;  %1405 = vmatprep.subr.bf16.mxu1 %v4469_v49 }
 0x365   : > { %1365 = vmatpush1.bf16.msra.mxu0 %v4457_v46  ;;  %1406 = vmatpush1.bf16.msra.mxu1 %v4481_v52 }
 0x366   : > { %1366 = vmatprep.subr.bf16.mxu0 %v4461_v47  ;;  %1407 = vmatprep.subr.bf16.mxu1 %v4485_v53 }
 0x369   : > { %1367 = vmatpush1.bf16.msra.mxu0 %v4473_v50  ;;  %1408 = vmatpush1.bf16.msra.mxu1 %v4497_v56 }
 0x36a   : > { %1368 = vmatprep.subr.bf16.mxu0 %v4476_v51  ;;  %1409 = vmatprep.subr.bf16.mxu1 %v4501_v57 }
 0x36d   : > { %1369 = vmatpush1.bf16.msra.mxu0 %v4489_v54  ;;  %1410 = vmatpush1.bf16.msra.mxu1 %v4510_v59 }
 0x36e   : > { %1370 = vmatprep.subr.bf16.mxu0 %v4493_v55  ;;  %1411 = vmatprep.subr.bf16.mxu1 %v4514_v60 }
 0x371   : > { %1371 = vmatpush1.bf16.msra.mxu0 %v4505_v58  ;;  %1412 = vmatpush1.bf16.msra.mxu1 %v4519_v61 }
 0x372   : > { %1493 = vmatprep.subr.bf16.mxu0 %v4394_v29  ;;  %1534 = vmatprep.subr.bf16.mxu1 %v4414_v35 }
 0x427   : > { %v1253_v14 = vpop.f32.mrb[8].mxu0  ;;  %v1294_v15 = vpop.f32.mrb[8].mxu1 }
 0x428   : > { %v1305_v16 = vrot.slane %v1253_v14, 4  ;;  %v1255_v18 = vpop.f32.mrb[9].mxu0  ;;  %v1296_v19 = vpop.f32.mrb[9].mxu1  ;;  %v1307_v3 = vrot.slane %v1294_v15, 4 }
 0x429   : > { %v1306_v20 = vrot.slane %v1255_v18, 4  ;;  %v1257_v21 = vpop.f32.mrb[10].mxu0  ;;  %v1298_v22 = vpop.f32.mrb[10].mxu1  ;;  %v1308_v63 = vrot.slane %v1296_v19, 4 }
 0x42a   : > { %v1313_v23 = vadd.f32 %v1305_v16, %v1211_v28  ;;  %v1258_v24 = vpop.f32.mrb[11].mxu0  ;;  %v1299_v25 = vpop.f32.mrb[11].mxu1  ;;  %v1315_v7 = vadd.f32 %v1307_v3, %v1213_v5  ;;  %v1337_v16 = vrot.slane %v4603_v8, 6  ;;  %v1208_v22 = vrot.slane %v4606_v11, 2 }
 0x42b   : > { %v1314_v26 = vadd.f32 %v1306_v20, %v1212_v17  ;;  %v1316_v2 = vadd.f32 %v1308_v63, %v1214_v1 }
 0x42c   : > { %v3477_v27 = vmul.f32 -1.442695, %v1313_v23  ;;  %v1210_v25 = vadd.f32 %v1208_v22, %v4564_v0  ;;  %v1348_v0 = vld [vmem:[#allocation2] sm:$0xc0] }
 0x42d   : > { %v3478_v62 = vmul.f32 -1.442695, %v1314_v26  ;;  %v3479_v6 = vmul.f32 -1.442695, %v1316_v2  ;;  %v1349_v2 = vld [vmem:[#allocation2 + $0x8] sm:$0xc0] }
 0x42e   : > { %3778 = vpow2.f32 %v3477_v27 }
 0x42f   : > { %3780 = vpow2.f32 %v3478_v62 }
 0x430   : > { %3782 = vpow2.f32 %v3479_v6 }
 0x431   : > { %3784 = vtanh.f32 %v1315_v7 }
 0x438   : > { %v3779_v4 = vpop.eup %3778 }
 0x439   : > { %v3781_v9 = vpop.eup %3780  ;;  %v1320_v10 = vadd.f32 1.0, %v3779_v4 }
 0x43a   : > { %v1326_v12 = vadd.f32 1.0, %v3781_v9  ;;  %v3783_v13 = vpop.eup %3782 }
 0x43b   : > { %3786 = vrcp.f32 %v1320_v10  ;;  %v3785_v28 = vpop.eup %3784  ;;  %v1333_v19 = vadd.f32 1.0, %v3783_v13 }
 0x43c   : > { %3788 = vrcp.f32 %v1326_v12 }
 0x43d   : > { %3790 = vrcp.f32 %v1333_v19 }
 0x445   : > { %v3787_v14 = vpop.eup %3786 }
 0x446   : > { %v3789_v17 = vpop.eup %3788  ;;  %v1340_v18 = vmul.f32 %v3787_v14, %v3785_v28 }
 0x447   : > { %v1339_v15 = vmul.f32 %v3789_v17, %v1337_v16  ;;  %v3791_v21 = vpop.eup %3790  ;;  %v1351_v17 = vld [vmem:[#allocation2 + $0x18] sm:$0xc0] }
 0x449   : > { %v4645_v20 = vadd.f32 %v1340_v18, %v1339_v15  ;;  %v1350_v15 = vld [vmem:[#allocation2 + $0x10] sm:$0xc0] }
 0x44b   : > { %3792 = vtanh.f32 %v4645_v20 }
 0x455   : > { %v3793_v23 = vpop.eup %3792 }
 0x456   : > { %v1343_v24 = vmul.f32 %v3793_v23, %v3791_v21 }
 0x458   : > { %v1345_v26 = vrot.slane %v1343_v24, 4  ;;  %v1352_v27 = vpack.c.bf16 %v1343_v24, %v1343_v24 }
 0x45a   : > { %v4650_v62 = vadd.f32 %v1345_v26, %v1210_v25  ;;  %v1354_v8 = vrot.slane %v1352_v27, 2 }
 0x45c   : > { %1389 = vmatmul.mubr.bf16.vlgmr.msra.gmra.mrb[12].mxu0 %v1354_v8  ;;  %1430 = vmatmul.mubr.bf16.vlgmr.msra.gmra.mrb[12].mxu1 %v1354_v8 }
 0x45d   : > { %1494 = vmatpush1.bf16.msra.mxu0 %v4397_v30  ;;  %1535 = vmatpush1.bf16.msra.mxu1 %v4417_v36 }
 0x45e   : > { %1495 = vmatprep.subr.bf16.mxu0 %v4403_v32  ;;  %1536 = vmatprep.subr.bf16.mxu1 %v4430_v39 }
 0x45f   : > { %1525 = vmatprep.mubr.bf16.mxu0 %v4183_v31  ;;  %1566 = vmatprep.mubr.bf16.mxu1 %v4183_v31 }
 0x461   : > { %1496 = vmatpush1.bf16.msra.mxu0 %v4407_v33  ;;  %1537 = vmatpush1.bf16.msra.mxu1 %v4433_v40 }
 0x462   : > { %1497 = vmatprep.subr.bf16.mxu0 %v4411_v34  ;;  %1538 = vmatprep.subr.bf16.mxu1 %v4444_v43 }
 0x465   : > { %1498 = vmatpush1.bf16.msra.mxu0 %v4421_v37  ;;  %1539 = vmatpush1.bf16.msra.mxu1 %v4449_v44 }
 0x466   : > { %1499 = vmatprep.subr.bf16.mxu0 %v4426_v38  ;;  %1540 = vmatprep.subr.bf16.mxu1 %v4453_v45 }
 0x469   : > { %1500 = vmatpush1.bf16.msra.mxu0 %v4438_v41  ;;  %1541 = vmatpush1.bf16.msra.mxu1 %v4465_v48 }
 0x46a   : > { %1501 = vmatprep.subr.bf16.mxu0 %v4441_v42  ;;  %1542 = vmatprep.subr.bf16.mxu1 %v4469_v49 }
 0x46d   : > { %1502 = vmatpush1.bf16.msra.mxu0 %v4457_v46  ;;  %1543 = vmatpush1.bf16.msra.mxu1 %v4481_v52 }
 0x46e   : > { %1503 = vmatprep.subr.bf16.mxu0 %v4461_v47  ;;  %1544 = vmatprep.subr.bf16.mxu1 %v4485_v53 }
 0x471   : > { %1504 = vmatpush1.bf16.msra.mxu0 %v4473_v50  ;;  %1545 = vmatpush1.bf16.msra.mxu1 %v4497_v56 }
 0x472   : > { %1505 = vmatprep.subr.bf16.mxu0 %v4476_v51  ;;  %1546 = vmatprep.subr.bf16.mxu1 %v4501_v57 }
 0x475   : > { %1506 = vmatpush1.bf16.msra.mxu0 %v4489_v54  ;;  %1547 = vmatpush1.bf16.msra.mxu1 %v4510_v59 }
 0x476   : > { %1507 = vmatprep.subr.bf16.mxu0 %v4493_v55  ;;  %1548 = vmatprep.subr.bf16.mxu1 %v4514_v60 }
 0x479   : > { %1508 = vmatpush1.bf16.msra.mxu0 %v4505_v58  ;;  %1549 = vmatpush1.bf16.msra.mxu1 %v4519_v61 }
 0x47a   : > { %1612 = vmatprep.subr.bf16.mxu0 %v4394_v29  ;;  %1653 = vmatprep.subr.bf16.mxu1 %v4414_v35 }
 0x52f   : > { %v1390_v11 = vpop.f32.mrb[12].mxu0  ;;  %v1431_v63 = vpop.f32.mrb[12].mxu1 }
 0x530   : > { %v1442_v1 = vrot.slane %v1390_v11, 2  ;;  %v1392_v3 = vpop.f32.mrb[13].mxu0  ;;  %v1433_v5 = vpop.f32.mrb[13].mxu1  ;;  %v1444_v19 = vrot.slane %v1431_v63, 2  ;;  %v1474_v11 = vrot.slane %v4645_v20, 6 }
 0x531   : > { %v1443_v6 = vrot.slane %v1392_v3, 2  ;;  %v1394_v7 = vpop.f32.mrb[14].mxu0  ;;  %v1435_v4 = vpop.f32.mrb[14].mxu1  ;;  %v1445_v16 = vrot.slane %v1433_v5, 2 }
 0x532   : > { %v1450_v9 = vadd.f32 %v1442_v1, %v1348_v0  ;;  %v1395_v10 = vpop.f32.mrb[15].mxu0  ;;  %v1436_v12 = vpop.f32.mrb[15].mxu1  ;;  %v1452_v22 = vadd.f32 %v1444_v19, %v1350_v15 }
 0x533   : > { %v1451_v13 = vadd.f32 %v1443_v6, %v1349_v2  ;;  %v1453_v18 = vadd.f32 %v1445_v16, %v1351_v17 }
 0x534   : > { %v3480_v28 = vmul.f32 -1.442695, %v1450_v9 }
 0x535   : > { %v3481_v14 = vmul.f32 -1.442695, %v1451_v13  ;;  %v3482_v21 = vmul.f32 -1.442695, %v1453_v18 }
 0x536   : > { %3794 = vpow2.f32 %v3480_v28 }
 0x537   : > { %3796 = vpow2.f32 %v3481_v14 }
 0x538   : > { %3798 = vpow2.f32 %v3482_v21 }
 0x539   : > { %3800 = vtanh.f32 %v1452_v22  ;;  %v1488_v22 = vld [vmem:[#allocation2 + $0x38] sm:$0x3] }
 0x540   : > { %v3795_v23 = vpop.eup %3794 }
 0x541   : > { %v3797_v24 = vpop.eup %3796  ;;  %v1457_v25 = vadd.f32 1.0, %v3795_v23  ;;  %v1487_v23 = vld [vmem:[#allocation2 + $0x30] sm:$0x3] }
 0x542   : > { %v1463_v26 = vadd.f32 1.0, %v3797_v24  ;;  %v3799_v27 = vpop.eup %3798 }
 0x543   : > { %3802 = vrcp.f32 %v1457_v25  ;;  %v3801_v8 = vpop.eup %3800  ;;  %v1470_v3 = vadd.f32 1.0, %v3799_v27 }
 0x544   : > { %3804 = vrcp.f32 %v1463_v26 }
 0x545   : > { %3806 = vrcp.f32 %v1470_v3 }
 0x54d   : > { %v3803_v0 = vpop.eup %3802 }
 0x54e   : > { %v3805_v1 = vpop.eup %3804  ;;  %v1477_v2 = vmul.f32 %v3803_v0, %v3801_v8 }
 0x54f   : > { %v1476_v63 = vmul.f32 %v3805_v1, %v1474_v11  ;;  %v3807_v6 = vpop.eup %3806 }
 0x551   : > { %v4687_v5 = vadd.f32 %v1477_v2, %v1476_v63 }
 0x553   : > { %3808 = vtanh.f32 %v4687_v5  ;;  %v1599_v2 = vrot.slane %v4687_v5, 6  ;;  %v4735_v5 = vld [vmem:[%s4310_s24] ss:$16 sps:$4 sm:$0xff]  }
 0x55d   : > { %v3809_v7 = vpop.eup %3808 }
 0x55e   : > { %v1480_v4 = vmul.f32 %v3809_v7, %v3807_v6 }
 0x560   : > { %v1482_v9 = vrot.slane %v1480_v4, 6  ;;  %v1489_v10 = vpack.c.bf16 %v1480_v4, %v1480_v4 }
 0x562   : > { %v1491_v12 = vrot.slane %v1489_v10, 3  ;;  %v4691_v13 = vadd.f32 %v1482_v9, %v4650_v62 }
 0x564   : > { %1526 = vmatmul.mubr.bf16.vlgmr.msra.gmra.mrb[16].mxu0 %v1491_v12  ;;  %1567 = vmatmul.mubr.bf16.vlgmr.msra.gmra.mrb[16].mxu1 %v1491_v12 }
 0x565   : > { %1613 = vmatpush1.bf16.msra.mxu0 %v4397_v30  ;;  %1654 = vmatpush1.bf16.msra.mxu1 %v4417_v36  ;;  %v1485_v30 = vld [vmem:[#allocation2 + $0x20] sm:$0x3] }
 0x566   : > { %1614 = vmatprep.subr.bf16.mxu0 %v4403_v32  ;;  %1655 = vmatprep.subr.bf16.mxu1 %v4430_v39  ;;  %v1486_v32 = vld [vmem:[#allocation2 + $0x28] sm:$0x3] }
 0x567   : > { %1644 = vmatprep.mubr.bf16.mxu0 %v4183_v31  ;;  %1685 = vmatprep.mubr.bf16.mxu1 %v4183_v31 }
 0x569   : > { %1615 = vmatpush1.bf16.msra.mxu0 %v4407_v33  ;;  %1656 = vmatpush1.bf16.msra.mxu1 %v4433_v40 }
 0x56a   : > { %1616 = vmatprep.subr.bf16.mxu0 %v4411_v34  ;;  %1657 = vmatprep.subr.bf16.mxu1 %v4444_v43 }
 0x56d   : > { %1617 = vmatpush1.bf16.msra.mxu0 %v4421_v37  ;;  %1658 = vmatpush1.bf16.msra.mxu1 %v4449_v44 }
 0x56e   : > { %1618 = vmatprep.subr.bf16.mxu0 %v4426_v38  ;;  %1659 = vmatprep.subr.bf16.mxu1 %v4453_v45 }
 0x571   : > { %1619 = vmatpush1.bf16.msra.mxu0 %v4438_v41  ;;  %1660 = vmatpush1.bf16.msra.mxu1 %v4465_v48 }
 0x572   : > { %1620 = vmatprep.subr.bf16.mxu0 %v4441_v42  ;;  %1661 = vmatprep.subr.bf16.mxu1 %v4469_v49 }
 0x575   : > { %1621 = vmatpush1.bf16.msra.mxu0 %v4457_v46  ;;  %1662 = vmatpush1.bf16.msra.mxu1 %v4481_v52 }
 0x576   : > { %1622 = vmatprep.subr.bf16.mxu0 %v4461_v47  ;;  %1663 = vmatprep.subr.bf16.mxu1 %v4485_v53 }
 0x579   : > { %1623 = vmatpush1.bf16.msra.mxu0 %v4473_v50  ;;  %1664 = vmatpush1.bf16.msra.mxu1 %v4497_v56 }
 0x57a   : > { %1624 = vmatprep.subr.bf16.mxu0 %v4476_v51  ;;  %1665 = vmatprep.subr.bf16.mxu1 %v4501_v57 }
 0x57d   : > { %1625 = vmatpush1.bf16.msra.mxu0 %v4489_v54  ;;  %1666 = vmatpush1.bf16.msra.mxu1 %v4510_v59 }
 0x57e   : > { %1626 = vmatprep.subr.bf16.mxu0 %v4493_v55  ;;  %1667 = vmatprep.subr.bf16.mxu1 %v4514_v60 }
 0x581   : > { %1627 = vmatpush1.bf16.msra.mxu0 %v4505_v58  ;;  %1668 = vmatpush1.bf16.msra.mxu1 %v4519_v61 }
 0x582   : > { %1749 = vmatprep.subr.bf16.mxu0 %v4394_v29  ;;  %1790 = vmatprep.subr.bf16.mxu1 %v4414_v35 }
 0x637   : > { %v1527_v33 = vpop.f32.mrb[16].mxu0  ;;  %v1568_v34 = vpop.f32.mrb[16].mxu1 }
 0x638   : > { %v1575_v20 = vadd.f32 %v1527_v33, %v1485_v30  ;;  %v1529_v62 = vpop.f32.mrb[17].mxu0  ;;  %v1570_v28 = vpop.f32.mrb[17].mxu1  ;;  %v1577_v24 = vadd.f32 %v1568_v34, %v1487_v23  ;;  %v4740_v33 = vld [vmem:[%s4310_s24 + $0x24] ss:$16 sps:$4 sm:$0xff]  }
 0x639   : > { %v1576_v14 = vadd.f32 %v1529_v62, %v1486_v32  ;;  %v1531_v16 = vpop.f32.mrb[18].mxu0  ;;  %v1572_v17 = vpop.f32.mrb[18].mxu1  ;;  %v1578_v29 = vadd.f32 %v1570_v28, %v1488_v22  ;;  %v4752_v34 = vld [vmem:[%s4310_s24 + $0x44] ss:$16 sps:$4 sm:$0xff]  }
 0x63a   : > { %v3483_v18 = vmul.f32 -1.442695, %v1575_v20  ;;  %v1532_v19 = vpop.f32.mrb[19].mxu0  ;;  %v1573_v15 = vpop.f32.mrb[19].mxu1 }
 0x63b   : > { %v3484_v21 = vmul.f32 -1.442695, %v1576_v14  ;;  %v3485_v35 = vmul.f32 -1.442695, %v1578_v29 }
 0x63c   : > { %3810 = vpow2.f32 %v3483_v18 }
 0x63d   : > { %3812 = vpow2.f32 %v3484_v21 }
 0x63e   : > { %3814 = vpow2.f32 %v3485_v35 }
 0x63f   : > { %3816 = vtanh.f32 %v1577_v24 }
 0x646   : > { %v3811_v25 = vpop.eup %3810 }
 0x647   : > { %v3813_v26 = vpop.eup %3812  ;;  %v1582_v27 = vadd.f32 1.0, %v3811_v25 }
 0x648   : > { %v1588_v8 = vadd.f32 1.0, %v3813_v26  ;;  %v3815_v0 = vpop.eup %3814 }
 0x649   : > { %3818 = vrcp.f32 %v1582_v27  ;;  %v3817_v11 = vpop.eup %3816  ;;  %v1595_v6 = vadd.f32 1.0, %v3815_v0  ;;  %v3880_v0 = vld [vmem:[%s4310_s24 + $0x8] ss:$16 sps:$4 sm:$0xff]  }
 0x64a   : > { %3820 = vrcp.f32 %v1588_v8 }
 0x64b   : > { %3822 = vrcp.f32 %v1595_v6  ;;  %v3886_v6 = vld [vmem:[%s4310_s24 + $0x64] ss:$16 sps:$4 sm:$0xff]  }
 0x653   : > { %v3819_v1 = vpop.eup %3818 }
 0x654   : > { %v3821_v3 = vpop.eup %3820  ;;  %v1602_v63 = vmul.f32 %v3819_v1, %v3817_v11  ;;  %v3881_v11 = vld [vmem:[%s4310_s24 + $0x2c] ss:$16 sps:$4 sm:$0xff]   ;;  %v3882_v1 = vld [vmem:[%s4310_s24 + $0x28] ss:$16 sps:$4 sm:$0xff]  }
 0x655   : > { %v1601_v7 = vmul.f32 %v3821_v3, %v1599_v2  ;;  %v3823_v9 = vpop.eup %3822  ;;  %v3883_v2 = vld [vmem:[%s4310_s24 + $0x4c] ss:$16 sps:$4 sm:$0xff]   ;;  %v3884_v3 = vld [vmem:[%s4310_s24 + $0x40] ss:$16 sps:$4 sm:$0xff]  }
 0x657   : > { %v4728_v4 = vadd.f32 %v1602_v63, %v1601_v7  ;;  %v3885_v63 = vld [vmem:[%s4310_s24 + $0x48] ss:$16 sps:$4 sm:$0xff]   ;;  %v3888_v7 = vld [vmem:[%s4310_s24 + $0x60] ss:$16 sps:$4 sm:$0xff]  }
 0x659   : > { %3824 = vtanh.f32 %v4728_v4  ;;  %v1730_v18 = vrot.slane %v4728_v4, 6  ;;  %v3889_v4 = vld [vmem:[%s4310_s24 + $0x68] ss:$16 sps:$4 sm:$0xff]  }
 0x663   : > { %v3825_v10 = vpop.eup %3824 }
 0x664   : > { %v1605_v12 = vmul.f32 %v3825_v10, %v3823_v9  ;;  %v3890_v9 = vld [vmem:[%s4310_s24 + $0x84] ss:$16 sps:$4 sm:$0xff]   ;;  %v3891_v10 = vld [vmem:[%s4310_s24 + $0x8c] ss:$16 sps:$4 sm:$0xff]  }
 0x666   : > { %v4732_v30 = vadd.f32 %v1605_v12, %v4691_v13  ;;  %v1611_v32 = vpack.c.bf16 %v1605_v12, %v1605_v12  ;;  %v4747_v13 = vld [vmem:[%s4310_s24 + $0x20] ss:$16 sps:$4 sm:$0xff]  }
 0x667   : > { %v3892_v12 = vld [vmem:[%s4310_s24 + $0x80] ss:$16 sps:$4 sm:$0xff]  }
 0x668   : > { %1645 = vmatmul.mubr.bf16.vlgmr.msra.gmra.mrb[20].mxu0 %v1611_v32  ;;  %1686 = vmatmul.mubr.bf16.vlgmr.msra.gmra.mrb[20].mxu1 %v1611_v32  ;;  %v3894_v32 = vld [vmem:[%s4310_s24 + $0xa4] ss:$16 sps:$4 sm:$0xff]  }
 0x669   : > { %1750 = vmatpush1.bf16.msra.mxu0 %v4735_v5  ;;  %1791 = vmatpush1.bf16.msra.mxu1 %v4417_v36  ;;  %v3878_v36 = vld [vmem:[%s4310_s24 + $0x4] ss:$16 sps:$4 sm:$0xff]  }
 0x66a   : > { %1751 = vmatprep.subr.bf16.mxu0 %v4740_v33  ;;  %1792 = vmatprep.subr.bf16.mxu1 %v4430_v39 }
 0x66b   : > { %1781 = vmatprep.mubr.bf16.mxu0 %v4183_v31  ;;  %1822 = vmatprep.mubr.bf16.mxu1 %v4183_v31 }
 0x66d   : > { %1752 = vmatpush1.bf16.msra.mxu0 %v4747_v13  ;;  %1793 = vmatpush1.bf16.msra.mxu1 %v4433_v40 }
 0x66e   : > { %1753 = vmatprep.subr.bf16.mxu0 %v4752_v34  ;;  %1794 = vmatprep.subr.bf16.mxu1 %v4444_v43 }
 0x671   : > { %1754 = vmatpush1.bf16.msra.mxu0 %v4421_v37  ;;  %1795 = vmatpush1.bf16.msra.mxu1 %v4449_v44  ;;  %v3879_v37 = vld [vmem:[%s4310_s24 + $0xc] ss:$16 sps:$4 sm:$0xff]  }
 0x672   : > { %1755 = vmatprep.subr.bf16.mxu0 %v4426_v38  ;;  %1796 = vmatprep.subr.bf16.mxu1 %v4453_v45  ;;  %v1607_v38 = vld [vmem:[#allocation2 + $0x20] sm:$0xc] }
 0x675   : > { %1756 = vmatpush1.bf16.msra.mxu0 %v4438_v41  ;;  %1797 = vmatpush1.bf16.msra.mxu1 %v4465_v48 }
 0x676   : > { %1757 = vmatprep.subr.bf16.mxu0 %v4441_v42  ;;  %1798 = vmatprep.subr.bf16.mxu1 %v4469_v49  ;;  %v1608_v42 = vld [vmem:[#allocation2 + $0x28] sm:$0xc] }
 0x679   : > { %1758 = vmatpush1.bf16.msra.mxu0 %v4457_v46  ;;  %1799 = vmatpush1.bf16.msra.mxu1 %v4481_v52 }
 0x67a   : > { %1759 = vmatprep.subr.bf16.mxu0 %v4461_v47  ;;  %1800 = vmatprep.subr.bf16.mxu1 %v4485_v53 }
 0x67d   : > { %1760 = vmatpush1.bf16.msra.mxu0 %v4473_v50  ;;  %1801 = vmatpush1.bf16.msra.mxu1 %v4497_v56 }
 0x67e   : > { %1761 = vmatprep.subr.bf16.mxu0 %v4476_v51  ;;  %1802 = vmatprep.subr.bf16.mxu1 %v4501_v57 }
 0x681   : > { %1762 = vmatpush1.bf16.msra.mxu0 %v4489_v54  ;;  %1803 = vmatpush1.bf16.msra.mxu1 %v4510_v59 }
 0x682   : > { %1763 = vmatprep.subr.bf16.mxu0 %v4493_v55  ;;  %1804 = vmatprep.subr.bf16.mxu1 %v4514_v60  ;;  %v1610_v55 = vld [vmem:[#allocation2 + $0x38] sm:$0xc] }
 0x685   : > { %1764 = vmatpush1.bf16.msra.mxu0 %v4505_v58  ;;  %1805 = vmatpush1.bf16.msra.mxu1 %v4519_v61  ;;  %v1609_v58 = vld [vmem:[#allocation2 + $0x30] sm:$0xc] }
 0x686   : > { %1886 = vmatprep.subr.bf16.mxu0 %v3878_v36  ;;  %1927 = vmatprep.subr.bf16.mxu1 %v3879_v37  ;;  %v3899_v36 = vld [vmem:[%s4310_s24 + $0xcc] ss:$16 sps:$4 sm:$0xff]   ;;  %v3900_v37 = vld [vmem:[%s4310_s24 + $0xc0] ss:$16 sps:$4 sm:$0xff]  }
 0x73b   : > { %v1646_v39 = vpop.f32.mrb[20].mxu0  ;;  %v1687_v40 = vpop.f32.mrb[20].mxu1 }
 0x73c   : > { %v1698_v41 = vrot.slane %v1646_v39, 6  ;;  %v1648_v43 = vpop.f32.mrb[21].mxu0  ;;  %v1689_v44 = vpop.f32.mrb[21].mxu1  ;;  %v1700_v57 = vrot.slane %v1687_v40, 6  ;;  %v3902_v39 = vld [vmem:[%s4310_s24 + $0xe4] ss:$16 sps:$4 sm:$0xff]  }
 0x73d   : > { %v1699_v45 = vrot.slane %v1648_v43, 6  ;;  %v1650_v46 = vpop.f32.mrb[22].mxu0  ;;  %v1691_v47 = vpop.f32.mrb[22].mxu1  ;;  %v1701_v54 = vrot.slane %v1689_v44, 6  ;;  %v3903_v40 = vld [vmem:[%s4310_s24 + $0xec] ss:$16 sps:$4 sm:$0xff]  }
 0x73e   : > { %v1706_v48 = vadd.f32 %v1698_v41, %v1607_v38  ;;  %v1651_v49 = vpop.f32.mrb[23].mxu0  ;;  %v1692_v50 = vpop.f32.mrb[23].mxu1  ;;  %v1708_v60 = vadd.f32 %v1700_v57, %v1609_v58  ;;  %v3901_v38 = vld [vmem:[%s4310_s24 + $0xc8] ss:$16 sps:$4 sm:$0xff]   ;;  %v3904_v41 = vld [vmem:[%s4310_s24 + $0xe0] ss:$16 sps:$4 sm:$0xff]  }
 0x73f   : > { %v1707_v51 = vadd.f32 %v1699_v45, %v1608_v42  ;;  %v1709_v56 = vadd.f32 %v1701_v54, %v1610_v55  ;;  %v3905_v42 = vld [vmem:[%s4310_s24 + $0xe8] ss:$16 sps:$4 sm:$0xff]   ;;  %v1741_v43 = vld [vmem:[#allocation2 + $0x20] sm:$0x30]  ;;  %v1742_v47 = vld [vmem:[#allocation2 + $0x28] sm:$0x30] }
 0x740   : > { %v3486_v52 = vmul.f32 -1.442695, %v1706_v48 }
 0x741   : > { %v3487_v53 = vmul.f32 -1.442695, %v1707_v51  ;;  %v3488_v59 = vmul.f32 -1.442695, %v1709_v56 }
 0x742   : > { %3826 = vpow2.f32 %v3486_v52 }
 0x743   : > { %3828 = vpow2.f32 %v3487_v53 }
 0x744   : > { %3830 = vpow2.f32 %v3488_v59 }
 0x745   : > { %3832 = vtanh.f32 %v1708_v60  ;;  %v1744_v60 = vld [vmem:[#allocation2 + $0x38] sm:$0x30] }
 0x74c   : > { %v3827_v61 = vpop.eup %3826 }
 0x74d   : > { %v3829_v20 = vpop.eup %3828  ;;  %v1713_v62 = vadd.f32 1.0, %v3827_v61 }
 0x74e   : > { %v1719_v28 = vadd.f32 1.0, %v3829_v20  ;;  %v3831_v14 = vpop.eup %3830 }
 0x74f   : > { %3834 = vrcp.f32 %v1713_v62  ;;  %v3833_v16 = vpop.eup %3832  ;;  %v1726_v21 = vadd.f32 1.0, %v3831_v14  ;;  %v1743_v62 = vld [vmem:[#allocation2 + $0x30] sm:$0x30] }
 0x750   : > { %3836 = vrcp.f32 %v1719_v28 }
 0x751   : > { %3838 = vrcp.f32 %v1726_v21 }
 0x759   : > { %v3835_v17 = vpop.eup %3834 }
 0x75a   : > { %v3837_v19 = vpop.eup %3836  ;;  %v1733_v15 = vmul.f32 %v3835_v17, %v3833_v16 }
 0x75b   : > { %v1732_v22 = vmul.f32 %v3837_v19, %v1730_v18  ;;  %v3839_v23 = vpop.eup %3838 }
 0x75d   : > { %v4781_v29 = vadd.f32 %v1733_v15, %v1732_v22 }
 0x75f   : > { %3840 = vtanh.f32 %v4781_v29 }
 0x769   : > { %v3841_v35 = vpop.eup %3840 }
 0x76a   : > { %v1736_v24 = vmul.f32 %v3841_v35, %v3839_v23  ;;  %v1867_v23 = vrot.slane %v4781_v29, 6 }
 0x76c   : > { %v1738_v25 = vrot.slane %v1736_v24, 2  ;;  %v1745_v26 = vpack.c.bf16 %v1736_v24, %v1736_v24 }
 0x76e   : > { %v4785_v27 = vadd.f32 %v1738_v25, %v4732_v30  ;;  %v1747_v8 = vrot.slane %v1745_v26, 1  ;;  %v3893_v30 = vld [vmem:[%s4310_s24 + $0x88] ss:$16 sps:$4 sm:$0xff]  }
 0x770   : > { %1782 = vmatmul.mubr.bf16.vlgmr.msra.gmra.mrb[24].mxu0 %v1747_v8  ;;  %1823 = vmatmul.mubr.bf16.vlgmr.msra.gmra.mrb[24].mxu1 %v1747_v8 }
 0x771   : > { %1887 = vmatpush1.bf16.msra.mxu0 %v4735_v5  ;;  %1928 = vmatpush1.bf16.msra.mxu1 %v3880_v0  ;;  %v3895_v5 = vld [vmem:[%s4310_s24 + $0xac] ss:$16 sps:$4 sm:$0xff]  }
 0x772   : > { %1888 = vmatprep.subr.bf16.mxu0 %v4740_v33  ;;  %1929 = vmatprep.subr.bf16.mxu1 %v3881_v11  ;;  %v3896_v33 = vld [vmem:[%s4310_s24 + $0xa0] ss:$16 sps:$4 sm:$0xff]  }
 0x773   : > { %1918 = vmatprep.mubr.bf16.mxu0 %v4183_v31  ;;  %1959 = vmatprep.mubr.bf16.mxu1 %v4183_v31  ;;  %v3887_v31 = vld [vmem:[%s4310_s24 + $0x6c] ss:$16 sps:$4 sm:$0xff]  }
 0x775   : > { %1889 = vmatpush1.bf16.msra.mxu0 %v4747_v13  ;;  %1930 = vmatpush1.bf16.msra.mxu1 %v3882_v1  ;;  %v3897_v13 = vld [vmem:[%s4310_s24 + $0xa8] ss:$16 sps:$4 sm:$0xff]  }
 0x776   : > { %1890 = vmatprep.subr.bf16.mxu0 %v4752_v34  ;;  %1931 = vmatprep.subr.bf16.mxu1 %v3883_v2  ;;  %v3898_v34 = vld [vmem:[%s4310_s24 + $0xc4] ss:$16 sps:$4 sm:$0xff]  }
 0x779   : > { %1891 = vmatpush1.bf16.msra.mxu0 %v3884_v3  ;;  %1932 = vmatpush1.bf16.msra.mxu1 %v3885_v63 }
 0x77a   : > { %1892 = vmatprep.subr.bf16.mxu0 %v3886_v6  ;;  %1933 = vmatprep.subr.bf16.mxu1 %v3887_v31  ;;  %v1878_v31 = vld [vmem:[#allocation2 + $0x20] sm:$0xc0] }
 0x77d   : > { %1893 = vmatpush1.bf16.msra.mxu0 %v3888_v7  ;;  %1934 = vmatpush1.bf16.msra.mxu1 %v3889_v4 }
 0x77e   : > { %1894 = vmatprep.subr.bf16.mxu0 %v3890_v9  ;;  %1935 = vmatprep.subr.bf16.mxu1 %v3891_v10  ;;  %v1879_v9 = vld [vmem:[#allocation2 + $0x28] sm:$0xc0] }
 0x781   : > { %1895 = vmatpush1.bf16.msra.mxu0 %v3892_v12  ;;  %1936 = vmatpush1.bf16.msra.mxu1 %v3893_v30 }
 0x782   : > { %1896 = vmatprep.subr.bf16.mxu0 %v3894_v32  ;;  %1937 = vmatprep.subr.bf16.mxu1 %v3895_v5 }
 0x785   : > { %1897 = vmatpush1.bf16.msra.mxu0 %v3896_v33  ;;  %1938 = vmatpush1.bf16.msra.mxu1 %v3897_v13 }
 0x786   : > { %1898 = vmatprep.subr.bf16.mxu0 %v3898_v34  ;;  %1939 = vmatprep.subr.bf16.mxu1 %v3899_v36 }
 0x789   : > { %1899 = vmatpush1.bf16.msra.mxu0 %v3900_v37  ;;  %1940 = vmatpush1.bf16.msra.mxu1 %v3901_v38 }
 0x78a   : > { %1900 = vmatprep.subr.bf16.mxu0 %v3902_v39  ;;  %1941 = vmatprep.subr.bf16.mxu1 %v3903_v40  ;;  %v1881_v39 = vld [vmem:[#allocation2 + $0x38] sm:$0xc0] }
 0x78d   : > { %1901 = vmatpush1.bf16.msra.mxu0 %v3904_v41  ;;  %1942 = vmatpush1.bf16.msra.mxu1 %v3905_v42  ;;  %v1880_v42 = vld [vmem:[#allocation2 + $0x30] sm:$0xc0] }
 0x843   : > { %v1783_v44 = vpop.f32.mrb[24].mxu0  ;;  %v1824_v45 = vpop.f32.mrb[24].mxu1 }
 0x844   : > { %v1835_v46 = vrot.slane %v1783_v44, 4  ;;  %v1785_v48 = vpop.f32.mrb[25].mxu0  ;;  %v1826_v49 = vpop.f32.mrb[25].mxu1  ;;  %v1837_v20 = vrot.slane %v1824_v45, 4 }
 0x845   : > { %v1836_v50 = vrot.slane %v1785_v48, 4  ;;  %v1787_v51 = vpop.f32.mrb[26].mxu0  ;;  %v1828_v52 = vpop.f32.mrb[26].mxu1  ;;  %v1838_v59 = vrot.slane %v1826_v49, 4 }
 0x846   : > { %v1843_v53 = vadd.f32 %v1835_v46, %v1741_v43  ;;  %v1788_v54 = vpop.f32.mrb[27].mxu0  ;;  %v1829_v55 = vpop.f32.mrb[27].mxu1  ;;  %v1845_v14 = vadd.f32 %v1837_v20, %v1743_v62 }
 0x847   : > { %v1844_v56 = vadd.f32 %v1836_v50, %v1742_v47  ;;  %v1846_v61 = vadd.f32 %v1838_v59, %v1744_v60 }
 0x848   : > { %v3489_v57 = vmul.f32 -1.442695, %v1843_v53 }
 0x849   : > { %v3490_v58 = vmul.f32 -1.442695, %v1844_v56  ;;  %v3491_v28 = vmul.f32 -1.442695, %v1846_v61 }
 0x84a   : > { %3842 = vpow2.f32 %v3489_v57 }
 0x84b   : > { %3844 = vpow2.f32 %v3490_v58 }
 0x84c   : > { %3846 = vpow2.f32 %v3491_v28 }
 0x84d   : > { %3848 = vtanh.f32 %v1845_v14 }
 0x854   : > { %v3843_v16 = vpop.eup %3842 }
 0x855   : > { %v3845_v17 = vpop.eup %3844  ;;  %v1850_v18 = vadd.f32 1.0, %v3843_v16 }
 0x856   : > { %v1856_v19 = vadd.f32 1.0, %v3845_v17  ;;  %v3847_v15 = vpop.eup %3846 }
 0x857   : > { %3850 = vrcp.f32 %v1850_v18  ;;  %v3849_v21 = vpop.eup %3848  ;;  %v1863_v25 = vadd.f32 1.0, %v3847_v15 }
 0x858   : > { %3852 = vrcp.f32 %v1856_v19 }
 0x859   : > { %3854 = vrcp.f32 %v1863_v25 }
 0x861   : > { %v3851_v22 = vpop.eup %3850 }
 0x862   : > { %v3853_v35 = vpop.eup %3852  ;;  %v1870_v24 = vmul.f32 %v3851_v22, %v3849_v21 }
 0x863   : > { %v1869_v26 = vmul.f32 %v3853_v35, %v1867_v23  ;;  %v3855_v0 = vpop.eup %3854 }
 0x865   : > { %v1871_v8 = vadd.f32 %v1870_v24, %v1869_v26 }
 0x867   : > { %3856 = vtanh.f32 %v1871_v8  ;;  %v2004_v52 = vrot.slane %v1871_v8, 6 }
 0x871   : > { %v3857_v11 = vpop.eup %3856 }
 0x872   : > { %v1873_v1 = vmul.f32 %v3857_v11, %v3855_v0 }
 0x874   : > { %v1875_v2 = vrot.slane %v1873_v1, 4  ;;  %v1882_v3 = vpack.c.bf16 %v1873_v1, %v1873_v1 }
 0x876   : > { %v1877_v63 = vadd.f32 %v1875_v2, %v4785_v27  ;;  %v1884_v6 = vrot.slane %v1882_v3, 2 }
 0x878   : > { %1919 = vmatmul.mubr.bf16.vlgmr.msra.gmra.mrb[28].mxu0 %v1884_v6  ;;  %1960 = vmatmul.mubr.bf16.vlgmr.msra.gmra.mrb[28].mxu1 %v1884_v6 }
 0x94b   : > { %v1920_v7 = vpop.f32.mrb[28].mxu0  ;;  %v1961_v29 = vpop.f32.mrb[28].mxu1 }
 0x94c   : > { %v1972_v4 = vrot.slane %v1920_v7, 2  ;;  %v1922_v10 = vpop.f32.mrb[29].mxu0  ;;  %v1963_v12 = vpop.f32.mrb[29].mxu1  ;;  %v1974_v41 = vrot.slane %v1961_v29, 2 }
 0x94d   : > { %v1973_v30 = vrot.slane %v1922_v10, 2  ;;  %v1924_v32 = vpop.f32.mrb[30].mxu0  ;;  %v1965_v5 = vpop.f32.mrb[30].mxu1  ;;  %v1975_v27 = vrot.slane %v1963_v12, 2 }
 0x94e   : > { %v1980_v33 = vadd.f32 %v1972_v4, %v1878_v31  ;;  %v1925_v13 = vpop.f32.mrb[31].mxu0  ;;  %v1966_v34 = vpop.f32.mrb[31].mxu1  ;;  %v1982_v44 = vadd.f32 %v1974_v41, %v1880_v42 }
 0x94f   : > { %v1981_v36 = vadd.f32 %v1973_v30, %v1879_v9  ;;  %v1983_v40 = vadd.f32 %v1975_v27, %v1881_v39 }
 0x950   : > { %v3492_v37 = vmul.f32 -1.442695, %v1980_v33 }
 0x951   : > { %v3493_v38 = vmul.f32 -1.442695, %v1981_v36  ;;  %v3494_v43 = vmul.f32 -1.442695, %v1983_v40 }
 0x952   : > { %3858 = vpow2.f32 %v3492_v37 }
 0x953   : > { %3860 = vpow2.f32 %v3493_v38 }
 0x954   : > { %3862 = vpow2.f32 %v3494_v43 }
 0x955   : > { %3864 = vtanh.f32 %v1982_v44 }
 0x95c   : > { %v3859_v45 = vpop.eup %3858 }
 0x95d   : > { %v3861_v46 = vpop.eup %3860  ;;  %v1987_v47 = vadd.f32 1.0, %v3859_v45 }
 0x95e   : > { %v1993_v48 = vadd.f32 1.0, %v3861_v46  ;;  %v3863_v49 = vpop.eup %3862 }
 0x95f   : > { %3866 = vrcp.f32 %v1987_v47  ;;  %v3865_v50 = vpop.eup %3864  ;;  %v2000_v55 = vadd.f32 1.0, %v3863_v49 }
 0x960   : > { %3868 = vrcp.f32 %v1993_v48 }
 0x961   : > { %3870 = vrcp.f32 %v2000_v55 }
 0x969   : > { %v3867_v51 = vpop.eup %3866 }
 0x96a   : > { %v3869_v53 = vpop.eup %3868  ;;  %v2007_v54 = vmul.f32 %v3867_v51, %v3865_v50 }
 0x96b   : > { %v2006_v56 = vmul.f32 %v3869_v53, %v2004_v52  ;;  %v3871_v58 = vpop.eup %3870 }
 0x96d   : > { %v2008_v57 = vadd.f32 %v2007_v54, %v2006_v56 }
 0x96f   : > { %3872 = vtanh.f32 %v2008_v57 }
 0x979   : > { %v3873_v59 = vpop.eup %3872 }
 0x97a   : > { %v2010_v60 = vmul.f32 %v3873_v59, %v3871_v58 }
 0x97c   : > { %v2012_v61 = vrot.slane %v2010_v60, 6 }
 0x97e   : > { %v2014_v20 = vadd.f32 %v2012_v61, %v1877_v63 }
 0x980   : > { %v2015_v62 = vmul.f32 0.125, %v2014_v20 }
 0x982   : > { %2016 = vst [vmem:[%s4317_s12] sm:$0x3] %v2015_v62 }
 0x983 PF: > { %p3495_p9 = scmp.ne.s32.totalorder %s4229_s19, 1 }
 0x984   : > { %v4824_v28 = vld [vmem:[%s4310_s24 + $0x4] ss:$16 sps:$4 sm:$0xff] (!%p3495_p9)   ;;  %v4827_v14 = vld [vmem:[%s4310_s24] ss:$16 sps:$4 sm:$0xff] (!%p3495_p9)   ;;  %v4184_v16 = vmov (!%p3495_p9), 0  }
 0x985   : > { %2020 = sbr.rel (%p3495_p9) target bundleno = 4579 (0x11e3), region = 48  ;;  %2249 = vmatprep.mubr.bf16.mxu0 (!%p3495_p9), %v4184_v16  ;;  %2290 = vmatprep.mubr.bf16.mxu1 (!%p3495_p9), %v4184_v16  ;;  %v4833_v17 = vld [vmem:[%s4310_s24 + $0x24] ss:$16 sps:$4 sm:$0xff] (!%p3495_p9)   ;;  %v4837_v18 = vld [vmem:[%s4310_s24 + $0x20] ss:$16 sps:$4 sm:$0xff] (!%p3495_p9)  }
 0x986   : > { %2217 = vmatprep.subr.bf16.mxu0 (!%p3495_p9), %v4824_v28  ;;  %v4841_v19 = vld [vmem:[%s4310_s24 + $0x44] ss:$16 sps:$4 sm:$0xff] (!%p3495_p9)   ;;  %v4844_v15 = vld [vmem:[%s4310_s24 + $0xc] ss:$16 sps:$4 sm:$0xff] (!%p3495_p9)   ;;  %v4847_v21 = vld [vmem:[%s4310_s24 + $0x8] ss:$16 sps:$4 sm:$0xff] (!%p3495_p9)  }
 0x987   : > { %2218 = vmatpush1.bf16.msra.mxu0 (!%p3495_p9), %v4827_v14  ;;  %v4851_v22 = vld [vmem:[%s4310_s24 + $0x40] ss:$16 sps:$4 sm:$0xff] (!%p3495_p9)   ;;  %2258 = vmatprep.subr.bf16.mxu1 (!%p3495_p9), %v4844_v15  ;;  %v4856_v23 = vld [vmem:[%s4310_s24 + $0x64] ss:$16 sps:$4 sm:$0xff] (!%p3495_p9)   ;;  %v4860_v35 = vld [vmem:[%s4310_s24 + $0x2c] ss:$16 sps:$4 sm:$0xff] (!%p3495_p9)  }
 0x988   : > { %2219 = vmatprep.subr.bf16.mxu0 (!%p3495_p9), %v4833_v17  ;;  %2259 = vmatpush1.bf16.msra.mxu1 (!%p3495_p9), %v4847_v21  ;;  %v4863_v24 = vld [vmem:[%s4310_s24 + $0x28] ss:$16 sps:$4 sm:$0xff] (!%p3495_p9)   ;;  %v4868_v25 = vld [vmem:[%s4310_s24 + $0x60] ss:$16 sps:$4 sm:$0xff] (!%p3495_p9)   ;;  %v4871_v26 = vld [vmem:[%s4310_s24 + $0x84] ss:$16 sps:$4 sm:$0xff] (!%p3495_p9)  }
 0x989   : > { %2260 = vmatprep.subr.bf16.mxu1 (!%p3495_p9), %v4860_v35  ;;  %v4874_v8 = vld [vmem:[%s4310_s24 + $0x4c] ss:$16 sps:$4 sm:$0xff] (!%p3495_p9)   ;;  %v4879_v0 = vld [vmem:[%s4310_s24 + $0x48] ss:$16 sps:$4 sm:$0xff] (!%p3495_p9)   ;;  %v4887_v1 = vld [vmem:[%s4310_s24 + $0x80] ss:$16 sps:$4 sm:$0xff] (!%p3495_p9)  }
 0x98a   : > { %v4883_v11 = vld [vmem:[%s4310_s24 + $0x6c] ss:$16 sps:$4 sm:$0xff] (!%p3495_p9)   ;;  %v4891_v2 = vld [vmem:[%s4310_s24 + $0xa4] ss:$16 sps:$4 sm:$0xff] (!%p3495_p9)   ;;  %v4895_v3 = vld [vmem:[%s4310_s24 + $0x68] ss:$16 sps:$4 sm:$0xff] (!%p3495_p9)  }
 0x98b   : > { %2220 = vmatpush1.bf16.msra.mxu0 (!%p3495_p9), %v4837_v18  ;;  %v4899_v63 = vld [vmem:[%s4310_s24 + $0x8c] ss:$16 sps:$4 sm:$0xff] (!%p3495_p9)   ;;  %v4903_v6 = vld [vmem:[%s4310_s24 + $0xa0] ss:$16 sps:$4 sm:$0xff] (!%p3495_p9)   ;;  %v4906_v31 = vld [vmem:[%s4310_s24 + $0xc4] ss:$16 sps:$4 sm:$0xff] (!%p3495_p9)  }
 0x98c   : > { %2221 = vmatprep.subr.bf16.mxu0 %v4841_v19  ;;  %2261 = vmatpush1.bf16.msra.mxu1 %v4863_v24  ;;  %v4911_v7 = vld [vmem:[%s4310_s24 + $0x88] ss:$16 sps:$4 sm:$0xff]   ;;  %v4915_v29 = vld [vmem:[%s4310_s24 + $0xac] ss:$16 sps:$4 sm:$0xff]   ;;  %v4919_v4 = vld [vmem:[%s4310_s24 + $0xc0] ss:$16 sps:$4 sm:$0xff]  }
 0x98d   : > { %2262 = vmatprep.subr.bf16.mxu1 %v4874_v8  ;;  %v4923_v9 = vld [vmem:[%s4310_s24 + $0xe4] ss:$16 sps:$4 sm:$0xff]   ;;  %v4927_v10 = vld [vmem:[%s4310_s24 + $0xa8] ss:$16 sps:$4 sm:$0xff]   ;;  %v4931_v12 = vld [vmem:[%s4310_s24 + $0xcc] ss:$16 sps:$4 sm:$0xff]  }
 0x98e   : > { %v4935_v30 = vld [vmem:[%s4310_s24 + $0xe0] ss:$16 sps:$4 sm:$0xff]   ;;  %v4940_v32 = vld [vmem:[%s4310_s24 + $0xc8] ss:$16 sps:$4 sm:$0xff]   ;;  %v4944_v5 = vld [vmem:[%s4310_s24 + $0xec] ss:$16 sps:$4 sm:$0xff]  }
 0x98f   : > { %2222 = vmatpush1.bf16.msra.mxu0 %v4851_v22  ;;  %v4949_v33 = vld [vmem:[%s4310_s24 + $0xe8] ss:$16 sps:$4 sm:$0xff]   ;;  %v2021_v13 = vld [vmem:[#allocation2 + $0x20] sm:$0xc0]  ;;  %v2022_v37 = vld [vmem:[#allocation2 + $0x28] sm:$0xc0] }
 0x990   : > { %2223 = vmatprep.subr.bf16.mxu0 %v4856_v23  ;;  %2263 = vmatpush1.bf16.msra.mxu1 %v4879_v0  ;;  %v2024_v46 = vld [vmem:[#allocation2 + $0x38] sm:$0xc0]  ;;  %v2023_v53 = vld [vmem:[#allocation2 + $0x30] sm:$0xc0] }
 0x991   : > { %2264 = vmatprep.subr.bf16.mxu1 %v4883_v11 }
 0x993   : > { %2224 = vmatpush1.bf16.msra.mxu0 %v4868_v25 }
 0x994   : > { %2225 = vmatprep.subr.bf16.mxu0 %v4871_v26  ;;  %2265 = vmatpush1.bf16.msra.mxu1 %v4895_v3 }
 0x995   : > { %2266 = vmatprep.subr.bf16.mxu1 %v4899_v63 }
 0x997   : > { %2226 = vmatpush1.bf16.msra.mxu0 %v4887_v1 }
 0x998   : > { %2227 = vmatprep.subr.bf16.mxu0 %v4891_v2  ;;  %2267 = vmatpush1.bf16.msra.mxu1 %v4911_v7 }
 0x999   : > { %2268 = vmatprep.subr.bf16.mxu1 %v4915_v29 }
 0x99b   : > { %2228 = vmatpush1.bf16.msra.mxu0 %v4903_v6 }
 0x99c   : > { %2229 = vmatprep.subr.bf16.mxu0 %v4906_v31  ;;  %2269 = vmatpush1.bf16.msra.mxu1 %v4927_v10 }
 0x99d   : > { %2270 = vmatprep.subr.bf16.mxu1 %v4931_v12 }
 0x99f   : > { %2230 = vmatpush1.bf16.msra.mxu0 %v4919_v4 }
 0x9a0   : > { %2231 = vmatprep.subr.bf16.mxu0 %v4923_v9  ;;  %2271 = vmatpush1.bf16.msra.mxu1 %v4940_v32 }
 0x9a1   : > { %2272 = vmatprep.subr.bf16.mxu1 %v4944_v5 }
 0x9a3   : > { %2232 = vmatpush1.bf16.msra.mxu0 %v4935_v30 }
 0x9a4   : > { %2348 = vmatprep.subr.bf16.mxu0 %v4824_v28  ;;  %2273 = vmatpush1.bf16.msra.mxu1 %v4949_v33 }
 0x9a5   : > { %2389 = vmatprep.subr.bf16.mxu1 %v4844_v15 }
 0x9a6   : > { %2250 = vmatmul.mubr.bf16.vlgmr.msra.gmra.mrb[0].mxu0 %v4184_v16 }
 0x9a7   : > { %2349 = vmatpush1.bf16.msra.mxu0 %v4827_v14  ;;  %2380 = vmatprep.mubr.bf16.mxu0 %v4184_v16 }
 0x9a8   : > { %2350 = vmatprep.subr.bf16.mxu0 %v4833_v17  ;;  %2291 = vmatmul.mubr.bf16.vlgmr.msra.gmra.mrb[0].mxu1 %v4184_v16 }
 0x9a9   : > { %2390 = vmatpush1.bf16.msra.mxu1 %v4847_v21  ;;  %2421 = vmatprep.mubr.bf16.mxu1 %v4184_v16 }
 0x9aa   : > { %2391 = vmatprep.subr.bf16.mxu1 %v4860_v35 }
 0x9ab   : > { %2351 = vmatpush1.bf16.msra.mxu0 %v4837_v18 }
 0x9ac   : > { %2352 = vmatprep.subr.bf16.mxu0 %v4841_v19 }
 0x9ad   : > { %2392 = vmatpush1.bf16.msra.mxu1 %v4863_v24 }
 0x9ae   : > { %2393 = vmatprep.subr.bf16.mxu1 %v4874_v8 }
 0x9af   : > { %2353 = vmatpush1.bf16.msra.mxu0 %v4851_v22 }
 0x9b0   : > { %2354 = vmatprep.subr.bf16.mxu0 %v4856_v23 }
 0x9b1   : > { %2394 = vmatpush1.bf16.msra.mxu1 %v4879_v0 }
 0x9b2   : > { %2395 = vmatprep.subr.bf16.mxu1 %v4883_v11 }
 0x9b3   : > { %2355 = vmatpush1.bf16.msra.mxu0 %v4868_v25 }
 0x9b4   : > { %2356 = vmatprep.subr.bf16.mxu0 %v4871_v26 }
 0x9b5   : > { %2396 = vmatpush1.bf16.msra.mxu1 %v4895_v3 }
 0x9b6   : > { %2397 = vmatprep.subr.bf16.mxu1 %v4899_v63 }
 0x9b7   : > { %2357 = vmatpush1.bf16.msra.mxu0 %v4887_v1 }
 0x9b8   : > { %2358 = vmatprep.subr.bf16.mxu0 %v4891_v2 }
 0x9b9   : > { %2398 = vmatpush1.bf16.msra.mxu1 %v4911_v7 }
 0x9ba   : > { %2399 = vmatprep.subr.bf16.mxu1 %v4915_v29 }
 0x9bb   : > { %2359 = vmatpush1.bf16.msra.mxu0 %v4903_v6 }
 0x9bc   : > { %2360 = vmatprep.subr.bf16.mxu0 %v4906_v31 }
 0x9bd   : > { %2400 = vmatpush1.bf16.msra.mxu1 %v4927_v10 }
 0x9be   : > { %2401 = vmatprep.subr.bf16.mxu1 %v4931_v12 }
 0x9bf   : > { %2361 = vmatpush1.bf16.msra.mxu0 %v4919_v4 }
 0x9c0   : > { %2362 = vmatprep.subr.bf16.mxu0 %v4923_v9 }
 0x9c1   : > { %2402 = vmatpush1.bf16.msra.mxu1 %v4940_v32 }
 0x9c2   : > { %2403 = vmatprep.subr.bf16.mxu1 %v4944_v5 }
 0x9c3   : > { %2363 = vmatpush1.bf16.msra.mxu0 %v4935_v30 }
 0x9c4   : > { %2485 = vmatprep.subr.bf16.mxu0 %v4824_v28 }
 0x9c5   : > { %2404 = vmatpush1.bf16.msra.mxu1 %v4949_v33 }
 0x9c6   : > { %2526 = vmatprep.subr.bf16.mxu1 %v4844_v15 }
 0xa79   : > { %v2251_v34 = vpop.f32.mrb[0].mxu0 }
 0xa7a   : > { %v2303_v36 = vrot.slane %v2251_v34, 2  ;;  %v2253_v38 = vpop.f32.mrb[1].mxu0 }
 0xa7b   : > { %v2304_v27 = vrot.slane %v2253_v38, 2  ;;  %v2255_v39 = vpop.f32.mrb[2].mxu0  ;;  %v2292_v44 = vpop.f32.mrb[0].mxu1 }
 0xa7c   : > { %v2311_v40 = vadd.f32 %v2303_v36, %v2021_v13  ;;  %v2256_v41 = vpop.f32.mrb[3].mxu0  ;;  %v2294_v47 = vpop.f32.mrb[1].mxu1  ;;  %v2305_v52 = vrot.slane %v2292_v44, 2 }
 0xa7d   : > { %v2312_v42 = vadd.f32 %v2304_v27, %v2022_v37  ;;  %v2306_v48 = vrot.slane %v2294_v47, 2  ;;  %v2296_v49 = vpop.f32.mrb[2].mxu1 }
 0xa7e   : > { %v3528_v43 = vmul.f32 -1.442695, %v2311_v40  ;;  %v2297_v50 = vpop.f32.mrb[3].mxu1  ;;  %v2313_v55 = vadd.f32 %v2305_v52, %v2023_v53 }
 0xa7f   : > { %v3529_v45 = vmul.f32 -1.442695, %v2312_v42  ;;  %v2314_v51 = vadd.f32 %v2306_v48, %v2024_v46  ;;  %v2340_v42 = vld [vmem:[#allocation2 + $0x20] sm:$0x30]  ;;  %v2341_v46 = vld [vmem:[#allocation2 + $0x28] sm:$0x30] }
 0xa80   : > { %3954 = vpow2.f32 %v3528_v43 }
 0xa81   : > { %3956 = vpow2.f32 %v3529_v45  ;;  %v3530_v54 = vmul.f32 -1.442695, %v2314_v51 }
 0xa83   : > { %3958 = vpow2.f32 %v3530_v54 }
 0xa84   : > { %3960 = vtanh.f32 %v2313_v55 }
 0xa8a   : > { %v3955_v56 = vpop.eup %3954 }
 0xa8b   : > { %v3957_v57 = vpop.eup %3956  ;;  %v2318_v58 = vadd.f32 1.0, %v3955_v56 }
 0xa8c   : > { %v2324_v59 = vadd.f32 1.0, %v3957_v57 }
 0xa8d   : > { %3962 = vrcp.f32 %v2318_v58  ;;  %v3959_v60 = vpop.eup %3958 }
 0xa8e   : > { %3964 = vrcp.f32 %v2324_v59  ;;  %v3961_v61 = vpop.eup %3960  ;;  %v2331_v62 = vadd.f32 1.0, %v3959_v60  ;;  %v2343_v59 = vld [vmem:[#allocation2 + $0x38] sm:$0x30] }
 0xa90   : > { %3966 = vrcp.f32 %v2331_v62 }
 0xa97   : > { %v3963_v20 = vpop.eup %3962 }
 0xa98   : > { %v3965_v13 = vpop.eup %3964  ;;  %v2335_v34 = vmul.f32 %v3963_v20, %v3961_v61  ;;  %v2342_v20 = vld [vmem:[#allocation2 + $0x30] sm:$0x30] }
 0xa99   : > { %v2334_v36 = vmul.f32 0.0, %v3965_v13 }
 0xa9a   : > { %v3967_v38 = vpop.eup %3966 }
 0xa9b   : > { %v4991_v37 = vadd.f32 %v2335_v34, %v2334_v36 }
 0xa9d   : > { %3968 = vtanh.f32 %v4991_v37 }
 0xaa7   : > { %v3969_v27 = vpop.eup %3968 }
 0xaa8   : > { %v4994_v39 = vmul.f32 %v3969_v27, %v3967_v38 }
 0xaaa   : > { %v2344_v40 = vpack.c.bf16 %v4994_v39, %v4994_v39 }
 0xaac   : > { %v2346_v41 = vrot.slane %v2344_v40, 3 }
 0xaae   : > { %2381 = vmatmul.mubr.bf16.vlgmr.msra.gmra.mrb[4].mxu0 %v2346_v41  ;;  %2422 = vmatmul.mubr.bf16.vlgmr.msra.gmra.mrb[4].mxu1 %v2346_v41 }
 0xaaf   : > { %2486 = vmatpush1.bf16.msra.mxu0 %v4827_v14  ;;  %2527 = vmatpush1.bf16.msra.mxu1 %v4847_v21 }
 0xab0   : > { %2487 = vmatprep.subr.bf16.mxu0 %v4833_v17  ;;  %2528 = vmatprep.subr.bf16.mxu1 %v4860_v35 }
 0xab1   : > { %2517 = vmatprep.mubr.bf16.mxu0 %v4184_v16  ;;  %2558 = vmatprep.mubr.bf16.mxu1 %v4184_v16 }
 0xab3   : > { %2488 = vmatpush1.bf16.msra.mxu0 %v4837_v18  ;;  %2529 = vmatpush1.bf16.msra.mxu1 %v4863_v24 }
 0xab4   : > { %2489 = vmatprep.subr.bf16.mxu0 %v4841_v19  ;;  %2530 = vmatprep.subr.bf16.mxu1 %v4874_v8 }
 0xab7   : > { %2490 = vmatpush1.bf16.msra.mxu0 %v4851_v22  ;;  %2531 = vmatpush1.bf16.msra.mxu1 %v4879_v0 }
 0xab8   : > { %2491 = vmatprep.subr.bf16.mxu0 %v4856_v23  ;;  %2532 = vmatprep.subr.bf16.mxu1 %v4883_v11 }
 0xabb   : > { %2492 = vmatpush1.bf16.msra.mxu0 %v4868_v25  ;;  %2533 = vmatpush1.bf16.msra.mxu1 %v4895_v3 }
 0xabc   : > { %2493 = vmatprep.subr.bf16.mxu0 %v4871_v26  ;;  %2534 = vmatprep.subr.bf16.mxu1 %v4899_v63 }
 0xabf   : > { %2494 = vmatpush1.bf16.msra.mxu0 %v4887_v1  ;;  %2535 = vmatpush1.bf16.msra.mxu1 %v4911_v7 }
 0xac0   : > { %2495 = vmatprep.subr.bf16.mxu0 %v4891_v2  ;;  %2536 = vmatprep.subr.bf16.mxu1 %v4915_v29 }
 0xac3   : > { %2496 = vmatpush1.bf16.msra.mxu0 %v4903_v6  ;;  %2537 = vmatpush1.bf16.msra.mxu1 %v4927_v10 }
 0xac4   : > { %2497 = vmatprep.subr.bf16.mxu0 %v4906_v31  ;;  %2538 = vmatprep.subr.bf16.mxu1 %v4931_v12 }
 0xac7   : > { %2498 = vmatpush1.bf16.msra.mxu0 %v4919_v4  ;;  %2539 = vmatpush1.bf16.msra.mxu1 %v4940_v32 }
 0xac8   : > { %2499 = vmatprep.subr.bf16.mxu0 %v4923_v9  ;;  %2540 = vmatprep.subr.bf16.mxu1 %v4944_v5 }
 0xacb   : > { %2500 = vmatpush1.bf16.msra.mxu0 %v4935_v30  ;;  %2541 = vmatpush1.bf16.msra.mxu1 %v4949_v33 }
 0xacc   : > { %2622 = vmatprep.subr.bf16.mxu0 %v4824_v28  ;;  %2663 = vmatprep.subr.bf16.mxu1 %v4844_v15 }
 0xb81   : > { %v2382_v43 = vpop.f32.mrb[4].mxu0  ;;  %v2423_v44 = vpop.f32.mrb[4].mxu1 }
 0xb82   : > { %v2434_v45 = vrot.slane %v2382_v43, 4  ;;  %v2384_v47 = vpop.f32.mrb[5].mxu0  ;;  %v2425_v48 = vpop.f32.mrb[5].mxu1  ;;  %v2436_v61 = vrot.slane %v2423_v44, 4  ;;  %v2466_v43 = vrot.slane %v4991_v37, 2 }
 0xb83   : > { %v2435_v49 = vrot.slane %v2384_v47, 4  ;;  %v2386_v50 = vpop.f32.mrb[6].mxu0  ;;  %v2427_v51 = vpop.f32.mrb[6].mxu1  ;;  %v2437_v58 = vrot.slane %v2425_v48, 4  ;;  %v2477_v37 = vld [vmem:[#allocation2 + $0x20] sm:$0xc] }
 0xb84   : > { %v2442_v52 = vadd.f32 %v2434_v45, %v2340_v42  ;;  %v2387_v53 = vpop.f32.mrb[7].mxu0  ;;  %v2428_v54 = vpop.f32.mrb[7].mxu1  ;;  %v2444_v13 = vadd.f32 %v2436_v61, %v2342_v20 }
 0xb85   : > { %v2443_v55 = vadd.f32 %v2435_v49, %v2341_v46  ;;  %v2445_v60 = vadd.f32 %v2437_v58, %v2343_v59 }
 0xb86   : > { %v3531_v56 = vmul.f32 -1.442695, %v2442_v52 }
 0xb87   : > { %v3532_v57 = vmul.f32 -1.442695, %v2443_v55  ;;  %v3533_v62 = vmul.f32 -1.442695, %v2445_v60 }
 0xb88   : > { %3970 = vpow2.f32 %v3531_v56 }
 0xb89   : > { %3972 = vpow2.f32 %v3532_v57  ;;  %v2478_v57 = vld [vmem:[#allocation2 + $0x28] sm:$0xc] }
 0xb8a   : > { %3974 = vpow2.f32 %v3533_v62 }
 0xb8b   : > { %3976 = vtanh.f32 %v2444_v13 }
 0xb92   : > { %v3971_v34 = vpop.eup %3970 }
 0xb93   : > { %v3973_v36 = vpop.eup %3972  ;;  %v2449_v38 = vadd.f32 1.0, %v3971_v34 }
 0xb94   : > { %v2455_v27 = vadd.f32 1.0, %v3973_v36  ;;  %v3975_v40 = vpop.eup %3974 }
 0xb95   : > { %3978 = vrcp.f32 %v2449_v38  ;;  %v3977_v41 = vpop.eup %3976  ;;  %v2462_v47 = vadd.f32 1.0, %v3975_v40 }
 0xb96   : > { %3980 = vrcp.f32 %v2455_v27 }
 0xb97   : > { %3982 = vrcp.f32 %v2462_v47 }
 0xb9f   : > { %v3979_v42 = vpop.eup %3978 }
 0xba0   : > { %v3981_v45 = vpop.eup %3980  ;;  %v2469_v46 = vmul.f32 %v3979_v42, %v3977_v41  ;;  %v2480_v41 = vld [vmem:[#allocation2 + $0x38] sm:$0xc] }
 0xba1   : > { %v2468_v44 = vmul.f32 %v3981_v45, %v2466_v43  ;;  %v3983_v49 = vpop.eup %3982  ;;  %v2479_v45 = vld [vmem:[#allocation2 + $0x30] sm:$0xc] }
 0xba3   : > { %v5033_v48 = vadd.f32 %v2469_v46, %v2468_v44 }
 0xba5   : > { %3984 = vtanh.f32 %v5033_v48 }
 0xbaf   : > { %v3985_v50 = vpop.eup %3984 }
 0xbb0   : > { %v5036_v51 = vmul.f32 %v3985_v50, %v3983_v49 }
 0xbb2   : > { %v2481_v52 = vpack.c.bf16 %v5036_v51, %v5036_v51 }
 0xbb4   : > { %v2483_v53 = vrot.slane %v2481_v52, 2 }
 0xbb6   : > { %2518 = vmatmul.mubr.bf16.vlgmr.msra.gmra.mrb[8].mxu0 %v2483_v53  ;;  %2559 = vmatmul.mubr.bf16.vlgmr.msra.gmra.mrb[8].mxu1 %v2483_v53 }
 0xbb7   : > { %2623 = vmatpush1.bf16.msra.mxu0 %v4827_v14  ;;  %2664 = vmatpush1.bf16.msra.mxu1 %v4847_v21 }
 0xbb8   : > { %2624 = vmatprep.subr.bf16.mxu0 %v4833_v17  ;;  %2665 = vmatprep.subr.bf16.mxu1 %v4860_v35 }
 0xbb9   : > { %2654 = vmatprep.mubr.bf16.mxu0 %v4184_v16  ;;  %2695 = vmatprep.mubr.bf16.mxu1 %v4184_v16 }
 0xbbb   : > { %2625 = vmatpush1.bf16.msra.mxu0 %v4837_v18  ;;  %2666 = vmatpush1.bf16.msra.mxu1 %v4863_v24 }
 0xbbc   : > { %2626 = vmatprep.subr.bf16.mxu0 %v4841_v19  ;;  %2667 = vmatprep.subr.bf16.mxu1 %v4874_v8 }
 0xbbf   : > { %2627 = vmatpush1.bf16.msra.mxu0 %v4851_v22  ;;  %2668 = vmatpush1.bf16.msra.mxu1 %v4879_v0 }
 0xbc0   : > { %2628 = vmatprep.subr.bf16.mxu0 %v4856_v23  ;;  %2669 = vmatprep.subr.bf16.mxu1 %v4883_v11 }
 0xbc3   : > { %2629 = vmatpush1.bf16.msra.mxu0 %v4868_v25  ;;  %2670 = vmatpush1.bf16.msra.mxu1 %v4895_v3 }
 0xbc4   : > { %2630 = vmatprep.subr.bf16.mxu0 %v4871_v26  ;;  %2671 = vmatprep.subr.bf16.mxu1 %v4899_v63 }
 0xbc7   : > { %2631 = vmatpush1.bf16.msra.mxu0 %v4887_v1  ;;  %2672 = vmatpush1.bf16.msra.mxu1 %v4911_v7 }
 0xbc8   : > { %2632 = vmatprep.subr.bf16.mxu0 %v4891_v2  ;;  %2673 = vmatprep.subr.bf16.mxu1 %v4915_v29 }
 0xbcb   : > { %2633 = vmatpush1.bf16.msra.mxu0 %v4903_v6  ;;  %2674 = vmatpush1.bf16.msra.mxu1 %v4927_v10 }
 0xbcc   : > { %2634 = vmatprep.subr.bf16.mxu0 %v4906_v31  ;;  %2675 = vmatprep.subr.bf16.mxu1 %v4931_v12 }
 0xbcf   : > { %2635 = vmatpush1.bf16.msra.mxu0 %v4919_v4  ;;  %2676 = vmatpush1.bf16.msra.mxu1 %v4940_v32 }
 0xbd0   : > { %2636 = vmatprep.subr.bf16.mxu0 %v4923_v9  ;;  %2677 = vmatprep.subr.bf16.mxu1 %v4944_v5 }
 0xbd3   : > { %2637 = vmatpush1.bf16.msra.mxu0 %v4935_v30  ;;  %2678 = vmatpush1.bf16.msra.mxu1 %v4949_v33 }
 0xbd4   : > { %2744 = vmatprep.subr.bf16.mxu0 %v4824_v28  ;;  %2785 = vmatprep.subr.bf16.mxu1 %v4844_v15 }
 0xc89   : > { %v2519_v54 = vpop.f32.mrb[8].mxu0  ;;  %v2560_v55 = vpop.f32.mrb[8].mxu1 }
 0xc8a   : > { %v2571_v56 = vrot.slane %v2519_v54, 6  ;;  %v2521_v58 = vpop.f32.mrb[9].mxu0  ;;  %v2562_v59 = vpop.f32.mrb[9].mxu1  ;;  %v2573_v43 = vrot.slane %v2560_v55, 6 }
 0xc8b   : > { %v2572_v60 = vrot.slane %v2521_v58, 6  ;;  %v2523_v61 = vpop.f32.mrb[10].mxu0  ;;  %v2564_v20 = vpop.f32.mrb[10].mxu1  ;;  %v2574_v40 = vrot.slane %v2562_v59, 6 }
 0xc8c   : > { %v2579_v62 = vadd.f32 %v2571_v56, %v2477_v37  ;;  %v2524_v13 = vpop.f32.mrb[11].mxu0  ;;  %v2565_v34 = vpop.f32.mrb[11].mxu1  ;;  %v2581_v47 = vadd.f32 %v2573_v43, %v2479_v45  ;;  %v2603_v56 = vrot.slane %v5033_v48, 2  ;;  %v2474_v20 = vrot.slane %v5036_v51, 6  ;;  %v2615_v51 = vld [vmem:[#allocation2 + $0x28] sm:$0x3] }
 0xc8d   : > { %v2580_v36 = vadd.f32 %v2572_v60, %v2478_v57  ;;  %v2582_v42 = vadd.f32 %v2574_v40, %v2480_v41 }
 0xc8e   : > { %v3534_v38 = vmul.f32 -1.442695, %v2579_v62  ;;  %v2476_v34 = vadd.f32 %v2474_v20, %v4994_v39  ;;  %v2614_v39 = vld [vmem:[#allocation2 + $0x20] sm:$0x3] }
 0xc8f   : > { %v3535_v27 = vmul.f32 -1.442695, %v2580_v36  ;;  %v3536_v46 = vmul.f32 -1.442695, %v2582_v42 }
 0xc90   : > { %3986 = vpow2.f32 %v3534_v38 }
 0xc91   : > { %3988 = vpow2.f32 %v3535_v27 }
 0xc92   : > { %3990 = vpow2.f32 %v3536_v46 }
 0xc93   : > { %3992 = vtanh.f32 %v2581_v47 }
 0xc9a   : > { %v3987_v44 = vpop.eup %3986 }
 0xc9b   : > { %v3989_v49 = vpop.eup %3988  ;;  %v2586_v50 = vadd.f32 1.0, %v3987_v44 }
 0xc9c   : > { %v2592_v52 = vadd.f32 1.0, %v3989_v49  ;;  %v3991_v53 = vpop.eup %3990 }
 0xc9d   : > { %3994 = vrcp.f32 %v2586_v50  ;;  %v3993_v37 = vpop.eup %3992  ;;  %v2599_v59 = vadd.f32 1.0, %v3991_v53 }
 0xc9e   : > { %3996 = vrcp.f32 %v2592_v52 }
 0xc9f   : > { %3998 = vrcp.f32 %v2599_v59 }
 0xca7   : > { %v3995_v54 = vpop.eup %3994 }
 0xca8   : > { %v3997_v57 = vpop.eup %3996  ;;  %v2606_v58 = vmul.f32 %v3995_v54, %v3993_v37  ;;  %v2617_v37 = vld [vmem:[#allocation2 + $0x38] sm:$0x3] }
 0xca9   : > { %v2605_v55 = vmul.f32 %v3997_v57, %v2603_v56  ;;  %v3999_v61 = vpop.eup %3998  ;;  %v2616_v56 = vld [vmem:[#allocation2 + $0x30] sm:$0x3] }
 0xcab   : > { %v5075_v60 = vadd.f32 %v2606_v58, %v2605_v55 }
 0xcad   : > { %4000 = vtanh.f32 %v5075_v60 }
 0xcb7   : > { %v4001_v62 = vpop.eup %4000 }
 0xcb8   : > { %v2609_v13 = vmul.f32 %v4001_v62, %v3999_v61 }
 0xcba   : > { %v2611_v36 = vrot.slane %v2609_v13, 4  ;;  %v2618_v38 = vpack.c.bf16 %v2609_v13, %v2609_v13 }
 0xcbc   : > { %v5080_v27 = vadd.f32 %v2611_v36, %v2476_v34  ;;  %v2620_v48 = vrot.slane %v2618_v38, 1  ;;  %v2728_v36 = vrot.slane %v5075_v60, 2 }
 0xcbe   : > { %2655 = vmatmul.mubr.bf16.vlgmr.msra.gmra.mrb[12].mxu0 %v2620_v48  ;;  %2696 = vmatmul.mubr.bf16.vlgmr.msra.gmra.mrb[12].mxu1 %v2620_v48 }
 0xcbf   : > { %2745 = vmatpush1.bf16.msra.mxu0 %v4827_v14  ;;  %2786 = vmatpush1.bf16.msra.mxu1 %v4847_v21 }
 0xcc0   : > { %2746 = vmatprep.subr.bf16.mxu0 %v4833_v17  ;;  %2787 = vmatprep.subr.bf16.mxu1 %v4860_v35 }
 0xcc1   : > { %2776 = vmatprep.mubr.bf16.mxu0 %v4184_v16  ;;  %2817 = vmatprep.mubr.bf16.mxu1 %v4184_v16 }
 0xcc3   : > { %2747 = vmatpush1.bf16.msra.mxu0 %v4837_v18  ;;  %2788 = vmatpush1.bf16.msra.mxu1 %v4863_v24 }
 0xcc4   : > { %2748 = vmatprep.subr.bf16.mxu0 %v4841_v19  ;;  %2789 = vmatprep.subr.bf16.mxu1 %v4874_v8 }
 0xcc7   : > { %2749 = vmatpush1.bf16.msra.mxu0 %v4851_v22  ;;  %2790 = vmatpush1.bf16.msra.mxu1 %v4879_v0 }
 0xcc8   : > { %2750 = vmatprep.subr.bf16.mxu0 %v4856_v23  ;;  %2791 = vmatprep.subr.bf16.mxu1 %v4883_v11 }
 0xccb   : > { %2751 = vmatpush1.bf16.msra.mxu0 %v4868_v25  ;;  %2792 = vmatpush1.bf16.msra.mxu1 %v4895_v3 }
 0xccc   : > { %2752 = vmatprep.subr.bf16.mxu0 %v4871_v26  ;;  %2793 = vmatprep.subr.bf16.mxu1 %v4899_v63 }
 0xccf   : > { %2753 = vmatpush1.bf16.msra.mxu0 %v4887_v1  ;;  %2794 = vmatpush1.bf16.msra.mxu1 %v4911_v7 }
 0xcd0   : > { %2754 = vmatprep.subr.bf16.mxu0 %v4891_v2  ;;  %2795 = vmatprep.subr.bf16.mxu1 %v4915_v29 }
 0xcd3   : > { %2755 = vmatpush1.bf16.msra.mxu0 %v4903_v6  ;;  %2796 = vmatpush1.bf16.msra.mxu1 %v4927_v10 }
 0xcd4   : > { %2756 = vmatprep.subr.bf16.mxu0 %v4906_v31  ;;  %2797 = vmatprep.subr.bf16.mxu1 %v4931_v12 }
 0xcd7   : > { %2757 = vmatpush1.bf16.msra.mxu0 %v4919_v4  ;;  %2798 = vmatpush1.bf16.msra.mxu1 %v4940_v32 }
 0xcd8   : > { %2758 = vmatprep.subr.bf16.mxu0 %v4923_v9  ;;  %2799 = vmatprep.subr.bf16.mxu1 %v4944_v5 }
 0xcdb   : > { %2759 = vmatpush1.bf16.msra.mxu0 %v4935_v30  ;;  %2800 = vmatpush1.bf16.msra.mxu1 %v4949_v33 }
 0xcdc   : > { %2878 = vmatprep.subr.bf16.mxu0 %v4824_v28  ;;  %2919 = vmatprep.subr.bf16.mxu1 %v4844_v15 }
 0xd91   : > { %v2656_v40 = vpop.f32.mrb[12].mxu0  ;;  %v2697_v41 = vpop.f32.mrb[12].mxu1 }
 0xd92   : > { %v2704_v42 = vadd.f32 %v2656_v40, %v2614_v39  ;;  %v2658_v43 = vpop.f32.mrb[13].mxu0  ;;  %v2699_v45 = vpop.f32.mrb[13].mxu1  ;;  %v2706_v58 = vadd.f32 %v2697_v41, %v2616_v56 }
 0xd93   : > { %v2705_v46 = vadd.f32 %v2658_v43, %v2615_v51  ;;  %v2660_v47 = vpop.f32.mrb[14].mxu0  ;;  %v2701_v44 = vpop.f32.mrb[14].mxu1  ;;  %v2707_v54 = vadd.f32 %v2699_v45, %v2617_v37 }
 0xd94   : > { %v3537_v49 = vmul.f32 -1.442695, %v2704_v42  ;;  %v2661_v50 = vpop.f32.mrb[15].mxu0  ;;  %v2702_v52 = vpop.f32.mrb[15].mxu1 }
 0xd95   : > { %v3538_v53 = vmul.f32 -1.442695, %v2705_v46  ;;  %v3539_v57 = vmul.f32 -1.442695, %v2707_v54 }
 0xd96   : > { %4002 = vpow2.f32 %v3537_v49 }
 0xd97   : > { %4004 = vpow2.f32 %v3538_v53 }
 0xd98   : > { %4006 = vpow2.f32 %v3539_v57 }
 0xd99   : > { %4008 = vtanh.f32 %v2706_v58 }
 0xda0   : > { %v4003_v59 = vpop.eup %4002 }
 0xda1   : > { %v4005_v55 = vpop.eup %4004  ;;  %v2711_v61 = vadd.f32 1.0, %v4003_v59 }
 0xda2   : > { %v2717_v20 = vadd.f32 1.0, %v4005_v55  ;;  %v4007_v62 = vpop.eup %4006  ;;  %v2741_v55 = vld [vmem:[#allocation2 + $0x10] sm:$0xc0] }
 0xda3   : > { %4010 = vrcp.f32 %v2711_v61  ;;  %v4009_v13 = vpop.eup %4008  ;;  %v2724_v39 = vadd.f32 1.0, %v4007_v62 }
 0xda4   : > { %4012 = vrcp.f32 %v2717_v20 }
 0xda5   : > { %4014 = vrcp.f32 %v2724_v39 }
 0xdad   : > { %v4011_v34 = vpop.eup %4010 }
 0xdae   : > { %v4013_v38 = vpop.eup %4012  ;;  %v2731_v48 = vmul.f32 %v4011_v34, %v4009_v13 }
 0xdaf   : > { %v2730_v51 = vmul.f32 %v4013_v38, %v2728_v36  ;;  %v4015_v41 = vpop.eup %4014 }
 0xdb1   : > { %v5117_v40 = vadd.f32 %v2731_v48, %v2730_v51 }
 0xdb3   : > { %4016 = vtanh.f32 %v5117_v40  ;;  %v2862_v51 = vrot.slane %v5117_v40, 2 }
 0xdbd   : > { %v4017_v42 = vpop.eup %4016 }
 0xdbe   : > { %v2734_v43 = vmul.f32 %v4017_v42, %v4015_v41 }
 0xdc0   : > { %v2736_v45 = vrot.slane %v2734_v43, 2  ;;  %v2743_v46 = vpack.c.bf16 %v2734_v43, %v2734_v43 }
 0xdc2   : > { %v5121_v47 = vadd.f32 %v2736_v45, %v5080_v27  ;;  %2777 = vmatmul.mubr.bf16.vlgmr.msra.gmra.mrb[16].mxu0 %v2743_v46  ;;  %2818 = vmatmul.mubr.bf16.vlgmr.msra.gmra.mrb[16].mxu1 %v2743_v46 }
 0xdc3   : > { %2879 = vmatpush1.bf16.msra.mxu0 %v4827_v14  ;;  %2920 = vmatpush1.bf16.msra.mxu1 %v4847_v21  ;;  %v2739_v14 = vld [vmem:[#allocation2] sm:$0xc0] }
 0xdc4   : > { %2880 = vmatprep.subr.bf16.mxu0 %v4833_v17  ;;  %2921 = vmatprep.subr.bf16.mxu1 %v4860_v35 }
 0xdc5   : > { %2910 = vmatprep.mubr.bf16.mxu0 %v4184_v16  ;;  %2951 = vmatprep.mubr.bf16.mxu1 %v4184_v16 }
 0xdc7   : > { %2881 = vmatpush1.bf16.msra.mxu0 %v4837_v18  ;;  %2922 = vmatpush1.bf16.msra.mxu1 %v4863_v24 }
 0xdc8   : > { %2882 = vmatprep.subr.bf16.mxu0 %v4841_v19  ;;  %2923 = vmatprep.subr.bf16.mxu1 %v4874_v8 }
 0xdcb   : > { %2883 = vmatpush1.bf16.msra.mxu0 %v4851_v22  ;;  %2924 = vmatpush1.bf16.msra.mxu1 %v4879_v0  ;;  %v2740_v22 = vld [vmem:[#allocation2 + $0x8] sm:$0xc0] }
 0xdcc   : > { %2884 = vmatprep.subr.bf16.mxu0 %v4856_v23  ;;  %2925 = vmatprep.subr.bf16.mxu1 %v4883_v11 }
 0xdcf   : > { %2885 = vmatpush1.bf16.msra.mxu0 %v4868_v25  ;;  %2926 = vmatpush1.bf16.msra.mxu1 %v4895_v3 }
 0xdd0   : > { %2886 = vmatprep.subr.bf16.mxu0 %v4871_v26  ;;  %2927 = vmatprep.subr.bf16.mxu1 %v4899_v63 }
 0xdd3   : > { %2887 = vmatpush1.bf16.msra.mxu0 %v4887_v1  ;;  %2928 = vmatpush1.bf16.msra.mxu1 %v4911_v7 }
 0xdd4   : > { %2888 = vmatprep.subr.bf16.mxu0 %v4891_v2  ;;  %2929 = vmatprep.subr.bf16.mxu1 %v4915_v29 }
 0xdd7   : > { %2889 = vmatpush1.bf16.msra.mxu0 %v4903_v6  ;;  %2930 = vmatpush1.bf16.msra.mxu1 %v4927_v10 }
 0xdd8   : > { %2890 = vmatprep.subr.bf16.mxu0 %v4906_v31  ;;  %2931 = vmatprep.subr.bf16.mxu1 %v4931_v12 }
 0xddb   : > { %2891 = vmatpush1.bf16.msra.mxu0 %v4919_v4  ;;  %2932 = vmatpush1.bf16.msra.mxu1 %v4940_v32 }
 0xddc   : > { %2892 = vmatprep.subr.bf16.mxu0 %v4923_v9  ;;  %2933 = vmatprep.subr.bf16.mxu1 %v4944_v5 }
 0xddf   : > { %2893 = vmatpush1.bf16.msra.mxu0 %v4935_v30  ;;  %2934 = vmatpush1.bf16.msra.mxu1 %v4949_v33 }
 0xde0   : > { %3015 = vmatprep.subr.bf16.mxu0 %v4824_v28  ;;  %3056 = vmatprep.subr.bf16.mxu1 %v4844_v15  ;;  %v2742_v28 = vld [vmem:[#allocation2 + $0x18] sm:$0xc0] }
 0xe95   : > { %v2778_v17 = vpop.f32.mrb[16].mxu0  ;;  %v2819_v18 = vpop.f32.mrb[16].mxu1 }
 0xe96   : > { %v2830_v19 = vrot.slane %v2778_v17, 2  ;;  %v2780_v60 = vpop.f32.mrb[17].mxu0  ;;  %v2821_v27 = vpop.f32.mrb[17].mxu1  ;;  %v2832_v59 = vrot.slane %v2819_v18, 2 }
 0xe97   : > { %v2831_v44 = vrot.slane %v2780_v60, 2  ;;  %v2782_v49 = vpop.f32.mrb[18].mxu0  ;;  %v2823_v50 = vpop.f32.mrb[18].mxu1  ;;  %v2833_v58 = vrot.slane %v2821_v27, 2  ;;  %v5165_v60 = vld [vmem:[%s4310_s24] ss:$16 sps:$4 sm:$0xff]  }
 0xe98   : > { %v2838_v52 = vadd.f32 %v2830_v19, %v2739_v14  ;;  %v2783_v53 = vpop.f32.mrb[19].mxu0  ;;  %v2824_v37 = vpop.f32.mrb[19].mxu1  ;;  %v2840_v20 = vadd.f32 %v2832_v59, %v2741_v55  ;;  %v5170_v27 = vld [vmem:[%s4310_s24 + $0x24] ss:$16 sps:$4 sm:$0xff]  }
 0xe99   : > { %v2839_v54 = vadd.f32 %v2831_v44, %v2740_v22  ;;  %v2841_v15 = vadd.f32 %v2833_v58, %v2742_v28  ;;  %v5182_v44 = vld [vmem:[%s4310_s24 + $0x44] ss:$16 sps:$4 sm:$0xff]  }
 0xe9a   : > { %v3540_v56 = vmul.f32 -1.442695, %v2838_v52 }
 0xe9b   : > { %v3541_v57 = vmul.f32 -1.442695, %v2839_v54  ;;  %v3542_v61 = vmul.f32 -1.442695, %v2841_v15 }
 0xe9c   : > { %4018 = vpow2.f32 %v3540_v56 }
 0xe9d   : > { %4020 = vpow2.f32 %v3541_v57 }
 0xe9e   : > { %4022 = vpow2.f32 %v3542_v61 }
 0xe9f   : > { %4024 = vtanh.f32 %v2840_v20 }
 0xea6   : > { %v4019_v62 = vpop.eup %4018 }
 0xea7   : > { %v4021_v13 = vpop.eup %4020  ;;  %v2845_v34 = vadd.f32 1.0, %v4019_v62 }
 0xea8   : > { %v2851_v36 = vadd.f32 1.0, %v4021_v13  ;;  %v4023_v38 = vpop.eup %4022 }
 0xea9   : > { %4026 = vrcp.f32 %v2845_v34  ;;  %v4025_v48 = vpop.eup %4024  ;;  %v2858_v43 = vadd.f32 1.0, %v4023_v38 }
 0xeaa   : > { %4028 = vrcp.f32 %v2851_v36 }
 0xeab   : > { %4030 = vrcp.f32 %v2858_v43  ;;  %v4093_v43 = vld [vmem:[%s4310_s24 + $0x48] ss:$16 sps:$4 sm:$0xff]  }
 0xeb3   : > { %v4027_v39 = vpop.eup %4026 }
 0xeb4   : > { %v4029_v41 = vpop.eup %4028  ;;  %v2865_v42 = vmul.f32 %v4027_v39, %v4025_v48  ;;  %v4089_v39 = vld [vmem:[%s4310_s24 + $0x8] ss:$16 sps:$4 sm:$0xff]  }
 0xeb5   : > { %v2864_v45 = vmul.f32 %v4029_v41, %v2862_v51  ;;  %v4031_v14 = vpop.eup %4030  ;;  %v4090_v51 = vld [vmem:[%s4310_s24 + $0x2c] ss:$16 sps:$4 sm:$0xff]   ;;  %v4091_v41 = vld [vmem:[%s4310_s24 + $0x28] ss:$16 sps:$4 sm:$0xff]  }
 0xeb7   : > { %v5158_v46 = vadd.f32 %v2865_v42, %v2864_v45  ;;  %v4092_v42 = vld [vmem:[%s4310_s24 + $0x4c] ss:$16 sps:$4 sm:$0xff]   ;;  %v4094_v45 = vld [vmem:[%s4310_s24 + $0x64] ss:$16 sps:$4 sm:$0xff]  }
 0xeb9   : > { %4032 = vtanh.f32 %v5158_v46  ;;  %v2996_v58 = vrot.slane %v5158_v46, 2  ;;  %v4096_v46 = vld [vmem:[%s4310_s24 + $0x60] ss:$16 sps:$4 sm:$0xff]  }
 0xec3   : > { %v4033_v17 = vpop.eup %4032 }
 0xec4   : > { %v2868_v18 = vmul.f32 %v4033_v17, %v4031_v14  ;;  %v4097_v14 = vld [vmem:[%s4310_s24 + $0x68] ss:$16 sps:$4 sm:$0xff]   ;;  %v4098_v17 = vld [vmem:[%s4310_s24 + $0x84] ss:$16 sps:$4 sm:$0xff]  }
 0xec6   : > { %v5162_v19 = vadd.f32 %v2868_v18, %v5121_v47  ;;  %v2874_v40 = vpack.c.bf16 %v2868_v18, %v2868_v18  ;;  %v5177_v47 = vld [vmem:[%s4310_s24 + $0x20] ss:$16 sps:$4 sm:$0xff]   ;;  %v4099_v18 = vld [vmem:[%s4310_s24 + $0x8c] ss:$16 sps:$4 sm:$0xff]  }
 0xec8   : > { %v2876_v22 = vrot.slane %v2874_v40, 3  ;;  %v4101_v40 = vld [vmem:[%s4310_s24 + $0x88] ss:$16 sps:$4 sm:$0xff]  }
 0xeca   : > { %2911 = vmatmul.mubr.bf16.vlgmr.msra.gmra.mrb[20].mxu0 %v2876_v22  ;;  %2952 = vmatmul.mubr.bf16.vlgmr.msra.gmra.mrb[20].mxu1 %v2876_v22  ;;  %v4102_v22 = vld [vmem:[%s4310_s24 + $0xa4] ss:$16 sps:$4 sm:$0xff]  }
 0xecb   : > { %3016 = vmatpush1.bf16.msra.mxu0 %v5165_v60  ;;  %3057 = vmatpush1.bf16.msra.mxu1 %v4847_v21  ;;  %v5187_v21 = vld [vmem:[%s4310_s24 + $0x40] ss:$16 sps:$4 sm:$0xff]  }
 0xecc   : > { %3017 = vmatprep.subr.bf16.mxu0 %v5170_v27  ;;  %3058 = vmatprep.subr.bf16.mxu1 %v4860_v35  ;;  %v4088_v35 = vld [vmem:[%s4310_s24 + $0xc] ss:$16 sps:$4 sm:$0xff]  }
 0xecd   : > { %3047 = vmatprep.mubr.bf16.mxu0 %v4184_v16  ;;  %3088 = vmatprep.mubr.bf16.mxu1 %v4184_v16 }
 0xecf   : > { %3018 = vmatpush1.bf16.msra.mxu0 %v5177_v47  ;;  %3059 = vmatpush1.bf16.msra.mxu1 %v4863_v24  ;;  %v2870_v24 = vld [vmem:[#allocation2] sm:$0x30] }
 0xed0   : > { %3019 = vmatprep.subr.bf16.mxu0 %v5182_v44  ;;  %3060 = vmatprep.subr.bf16.mxu1 %v4874_v8 }
 0xed3   : > { %3020 = vmatpush1.bf16.msra.mxu0 %v5187_v21  ;;  %3061 = vmatpush1.bf16.msra.mxu1 %v4879_v0  ;;  %v2871_v0 = vld [vmem:[#allocation2 + $0x8] sm:$0x30] }
 0xed4   : > { %3021 = vmatprep.subr.bf16.mxu0 %v4856_v23  ;;  %3062 = vmatprep.subr.bf16.mxu1 %v4883_v11  ;;  %v4087_v23 = vld [vmem:[%s4310_s24 + $0x4] ss:$16 sps:$4 sm:$0xff]  }
 0xed7   : > { %3022 = vmatpush1.bf16.msra.mxu0 %v4868_v25  ;;  %3063 = vmatpush1.bf16.msra.mxu1 %v4895_v3 }
 0xed8   : > { %3023 = vmatprep.subr.bf16.mxu0 %v4871_v26  ;;  %3064 = vmatprep.subr.bf16.mxu1 %v4899_v63 }
 0xedb   : > { %3024 = vmatpush1.bf16.msra.mxu0 %v4887_v1  ;;  %3065 = vmatpush1.bf16.msra.mxu1 %v4911_v7 }
 0xedc   : > { %3025 = vmatprep.subr.bf16.mxu0 %v4891_v2  ;;  %3066 = vmatprep.subr.bf16.mxu1 %v4915_v29 }
 0xedf   : > { %3026 = vmatpush1.bf16.msra.mxu0 %v4903_v6  ;;  %3067 = vmatpush1.bf16.msra.mxu1 %v4927_v10 }
 0xee0   : > { %3027 = vmatprep.subr.bf16.mxu0 %v4906_v31  ;;  %3068 = vmatprep.subr.bf16.mxu1 %v4931_v12  ;;  %v2873_v12 = vld [vmem:[#allocation2 + $0x18] sm:$0x30] }
 0xee3   : > { %3028 = vmatpush1.bf16.msra.mxu0 %v4919_v4  ;;  %3069 = vmatpush1.bf16.msra.mxu1 %v4940_v32 }
 0xee4   : > { %3029 = vmatprep.subr.bf16.mxu0 %v4923_v9  ;;  %3070 = vmatprep.subr.bf16.mxu1 %v4944_v5  ;;  %v2872_v5 = vld [vmem:[#allocation2 + $0x10] sm:$0x30] }
 0xee7   : > { %3030 = vmatpush1.bf16.msra.mxu0 %v4935_v30  ;;  %3071 = vmatpush1.bf16.msra.mxu1 %v4949_v33 }
 0xee8   : > { %3152 = vmatprep.subr.bf16.mxu0 %v4087_v23  ;;  %3193 = vmatprep.subr.bf16.mxu1 %v4088_v35  ;;  %v4108_v23 = vld [vmem:[%s4310_s24 + $0xc0] ss:$16 sps:$4 sm:$0xff]   ;;  %v4109_v35 = vld [vmem:[%s4310_s24 + $0xc8] ss:$16 sps:$4 sm:$0xff]  }
 0xf9d   : > { %v2912_v25 = vpop.f32.mrb[20].mxu0  ;;  %v2953_v26 = vpop.f32.mrb[20].mxu1 }
 0xf9e   : > { %v2964_v8 = vrot.slane %v2912_v25, 4  ;;  %v2914_v11 = vpop.f32.mrb[21].mxu0  ;;  %v2955_v1 = vpop.f32.mrb[21].mxu1  ;;  %v2966_v32 = vrot.slane %v2953_v26, 4  ;;  %v4111_v25 = vld [vmem:[%s4310_s24 + $0xec] ss:$16 sps:$4 sm:$0xff]  }
 0xf9f   : > { %v2965_v2 = vrot.slane %v2914_v11, 4  ;;  %v2916_v3 = vpop.f32.mrb[22].mxu0  ;;  %v2957_v63 = vpop.f32.mrb[22].mxu1  ;;  %v2967_v10 = vrot.slane %v2955_v1, 4  ;;  %v4112_v26 = vld [vmem:[%s4310_s24 + $0xe0] ss:$16 sps:$4 sm:$0xff]  }
 0xfa0   : > { %v2972_v6 = vadd.f32 %v2964_v8, %v2870_v24  ;;  %v2917_v31 = vpop.f32.mrb[23].mxu0  ;;  %v2958_v7 = vpop.f32.mrb[23].mxu1  ;;  %v2974_v49 = vadd.f32 %v2966_v32, %v2872_v5  ;;  %v4110_v24 = vld [vmem:[%s4310_s24 + $0xe4] ss:$16 sps:$4 sm:$0xff]   ;;  %v4113_v8 = vld [vmem:[%s4310_s24 + $0xe8] ss:$16 sps:$4 sm:$0xff]  }
 0xfa1   : > { %v2973_v29 = vadd.f32 %v2965_v2, %v2871_v0  ;;  %v2975_v30 = vadd.f32 %v2967_v10, %v2873_v12  ;;  %v3007_v0 = vld [vmem:[#allocation2] sm:$0xc]  ;;  %v3008_v3 = vld [vmem:[#allocation2 + $0x8] sm:$0xc] }
 0xfa2   : > { %v3543_v4 = vmul.f32 -1.442695, %v2972_v6 }
 0xfa3   : > { %v3544_v9 = vmul.f32 -1.442695, %v2973_v29  ;;  %v3545_v33 = vmul.f32 -1.442695, %v2975_v30 }
 0xfa4   : > { %4034 = vpow2.f32 %v3543_v4 }
 0xfa5   : > { %4036 = vpow2.f32 %v3544_v9 }
 0xfa6   : > { %4038 = vpow2.f32 %v3545_v33  ;;  %v3010_v33 = vld [vmem:[#allocation2 + $0x18] sm:$0xc] }
 0xfa7   : > { %4040 = vtanh.f32 %v2974_v49 }
 0xfae   : > { %v4035_v50 = vpop.eup %4034 }
 0xfaf   : > { %v4037_v52 = vpop.eup %4036  ;;  %v2979_v53 = vadd.f32 1.0, %v4035_v50 }
 0xfb0   : > { %v2985_v37 = vadd.f32 1.0, %v4037_v52  ;;  %v4039_v54 = vpop.eup %4038  ;;  %v3009_v52 = vld [vmem:[#allocation2 + $0x10] sm:$0xc] }
 0xfb1   : > { %4042 = vrcp.f32 %v2979_v53  ;;  %v4041_v56 = vpop.eup %4040  ;;  %v2992_v59 = vadd.f32 1.0, %v4039_v54 }
 0xfb2   : > { %4044 = vrcp.f32 %v2985_v37 }
 0xfb3   : > { %4046 = vrcp.f32 %v2992_v59 }
 0xfbb   : > { %v4043_v57 = vpop.eup %4042 }
 0xfbc   : > { %v4045_v28 = vpop.eup %4044  ;;  %v2999_v15 = vmul.f32 %v4043_v57, %v4041_v56 }
 0xfbd   : > { %v2998_v55 = vmul.f32 %v4045_v28, %v2996_v58  ;;  %v4047_v20 = vpop.eup %4046 }
 0xfbf   : > { %v5214_v61 = vadd.f32 %v2999_v15, %v2998_v55 }
 0xfc1   : > { %4048 = vtanh.f32 %v5214_v61  ;;  %v3133_v55 = vrot.slane %v5214_v61, 2 }
 0xfcb   : > { %v4049_v62 = vpop.eup %4048 }
 0xfcc   : > { %v3002_v13 = vmul.f32 %v4049_v62, %v4047_v20 }
 0xfce   : > { %v3004_v34 = vrot.slane %v3002_v13, 6  ;;  %v3011_v36 = vpack.c.bf16 %v3002_v13, %v3002_v13 }
 0xfd0   : > { %v5218_v38 = vadd.f32 %v3004_v34, %v5162_v19  ;;  %v3013_v48 = vrot.slane %v3011_v36, 2  ;;  %v4100_v19 = vld [vmem:[%s4310_s24 + $0x80] ss:$16 sps:$4 sm:$0xff]  }
 0xfd2   : > { %3048 = vmatmul.mubr.bf16.vlgmr.msra.gmra.mrb[24].mxu0 %v3013_v48  ;;  %3089 = vmatmul.mubr.bf16.vlgmr.msra.gmra.mrb[24].mxu1 %v3013_v48 }
 0xfd3   : > { %3153 = vmatpush1.bf16.msra.mxu0 %v5165_v60  ;;  %3194 = vmatpush1.bf16.msra.mxu1 %v4089_v39  ;;  %v4103_v60 = vld [vmem:[%s4310_s24 + $0xac] ss:$16 sps:$4 sm:$0xff]  }
 0xfd4   : > { %3154 = vmatprep.subr.bf16.mxu0 %v5170_v27  ;;  %3195 = vmatprep.subr.bf16.mxu1 %v4090_v51  ;;  %v4104_v27 = vld [vmem:[%s4310_s24 + $0xa0] ss:$16 sps:$4 sm:$0xff]  }
 0xfd5   : > { %3184 = vmatprep.mubr.bf16.mxu0 %v4184_v16  ;;  %3225 = vmatprep.mubr.bf16.mxu1 %v4184_v16  ;;  %v4095_v16 = vld [vmem:[%s4310_s24 + $0x6c] ss:$16 sps:$4 sm:$0xff]  }
 0xfd7   : > { %3155 = vmatpush1.bf16.msra.mxu0 %v5177_v47  ;;  %3196 = vmatpush1.bf16.msra.mxu1 %v4091_v41  ;;  %v4105_v47 = vld [vmem:[%s4310_s24 + $0xa8] ss:$16 sps:$4 sm:$0xff]  }
 0xfd8   : > { %3156 = vmatprep.subr.bf16.mxu0 %v5182_v44  ;;  %3197 = vmatprep.subr.bf16.mxu1 %v4092_v42  ;;  %v4106_v44 = vld [vmem:[%s4310_s24 + $0xc4] ss:$16 sps:$4 sm:$0xff]  }
 0xfdb   : > { %3157 = vmatpush1.bf16.msra.mxu0 %v5187_v21  ;;  %3198 = vmatpush1.bf16.msra.mxu1 %v4093_v43  ;;  %v4107_v21 = vld [vmem:[%s4310_s24 + $0xcc] ss:$16 sps:$4 sm:$0xff]  }
 0xfdc   : > { %3158 = vmatprep.subr.bf16.mxu0 %v4094_v45  ;;  %3199 = vmatprep.subr.bf16.mxu1 %v4095_v16  ;;  %v3144_v16 = vld [vmem:[#allocation2] sm:$0x3] }
 0xfdf   : > { %3159 = vmatpush1.bf16.msra.mxu0 %v4096_v46  ;;  %3200 = vmatpush1.bf16.msra.mxu1 %v4097_v14  ;;  %v3145_v46 = vld [vmem:[#allocation2 + $0x8] sm:$0x3] }
 0xfe0   : > { %3160 = vmatprep.subr.bf16.mxu0 %v4098_v17  ;;  %3201 = vmatprep.subr.bf16.mxu1 %v4099_v18 }
 0xfe3   : > { %3161 = vmatpush1.bf16.msra.mxu0 %v4100_v19  ;;  %3202 = vmatpush1.bf16.msra.mxu1 %v4101_v40 }
 0xfe4   : > { %3162 = vmatprep.subr.bf16.mxu0 %v4102_v22  ;;  %3203 = vmatprep.subr.bf16.mxu1 %v4103_v60 }
 0xfe7   : > { %3163 = vmatpush1.bf16.msra.mxu0 %v4104_v27  ;;  %3204 = vmatpush1.bf16.msra.mxu1 %v4105_v47 }
 0xfe8   : > { %3164 = vmatprep.subr.bf16.mxu0 %v4106_v44  ;;  %3205 = vmatprep.subr.bf16.mxu1 %v4107_v21 }
 0xfeb   : > { %3165 = vmatpush1.bf16.msra.mxu0 %v4108_v23  ;;  %3206 = vmatpush1.bf16.msra.mxu1 %v4109_v35  ;;  %v3147_v23 = vld [vmem:[#allocation2 + $0x18] sm:$0x3]  ;;  %v3146_v35 = vld [vmem:[#allocation2 + $0x10] sm:$0x3] }
 0xfec   : > { %3166 = vmatprep.subr.bf16.mxu0 %v4110_v24  ;;  %3207 = vmatprep.subr.bf16.mxu1 %v4111_v25 }
 0xfef   : > { %3167 = vmatpush1.bf16.msra.mxu0 %v4112_v26  ;;  %3208 = vmatpush1.bf16.msra.mxu1 %v4113_v8 }
0x10a5   : > { %v3049_v11 = vpop.f32.mrb[24].mxu0  ;;  %v3090_v1 = vpop.f32.mrb[24].mxu1 }
0x10a6   : > { %v3101_v2 = vrot.slane %v3049_v11, 6  ;;  %v3051_v63 = vpop.f32.mrb[25].mxu0  ;;  %v3092_v6 = vpop.f32.mrb[25].mxu1  ;;  %v3103_v50 = vrot.slane %v3090_v1, 6 }
0x10a7   : > { %v3102_v31 = vrot.slane %v3051_v63, 6  ;;  %v3053_v7 = vpop.f32.mrb[26].mxu0  ;;  %v3094_v29 = vpop.f32.mrb[26].mxu1  ;;  %v3104_v5 = vrot.slane %v3092_v6, 6 }
0x10a8   : > { %v3109_v4 = vadd.f32 %v3101_v2, %v3007_v0  ;;  %v3054_v9 = vpop.f32.mrb[27].mxu0  ;;  %v3095_v10 = vpop.f32.mrb[27].mxu1  ;;  %v3111_v37 = vadd.f32 %v3103_v50, %v3009_v52 }
0x10a9   : > { %v3110_v12 = vadd.f32 %v3102_v31, %v3008_v3  ;;  %v3112_v49 = vadd.f32 %v3104_v5, %v3010_v33 }
0x10aa   : > { %v3546_v30 = vmul.f32 -1.442695, %v3109_v4 }
0x10ab   : > { %v3547_v32 = vmul.f32 -1.442695, %v3110_v12  ;;  %v3548_v53 = vmul.f32 -1.442695, %v3112_v49 }
0x10ac   : > { %4050 = vpow2.f32 %v3546_v30 }
0x10ad   : > { %4052 = vpow2.f32 %v3547_v32 }
0x10ae   : > { %4054 = vpow2.f32 %v3548_v53 }
0x10af   : > { %4056 = vtanh.f32 %v3111_v37 }
0x10b6   : > { %v4051_v54 = vpop.eup %4050 }
0x10b7   : > { %v4053_v56 = vpop.eup %4052  ;;  %v3116_v57 = vadd.f32 1.0, %v4051_v54 }
0x10b8   : > { %v3122_v58 = vadd.f32 1.0, %v4053_v56  ;;  %v4055_v28 = vpop.eup %4054 }
0x10b9   : > { %4058 = vrcp.f32 %v3116_v57  ;;  %v4057_v15 = vpop.eup %4056  ;;  %v3129_v13 = vadd.f32 1.0, %v4055_v28 }
0x10ba   : > { %4060 = vrcp.f32 %v3122_v58 }
0x10bb   : > { %4062 = vrcp.f32 %v3129_v13 }
0x10c3   : > { %v4059_v59 = vpop.eup %4058 }
0x10c4   : > { %v4061_v20 = vpop.eup %4060  ;;  %v3136_v62 = vmul.f32 %v4059_v59, %v4057_v15 }
0x10c5   : > { %v3135_v34 = vmul.f32 %v4061_v20, %v3133_v55  ;;  %v4063_v48 = vpop.eup %4062 }
0x10c7   : > { %v3137_v36 = vadd.f32 %v3136_v62, %v3135_v34 }
0x10c9   : > { %4064 = vtanh.f32 %v3137_v36  ;;  %v3258_v63 = vrot.slane %v3137_v36, 2 }
0x10d3   : > { %v4065_v39 = vpop.eup %4064 }
0x10d4   : > { %v3139_v51 = vmul.f32 %v4065_v39, %v4063_v48 }
0x10d6   : > { %v3141_v41 = vrot.slane %v3139_v51, 4  ;;  %v3148_v42 = vpack.c.bf16 %v3139_v51, %v3139_v51 }
0x10d8   : > { %v3143_v43 = vadd.f32 %v3141_v41, %v5218_v38  ;;  %v3150_v45 = vrot.slane %v3148_v42, 1 }
0x10da   : > { %3185 = vmatmul.mubr.bf16.vlgmr.msra.gmra.mrb[28].mxu0 %v3150_v45  ;;  %3226 = vmatmul.mubr.bf16.vlgmr.msra.gmra.mrb[28].mxu1 %v3150_v45 }
0x11ad   : > { %v3186_v61 = vpop.f32.mrb[28].mxu0  ;;  %v3227_v14 = vpop.f32.mrb[28].mxu1 }
0x11ae   : > { %v3234_v17 = vadd.f32 %v3186_v61, %v3144_v16  ;;  %v3188_v18 = vpop.f32.mrb[29].mxu0  ;;  %v3229_v19 = vpop.f32.mrb[29].mxu1  ;;  %v3236_v25 = vadd.f32 %v3227_v14, %v3146_v35 }
0x11af   : > { %v3235_v40 = vadd.f32 %v3188_v18, %v3145_v46  ;;  %v3190_v22 = vpop.f32.mrb[30].mxu0  ;;  %v3231_v60 = vpop.f32.mrb[30].mxu1  ;;  %v3237_v38 = vadd.f32 %v3229_v19, %v3147_v23 }
0x11b0   : > { %v3549_v27 = vmul.f32 -1.442695, %v3234_v17  ;;  %v3191_v47 = vpop.f32.mrb[31].mxu0  ;;  %v3232_v44 = vpop.f32.mrb[31].mxu1 }
0x11b1   : > { %v3550_v21 = vmul.f32 -1.442695, %v3235_v40  ;;  %v3551_v24 = vmul.f32 -1.442695, %v3237_v38 }
0x11b2   : > { %4066 = vpow2.f32 %v3549_v27 }
0x11b3   : > { %4068 = vpow2.f32 %v3550_v21 }
0x11b4   : > { %4070 = vpow2.f32 %v3551_v24 }
0x11b5   : > { %4072 = vtanh.f32 %v3236_v25 }
0x11bc   : > { %v4067_v26 = vpop.eup %4066 }
0x11bd   : > { %v4069_v8 = vpop.eup %4068  ;;  %v3241_v0 = vadd.f32 1.0, %v4067_v26 }
0x11be   : > { %v3247_v11 = vadd.f32 1.0, %v4069_v8  ;;  %v4071_v1 = vpop.eup %4070 }
0x11bf   : > { %4074 = vrcp.f32 %v3241_v0  ;;  %v4073_v2 = vpop.eup %4072  ;;  %v3254_v7 = vadd.f32 1.0, %v4071_v1 }
0x11c0   : > { %4076 = vrcp.f32 %v3247_v11 }
0x11c1   : > { %4078 = vrcp.f32 %v3254_v7 }
0x11c9   : > { %v4075_v3 = vpop.eup %4074 }
0x11ca   : > { %v4077_v6 = vpop.eup %4076  ;;  %v3261_v31 = vmul.f32 %v4075_v3, %v4073_v2 }
0x11cb   : > { %v3260_v29 = vmul.f32 %v4077_v6, %v3258_v63  ;;  %v4079_v9 = vpop.eup %4078 }
0x11cd   : > { %v3262_v4 = vadd.f32 %v3261_v31, %v3260_v29 }
0x11cf   : > { %4080 = vtanh.f32 %v3262_v4 }
0x11d9   : > { %v4081_v10 = vpop.eup %4080 }
0x11da   : > { %v3264_v12 = vmul.f32 %v4081_v10, %v4079_v9 }
0x11dc   : > { %v3266_v30 = vrot.slane %v3264_v12, 2 }
0x11de   : > { %v3268_v32 = vadd.f32 %v3266_v30, %v3143_v43 }
0x11e0   : > { %v3269_v5 = vmul.f32 0.125, %v3268_v32 }
0x11e2   : > { %3270 = vst [vmem:[%s4317_s12 - $0x6] sm:$0xc0] %v3269_v5 }
0x11e3 PF: > { %p14_p4 = scmp.ge.s32.totalorder %s4232_s20, 4   ;;  %s5276_s15 = smov %s4170_s16 }
0x11e4   : > { %s5277_s16 = smov %s4174_s17  ;;  %s5278_s17 = smov %s4242_s23 }
0x11e5   : > { %s5279_s18 = smov %s4232_s20  ;;  %16 = sbr.rel (!%p14_p4) target bundleno = 3 (0x3), region = 90 }
0x11ec   :  { %3290 = vsyncpa [#allocation4], 1 }
0x11ed   :  { %3292 = vsyncpa [#allocation4 + $0x1], 1 }

// kernel: bilstm_classifier_forward.3
= control target key start
LH: loop header
LB: loop body
LE: loop exit
PB: predicated region body
PF: predicated region fallthrough
CT: control target
= control target key end

     0   :  { %s8224_s0 = inlined_call_operand.vmem [shape: bf16[16,16], index: 0, kind: input, shape index: {}]   ;;  %s8225_s1 = inlined_call_operand.hbm [shape: bf16[2,16,512], index: 1, kind: input, shape index: {}]   ;;  %s8226_s2 = inlined_call_operand.hbm [shape: bf16[2,128,512], index: 2, kind: input, shape index: {}]   ;;  %s8227_s3 = inlined_call_operand.hbm [shape: f32[2,1,512], index: 3, kind: input, shape index: {}]   ;;  %s8228_s4 = inlined_call_operand.vmem [shape: bf16[16,256], index: 4, kind: output, shape index: {}]  }
   0x1   :  { %8233 = sst [smem:[#allocation13_spill]] %s8225_s1 }
   0x2   :  { %8234 = sst [smem:[#allocation14_spill]] %s8226_s2 }
   0x3   :  { %9 = vsyncpa [#allocation4], 0 }
   0x4   :  { %11 = vsyncpa [#allocation4 + $0x1], 0 }
   0x5   :  { %12 = vsyncpa [#allocation6], 0 }
   0x6   :  { %14 = vsyncpa [#allocation6 + $0x1], 0  ;;  %s7016_s15 = smov 0   ;;  %s7018_s16 = smov 0  }
   0x7   :  { %s7020_s17 = smov 0   ;;  %s7022_s18 = smov 0  }
   0x8 LB: > { %8235 = sst [smem:[#allocation11_spill]] %s6977_s17  ;;  %s7035_s19 = sadd.s32 4294967295, %s6981_s18   ;;  %s6981_s18 = sphi %s7022_s18, %s8255_s18   ;;  %s6977_s17 = sphi %s7020_s17, %s8252_s17   ;;  %s6973_s16 = sphi %s7018_s16, %s8254_s16   ;;  %s6969_s15 = sphi %s7016_s15, %s8253_s15  }
   0x9   : > { %s7038_s20 = sadd.s32 1, %s6981_s18   ;;  %s48_s22 = sadd.s32 1, %s6977_s17 }
   0xa   : > { %s45_s21 = ssub.s32 %s6981_s18, %s7038_s20  ;;  %p55_p1 = scmp.ne.s32.totalorder %s6977_s17, %s6973_s16 }
   0xb   : > { %p46_p0 = scmp.eq.s32.totalorder %s45_s21, 0  ;;  %p56_p2 = scmp.eq.s32.totalorder %s6981_s18, 0 }
   0xc   : > { %p61_p3 = scmp.ne.s32.totalorder %s6973_s16, %s6969_s15  ;;  %p62_p5 = scmp.eq.s32.totalorder %s7035_s19, 0 }
   0xd   : > { %s7048_s23 = scalar_select %p46_p0, %s6977_s17, %s48_s22  }
   0xe   : > { %p57_p4 = por %p56_p2, %p55_p1  ;;  %p137_p6 = scmp.eq.s32.totalorder %s7035_s19, 1 }
   0xf   : > { %8236 = sst [smem:[#allocation12_spill]] %s7048_s23  ;;  %p7052_p7 = por %p62_p5, %p61_p3 }
  0x10   : > { %p6360_p8 = scmp.lt.s32.totalorder %s6981_s18, 2  ;;  %p7057_p9 = por %p137_p6, %p55_p1 }
  0x11   : > { %s8237_s24 = scalar_select %p7052_p7, 1, 0 }
  0x12   : > { %s8238_s25 = scalar_select %p7057_p9, 1, 0 }
  0x13   : > { %s7062_s26 = sand.u32 1, %s6977_s17   ;;  %p7064_p10 = pnand %p6360_p8, %p57_p4 }
  0x14   : > { %s187_s28 = sand.u32 1, %s6981_s18   ;;  %s5757_s29 = sshll.u32 %s7062_s26, 8 }
  0x15   : > { %s8239_s27 = scalar_select %p7064_p10, 1, 0 }
  0x16   : > { %s6342_s30 = sshll.u32 %s6981_s18, 12  ;;  %s8240_s2 = sld [smem:[#allocation14_spill]] }
  0x17   : > { %s191_s8 = scalar_lea.vmem [#allocation5], %s5757_s29  ;;  %s7080_s10 = scalar_lea.sflag [#allocation6], %s187_s28 }
  0x18   : > { %s198_s9 = sshll.u32 %s191_s8, 4  ;;  %p7086_p0 = pneg %p7064_p10  ;;  %s7077_s9 = int_to_ptr.vmem [resolvable:$true] %s198_s9 }
  0x1c   : > { %s7074_s7 = scalar_lea.hbm %s8240_s2, %s6342_s30  ;;  %s6858_s15 = scalar_lea.hbm %s8240_s2, 8192 }
  0x1d   : > { %s6853_s11 = scalar_lea.hbm %s7074_s7, 4096  ;;  %p6859_p3 = scmp.lt.u32.totalorder %s7074_s7, %s8240_s2 }
  0x1e   : > { %p6854_p13 = scmp.ne.s32.totalorder %s7074_s7, %s6853_s11  ;;  %p6860_p4 = scmp.lt.u32.totalorder %s6858_s15, %s6853_s11 }
  0x1f   : > { %p6862_p6 = scmp.lt.u32.totalorder %s6853_s11, %s7074_s7 }
  0x20   : > { %p6856_p1 = pnand %p7086_p0, %p6854_p13  ;;  %p6861_p5 = por %p6860_p4, %p6859_p3 }
  0x22   : > { %p6857_p2 = pneg %p6856_p1  ;;  %p6863_p8 = por %p6862_p6, %p6861_p5 }
  0x24   : > { %p6864_p11 = pnand %p6863_p8, %p6857_p2 }
  0x26   : > { %6867 = shalt.err (!%p6864_p11)
}
  0x27   : > { %s6868_s28 = scalar_lea.vmem %s7077_s9, 4096  ;;  %s6983_s29 = smov [#allocation5]  }
  0x28   : > { %p6869_p13 = scmp.ne.s32.totalorder %s7077_s9, %s6868_s28  ;;  %s6873_s30 = sshll.u32 %s6983_s29, 4  ;;  %s6874_s30 = int_to_ptr.vmem [resolvable:$false] %s6873_s30 }
  0x29   : > { %s6875_s5 = scalar_lea.vmem %s6874_s30, 8192  ;;  %p6876_p9 = scmp.lt.s32.totalorder %s7077_s9, %s6874_s30 }
  0x2a   : > { %p6871_p1 = pnand %p6869_p13, %p7086_p0  ;;  %p6877_p7 = scmp.lt.s32.totalorder %s6875_s5, %s6868_s28 }
  0x2c   : > { %p6872_p12 = pneg %p6871_p1  ;;  %p6878_p3 = por %p6877_p7, %p6876_p9 }
  0x2e   : > { %p6879_p4 = pnand %p6878_p3, %p6872_p12 }
  0x30   : > { %6882 = shalt.err (!%p6879_p4)
}
  0x31   : > { %s8230_s6 = smov 256   ;;  %s6985_s8 = smov 16  }
  0x32   : > { %6356 = dma.hbm_to_vmem [thread:$0]  (!%p7064_p10), %s7074_s7, 4096, %s7077_s9, %s7080_s10, %s8230_s6, %s8230_s6, %s6985_s8  }
  0x33   : > { %p8242_p7 = scmp.lt.s32.totalorder %s6981_s18, 3  ;;  %p8243_p9 = scmp.ge.s32.totalorder %s6981_s18, 1 }
  0x34   : > { %s5754_s13 = sshll.u32 %s7062_s26, 5  ;;  %s6341_s14 = sshll.u32 %s6981_s18, 9 }
  0x35   : > { %p7117_p11 = pnand %p8243_p9, %p8242_p7  ;;  %s8245_s1 = sld [smem:[#allocation13_spill]] }
  0x36   : > { %s170_s28 = scalar_lea.vmem [#allocation3], %s5754_s13  ;;  %s5760_s7 = sshll.u32 %s7062_s26, 2 }
  0x37   : > { %s8244_s11 = scalar_select %p7117_p11, 1, 0 }
  0x38   : > { %s177_s29 = sshll.u32 %s170_s28, 4  ;;  %s167_s9 = scalar_lea.sflag [#allocation4], %s7062_s26  ;;  %s7129_s29 = int_to_ptr.vmem [resolvable:$true] %s177_s29 }
  0x3b   : > { %s7126_s22 = scalar_lea.hbm %s8245_s1, %s6341_s14  ;;  %s6888_s14 = scalar_lea.hbm %s8245_s1, 1024 }
  0x3c   : > { %s6883_s30 = scalar_lea.hbm %s7126_s22, 512  ;;  %p6889_p6 = scmp.lt.u32.totalorder %s7126_s22, %s8245_s1 }
  0x3d   : > { %p6884_p12 = scmp.ne.s32.totalorder %s7126_s22, %s6883_s30  ;;  %p6890_p8 = scmp.lt.u32.totalorder %s6888_s14, %s6883_s30 }
  0x3e   : > { %p6892_p1 = scmp.lt.u32.totalorder %s6883_s30, %s7126_s22 }
  0x3f   : > { %p6886_p2 = pnand %p6884_p12, %p7086_p0  ;;  %p6891_p13 = por %p6890_p8, %p6889_p6 }
  0x41   : > { %p6887_p5 = pneg %p6886_p2  ;;  %p6893_p3 = por %p6892_p1, %p6891_p13 }
  0x43   : > { %p6894_p4 = pnand %p6893_p3, %p6887_p5 }
  0x45   : > { %6897 = shalt.err (!%p6894_p4)
}
  0x46   : > { %s6898_s13 = scalar_lea.vmem %s7129_s29, 512  ;;  %s6986_s6 = smov [#allocation3]  }
  0x47   : > { %p6899_p7 = scmp.ne.s32.totalorder %s7129_s29, %s6898_s13  ;;  %s6903_s28 = sshll.u32 %s6986_s6, 4  ;;  %s6904_s28 = int_to_ptr.vmem [resolvable:$false] %s6903_s28 }
  0x48   : > { %s6905_s5 = scalar_lea.vmem %s6904_s28, 1024  ;;  %p6906_p2 = scmp.lt.s32.totalorder %s7129_s29, %s6904_s28 }
  0x49   : > { %p6901_p9 = pnand %p6899_p7, %p7086_p0  ;;  %p6907_p11 = scmp.lt.s32.totalorder %s6905_s5, %s6898_s13 }
  0x4b   : > { %p6902_p12 = pneg %p6901_p9  ;;  %p6908_p6 = por %p6907_p11, %p6906_p2 }
  0x4d   : > { %p6909_p8 = pnand %p6908_p6, %p6902_p12 }
  0x4f   : > { %6912 = shalt.err (!%p6909_p8)
}
  0x50   : > { %s8246_s30 = smov 256   ;;  %s6343_s14 = sshll.u32 %s6981_s18, 6 }
  0x51   : > { %6353 = dma.hbm_to_vmem [thread:$0]  (!%p7064_p10), %s7126_s22, 512, %s7129_s29, %s167_s9, %s8246_s30, %s8246_s30, %s6985_s8  }
  0x52   : > { %s212_s15 = scalar_lea.vmem [#allocation7], %s5760_s7  ;;  %s218_s28 = scalar_lea.hbm %s8227_s3, %s6343_s14 }
  0x53   : > { %s220_s21 = sshll.u32 %s212_s15, 4  ;;  %s6913_s5 = scalar_lea.hbm %s218_s28, 64  ;;  %s221_s21 = int_to_ptr.vmem [resolvable:$true] %s220_s21 }
  0x54   : > { %p6914_p11 = scmp.ne.s32.totalorder %s218_s28, %s6913_s5  ;;  %s6918_s23 = scalar_lea.hbm %s8227_s3, 128 }
  0x55   : > { %p6919_p1 = scmp.lt.u32.totalorder %s218_s28, %s8227_s3  ;;  %p6920_p3 = scmp.lt.u32.totalorder %s6918_s23, %s6913_s5 }
  0x56   : > { %p6916_p5 = pnand %p6914_p11, %p7086_p0  ;;  %p6922_p7 = scmp.lt.u32.totalorder %s6913_s5, %s218_s28 }
  0x57   : > { %p6921_p4 = por %p6920_p3, %p6919_p1 }
  0x58   : > { %p6917_p13 = pneg %p6916_p5 }
  0x59   : > { %p6923_p9 = por %p6922_p7, %p6921_p4 }
  0x5b   : > { %p6924_p12 = pnand %p6923_p9, %p6917_p13 }
  0x5d   : > { %6927 = shalt.err (!%p6924_p12)
}
  0x5e   : > { %s6928_s18 = scalar_lea.vmem %s221_s21, 64  ;;  %s6987_s26 = smov [#allocation7]  }
  0x5f   : > { %p6929_p2 = scmp.ne.s32.totalorder %s221_s21, %s6928_s18  ;;  %s6933_s22 = sshll.u32 %s6987_s26, 4  ;;  %s6934_s22 = int_to_ptr.vmem [resolvable:$false] %s6933_s22 }
  0x60   : > { %s6935_s1 = scalar_lea.vmem %s6934_s22, 128  ;;  %p6936_p11 = scmp.lt.s32.totalorder %s221_s21, %s6934_s22 }
  0x61   : > { %p6931_p6 = pnand %p6929_p2, %p7086_p0  ;;  %p6937_p5 = scmp.lt.s32.totalorder %s6935_s1, %s6928_s18 }
  0x63   : > { %p6932_p8 = pneg %p6931_p6  ;;  %p6938_p10 = por %p6937_p5, %p6936_p11 }
  0x65   : > { %p6939_p1 = pnand %p6938_p10, %p6932_p8 }
  0x67   : > { %6942 = shalt.err (!%p6939_p1)
}
  0x68   : > { %p8247_p3 = scmp.ne.s32.totalorder %s8239_s27, 0  ;;  %p8248_p13 = scmp.ne.s32.totalorder %s8244_s11, 0 }
  0x69   : > { %s7180_s2 = sand.u32 (!%p8248_p13), 1, %s6973_s16   ;;  %p8249_p0 = scmp.ne.s32.totalorder (!%p8248_p13), %s8237_s24, 0 }
  0x6a   : > { %6359 = dma.hbm_to_vmem [thread:$0]  (!%p8247_p3), %s218_s28, 64, %s221_s21, %s7080_s10  }
  0x6b   : > { %229 = sbr.rel (%p8248_p13) target bundleno = 4590 (0x11ee), region = 36  ;;  %s5764_s17 = sshll.u32 (!%p8248_p13), %s7180_s2, 5 }
  0x6c   : > { %s232_s23 = scalar_lea.sflag (!%p8248_p13), [#allocation4], %s7180_s2  ;;  %s235_s12 = scalar_lea.vmem (!%p8248_p13), [#allocation3], %s5764_s17 }
  0x72   : > { %6960 = dma.done.wait (%p8249_p0), %s232_s23, 512  }
  0x73   : > { %6962 = vsyncadd (%p8249_p0), %s232_s23, 4294966784  ;;  %s240_s27 = sand.u32 1, %s7035_s19   ;;  %s5765_s10 = sshll.u32 %s7180_s2, 8 }
  0x74   : > { %s241_s11 = scalar_lea.sflag [#allocation6], %s240_s27  ;;  %s7190_s29 = scalar_lea.vmem [#allocation5], %s5765_s10 }
  0x75   : > { %6964 = dma.done.wait (%p8249_p0), %s241_s11, 4160  }
  0x76   : > { %6966 = vsyncadd (%p8249_p0), %s241_s11, 4294963136  ;;  %s5767_s7 = sshll.u32 %s7180_s2, 3  ;;  %v6988_v0 = vmov 0   ;;  %v6398_v1 = vld [vmem:[%s235_s12 + $0x4] ss:$16 sps:$4 sm:$0xff]   ;;  %vm341_vm0 = vcmask 130048   ;;  %v296_v6 = vlaneseq }
  0x77   : > { %377 = vmatprep.mubr.bf16.mxu0 %v6988_v0  ;;  %420 = vmatprep.mubr.bf16.mxu1 %v6988_v0  ;;  %v6400_v2 = vld [vmem:[%s235_s12 + $0xc] ss:$16 sps:$4 sm:$0xff]   ;;  %v6402_v3 = vld [vmem:[%s235_s12] ss:$16 sps:$4 sm:$0xff]   ;;  %v6403_v4 = vld [vmem:[%s235_s12 + $0x8] ss:$16 sps:$4 sm:$0xff]  }
  0x78   : > { %345 = vmatprep.subr.bf16.mxu0 %v6398_v1  ;;  %388 = vmatprep.subr.bf16.mxu1 %v6400_v2  ;;  %v6404_v5 = vld [vmem:[%s8224_s0] sm:$0xff]   ;;  %s5766_s24 = sshll.u32 %s7180_s2, 2  ;;  %v297_v7 = vshrl.u32 %v296_v6, 7  ;;  %s7203_s15 = scalar_lea.vmem [#allocation8], %s5767_s7 }
  0x79   : > { %346 = vmatpush1.bf16.msra.mxu0 %v6402_v3  ;;  %389 = vmatpush1.bf16.msra.mxu1 %v6403_v4  ;;  %s253_s14 = scalar_lea.vmem [#allocation7], %s5766_s24  ;;  %p5775_p10 = scmp.ne.s32.totalorder %s7035_s19, 0 }
  0x7a   : > { %v298_v8 = vsub.s32 0, %v297_v7  ;;  %v306_v9 = vsub.s32 2, %v297_v7  ;;  %v294_v10 = vld [vmem:[%s253_s14] sm:$0xf]  ;;  %v302_v11 = vsub.s32 1, %v297_v7  ;;  %v310_v12 = vsub.s32 3, %v297_v7 }
  0x7b   : > { %v7207_v33 = vld [vmem:[%s7190_s29 + $0x4] ss:$16 sps:$4 sm:$0xff] (!%p5775_p10)   ;;  %v7210_v34 = vld [vmem:[%s7190_s29] ss:$16 sps:$4 sm:$0xff] (!%p5775_p10)   ;;  %v6989_v35 = vmov (!%p5775_p10), 0  }
  0x7c   : > { %5773 = vmatmul.mubr.msk.bf16.vlgmr.msra.gmra.mrb[0].mxu0 %vm341_vm0, %v6404_v5  ;;  %5774 = vmatmul.mubr.msk.bf16.vlgmr.msra.gmra.mrb[0].mxu1 %vm341_vm0, %v6404_v5  ;;  %v299_v13 = vrot.slane %v294_v10, %v298_v8  ;;  %v307_v14 = vrot.slane %v294_v10, %v306_v9  ;;  %v303_v15 = vrot.slane %v294_v10, %v302_v11  ;;  %v7216_v36 = vld [vmem:[%s7190_s29 + $0x24] ss:$16 sps:$4 sm:$0xff] (!%p5775_p10)   ;;  %v7220_v37 = vld [vmem:[%s7190_s29 + $0x20] ss:$16 sps:$4 sm:$0xff] (!%p5775_p10)   ;;  %v7227_v39 = vld [vmem:[%s7190_s29 + $0xc] ss:$16 sps:$4 sm:$0xff] (!%p5775_p10)  }
  0x7d   : > { %v311_v16 = vrot.slane %v294_v10, %v310_v12  ;;  %671 = vmatprep.mubr.bf16.mxu0 (!%p5775_p10), %v6989_v35  ;;  %712 = vmatprep.mubr.bf16.mxu1 (!%p5775_p10), %v6989_v35  ;;  %v7224_v38 = vld [vmem:[%s7190_s29 + $0x44] ss:$16 sps:$4 sm:$0xff] (!%p5775_p10)   ;;  %v7230_v40 = vld [vmem:[%s7190_s29 + $0x8] ss:$16 sps:$4 sm:$0xff] (!%p5775_p10)   ;;  %v7234_v41 = vld [vmem:[%s7190_s29 + $0x40] ss:$16 sps:$4 sm:$0xff] (!%p5775_p10)  }
  0x7e   : > { %639 = vmatprep.subr.bf16.mxu0 (!%p5775_p10), %v7207_v33  ;;  %680 = vmatprep.subr.bf16.mxu1 (!%p5775_p10), %v7227_v39  ;;  %v7239_v42 = vld [vmem:[%s7190_s29 + $0x64] ss:$16 sps:$4 sm:$0xff] (!%p5775_p10)   ;;  %v7243_v43 = vld [vmem:[%s7190_s29 + $0x2c] ss:$16 sps:$4 sm:$0xff] (!%p5775_p10)   ;;  %v7246_v44 = vld [vmem:[%s7190_s29 + $0x28] ss:$16 sps:$4 sm:$0xff] (!%p5775_p10)  }
  0x7f   : > { %640 = vmatpush1.bf16.msra.mxu0 (!%p5775_p10), %v7210_v34  ;;  %681 = vmatpush1.bf16.msra.mxu1 (!%p5775_p10), %v7230_v40  ;;  %v7251_v45 = vld [vmem:[%s7190_s29 + $0x60] ss:$16 sps:$4 sm:$0xff] (!%p5775_p10)   ;;  %v7254_v46 = vld [vmem:[%s7190_s29 + $0x84] ss:$16 sps:$4 sm:$0xff] (!%p5775_p10)   ;;  %v7257_v47 = vld [vmem:[%s7190_s29 + $0x4c] ss:$16 sps:$4 sm:$0xff] (!%p5775_p10)  }
  0x80   : > { %641 = vmatprep.subr.bf16.mxu0 (!%p5775_p10), %v7216_v36  ;;  %682 = vmatprep.subr.bf16.mxu1 (!%p5775_p10), %v7243_v43  ;;  %v7262_v48 = vld [vmem:[%s7190_s29 + $0x48] ss:$16 sps:$4 sm:$0xff] (!%p5775_p10)   ;;  %v7266_v49 = vld [vmem:[%s7190_s29 + $0x6c] ss:$16 sps:$4 sm:$0xff] (!%p5775_p10)   ;;  %v7270_v50 = vld [vmem:[%s7190_s29 + $0x80] ss:$16 sps:$4 sm:$0xff] (!%p5775_p10)  }
  0x81   : > { %v7274_v51 = vld [vmem:[%s7190_s29 + $0xa4] ss:$16 sps:$4 sm:$0xff] (!%p5775_p10)   ;;  %v7278_v52 = vld [vmem:[%s7190_s29 + $0x68] ss:$16 sps:$4 sm:$0xff] (!%p5775_p10)   ;;  %v7282_v53 = vld [vmem:[%s7190_s29 + $0x8c] ss:$16 sps:$4 sm:$0xff] (!%p5775_p10)  }
  0x82   : > { %v7286_v54 = vld [vmem:[%s7190_s29 + $0xa0] ss:$16 sps:$4 sm:$0xff] (!%p5775_p10)   ;;  %v7289_v55 = vld [vmem:[%s7190_s29 + $0xc4] ss:$16 sps:$4 sm:$0xff] (!%p5775_p10)   ;;  %v7294_v56 = vld [vmem:[%s7190_s29 + $0x88] ss:$16 sps:$4 sm:$0xff] (!%p5775_p10)  }
  0x83   : > { %642 = vmatpush1.bf16.msra.mxu0 (!%p5775_p10), %v7220_v37  ;;  %683 = vmatpush1.bf16.msra.mxu1 (!%p5775_p10), %v7246_v44  ;;  %v7297_v57 = vld [vmem:[%s7190_s29 + $0xc0] ss:$16 sps:$4 sm:$0xff] (!%p5775_p10)   ;;  %v7301_v58 = vld [vmem:[%s7190_s29 + $0xac] ss:$16 sps:$4 sm:$0xff] (!%p5775_p10)   ;;  %v7304_v59 = vld [vmem:[%s7190_s29 + $0xe4] ss:$16 sps:$4 sm:$0xff] (!%p5775_p10)  }
  0x84   : > { %643 = vmatprep.subr.bf16.mxu0 (!%p5775_p10), %v7224_v38  ;;  %684 = vmatprep.subr.bf16.mxu1 (!%p5775_p10), %v7257_v47  ;;  %v7307_v60 = vld [vmem:[%s7190_s29 + $0xa8] ss:$16 sps:$4 sm:$0xff] (!%p5775_p10)   ;;  %v7311_v61 = vld [vmem:[%s7190_s29 + $0xcc] ss:$16 sps:$4 sm:$0xff] (!%p5775_p10)   ;;  %v7316_v62 = vld [vmem:[%s7190_s29 + $0xe0] ss:$16 sps:$4 sm:$0xff] (!%p5775_p10)  }
  0x85   : > { %v7320_v63 = vld [vmem:[%s7190_s29 + $0xc8] ss:$16 sps:$4 sm:$0xff] (!%p5775_p10)   ;;  %v7324_v0 = vld [vmem:[%s7190_s29 + $0xec] ss:$16 sps:$4 sm:$0xff] (!%p5775_p10)  }
  0x86   : > { %v7332_v1 = vld [vmem:[%s7190_s29 + $0xe8] ss:$16 sps:$4 sm:$0xff] (!%p5775_p10)  }
  0x87   : > { %644 = vmatpush1.bf16.msra.mxu0 (!%p5775_p10), %v7234_v41  ;;  %685 = vmatpush1.bf16.msra.mxu1 (!%p5775_p10), %v7262_v48 }
  0x88   : > { %645 = vmatprep.subr.bf16.mxu0 (!%p5775_p10), %v7239_v42  ;;  %686 = vmatprep.subr.bf16.mxu1 (!%p5775_p10), %v7266_v49 }
  0x8b   : > { %646 = vmatpush1.bf16.msra.mxu0 (!%p5775_p10), %v7251_v45  ;;  %687 = vmatpush1.bf16.msra.mxu1 (!%p5775_p10), %v7278_v52 }
  0x8c   : > { %647 = vmatprep.subr.bf16.mxu0 (!%p5775_p10), %v7254_v46  ;;  %688 = vmatprep.subr.bf16.mxu1 (!%p5775_p10), %v7282_v53 }
  0x8f   : > { %648 = vmatpush1.bf16.msra.mxu0 (!%p5775_p10), %v7270_v50  ;;  %689 = vmatpush1.bf16.msra.mxu1 (!%p5775_p10), %v7294_v56 }
  0x90   : > { %649 = vmatprep.subr.bf16.mxu0 (!%p5775_p10), %v7274_v51  ;;  %690 = vmatprep.subr.bf16.mxu1 (!%p5775_p10), %v7301_v58 }
  0x93   : > { %650 = vmatpush1.bf16.msra.mxu0 (!%p5775_p10), %v7286_v54  ;;  %691 = vmatpush1.bf16.msra.mxu1 (!%p5775_p10), %v7307_v60 }
  0x94   : > { %651 = vmatprep.subr.bf16.mxu0 (!%p5775_p10), %v7289_v55  ;;  %692 = vmatprep.subr.bf16.mxu1 (!%p5775_p10), %v7311_v61 }
  0x97   : > { %652 = vmatpush1.bf16.msra.mxu0 (!%p5775_p10), %v7297_v57  ;;  %693 = vmatpush1.bf16.msra.mxu1 (!%p5775_p10), %v7320_v63 }
  0x98   : > { %653 = vmatprep.subr.bf16.mxu0 (!%p5775_p10), %v7304_v59  ;;  %694 = vmatprep.subr.bf16.mxu1 (!%p5775_p10), %v7324_v0 }
  0x9b   : > { %654 = vmatpush1.bf16.msra.mxu0 (!%p5775_p10), %v7316_v62  ;;  %695 = vmatpush1.bf16.msra.mxu1 (!%p5775_p10), %v7332_v1 }
  0x9c   : > { %947 = vmatprep.subr.bf16.mxu0 (!%p5775_p10), %v7207_v33  ;;  %988 = vmatprep.subr.bf16.mxu1 (!%p5775_p10), %v7227_v39 }
 0x14f   : > { %v379_v17 = vpop.f32.mrb[0].mxu0  ;;  %v422_v18 = vpop.f32.mrb[0].mxu1  ;;  %442 = sbr.rel (%p5775_p10) target bundleno = 2441 (0x989), region = 52 }
 0x150   : > { %v380_v19 = vadd.f32 %v379_v17, %v299_v13  ;;  %v423_v20 = vadd.f32 %v422_v18, %v307_v14  ;;  %v381_v21 = vpop.f32.mrb[1].mxu0  ;;  %v424_v22 = vpop.f32.mrb[1].mxu1 }
 0x151   : > { %v382_v23 = vadd.f32 %v381_v21, %v303_v15  ;;  %v425_v24 = vadd.f32 %v424_v22, %v311_v16  ;;  %v383_v25 = vpop.f32.mrb[2].mxu0  ;;  %v426_v26 = vpop.f32.mrb[2].mxu1 }
 0x152   : > { %431 = vst [vmem:[#allocation2] sm:$0xff] %v380_v19  ;;  %433 = vst [vmem:[#allocation2 + $0x10] sm:$0xff] %v423_v20  ;;  %v384_v27 = vadd.f32 %v383_v25, %v299_v13  ;;  %v427_v28 = vadd.f32 %v426_v26, %v307_v14  ;;  %v385_v29 = vpop.f32.mrb[3].mxu0  ;;  %v428_v30 = vpop.f32.mrb[3].mxu1  ;;  %672 = vmatmul.mubr.bf16.vlgmr.msra.gmra.mrb[0].mxu0 (!%p5775_p10), %v6989_v35  ;;  %713 = vmatmul.mubr.bf16.vlgmr.msra.gmra.mrb[0].mxu1 (!%p5775_p10), %v6989_v35 }
 0x153   : > { %432 = vst [vmem:[#allocation2 + $0x8] sm:$0xff] %v382_v23  ;;  %434 = vst [vmem:[#allocation2 + $0x18] sm:$0xff] %v425_v24  ;;  %v386_v31 = vadd.f32 %v385_v29, %v303_v15  ;;  %v429_v32 = vadd.f32 %v428_v30, %v311_v16  ;;  %948 = vmatpush1.bf16.msra.mxu0 (!%p5775_p10), %v7210_v34  ;;  %979 = vmatprep.mubr.bf16.mxu0 (!%p5775_p10), %v6989_v35 }
 0x154   : > { %435 = vst [vmem:[#allocation2 + $0x20] sm:$0xff] %v384_v27  ;;  %437 = vst [vmem:[#allocation2 + $0x30] sm:$0xff] %v427_v28  ;;  %949 = vmatprep.subr.bf16.mxu0 (!%p5775_p10), %v7216_v36  ;;  %989 = vmatpush1.bf16.msra.mxu1 (!%p5775_p10), %v7230_v40 }
 0x155   : > { %436 = vst [vmem:[#allocation2 + $0x28] sm:$0xff] %v386_v31  ;;  %438 = vst [vmem:[#allocation2 + $0x38] sm:$0xff] %v429_v32  ;;  %990 = vmatprep.subr.bf16.mxu1 (!%p5775_p10), %v7243_v43  ;;  %1020 = vmatprep.mubr.bf16.mxu1 (!%p5775_p10), %v6989_v35 }
 0x157   : > { %950 = vmatpush1.bf16.msra.mxu0 %v7220_v37 }
 0x158   : > { %951 = vmatprep.subr.bf16.mxu0 %v7224_v38  ;;  %991 = vmatpush1.bf16.msra.mxu1 %v7246_v44 }
 0x159   : > { %992 = vmatprep.subr.bf16.mxu1 %v7257_v47  ;;  %v443_v2 = vld [vmem:[#allocation2] sm:$0x3]  ;;  %v445_v18 = vld [vmem:[#allocation2 + $0x10] sm:$0x3] }
 0x15a   : > { %v444_v3 = vld [vmem:[#allocation2 + $0x8] sm:$0x3]  ;;  %v446_v12 = vld [vmem:[#allocation2 + $0x18] sm:$0x3] }
 0x15b   : > { %952 = vmatpush1.bf16.msra.mxu0 %v7234_v41 }
 0x15c   : > { %953 = vmatprep.subr.bf16.mxu0 %v7239_v42  ;;  %993 = vmatpush1.bf16.msra.mxu1 %v7262_v48 }
 0x15d   : > { %994 = vmatprep.subr.bf16.mxu1 %v7266_v49 }
 0x15f   : > { %954 = vmatpush1.bf16.msra.mxu0 %v7251_v45 }
 0x160   : > { %955 = vmatprep.subr.bf16.mxu0 %v7254_v46  ;;  %995 = vmatpush1.bf16.msra.mxu1 %v7278_v52 }
 0x161   : > { %996 = vmatprep.subr.bf16.mxu1 %v7282_v53 }
 0x163   : > { %956 = vmatpush1.bf16.msra.mxu0 %v7270_v50 }
 0x164   : > { %957 = vmatprep.subr.bf16.mxu0 %v7274_v51  ;;  %997 = vmatpush1.bf16.msra.mxu1 %v7294_v56 }
 0x165   : > { %998 = vmatprep.subr.bf16.mxu1 %v7301_v58 }
 0x167   : > { %958 = vmatpush1.bf16.msra.mxu0 %v7286_v54 }
 0x168   : > { %959 = vmatprep.subr.bf16.mxu0 %v7289_v55  ;;  %999 = vmatpush1.bf16.msra.mxu1 %v7307_v60 }
 0x169   : > { %1000 = vmatprep.subr.bf16.mxu1 %v7311_v61 }
 0x16b   : > { %960 = vmatpush1.bf16.msra.mxu0 %v7297_v57 }
 0x16c   : > { %961 = vmatprep.subr.bf16.mxu0 %v7304_v59  ;;  %1001 = vmatpush1.bf16.msra.mxu1 %v7320_v63 }
 0x16d   : > { %1002 = vmatprep.subr.bf16.mxu1 %v7324_v0 }
 0x16f   : > { %962 = vmatpush1.bf16.msra.mxu0 %v7316_v62 }
 0x170   : > { %1273 = vmatprep.subr.bf16.mxu0 %v7207_v33  ;;  %1003 = vmatpush1.bf16.msra.mxu1 %v7332_v1 }
 0x171   : > { %1314 = vmatprep.subr.bf16.mxu1 %v7227_v39 }
 0x225   : > { %v673_v4 = vpop.f32.mrb[0].mxu0  ;;  %v714_v13 = vpop.f32.mrb[0].mxu1 }
 0x226   : > { %v721_v5 = vadd.f32 %v673_v4, %v443_v2  ;;  %v675_v6 = vpop.f32.mrb[1].mxu0  ;;  %v716_v14 = vpop.f32.mrb[1].mxu1  ;;  %v723_v20 = vadd.f32 %v714_v13, %v445_v18 }
 0x227   : > { %v722_v7 = vadd.f32 %v675_v6, %v444_v3  ;;  %v677_v8 = vpop.f32.mrb[2].mxu0  ;;  %v724_v15 = vadd.f32 %v716_v14, %v446_v12  ;;  %v718_v16 = vpop.f32.mrb[2].mxu1  ;;  %v751_v6 = vld [vmem:[#allocation2] sm:$0xc] }
 0x228   : > { %v5808_v9 = vmul.f32 -1.442695, %v721_v5  ;;  %v678_v10 = vpop.f32.mrb[3].mxu0  ;;  %v719_v17 = vpop.f32.mrb[3].mxu1 }
 0x229   : > { %v5809_v11 = vmul.f32 -1.442695, %v722_v7  ;;  %v5810_v19 = vmul.f32 -1.442695, %v724_v15  ;;  %v752_v10 = vld [vmem:[#allocation2 + $0x8] sm:$0xc] }
 0x22a   : > { %6501 = vpow2.f32 %v5808_v9 }
 0x22b   : > { %6503 = vpow2.f32 %v5809_v11 }
 0x22c   : > { %6505 = vpow2.f32 %v5810_v19 }
 0x22d   : > { %6507 = vtanh.f32 %v723_v20 }
 0x234   : > { %v6502_v21 = vpop.eup %6501 }
 0x235   : > { %v6504_v22 = vpop.eup %6503  ;;  %v728_v23 = vadd.f32 1.0, %v6502_v21 }
 0x236   : > { %v734_v24 = vadd.f32 1.0, %v6504_v22  ;;  %v6506_v25 = vpop.eup %6505 }
 0x237   : > { %6509 = vrcp.f32 %v728_v23  ;;  %v6508_v26 = vpop.eup %6507  ;;  %v741_v28 = vadd.f32 1.0, %v6506_v25 }
 0x238   : > { %6511 = vrcp.f32 %v734_v24  ;;  %v753_v24 = vld [vmem:[#allocation2 + $0x10] sm:$0xc] }
 0x239   : > { %6513 = vrcp.f32 %v741_v28 }
 0x241   : > { %v6510_v27 = vpop.eup %6509 }
 0x242   : > { %v6512_v29 = vpop.eup %6511  ;;  %v745_v30 = vmul.f32 %v6510_v27, %v6508_v26 }
 0x243   : > { %v744_v31 = vmul.f32 0.0, %v6512_v29  ;;  %v6514_v2 = vpop.eup %6513 }
 0x245   : > { %v7374_v32 = vadd.f32 %v745_v30, %v744_v31 }
 0x247   : > { %6515 = vtanh.f32 %v7374_v32 }
 0x251   : > { %v6516_v3 = vpop.eup %6515 }
 0x252   : > { %v748_v4 = vmul.f32 %v6516_v3, %v6514_v2 }
 0x254   : > { %v749_v5 = vpack.c.bf16 %v748_v4, %v748_v4  ;;  %v1065_v4 = vrot.slane %v7374_v32, 6 }
 0x256   : > { %750 = vst [vmem:[%s7203_s15] sm:$0x1] %v749_v5  ;;  %980 = vmatmul.mubr.bf16.vlgmr.msra.gmra.mrb[4].mxu0 %v749_v5  ;;  %1021 = vmatmul.mubr.bf16.vlgmr.msra.gmra.mrb[4].mxu1 %v749_v5 }
 0x257   : > { %1274 = vmatpush1.bf16.msra.mxu0 %v7210_v34  ;;  %1315 = vmatpush1.bf16.msra.mxu1 %v7230_v40 }
 0x258   : > { %1275 = vmatprep.subr.bf16.mxu0 %v7216_v36  ;;  %1316 = vmatprep.subr.bf16.mxu1 %v7243_v43 }
 0x259   : > { %1305 = vmatprep.mubr.bf16.mxu0 %v6989_v35  ;;  %1346 = vmatprep.mubr.bf16.mxu1 %v6989_v35 }
 0x25b   : > { %1276 = vmatpush1.bf16.msra.mxu0 %v7220_v37  ;;  %1317 = vmatpush1.bf16.msra.mxu1 %v7246_v44 }
 0x25c   : > { %1277 = vmatprep.subr.bf16.mxu0 %v7224_v38  ;;  %1318 = vmatprep.subr.bf16.mxu1 %v7257_v47 }
 0x25f   : > { %1278 = vmatpush1.bf16.msra.mxu0 %v7234_v41  ;;  %1319 = vmatpush1.bf16.msra.mxu1 %v7262_v48 }
 0x260   : > { %1279 = vmatprep.subr.bf16.mxu0 %v7239_v42  ;;  %1320 = vmatprep.subr.bf16.mxu1 %v7266_v49 }
 0x263   : > { %1280 = vmatpush1.bf16.msra.mxu0 %v7251_v45  ;;  %1321 = vmatpush1.bf16.msra.mxu1 %v7278_v52 }
 0x264   : > { %1281 = vmatprep.subr.bf16.mxu0 %v7254_v46  ;;  %1322 = vmatprep.subr.bf16.mxu1 %v7282_v53 }
 0x267   : > { %1282 = vmatpush1.bf16.msra.mxu0 %v7270_v50  ;;  %1323 = vmatpush1.bf16.msra.mxu1 %v7294_v56 }
 0x268   : > { %1283 = vmatprep.subr.bf16.mxu0 %v7274_v51  ;;  %1324 = vmatprep.subr.bf16.mxu1 %v7301_v58 }
 0x26b   : > { %1284 = vmatpush1.bf16.msra.mxu0 %v7286_v54  ;;  %1325 = vmatpush1.bf16.msra.mxu1 %v7307_v60 }
 0x26c   : > { %1285 = vmatprep.subr.bf16.mxu0 %v7289_v55  ;;  %1326 = vmatprep.subr.bf16.mxu1 %v7311_v61 }
 0x26f   : > { %1286 = vmatpush1.bf16.msra.mxu0 %v7297_v57  ;;  %1327 = vmatpush1.bf16.msra.mxu1 %v7320_v63 }
 0x270   : > { %1287 = vmatprep.subr.bf16.mxu0 %v7304_v59  ;;  %1328 = vmatprep.subr.bf16.mxu1 %v7324_v0 }
 0x273   : > { %1288 = vmatpush1.bf16.msra.mxu0 %v7316_v62  ;;  %1329 = vmatpush1.bf16.msra.mxu1 %v7332_v1 }
 0x274   : > { %1599 = vmatprep.subr.bf16.mxu0 %v7207_v33  ;;  %1640 = vmatprep.subr.bf16.mxu1 %v7227_v39  ;;  %v754_v33 = vld [vmem:[#allocation2 + $0x18] sm:$0xc] }
 0x329   : > { %v981_v7 = vpop.f32.mrb[4].mxu0  ;;  %v1022_v8 = vpop.f32.mrb[4].mxu1 }
 0x32a   : > { %v1033_v9 = vrot.slane %v981_v7, 6  ;;  %v983_v11 = vpop.f32.mrb[5].mxu0  ;;  %v1024_v12 = vpop.f32.mrb[5].mxu1  ;;  %v1035_v23 = vrot.slane %v1022_v8, 6 }
 0x32b   : > { %v1034_v13 = vrot.slane %v983_v11, 6  ;;  %v985_v14 = vpop.f32.mrb[6].mxu0  ;;  %v1026_v15 = vpop.f32.mrb[6].mxu1  ;;  %v1036_v22 = vrot.slane %v1024_v12, 6 }
 0x32c   : > { %v1041_v16 = vadd.f32 %v1033_v9, %v751_v6  ;;  %v986_v17 = vpop.f32.mrb[7].mxu0  ;;  %v1027_v18 = vpop.f32.mrb[7].mxu1  ;;  %v1043_v26 = vadd.f32 %v1035_v23, %v753_v24  ;;  %v7457_v23 = vld [vmem:[%s7190_s29 + $0x4] ss:$16 sps:$4 sm:$0xff]   ;;  %v7460_v24 = vld [vmem:[%s7190_s29 + $0xc] ss:$16 sps:$4 sm:$0xff]  }
 0x32d   : > { %v1042_v19 = vadd.f32 %v1034_v13, %v752_v10  ;;  %v1044_v39 = vadd.f32 %v1036_v22, %v754_v33 }
 0x32e   : > { %v5843_v20 = vmul.f32 -1.442695, %v1041_v16 }
 0x32f   : > { %v5844_v21 = vmul.f32 -1.442695, %v1042_v19  ;;  %v5845_v25 = vmul.f32 -1.442695, %v1044_v39 }
 0x330   : > { %6517 = vpow2.f32 %v5843_v20 }
 0x331   : > { %6519 = vpow2.f32 %v5844_v21 }
 0x332   : > { %6521 = vpow2.f32 %v5845_v25  ;;  %v7463_v25 = vld [vmem:[%s7190_s29] ss:$16 sps:$4 sm:$0xff]  }
 0x333   : > { %6523 = vtanh.f32 %v1043_v26  ;;  %v7466_v26 = vld [vmem:[%s7190_s29 + $0x8] ss:$16 sps:$4 sm:$0xff]  }
 0x33a   : > { %v6518_v27 = vpop.eup %6517 }
 0x33b   : > { %v6520_v28 = vpop.eup %6519  ;;  %v1048_v29 = vadd.f32 1.0, %v6518_v27  ;;  %v7473_v27 = vld [vmem:[%s7190_s29 + $0x24] ss:$16 sps:$4 sm:$0xff]  }
 0x33c   : > { %v1054_v30 = vadd.f32 1.0, %v6520_v28  ;;  %v6522_v31 = vpop.eup %6521  ;;  %v7476_v28 = vld [vmem:[%s7190_s29 + $0x2c] ss:$16 sps:$4 sm:$0xff]  }
 0x33d   : > { %6525 = vrcp.f32 %v1048_v29  ;;  %v6524_v2 = vpop.eup %6523  ;;  %v1061_v7 = vadd.f32 1.0, %v6522_v31  ;;  %v7479_v29 = vld [vmem:[%s7190_s29 + $0x20] ss:$16 sps:$4 sm:$0xff]   ;;  %v7489_v31 = vld [vmem:[%s7190_s29 + $0x44] ss:$16 sps:$4 sm:$0xff]  }
 0x33e   : > { %6527 = vrcp.f32 %v1054_v30  ;;  %v7482_v30 = vld [vmem:[%s7190_s29 + $0x28] ss:$16 sps:$4 sm:$0xff]  }
 0x33f   : > { %6529 = vrcp.f32 %v1061_v7  ;;  %v7511_v7 = vld [vmem:[%s7190_s29 + $0x60] ss:$16 sps:$4 sm:$0xff]  }
 0x347   : > { %v6526_v3 = vpop.eup %6525 }
 0x348   : > { %v6528_v5 = vpop.eup %6527  ;;  %v1068_v6 = vmul.f32 %v6526_v3, %v6524_v2  ;;  %v7492_v2 = vld [vmem:[%s7190_s29 + $0x4c] ss:$16 sps:$4 sm:$0xff]   ;;  %v7495_v3 = vld [vmem:[%s7190_s29 + $0x40] ss:$16 sps:$4 sm:$0xff]  }
 0x349   : > { %v1067_v8 = vmul.f32 %v6528_v5, %v1065_v4  ;;  %v6530_v10 = vpop.eup %6529  ;;  %v7498_v4 = vld [vmem:[%s7190_s29 + $0x48] ss:$16 sps:$4 sm:$0xff]   ;;  %v7505_v5 = vld [vmem:[%s7190_s29 + $0x64] ss:$16 sps:$4 sm:$0xff]  }
 0x34b   : > { %v7413_v9 = vadd.f32 %v1068_v6, %v1067_v8  ;;  %v7508_v6 = vld [vmem:[%s7190_s29 + $0x6c] ss:$16 sps:$4 sm:$0xff]   ;;  %v7514_v8 = vld [vmem:[%s7190_s29 + $0x68] ss:$16 sps:$4 sm:$0xff]  }
 0x34d   : > { %6531 = vtanh.f32 %v7413_v9  ;;  %v1391_v32 = vrot.slane %v7413_v9, 6  ;;  %v7519_v9 = vld [vmem:[%s7190_s29 + $0x84] ss:$16 sps:$4 sm:$0xff]  }
 0x357   : > { %v6532_v11 = vpop.eup %6531 }
 0x358   : > { %v1071_v12 = vmul.f32 %v6532_v11, %v6530_v10  ;;  %v7524_v10 = vld [vmem:[%s7190_s29 + $0x80] ss:$16 sps:$4 sm:$0xff]   ;;  %v7527_v11 = vld [vmem:[%s7190_s29 + $0x88] ss:$16 sps:$4 sm:$0xff]  }
 0x35a   : > { %v1072_v13 = vpack.c.bf16 %v1071_v12, %v1071_v12  ;;  %v7530_v12 = vld [vmem:[%s7190_s29 + $0x8c] ss:$16 sps:$4 sm:$0xff]  }
 0x35c   : > { %1073 = vst [vmem:[%s7203_s15] sm:$0x2] %v1072_v13  ;;  %v1111_v14 = vrot.slane %v1072_v13, 1  ;;  %v7534_v13 = vld [vmem:[%s7190_s29 + $0xa4] ss:$16 sps:$4 sm:$0xff]  }
 0x35e   : > { %1306 = vmatmul.mubr.bf16.vlgmr.msra.gmra.mrb[8].mxu0 %v1111_v14  ;;  %1347 = vmatmul.mubr.bf16.vlgmr.msra.gmra.mrb[8].mxu1 %v1111_v14  ;;  %v7537_v14 = vld [vmem:[%s7190_s29 + $0xac] ss:$16 sps:$4 sm:$0xff]  }
 0x35f   : > { %1600 = vmatpush1.bf16.msra.mxu0 %v7210_v34  ;;  %1641 = vmatpush1.bf16.msra.mxu1 %v7230_v40  ;;  %v1074_v34 = vld [vmem:[#allocation2] sm:$0x30]  ;;  %v1075_v40 = vld [vmem:[#allocation2 + $0x8] sm:$0x30] }
 0x360   : > { %1601 = vmatprep.subr.bf16.mxu0 %v7216_v36  ;;  %1642 = vmatprep.subr.bf16.mxu1 %v7243_v43 }
 0x361   : > { %1631 = vmatprep.mubr.bf16.mxu0 %v6989_v35  ;;  %1672 = vmatprep.mubr.bf16.mxu1 %v6989_v35 }
 0x363   : > { %1602 = vmatpush1.bf16.msra.mxu0 %v7220_v37  ;;  %1643 = vmatpush1.bf16.msra.mxu1 %v7246_v44 }
 0x364   : > { %1603 = vmatprep.subr.bf16.mxu0 %v7224_v38  ;;  %1644 = vmatprep.subr.bf16.mxu1 %v7257_v47 }
 0x367   : > { %1604 = vmatpush1.bf16.msra.mxu0 %v7234_v41  ;;  %1645 = vmatpush1.bf16.msra.mxu1 %v7262_v48 }
 0x368   : > { %1605 = vmatprep.subr.bf16.mxu0 %v7239_v42  ;;  %1646 = vmatprep.subr.bf16.mxu1 %v7266_v49 }
 0x36b   : > { %1606 = vmatpush1.bf16.msra.mxu0 %v7251_v45  ;;  %1647 = vmatpush1.bf16.msra.mxu1 %v7278_v52 }
 0x36c   : > { %1607 = vmatprep.subr.bf16.mxu0 %v7254_v46  ;;  %1648 = vmatprep.subr.bf16.mxu1 %v7282_v53  ;;  %v1077_v53 = vld [vmem:[#allocation2 + $0x18] sm:$0x30] }
 0x36f   : > { %1608 = vmatpush1.bf16.msra.mxu0 %v7270_v50  ;;  %1649 = vmatpush1.bf16.msra.mxu1 %v7294_v56  ;;  %v1076_v56 = vld [vmem:[#allocation2 + $0x10] sm:$0x30] }
 0x370   : > { %1609 = vmatprep.subr.bf16.mxu0 %v7274_v51  ;;  %1650 = vmatprep.subr.bf16.mxu1 %v7301_v58 }
 0x373   : > { %1610 = vmatpush1.bf16.msra.mxu0 %v7286_v54  ;;  %1651 = vmatpush1.bf16.msra.mxu1 %v7307_v60 }
 0x374   : > { %1611 = vmatprep.subr.bf16.mxu0 %v7289_v55  ;;  %1652 = vmatprep.subr.bf16.mxu1 %v7311_v61 }
 0x377   : > { %1612 = vmatpush1.bf16.msra.mxu0 %v7297_v57  ;;  %1653 = vmatpush1.bf16.msra.mxu1 %v7320_v63 }
 0x378   : > { %1613 = vmatprep.subr.bf16.mxu0 %v7304_v59  ;;  %1654 = vmatprep.subr.bf16.mxu1 %v7324_v0 }
 0x37b   : > { %1614 = vmatpush1.bf16.msra.mxu0 %v7316_v62  ;;  %1655 = vmatpush1.bf16.msra.mxu1 %v7332_v1 }
 0x37c   : > { %1925 = vmatprep.subr.bf16.mxu0 %v7457_v23  ;;  %1966 = vmatprep.subr.bf16.mxu1 %v7460_v24 }
 0x431   : > { %v1307_v36 = vpop.f32.mrb[8].mxu0  ;;  %v1348_v37 = vpop.f32.mrb[8].mxu1 }
 0x432   : > { %v1359_v38 = vrot.slane %v1307_v36, 4  ;;  %v1309_v41 = vpop.f32.mrb[9].mxu0  ;;  %v1350_v42 = vpop.f32.mrb[9].mxu1  ;;  %v1361_v55 = vrot.slane %v1348_v37, 4  ;;  %v7546_v36 = vld [vmem:[%s7190_s29 + $0xa8] ss:$16 sps:$4 sm:$0xff]  }
 0x433   : > { %v1360_v43 = vrot.slane %v1309_v41, 4  ;;  %v1311_v44 = vpop.f32.mrb[10].mxu0  ;;  %v1352_v45 = vpop.f32.mrb[10].mxu1  ;;  %v1362_v52 = vrot.slane %v1350_v42, 4  ;;  %v7551_v37 = vld [vmem:[%s7190_s29 + $0xc4] ss:$16 sps:$4 sm:$0xff]  }
 0x434   : > { %v1367_v46 = vadd.f32 %v1359_v38, %v1074_v34  ;;  %v1312_v47 = vpop.f32.mrb[11].mxu0  ;;  %v1353_v48 = vpop.f32.mrb[11].mxu1  ;;  %v1369_v58 = vadd.f32 %v1361_v55, %v1076_v56  ;;  %v7543_v34 = vld [vmem:[%s7190_s29 + $0xa0] ss:$16 sps:$4 sm:$0xff]   ;;  %v7554_v38 = vld [vmem:[%s7190_s29 + $0xcc] ss:$16 sps:$4 sm:$0xff]  }
 0x435   : > { %v1368_v49 = vadd.f32 %v1360_v43, %v1075_v40  ;;  %v1370_v54 = vadd.f32 %v1362_v52, %v1077_v53  ;;  %v7559_v40 = vld [vmem:[%s7190_s29 + $0xc0] ss:$16 sps:$4 sm:$0xff]   ;;  %v7562_v41 = vld [vmem:[%s7190_s29 + $0xc8] ss:$16 sps:$4 sm:$0xff]   ;;  %v7567_v42 = vld [vmem:[%s7190_s29 + $0xe4] ss:$16 sps:$4 sm:$0xff]  }
 0x436   : > { %v5878_v50 = vmul.f32 -1.442695, %v1367_v46  ;;  %v7570_v43 = vld [vmem:[%s7190_s29 + $0xec] ss:$16 sps:$4 sm:$0xff]   ;;  %v7575_v44 = vld [vmem:[%s7190_s29 + $0xe0] ss:$16 sps:$4 sm:$0xff]  }
 0x437   : > { %v5879_v51 = vmul.f32 -1.442695, %v1368_v49  ;;  %v5880_v57 = vmul.f32 -1.442695, %v1370_v54  ;;  %v7578_v45 = vld [vmem:[%s7190_s29 + $0xe8] ss:$16 sps:$4 sm:$0xff]  }
 0x438   : > { %6533 = vpow2.f32 %v5878_v50  ;;  %v1400_v46 = vld [vmem:[#allocation2] sm:$0xc0]  ;;  %v1401_v50 = vld [vmem:[#allocation2 + $0x8] sm:$0xc0] }
 0x439   : > { %6535 = vpow2.f32 %v5879_v51 }
 0x43a   : > { %6537 = vpow2.f32 %v5880_v57 }
 0x43b   : > { %6539 = vtanh.f32 %v1369_v58 }
 0x442   : > { %v6534_v59 = vpop.eup %6533 }
 0x443   : > { %v6536_v60 = vpop.eup %6535  ;;  %v1374_v61 = vadd.f32 1.0, %v6534_v59 }
 0x444   : > { %v1380_v62 = vadd.f32 1.0, %v6536_v60  ;;  %v6538_v63 = vpop.eup %6537 }
 0x445   : > { %6541 = vrcp.f32 %v1374_v61  ;;  %v6540_v0 = vpop.eup %6539  ;;  %v1387_v17 = vadd.f32 1.0, %v6538_v63  ;;  %v1403_v63 = vld [vmem:[#allocation2 + $0x18] sm:$0xc0] }
 0x446   : > { %6543 = vrcp.f32 %v1380_v62 }
 0x447   : > { %6545 = vrcp.f32 %v1387_v17 }
 0x44f   : > { %v6542_v1 = vpop.eup %6541 }
 0x450   : > { %v6544_v15 = vpop.eup %6543  ;;  %v1394_v16 = vmul.f32 %v6542_v1, %v6540_v0 }
 0x451   : > { %v1393_v18 = vmul.f32 %v6544_v15, %v1391_v32  ;;  %v6546_v20 = vpop.eup %6545  ;;  %v1402_v32 = vld [vmem:[#allocation2 + $0x10] sm:$0xc0] }
 0x453   : > { %v7450_v19 = vadd.f32 %v1394_v16, %v1393_v18 }
 0x455   : > { %6547 = vtanh.f32 %v7450_v19 }
 0x45f   : > { %v6548_v21 = vpop.eup %6547 }
 0x460   : > { %v1397_v22 = vmul.f32 %v6548_v21, %v6546_v20 }
 0x462   : > { %v1398_v33 = vpack.c.bf16 %v1397_v22, %v1397_v22 }
 0x464   : > { %1399 = vst [vmem:[%s7203_s15] sm:$0x4] %v1398_v33  ;;  %v1437_v39 = vrot.slane %v1398_v33, 2 }
 0x466   : > { %1632 = vmatmul.mubr.bf16.vlgmr.msra.gmra.mrb[12].mxu0 %v1437_v39  ;;  %1673 = vmatmul.mubr.bf16.vlgmr.msra.gmra.mrb[12].mxu1 %v1437_v39 }
 0x467   : > { %1957 = vmatprep.mubr.bf16.mxu0 %v6989_v35  ;;  %1998 = vmatprep.mubr.bf16.mxu1 %v6989_v35 }
 0x468   : > { %1926 = vmatpush1.bf16.msra.mxu0 %v7463_v25  ;;  %1967 = vmatpush1.bf16.msra.mxu1 %v7466_v26 }
 0x469   : > { %1927 = vmatprep.subr.bf16.mxu0 %v7473_v27  ;;  %1968 = vmatprep.subr.bf16.mxu1 %v7476_v28 }
 0x46c   : > { %1928 = vmatpush1.bf16.msra.mxu0 %v7479_v29  ;;  %1969 = vmatpush1.bf16.msra.mxu1 %v7482_v30 }
 0x46d   : > { %1929 = vmatprep.subr.bf16.mxu0 %v7489_v31  ;;  %1970 = vmatprep.subr.bf16.mxu1 %v7492_v2 }
 0x470   : > { %1930 = vmatpush1.bf16.msra.mxu0 %v7495_v3  ;;  %1971 = vmatpush1.bf16.msra.mxu1 %v7498_v4 }
 0x471   : > { %1931 = vmatprep.subr.bf16.mxu0 %v7505_v5  ;;  %1972 = vmatprep.subr.bf16.mxu1 %v7508_v6 }
 0x474   : > { %1932 = vmatpush1.bf16.msra.mxu0 %v7511_v7  ;;  %1973 = vmatpush1.bf16.msra.mxu1 %v7514_v8 }
 0x475   : > { %1933 = vmatprep.subr.bf16.mxu0 %v7519_v9  ;;  %1974 = vmatprep.subr.bf16.mxu1 %v7530_v12 }
 0x478   : > { %1934 = vmatpush1.bf16.msra.mxu0 %v7524_v10  ;;  %1975 = vmatpush1.bf16.msra.mxu1 %v7527_v11 }
 0x479   : > { %1935 = vmatprep.subr.bf16.mxu0 %v7534_v13  ;;  %1976 = vmatprep.subr.bf16.mxu1 %v7537_v14 }
 0x47c   : > { %1936 = vmatpush1.bf16.msra.mxu0 %v7543_v34  ;;  %1977 = vmatpush1.bf16.msra.mxu1 %v7546_v36 }
 0x47d   : > { %1937 = vmatprep.subr.bf16.mxu0 %v7551_v37  ;;  %1978 = vmatprep.subr.bf16.mxu1 %v7554_v38 }
 0x480   : > { %1938 = vmatpush1.bf16.msra.mxu0 %v7559_v40  ;;  %1979 = vmatpush1.bf16.msra.mxu1 %v7562_v41 }
 0x481   : > { %1939 = vmatprep.subr.bf16.mxu0 %v7567_v42  ;;  %1980 = vmatprep.subr.bf16.mxu1 %v7570_v43 }
 0x484   : > { %1940 = vmatpush1.bf16.msra.mxu0 %v7575_v44  ;;  %1981 = vmatpush1.bf16.msra.mxu1 %v7578_v45 }
 0x485   : > { %2236 = vmatprep.subr.bf16.mxu0 %v7457_v23  ;;  %2277 = vmatprep.subr.bf16.mxu1 %v7460_v24 }
 0x539   : > { %v1633_v47 = vpop.f32.mrb[12].mxu0  ;;  %v1674_v48 = vpop.f32.mrb[12].mxu1 }
 0x53a   : > { %v1685_v49 = vrot.slane %v1633_v47, 2  ;;  %v1635_v51 = vpop.f32.mrb[13].mxu0  ;;  %v1676_v52 = vpop.f32.mrb[13].mxu1  ;;  %v1687_v1 = vrot.slane %v1674_v48, 2 }
 0x53b   : > { %v1686_v53 = vrot.slane %v1635_v51, 2  ;;  %v1637_v54 = vpop.f32.mrb[14].mxu0  ;;  %v1678_v55 = vpop.f32.mrb[14].mxu1  ;;  %v1688_v62 = vrot.slane %v1676_v52, 2 }
 0x53c   : > { %v1693_v56 = vadd.f32 %v1685_v49, %v1400_v46  ;;  %v1638_v57 = vpop.f32.mrb[15].mxu0  ;;  %v1679_v58 = vpop.f32.mrb[15].mxu1  ;;  %v1695_v16 = vadd.f32 %v1687_v1, %v1402_v32  ;;  %v1717_v46 = vrot.slane %v7450_v19, 6  ;;  %v1726_v19 = vld [vmem:[#allocation2 + $0x20] sm:$0x3] }
 0x53d   : > { %v1694_v59 = vadd.f32 %v1686_v53, %v1401_v50  ;;  %v1696_v0 = vadd.f32 %v1688_v62, %v1403_v63  ;;  %v1727_v57 = vld [vmem:[#allocation2 + $0x28] sm:$0x3] }
 0x53e   : > { %v5913_v60 = vmul.f32 -1.442695, %v1693_v56 }
 0x53f   : > { %v5914_v61 = vmul.f32 -1.442695, %v1694_v59  ;;  %v5915_v15 = vmul.f32 -1.442695, %v1696_v0 }
 0x540   : > { %6549 = vpow2.f32 %v5913_v60 }
 0x541   : > { %6551 = vpow2.f32 %v5914_v61 }
 0x542   : > { %6553 = vpow2.f32 %v5915_v15 }
 0x543   : > { %6555 = vtanh.f32 %v1695_v16 }
 0x54a   : > { %v6550_v17 = vpop.eup %6549 }
 0x54b   : > { %v6552_v18 = vpop.eup %6551  ;;  %v1700_v20 = vadd.f32 1.0, %v6550_v17 }
 0x54c   : > { %v1706_v21 = vadd.f32 1.0, %v6552_v18  ;;  %v6554_v22 = vpop.eup %6553  ;;  %v1729_v18 = vld [vmem:[#allocation2 + $0x38] sm:$0x3] }
 0x54d   : > { %6557 = vrcp.f32 %v1700_v20  ;;  %v6556_v33 = vpop.eup %6555  ;;  %v1713_v48 = vadd.f32 1.0, %v6554_v22 }
 0x54e   : > { %6559 = vrcp.f32 %v1706_v21  ;;  %v1728_v21 = vld [vmem:[#allocation2 + $0x30] sm:$0x3] }
 0x54f   : > { %6561 = vrcp.f32 %v1713_v48 }
 0x557   : > { %v6558_v39 = vpop.eup %6557 }
 0x558   : > { %v6560_v47 = vpop.eup %6559  ;;  %v1720_v49 = vmul.f32 %v6558_v39, %v6556_v33 }
 0x559   : > { %v1719_v50 = vmul.f32 %v6560_v47, %v1717_v46  ;;  %v6562_v52 = vpop.eup %6561 }
 0x55b   : > { %v7587_v51 = vadd.f32 %v1720_v49, %v1719_v50 }
 0x55d   : > { %6563 = vtanh.f32 %v7587_v51 }
 0x567   : > { %v6564_v53 = vpop.eup %6563 }
 0x568   : > { %v1723_v54 = vmul.f32 %v6564_v53, %v6562_v52  ;;  %v2031_v53 = vrot.slane %v7587_v51, 6  ;;  %v2040_v51 = vld [vmem:[#allocation2 + $0x20] sm:$0xc] }
 0x56a   : > { %v1724_v55 = vpack.c.bf16 %v1723_v54, %v1723_v54 }
 0x56c   : > { %1725 = vst [vmem:[%s7203_s15] sm:$0x8] %v1724_v55  ;;  %v1763_v56 = vrot.slane %v1724_v55, 3 }
 0x56e   : > { %1958 = vmatmul.mubr.bf16.vlgmr.msra.gmra.mrb[16].mxu0 %v1763_v56  ;;  %1999 = vmatmul.mubr.bf16.vlgmr.msra.gmra.mrb[16].mxu1 %v1763_v56 }
 0x56f   : > { %2237 = vmatpush1.bf16.msra.mxu0 %v7463_v25  ;;  %2278 = vmatpush1.bf16.msra.mxu1 %v7466_v26 }
 0x570   : > { %2238 = vmatprep.subr.bf16.mxu0 %v7473_v27  ;;  %2279 = vmatprep.subr.bf16.mxu1 %v7476_v28 }
 0x571   : > { %2268 = vmatprep.mubr.bf16.mxu0 %v6989_v35  ;;  %2309 = vmatprep.mubr.bf16.mxu1 %v6989_v35 }
 0x573   : > { %2239 = vmatpush1.bf16.msra.mxu0 %v7479_v29  ;;  %2280 = vmatpush1.bf16.msra.mxu1 %v7482_v30 }
 0x574   : > { %2240 = vmatprep.subr.bf16.mxu0 %v7489_v31  ;;  %2281 = vmatprep.subr.bf16.mxu1 %v7492_v2 }
 0x577   : > { %2241 = vmatpush1.bf16.msra.mxu0 %v7495_v3  ;;  %2282 = vmatpush1.bf16.msra.mxu1 %v7498_v4 }
 0x578   : > { %2242 = vmatprep.subr.bf16.mxu0 %v7505_v5  ;;  %2283 = vmatprep.subr.bf16.mxu1 %v7508_v6 }
 0x57b   : > { %2243 = vmatpush1.bf16.msra.mxu0 %v7511_v7  ;;  %2284 = vmatpush1.bf16.msra.mxu1 %v7514_v8 }
 0x57c   : > { %2244 = vmatprep.subr.bf16.mxu0 %v7519_v9  ;;  %2285 = vmatprep.subr.bf16.mxu1 %v7530_v12 }
 0x57f   : > { %2245 = vmatpush1.bf16.msra.mxu0 %v7524_v10  ;;  %2286 = vmatpush1.bf16.msra.mxu1 %v7527_v11 }
 0x580   : > { %2246 = vmatprep.subr.bf16.mxu0 %v7534_v13  ;;  %2287 = vmatprep.subr.bf16.mxu1 %v7537_v14 }
 0x583   : > { %2247 = vmatpush1.bf16.msra.mxu0 %v7543_v34  ;;  %2288 = vmatpush1.bf16.msra.mxu1 %v7546_v36 }
 0x584   : > { %2248 = vmatprep.subr.bf16.mxu0 %v7551_v37  ;;  %2289 = vmatprep.subr.bf16.mxu1 %v7554_v38 }
 0x587   : > { %2249 = vmatpush1.bf16.msra.mxu0 %v7559_v40  ;;  %2290 = vmatpush1.bf16.msra.mxu1 %v7562_v41 }
 0x588   : > { %2250 = vmatprep.subr.bf16.mxu0 %v7567_v42  ;;  %2291 = vmatprep.subr.bf16.mxu1 %v7570_v43 }
 0x58b   : > { %2251 = vmatpush1.bf16.msra.mxu0 %v7575_v44  ;;  %2292 = vmatpush1.bf16.msra.mxu1 %v7578_v45 }
 0x58c   : > { %2562 = vmatprep.subr.bf16.mxu0 %v7457_v23  ;;  %2603 = vmatprep.subr.bf16.mxu1 %v7460_v24 }
 0x641   : > { %v1959_v58 = vpop.f32.mrb[16].mxu0  ;;  %v2000_v59 = vpop.f32.mrb[16].mxu1 }
 0x642   : > { %v2007_v60 = vadd.f32 %v1959_v58, %v1726_v19  ;;  %v1961_v61 = vpop.f32.mrb[17].mxu0  ;;  %v2002_v62 = vpop.f32.mrb[17].mxu1  ;;  %v2009_v33 = vadd.f32 %v2000_v59, %v1728_v21 }
 0x643   : > { %v2008_v63 = vadd.f32 %v1961_v61, %v1727_v57  ;;  %v1963_v0 = vpop.f32.mrb[18].mxu0  ;;  %v2004_v1 = vpop.f32.mrb[18].mxu1  ;;  %v2010_v20 = vadd.f32 %v2002_v62, %v1729_v18 }
 0x644   : > { %v5948_v32 = vmul.f32 -1.442695, %v2007_v60  ;;  %v1964_v15 = vpop.f32.mrb[19].mxu0  ;;  %v2005_v16 = vpop.f32.mrb[19].mxu1  ;;  %v2041_v1 = vld [vmem:[#allocation2 + $0x28] sm:$0xc] }
 0x645   : > { %v5949_v17 = vmul.f32 -1.442695, %v2008_v63  ;;  %v5950_v22 = vmul.f32 -1.442695, %v2010_v20 }
 0x646   : > { %6565 = vpow2.f32 %v5948_v32 }
 0x647   : > { %6567 = vpow2.f32 %v5949_v17 }
 0x648   : > { %6569 = vpow2.f32 %v5950_v22 }
 0x649   : > { %6571 = vtanh.f32 %v2009_v33 }
 0x650   : > { %v6566_v39 = vpop.eup %6565 }
 0x651   : > { %v6568_v46 = vpop.eup %6567  ;;  %v2014_v47 = vadd.f32 1.0, %v6566_v39 }
 0x652   : > { %v2020_v49 = vadd.f32 1.0, %v6568_v46  ;;  %v6570_v48 = vpop.eup %6569 }
 0x653   : > { %6573 = vrcp.f32 %v2014_v47  ;;  %v6572_v50 = vpop.eup %6571  ;;  %v2027_v56 = vadd.f32 1.0, %v6570_v48  ;;  %v2042_v48 = vld [vmem:[#allocation2 + $0x30] sm:$0xc] }
 0x654   : > { %6575 = vrcp.f32 %v2020_v49 }
 0x655   : > { %6577 = vrcp.f32 %v2027_v56 }
 0x65d   : > { %v6574_v52 = vpop.eup %6573 }
 0x65e   : > { %v6576_v54 = vpop.eup %6575  ;;  %v2034_v55 = vmul.f32 %v6574_v52, %v6572_v50 }
 0x65f   : > { %v2033_v19 = vmul.f32 %v6576_v54, %v2031_v53  ;;  %v6578_v58 = vpop.eup %6577 }
 0x661   : > { %v7626_v57 = vadd.f32 %v2034_v55, %v2033_v19 }
 0x663   : > { %6579 = vtanh.f32 %v7626_v57 }
 0x66d   : > { %v6580_v59 = vpop.eup %6579 }
 0x66e   : > { %v2037_v60 = vmul.f32 %v6580_v59, %v6578_v58 }
 0x670   : > { %v2038_v61 = vpack.c.bf16 %v2037_v60, %v2037_v60  ;;  %v2354_v60 = vrot.slane %v7626_v57, 6 }
 0x672   : > { %2039 = vst [vmem:[%s7203_s15 + $0x4] sm:$0x1] %v2038_v61  ;;  %2269 = vmatmul.mubr.bf16.vlgmr.msra.gmra.mrb[20].mxu0 %v2038_v61  ;;  %2310 = vmatmul.mubr.bf16.vlgmr.msra.gmra.mrb[20].mxu1 %v2038_v61 }
 0x673   : > { %2563 = vmatpush1.bf16.msra.mxu0 %v7463_v25  ;;  %2604 = vmatpush1.bf16.msra.mxu1 %v7466_v26 }
 0x674   : > { %2564 = vmatprep.subr.bf16.mxu0 %v7473_v27  ;;  %2605 = vmatprep.subr.bf16.mxu1 %v7476_v28 }
 0x675   : > { %2594 = vmatprep.mubr.bf16.mxu0 %v6989_v35  ;;  %2635 = vmatprep.mubr.bf16.mxu1 %v6989_v35 }
 0x677   : > { %2565 = vmatpush1.bf16.msra.mxu0 %v7479_v29  ;;  %2606 = vmatpush1.bf16.msra.mxu1 %v7482_v30 }
 0x678   : > { %2566 = vmatprep.subr.bf16.mxu0 %v7489_v31  ;;  %2607 = vmatprep.subr.bf16.mxu1 %v7492_v2 }
 0x67b   : > { %2567 = vmatpush1.bf16.msra.mxu0 %v7495_v3  ;;  %2608 = vmatpush1.bf16.msra.mxu1 %v7498_v4 }
 0x67c   : > { %2568 = vmatprep.subr.bf16.mxu0 %v7505_v5  ;;  %2609 = vmatprep.subr.bf16.mxu1 %v7508_v6 }
 0x67f   : > { %2569 = vmatpush1.bf16.msra.mxu0 %v7511_v7  ;;  %2610 = vmatpush1.bf16.msra.mxu1 %v7514_v8 }
 0x680   : > { %2570 = vmatprep.subr.bf16.mxu0 %v7519_v9  ;;  %2611 = vmatprep.subr.bf16.mxu1 %v7530_v12 }
 0x683   : > { %2571 = vmatpush1.bf16.msra.mxu0 %v7524_v10  ;;  %2612 = vmatpush1.bf16.msra.mxu1 %v7527_v11 }
 0x684   : > { %2572 = vmatprep.subr.bf16.mxu0 %v7534_v13  ;;  %2613 = vmatprep.subr.bf16.mxu1 %v7537_v14 }
 0x687   : > { %2573 = vmatpush1.bf16.msra.mxu0 %v7543_v34  ;;  %2614 = vmatpush1.bf16.msra.mxu1 %v7546_v36 }
 0x688   : > { %2574 = vmatprep.subr.bf16.mxu0 %v7551_v37  ;;  %2615 = vmatprep.subr.bf16.mxu1 %v7554_v38 }
 0x68b   : > { %2575 = vmatpush1.bf16.msra.mxu0 %v7559_v40  ;;  %2616 = vmatpush1.bf16.msra.mxu1 %v7562_v41 }
 0x68c   : > { %2576 = vmatprep.subr.bf16.mxu0 %v7567_v42  ;;  %2617 = vmatprep.subr.bf16.mxu1 %v7570_v43 }
 0x68f   : > { %2577 = vmatpush1.bf16.msra.mxu0 %v7575_v44  ;;  %2618 = vmatpush1.bf16.msra.mxu1 %v7578_v45 }
 0x690   : > { %2888 = vmatprep.subr.bf16.mxu0 %v7457_v23  ;;  %2929 = vmatprep.subr.bf16.mxu1 %v7460_v24  ;;  %v2043_v23 = vld [vmem:[#allocation2 + $0x38] sm:$0xc] }
 0x745   : > { %v2270_v62 = vpop.f32.mrb[20].mxu0  ;;  %v2311_v63 = vpop.f32.mrb[20].mxu1 }
 0x746   : > { %v2322_v0 = vrot.slane %v2270_v62, 6  ;;  %v2272_v32 = vpop.f32.mrb[21].mxu0  ;;  %v2313_v15 = vpop.f32.mrb[21].mxu1  ;;  %v2324_v49 = vrot.slane %v2311_v63, 6 }
 0x747   : > { %v2323_v16 = vrot.slane %v2272_v32, 6  ;;  %v2274_v17 = vpop.f32.mrb[22].mxu0  ;;  %v2315_v18 = vpop.f32.mrb[22].mxu1  ;;  %v2325_v47 = vrot.slane %v2313_v15, 6 }
 0x748   : > { %v2330_v20 = vadd.f32 %v2322_v0, %v2040_v51  ;;  %v2275_v21 = vpop.f32.mrb[23].mxu0  ;;  %v2316_v22 = vpop.f32.mrb[23].mxu1  ;;  %v2332_v52 = vadd.f32 %v2324_v49, %v2042_v48 }
 0x749   : > { %v2331_v33 = vadd.f32 %v2323_v16, %v2041_v1  ;;  %v2333_v24 = vadd.f32 %v2325_v47, %v2043_v23 }
 0x74a   : > { %v5983_v39 = vmul.f32 -1.442695, %v2330_v20 }
 0x74b   : > { %v5984_v46 = vmul.f32 -1.442695, %v2331_v33  ;;  %v5985_v50 = vmul.f32 -1.442695, %v2333_v24  ;;  %v2689_v24 = vld [vmem:[#allocation2 + $0x20] sm:$0xc0] }
 0x74c   : > { %6581 = vpow2.f32 %v5983_v39 }
 0x74d   : > { %6583 = vpow2.f32 %v5984_v46 }
 0x74e   : > { %6585 = vpow2.f32 %v5985_v50 }
 0x74f   : > { %6587 = vtanh.f32 %v2332_v52  ;;  %v2690_v52 = vld [vmem:[#allocation2 + $0x28] sm:$0xc0] }
 0x756   : > { %v6582_v53 = vpop.eup %6581 }
 0x757   : > { %v6584_v54 = vpop.eup %6583  ;;  %v2337_v55 = vadd.f32 1.0, %v6582_v53 }
 0x758   : > { %v2343_v56 = vadd.f32 1.0, %v6584_v54  ;;  %v6586_v19 = vpop.eup %6585 }
 0x759   : > { %6589 = vrcp.f32 %v2337_v55  ;;  %v6588_v58 = vpop.eup %6587  ;;  %v2350_v62 = vadd.f32 1.0, %v6586_v19 }
 0x75a   : > { %6591 = vrcp.f32 %v2343_v56 }
 0x75b   : > { %6593 = vrcp.f32 %v2350_v62 }
 0x763   : > { %v6590_v59 = vpop.eup %6589 }
 0x764   : > { %v6592_v61 = vpop.eup %6591  ;;  %v2357_v51 = vmul.f32 %v6590_v59, %v6588_v58 }
 0x765   : > { %v2356_v63 = vmul.f32 %v6592_v61, %v2354_v60  ;;  %v6594_v1 = vpop.eup %6593 }
 0x767   : > { %v7665_v0 = vadd.f32 %v2357_v51, %v2356_v63 }
 0x769   : > { %6595 = vtanh.f32 %v7665_v0 }
 0x773   : > { %v6596_v32 = vpop.eup %6595 }
 0x774   : > { %v2360_v15 = vmul.f32 %v6596_v32, %v6594_v1 }
 0x776   : > { %v2361_v16 = vpack.c.bf16 %v2360_v15, %v2360_v15  ;;  %v2691_v15 = vld [vmem:[#allocation2 + $0x30] sm:$0xc0] }
 0x778   : > { %2362 = vst [vmem:[%s7203_s15 + $0x4] sm:$0x2] %v2361_v16  ;;  %v2400_v17 = vrot.slane %v2361_v16, 1 }
 0x77a   : > { %2595 = vmatmul.mubr.bf16.vlgmr.msra.gmra.mrb[24].mxu0 %v2400_v17  ;;  %2636 = vmatmul.mubr.bf16.vlgmr.msra.gmra.mrb[24].mxu1 %v2400_v17 }
 0x77b   : > { %2889 = vmatpush1.bf16.msra.mxu0 %v7463_v25  ;;  %2930 = vmatpush1.bf16.msra.mxu1 %v7466_v26 }
 0x77c   : > { %2890 = vmatprep.subr.bf16.mxu0 %v7473_v27  ;;  %2931 = vmatprep.subr.bf16.mxu1 %v7476_v28  ;;  %v2364_v28 = vld [vmem:[#allocation2 + $0x28] sm:$0x30] }
 0x77d   : > { %2920 = vmatprep.mubr.bf16.mxu0 %v6989_v35  ;;  %2961 = vmatprep.mubr.bf16.mxu1 %v6989_v35  ;;  %v2363_v35 = vld [vmem:[#allocation2 + $0x20] sm:$0x30] }
 0x77f   : > { %2891 = vmatpush1.bf16.msra.mxu0 %v7479_v29  ;;  %2932 = vmatpush1.bf16.msra.mxu1 %v7482_v30 }
 0x780   : > { %2892 = vmatprep.subr.bf16.mxu0 %v7489_v31  ;;  %2933 = vmatprep.subr.bf16.mxu1 %v7492_v2 }
 0x783   : > { %2893 = vmatpush1.bf16.msra.mxu0 %v7495_v3  ;;  %2934 = vmatpush1.bf16.msra.mxu1 %v7498_v4 }
 0x784   : > { %2894 = vmatprep.subr.bf16.mxu0 %v7505_v5  ;;  %2935 = vmatprep.subr.bf16.mxu1 %v7508_v6 }
 0x787   : > { %2895 = vmatpush1.bf16.msra.mxu0 %v7511_v7  ;;  %2936 = vmatpush1.bf16.msra.mxu1 %v7514_v8 }
 0x788   : > { %2896 = vmatprep.subr.bf16.mxu0 %v7519_v9  ;;  %2937 = vmatprep.subr.bf16.mxu1 %v7530_v12 }
 0x78b   : > { %2897 = vmatpush1.bf16.msra.mxu0 %v7524_v10  ;;  %2938 = vmatpush1.bf16.msra.mxu1 %v7527_v11  ;;  %v2366_v11 = vld [vmem:[#allocation2 + $0x38] sm:$0x30] }
 0x78c   : > { %2898 = vmatprep.subr.bf16.mxu0 %v7534_v13  ;;  %2939 = vmatprep.subr.bf16.mxu1 %v7537_v14  ;;  %v2365_v14 = vld [vmem:[#allocation2 + $0x30] sm:$0x30] }
 0x78f   : > { %2899 = vmatpush1.bf16.msra.mxu0 %v7543_v34  ;;  %2940 = vmatpush1.bf16.msra.mxu1 %v7546_v36 }
 0x790   : > { %2900 = vmatprep.subr.bf16.mxu0 %v7551_v37  ;;  %2941 = vmatprep.subr.bf16.mxu1 %v7554_v38 }
 0x793   : > { %2901 = vmatpush1.bf16.msra.mxu0 %v7559_v40  ;;  %2942 = vmatpush1.bf16.msra.mxu1 %v7562_v41 }
 0x794   : > { %2902 = vmatprep.subr.bf16.mxu0 %v7567_v42  ;;  %2943 = vmatprep.subr.bf16.mxu1 %v7570_v43 }
 0x797   : > { %2903 = vmatpush1.bf16.msra.mxu0 %v7575_v44  ;;  %2944 = vmatpush1.bf16.msra.mxu1 %v7578_v45  ;;  %v2680_v45 = vrot.slane %v7665_v0, 6  ;;  %v2692_v0 = vld [vmem:[#allocation2 + $0x38] sm:$0xc0] }
 0x84d   : > { %v2596_v25 = vpop.f32.mrb[24].mxu0  ;;  %v2637_v26 = vpop.f32.mrb[24].mxu1 }
 0x84e   : > { %v2648_v27 = vrot.slane %v2596_v25, 4  ;;  %v2598_v29 = vpop.f32.mrb[25].mxu0  ;;  %v2639_v30 = vpop.f32.mrb[25].mxu1  ;;  %v2650_v13 = vrot.slane %v2637_v26, 4 }
 0x84f   : > { %v2649_v31 = vrot.slane %v2598_v29, 4  ;;  %v2600_v2 = vpop.f32.mrb[26].mxu0  ;;  %v2641_v3 = vpop.f32.mrb[26].mxu1  ;;  %v2651_v10 = vrot.slane %v2639_v30, 4 }
 0x850   : > { %v2656_v4 = vadd.f32 %v2648_v27, %v2363_v35  ;;  %v2601_v5 = vpop.f32.mrb[27].mxu0  ;;  %v2642_v6 = vpop.f32.mrb[27].mxu1  ;;  %v2658_v36 = vadd.f32 %v2650_v13, %v2365_v14 }
 0x851   : > { %v2657_v7 = vadd.f32 %v2649_v31, %v2364_v28  ;;  %v2659_v12 = vadd.f32 %v2651_v10, %v2366_v11 }
 0x852   : > { %v6018_v8 = vmul.f32 -1.442695, %v2656_v4 }
 0x853   : > { %v6019_v9 = vmul.f32 -1.442695, %v2657_v7  ;;  %v6020_v34 = vmul.f32 -1.442695, %v2659_v12 }
 0x854   : > { %6597 = vpow2.f32 %v6018_v8 }
 0x855   : > { %6599 = vpow2.f32 %v6019_v9 }
 0x856   : > { %6601 = vpow2.f32 %v6020_v34 }
 0x857   : > { %6603 = vtanh.f32 %v2658_v36 }
 0x85e   : > { %v6598_v37 = vpop.eup %6597 }
 0x85f   : > { %v6600_v38 = vpop.eup %6599  ;;  %v2663_v40 = vadd.f32 1.0, %v6598_v37 }
 0x860   : > { %v2669_v41 = vadd.f32 1.0, %v6600_v38  ;;  %v6602_v42 = vpop.eup %6601 }
 0x861   : > { %6605 = vrcp.f32 %v2663_v40  ;;  %v6604_v43 = vpop.eup %6603  ;;  %v2676_v20 = vadd.f32 1.0, %v6602_v42 }
 0x862   : > { %6607 = vrcp.f32 %v2669_v41 }
 0x863   : > { %6609 = vrcp.f32 %v2676_v20 }
 0x86b   : > { %v6606_v44 = vpop.eup %6605 }
 0x86c   : > { %v6608_v57 = vpop.eup %6607  ;;  %v2683_v18 = vmul.f32 %v6606_v44, %v6604_v43 }
 0x86d   : > { %v2682_v21 = vmul.f32 %v6608_v57, %v2680_v45  ;;  %v6610_v33 = vpop.eup %6609 }
 0x86f   : > { %v2684_v22 = vadd.f32 %v2683_v18, %v2682_v21 }
 0x871   : > { %6611 = vtanh.f32 %v2684_v22  ;;  %v3006_v31 = vrot.slane %v2684_v22, 6 }
 0x87b   : > { %v6612_v39 = vpop.eup %6611 }
 0x87c   : > { %v2686_v46 = vmul.f32 %v6612_v39, %v6610_v33 }
 0x87e   : > { %v2687_v47 = vpack.c.bf16 %v2686_v46, %v2686_v46 }
 0x880   : > { %2688 = vst [vmem:[%s7203_s15 + $0x4] sm:$0x4] %v2687_v47  ;;  %v2726_v23 = vrot.slane %v2687_v47, 2 }
 0x882   : > { %2921 = vmatmul.mubr.bf16.vlgmr.msra.gmra.mrb[28].mxu0 %v2726_v23  ;;  %2962 = vmatmul.mubr.bf16.vlgmr.msra.gmra.mrb[28].mxu1 %v2726_v23 }
 0x955   : > { %v2922_v49 = vpop.f32.mrb[28].mxu0  ;;  %v2963_v48 = vpop.f32.mrb[28].mxu1 }
 0x956   : > { %v2974_v50 = vrot.slane %v2922_v49, 2  ;;  %v2924_v53 = vpop.f32.mrb[29].mxu0  ;;  %v2965_v54 = vpop.f32.mrb[29].mxu1  ;;  %v2976_v32 = vrot.slane %v2963_v48, 2 }
 0x957   : > { %v2975_v55 = vrot.slane %v2924_v53, 2  ;;  %v2926_v56 = vpop.f32.mrb[30].mxu0  ;;  %v2967_v19 = vpop.f32.mrb[30].mxu1  ;;  %v2977_v63 = vrot.slane %v2965_v54, 2 }
 0x958   : > { %v2982_v58 = vadd.f32 %v2974_v50, %v2689_v24  ;;  %v2927_v59 = vpop.f32.mrb[31].mxu0  ;;  %v2968_v60 = vpop.f32.mrb[31].mxu1  ;;  %v2984_v17 = vadd.f32 %v2976_v32, %v2691_v15 }
 0x959   : > { %v2983_v61 = vadd.f32 %v2975_v55, %v2690_v52  ;;  %v2985_v1 = vadd.f32 %v2977_v63, %v2692_v0 }
 0x95a   : > { %v6053_v51 = vmul.f32 -1.442695, %v2982_v58 }
 0x95b   : > { %v6054_v62 = vmul.f32 -1.442695, %v2983_v61  ;;  %v6055_v16 = vmul.f32 -1.442695, %v2985_v1 }
 0x95c   : > { %6613 = vpow2.f32 %v6053_v51 }
 0x95d   : > { %6615 = vpow2.f32 %v6054_v62 }
 0x95e   : > { %6617 = vpow2.f32 %v6055_v16 }
 0x95f   : > { %6619 = vtanh.f32 %v2984_v17 }
 0x966   : > { %v6614_v35 = vpop.eup %6613 }
 0x967   : > { %v6616_v25 = vpop.eup %6615  ;;  %v2989_v26 = vadd.f32 1.0, %v6614_v35 }
 0x968   : > { %v2995_v27 = vadd.f32 1.0, %v6616_v25  ;;  %v6618_v28 = vpop.eup %6617 }
 0x969   : > { %6621 = vrcp.f32 %v2989_v26  ;;  %v6620_v29 = vpop.eup %6619  ;;  %v3002_v4 = vadd.f32 1.0, %v6618_v28 }
 0x96a   : > { %6623 = vrcp.f32 %v2995_v27 }
 0x96b   : > { %6625 = vrcp.f32 %v3002_v4 }
 0x973   : > { %v6622_v30 = vpop.eup %6621 }
 0x974   : > { %v6624_v2 = vpop.eup %6623  ;;  %v3009_v3 = vmul.f32 %v6622_v30, %v6620_v29 }
 0x975   : > { %v3008_v5 = vmul.f32 %v6624_v2, %v3006_v31  ;;  %v6626_v7 = vpop.eup %6625 }
 0x977   : > { %v3010_v6 = vadd.f32 %v3009_v3, %v3008_v5 }
 0x979   : > { %6627 = vtanh.f32 %v3010_v6 }
 0x983   : > { %v6628_v8 = vpop.eup %6627 }
 0x984   : > { %v3012_v9 = vmul.f32 %v6628_v8, %v6626_v7 }
 0x986   : > { %v3013_v10 = vpack.c.bf16 %v3012_v9, %v3012_v9 }
 0x988   : > { %3014 = vst [vmem:[%s7203_s15 + $0x4] sm:$0x8] %v3013_v10 }
 0x989 PF: > { %p6056_p4 = scmp.ne.s32.totalorder %s7035_s19, 1 }
 0x98a   : > { %v7706_v11 = vld [vmem:[%s7190_s29 + $0x4] ss:$16 sps:$4 sm:$0xff] (!%p6056_p4)   ;;  %v7709_v12 = vld [vmem:[%s7190_s29] ss:$16 sps:$4 sm:$0xff] (!%p6056_p4)   ;;  %v6990_v13 = vmov (!%p6056_p4), 0  }
 0x98b   : > { %3018 = sbr.rel (%p6056_p4) target bundleno = 4581 (0x11e5), region = 56  ;;  %3247 = vmatprep.mubr.bf16.mxu0 (!%p6056_p4), %v6990_v13  ;;  %3288 = vmatprep.mubr.bf16.mxu1 (!%p6056_p4), %v6990_v13  ;;  %v7715_v14 = vld [vmem:[%s7190_s29 + $0x24] ss:$16 sps:$4 sm:$0xff] (!%p6056_p4)   ;;  %v7719_v34 = vld [vmem:[%s7190_s29 + $0x20] ss:$16 sps:$4 sm:$0xff] (!%p6056_p4)  }
 0x98c   : > { %3215 = vmatprep.subr.bf16.mxu0 (!%p6056_p4), %v7706_v11  ;;  %v7723_v36 = vld [vmem:[%s7190_s29 + $0x44] ss:$16 sps:$4 sm:$0xff] (!%p6056_p4)   ;;  %v7726_v37 = vld [vmem:[%s7190_s29 + $0xc] ss:$16 sps:$4 sm:$0xff] (!%p6056_p4)   ;;  %v7729_v38 = vld [vmem:[%s7190_s29 + $0x8] ss:$16 sps:$4 sm:$0xff] (!%p6056_p4)  }
 0x98d   : > { %3216 = vmatpush1.bf16.msra.mxu0 (!%p6056_p4), %v7709_v12  ;;  %v7733_v40 = vld [vmem:[%s7190_s29 + $0x40] ss:$16 sps:$4 sm:$0xff] (!%p6056_p4)   ;;  %3256 = vmatprep.subr.bf16.mxu1 (!%p6056_p4), %v7726_v37  ;;  %v7738_v41 = vld [vmem:[%s7190_s29 + $0x64] ss:$16 sps:$4 sm:$0xff] (!%p6056_p4)   ;;  %v7742_v42 = vld [vmem:[%s7190_s29 + $0x2c] ss:$16 sps:$4 sm:$0xff] (!%p6056_p4)  }
 0x98e   : > { %3217 = vmatprep.subr.bf16.mxu0 (!%p6056_p4), %v7715_v14  ;;  %3257 = vmatpush1.bf16.msra.mxu1 (!%p6056_p4), %v7729_v38  ;;  %v7745_v43 = vld [vmem:[%s7190_s29 + $0x28] ss:$16 sps:$4 sm:$0xff] (!%p6056_p4)   ;;  %v7750_v44 = vld [vmem:[%s7190_s29 + $0x60] ss:$16 sps:$4 sm:$0xff] (!%p6056_p4)   ;;  %v7753_v45 = vld [vmem:[%s7190_s29 + $0x84] ss:$16 sps:$4 sm:$0xff] (!%p6056_p4)  }
 0x98f   : > { %3258 = vmatprep.subr.bf16.mxu1 (!%p6056_p4), %v7742_v42  ;;  %v7756_v57 = vld [vmem:[%s7190_s29 + $0x4c] ss:$16 sps:$4 sm:$0xff] (!%p6056_p4)   ;;  %v7761_v18 = vld [vmem:[%s7190_s29 + $0x48] ss:$16 sps:$4 sm:$0xff] (!%p6056_p4)   ;;  %v7769_v21 = vld [vmem:[%s7190_s29 + $0x80] ss:$16 sps:$4 sm:$0xff] (!%p6056_p4)  }
 0x990   : > { %v7765_v20 = vld [vmem:[%s7190_s29 + $0x6c] ss:$16 sps:$4 sm:$0xff] (!%p6056_p4)   ;;  %v7773_v22 = vld [vmem:[%s7190_s29 + $0xa4] ss:$16 sps:$4 sm:$0xff] (!%p6056_p4)   ;;  %v7777_v33 = vld [vmem:[%s7190_s29 + $0x68] ss:$16 sps:$4 sm:$0xff] (!%p6056_p4)  }
 0x991   : > { %3218 = vmatpush1.bf16.msra.mxu0 (!%p6056_p4), %v7719_v34  ;;  %v7781_v39 = vld [vmem:[%s7190_s29 + $0x8c] ss:$16 sps:$4 sm:$0xff] (!%p6056_p4)   ;;  %v7785_v46 = vld [vmem:[%s7190_s29 + $0xa0] ss:$16 sps:$4 sm:$0xff] (!%p6056_p4)   ;;  %v7788_v47 = vld [vmem:[%s7190_s29 + $0xc4] ss:$16 sps:$4 sm:$0xff] (!%p6056_p4)  }
 0x992   : > { %3219 = vmatprep.subr.bf16.mxu0 %v7723_v36  ;;  %3259 = vmatpush1.bf16.msra.mxu1 %v7745_v43  ;;  %v7793_v23 = vld [vmem:[%s7190_s29 + $0x88] ss:$16 sps:$4 sm:$0xff]   ;;  %v7796_v24 = vld [vmem:[%s7190_s29 + $0xc0] ss:$16 sps:$4 sm:$0xff]   ;;  %v7800_v49 = vld [vmem:[%s7190_s29 + $0xac] ss:$16 sps:$4 sm:$0xff]  }
 0x993   : > { %3260 = vmatprep.subr.bf16.mxu1 %v7756_v57  ;;  %v7803_v48 = vld [vmem:[%s7190_s29 + $0xe4] ss:$16 sps:$4 sm:$0xff]   ;;  %v7806_v50 = vld [vmem:[%s7190_s29 + $0xa8] ss:$16 sps:$4 sm:$0xff]   ;;  %v7810_v52 = vld [vmem:[%s7190_s29 + $0xcc] ss:$16 sps:$4 sm:$0xff]  }
 0x994   : > { %v7815_v53 = vld [vmem:[%s7190_s29 + $0xe0] ss:$16 sps:$4 sm:$0xff]   ;;  %v7819_v54 = vld [vmem:[%s7190_s29 + $0xc8] ss:$16 sps:$4 sm:$0xff]   ;;  %v7823_v55 = vld [vmem:[%s7190_s29 + $0xec] ss:$16 sps:$4 sm:$0xff]  }
 0x995   : > { %3220 = vmatpush1.bf16.msra.mxu0 %v7733_v40  ;;  %v7831_v56 = vld [vmem:[%s7190_s29 + $0xe8] ss:$16 sps:$4 sm:$0xff]   ;;  %v3019_v19 = vld [vmem:[#allocation2 + $0x20] sm:$0xc0]  ;;  %v3020_v60 = vld [vmem:[#allocation2 + $0x28] sm:$0xc0] }
 0x996   : > { %3221 = vmatprep.subr.bf16.mxu0 %v7738_v41  ;;  %3261 = vmatpush1.bf16.msra.mxu1 %v7761_v18  ;;  %v3022_v17 = vld [vmem:[#allocation2 + $0x38] sm:$0xc0]  ;;  %v3021_v30 = vld [vmem:[#allocation2 + $0x30] sm:$0xc0] }
 0x997   : > { %3262 = vmatprep.subr.bf16.mxu1 %v7765_v20 }
 0x999   : > { %3222 = vmatpush1.bf16.msra.mxu0 %v7750_v44 }
 0x99a   : > { %3223 = vmatprep.subr.bf16.mxu0 %v7753_v45  ;;  %3263 = vmatpush1.bf16.msra.mxu1 %v7777_v33 }
 0x99b   : > { %3264 = vmatprep.subr.bf16.mxu1 %v7781_v39 }
 0x99d   : > { %3224 = vmatpush1.bf16.msra.mxu0 %v7769_v21 }
 0x99e   : > { %3225 = vmatprep.subr.bf16.mxu0 %v7773_v22  ;;  %3265 = vmatpush1.bf16.msra.mxu1 %v7793_v23 }
 0x99f   : > { %3266 = vmatprep.subr.bf16.mxu1 %v7800_v49 }
 0x9a1   : > { %3226 = vmatpush1.bf16.msra.mxu0 %v7785_v46 }
 0x9a2   : > { %3227 = vmatprep.subr.bf16.mxu0 %v7788_v47  ;;  %3267 = vmatpush1.bf16.msra.mxu1 %v7806_v50 }
 0x9a3   : > { %3268 = vmatprep.subr.bf16.mxu1 %v7810_v52 }
 0x9a5   : > { %3228 = vmatpush1.bf16.msra.mxu0 %v7796_v24 }
 0x9a6   : > { %3229 = vmatprep.subr.bf16.mxu0 %v7803_v48  ;;  %3269 = vmatpush1.bf16.msra.mxu1 %v7819_v54 }
 0x9a7   : > { %3270 = vmatprep.subr.bf16.mxu1 %v7823_v55 }
 0x9a9   : > { %3230 = vmatpush1.bf16.msra.mxu0 %v7815_v53 }
 0x9aa   : > { %3538 = vmatprep.subr.bf16.mxu0 %v7706_v11  ;;  %3271 = vmatpush1.bf16.msra.mxu1 %v7831_v56 }
 0x9ab   : > { %3579 = vmatprep.subr.bf16.mxu1 %v7726_v37 }
 0x9ac   : > { %3248 = vmatmul.mubr.bf16.vlgmr.msra.gmra.mrb[0].mxu0 %v6990_v13 }
 0x9ad   : > { %3539 = vmatpush1.bf16.msra.mxu0 %v7709_v12  ;;  %3570 = vmatprep.mubr.bf16.mxu0 %v6990_v13 }
 0x9ae   : > { %3540 = vmatprep.subr.bf16.mxu0 %v7715_v14  ;;  %3289 = vmatmul.mubr.bf16.vlgmr.msra.gmra.mrb[0].mxu1 %v6990_v13 }
 0x9af   : > { %3580 = vmatpush1.bf16.msra.mxu1 %v7729_v38  ;;  %3611 = vmatprep.mubr.bf16.mxu1 %v6990_v13 }
 0x9b0   : > { %3581 = vmatprep.subr.bf16.mxu1 %v7742_v42 }
 0x9b1   : > { %3541 = vmatpush1.bf16.msra.mxu0 %v7719_v34 }
 0x9b2   : > { %3542 = vmatprep.subr.bf16.mxu0 %v7723_v36 }
 0x9b3   : > { %3582 = vmatpush1.bf16.msra.mxu1 %v7745_v43 }
 0x9b4   : > { %3583 = vmatprep.subr.bf16.mxu1 %v7756_v57 }
 0x9b5   : > { %3543 = vmatpush1.bf16.msra.mxu0 %v7733_v40 }
 0x9b6   : > { %3544 = vmatprep.subr.bf16.mxu0 %v7738_v41 }
 0x9b7   : > { %3584 = vmatpush1.bf16.msra.mxu1 %v7761_v18 }
 0x9b8   : > { %3585 = vmatprep.subr.bf16.mxu1 %v7765_v20 }
 0x9b9   : > { %3545 = vmatpush1.bf16.msra.mxu0 %v7750_v44 }
 0x9ba   : > { %3546 = vmatprep.subr.bf16.mxu0 %v7753_v45 }
 0x9bb   : > { %3586 = vmatpush1.bf16.msra.mxu1 %v7777_v33 }
 0x9bc   : > { %3587 = vmatprep.subr.bf16.mxu1 %v7781_v39 }
 0x9bd   : > { %3547 = vmatpush1.bf16.msra.mxu0 %v7769_v21 }
 0x9be   : > { %3548 = vmatprep.subr.bf16.mxu0 %v7773_v22 }
 0x9bf   : > { %3588 = vmatpush1.bf16.msra.mxu1 %v7793_v23 }
 0x9c0   : > { %3589 = vmatprep.subr.bf16.mxu1 %v7800_v49 }
 0x9c1   : > { %3549 = vmatpush1.bf16.msra.mxu0 %v7785_v46 }
 0x9c2   : > { %3550 = vmatprep.subr.bf16.mxu0 %v7788_v47 }
 0x9c3   : > { %3590 = vmatpush1.bf16.msra.mxu1 %v7806_v50 }
 0x9c4   : > { %3591 = vmatprep.subr.bf16.mxu1 %v7810_v52 }
 0x9c5   : > { %3551 = vmatpush1.bf16.msra.mxu0 %v7796_v24 }
 0x9c6   : > { %3552 = vmatprep.subr.bf16.mxu0 %v7803_v48 }
 0x9c7   : > { %3592 = vmatpush1.bf16.msra.mxu1 %v7819_v54 }
 0x9c8   : > { %3593 = vmatprep.subr.bf16.mxu1 %v7823_v55 }
 0x9c9   : > { %3553 = vmatpush1.bf16.msra.mxu0 %v7815_v53 }
 0x9ca   : > { %3864 = vmatprep.subr.bf16.mxu0 %v7706_v11 }
 0x9cb   : > { %3594 = vmatpush1.bf16.msra.mxu1 %v7831_v56 }
 0x9cc   : > { %3905 = vmatprep.subr.bf16.mxu1 %v7726_v37 }
 0xa7f   : > { %v3249_v58 = vpop.f32.mrb[0].mxu0 }
 0xa80   : > { %v3301_v59 = vrot.slane %v3249_v58, 2  ;;  %v3251_v61 = vpop.f32.mrb[1].mxu0 }
 0xa81   : > { %v3302_v51 = vrot.slane %v3251_v61, 2  ;;  %v3253_v62 = vpop.f32.mrb[2].mxu0  ;;  %v3290_v15 = vpop.f32.mrb[0].mxu1 }
 0xa82   : > { %v3309_v63 = vadd.f32 %v3301_v59, %v3019_v19  ;;  %v3254_v0 = vpop.f32.mrb[3].mxu0  ;;  %v3292_v35 = vpop.f32.mrb[1].mxu1  ;;  %v3303_v29 = vrot.slane %v3290_v15, 2 }
 0xa83   : > { %v3310_v1 = vadd.f32 %v3302_v51, %v3020_v60  ;;  %v3304_v25 = vrot.slane %v3292_v35, 2  ;;  %v3294_v26 = vpop.f32.mrb[2].mxu1 }
 0xa84   : > { %v6089_v32 = vmul.f32 -1.442695, %v3309_v63  ;;  %v3295_v27 = vpop.f32.mrb[3].mxu1  ;;  %v3311_v2 = vadd.f32 %v3303_v29, %v3021_v30 }
 0xa85   : > { %v6090_v16 = vmul.f32 -1.442695, %v3310_v1  ;;  %v3312_v28 = vadd.f32 %v3304_v25, %v3022_v17  ;;  %v3339_v1 = vld [vmem:[#allocation2 + $0x20] sm:$0x30]  ;;  %v3340_v17 = vld [vmem:[#allocation2 + $0x28] sm:$0x30] }
 0xa86   : > { %6725 = vpow2.f32 %v6089_v32 }
 0xa87   : > { %6727 = vpow2.f32 %v6090_v16  ;;  %v6091_v31 = vmul.f32 -1.442695, %v3312_v28 }
 0xa89   : > { %6729 = vpow2.f32 %v6091_v31 }
 0xa8a   : > { %6731 = vtanh.f32 %v3311_v2 }
 0xa90   : > { %v6726_v3 = vpop.eup %6725 }
 0xa91   : > { %v6728_v4 = vpop.eup %6727  ;;  %v3316_v5 = vadd.f32 1.0, %v6726_v3 }
 0xa92   : > { %v3322_v6 = vadd.f32 1.0, %v6728_v4 }
 0xa93   : > { %6733 = vrcp.f32 %v3316_v5  ;;  %v6730_v7 = vpop.eup %6729 }
 0xa94   : > { %6735 = vrcp.f32 %v3322_v6  ;;  %v6732_v8 = vpop.eup %6731  ;;  %v3329_v10 = vadd.f32 1.0, %v6730_v7  ;;  %v3341_v7 = vld [vmem:[#allocation2 + $0x30] sm:$0x30] }
 0xa96   : > { %6737 = vrcp.f32 %v3329_v10 }
 0xa9d   : > { %v6734_v9 = vpop.eup %6733 }
 0xa9e   : > { %v6736_v19 = vpop.eup %6735  ;;  %v3333_v58 = vmul.f32 %v6734_v9, %v6732_v8 }
 0xa9f   : > { %v3332_v59 = vmul.f32 0.0, %v6736_v19 }
 0xaa0   : > { %v6738_v61 = vpop.eup %6737 }
 0xaa1   : > { %v7873_v60 = vadd.f32 %v3333_v58, %v3332_v59 }
 0xaa3   : > { %6739 = vtanh.f32 %v7873_v60 }
 0xaad   : > { %v6740_v51 = vpop.eup %6739 }
 0xaae   : > { %v3336_v62 = vmul.f32 %v6740_v51, %v6738_v61 }
 0xab0   : > { %v3337_v63 = vpack.c.bf16 %v3336_v62, %v3336_v62 }
 0xab2   : > { %3338 = vst [vmem:[%s7203_s15 + $0x4] sm:$0x8] %v3337_v63  ;;  %v3376_v0 = vrot.slane %v3337_v63, 3  ;;  %v3656_v63 = vrot.slane %v7873_v60, 2 }
 0xab4   : > { %3571 = vmatmul.mubr.bf16.vlgmr.msra.gmra.mrb[4].mxu0 %v3376_v0  ;;  %3612 = vmatmul.mubr.bf16.vlgmr.msra.gmra.mrb[4].mxu1 %v3376_v0 }
 0xab5   : > { %3865 = vmatpush1.bf16.msra.mxu0 %v7709_v12  ;;  %3906 = vmatpush1.bf16.msra.mxu1 %v7729_v38 }
 0xab6   : > { %3866 = vmatprep.subr.bf16.mxu0 %v7715_v14  ;;  %3907 = vmatprep.subr.bf16.mxu1 %v7742_v42 }
 0xab7   : > { %3896 = vmatprep.mubr.bf16.mxu0 %v6990_v13  ;;  %3937 = vmatprep.mubr.bf16.mxu1 %v6990_v13 }
 0xab9   : > { %3867 = vmatpush1.bf16.msra.mxu0 %v7719_v34  ;;  %3908 = vmatpush1.bf16.msra.mxu1 %v7745_v43 }
 0xaba   : > { %3868 = vmatprep.subr.bf16.mxu0 %v7723_v36  ;;  %3909 = vmatprep.subr.bf16.mxu1 %v7756_v57 }
 0xabd   : > { %3869 = vmatpush1.bf16.msra.mxu0 %v7733_v40  ;;  %3910 = vmatpush1.bf16.msra.mxu1 %v7761_v18 }
 0xabe   : > { %3870 = vmatprep.subr.bf16.mxu0 %v7738_v41  ;;  %3911 = vmatprep.subr.bf16.mxu1 %v7765_v20 }
 0xac1   : > { %3871 = vmatpush1.bf16.msra.mxu0 %v7750_v44  ;;  %3912 = vmatpush1.bf16.msra.mxu1 %v7777_v33 }
 0xac2   : > { %3872 = vmatprep.subr.bf16.mxu0 %v7753_v45  ;;  %3913 = vmatprep.subr.bf16.mxu1 %v7781_v39 }
 0xac5   : > { %3873 = vmatpush1.bf16.msra.mxu0 %v7769_v21  ;;  %3914 = vmatpush1.bf16.msra.mxu1 %v7793_v23 }
 0xac6   : > { %3874 = vmatprep.subr.bf16.mxu0 %v7773_v22  ;;  %3915 = vmatprep.subr.bf16.mxu1 %v7800_v49 }
 0xac9   : > { %3875 = vmatpush1.bf16.msra.mxu0 %v7785_v46  ;;  %3916 = vmatpush1.bf16.msra.mxu1 %v7806_v50 }
 0xaca   : > { %3876 = vmatprep.subr.bf16.mxu0 %v7788_v47  ;;  %3917 = vmatprep.subr.bf16.mxu1 %v7810_v52 }
 0xacd   : > { %3877 = vmatpush1.bf16.msra.mxu0 %v7796_v24  ;;  %3918 = vmatpush1.bf16.msra.mxu1 %v7819_v54 }
 0xace   : > { %3878 = vmatprep.subr.bf16.mxu0 %v7803_v48  ;;  %3919 = vmatprep.subr.bf16.mxu1 %v7823_v55 }
 0xad1   : > { %3879 = vmatpush1.bf16.msra.mxu0 %v7815_v53  ;;  %3920 = vmatpush1.bf16.msra.mxu1 %v7831_v56 }
 0xad2   : > { %4190 = vmatprep.subr.bf16.mxu0 %v7706_v11  ;;  %4231 = vmatprep.subr.bf16.mxu1 %v7726_v37  ;;  %v3342_v11 = vld [vmem:[#allocation2 + $0x38] sm:$0x30] }
 0xb87   : > { %v3572_v32 = vpop.f32.mrb[4].mxu0  ;;  %v3613_v15 = vpop.f32.mrb[4].mxu1 }
 0xb88   : > { %v3624_v16 = vrot.slane %v3572_v32, 4  ;;  %v3574_v35 = vpop.f32.mrb[5].mxu0  ;;  %v3615_v25 = vpop.f32.mrb[5].mxu1  ;;  %v3626_v6 = vrot.slane %v3613_v15, 4 }
 0xb89   : > { %v3625_v26 = vrot.slane %v3574_v35, 4  ;;  %v3576_v27 = vpop.f32.mrb[6].mxu0  ;;  %v3617_v28 = vpop.f32.mrb[6].mxu1  ;;  %v3627_v5 = vrot.slane %v3615_v25, 4 }
 0xb8a   : > { %v3632_v29 = vadd.f32 %v3624_v16, %v3339_v1  ;;  %v3577_v30 = vpop.f32.mrb[7].mxu0  ;;  %v3618_v31 = vpop.f32.mrb[7].mxu1  ;;  %v3634_v9 = vadd.f32 %v3626_v6, %v3341_v7  ;;  %v7956_v6 = vld [vmem:[%s7190_s29 + $0x4] ss:$16 sps:$4 sm:$0xff]   ;;  %v7959_v7 = vld [vmem:[%s7190_s29 + $0xc] ss:$16 sps:$4 sm:$0xff]  }
 0xb8b   : > { %v3633_v2 = vadd.f32 %v3625_v26, %v3340_v17  ;;  %v3635_v37 = vadd.f32 %v3627_v5, %v3342_v11 }
 0xb8c   : > { %v6124_v3 = vmul.f32 -1.442695, %v3632_v29 }
 0xb8d   : > { %v6125_v4 = vmul.f32 -1.442695, %v3633_v2  ;;  %v6126_v8 = vmul.f32 -1.442695, %v3635_v37 }
 0xb8e   : > { %6741 = vpow2.f32 %v6124_v3 }
 0xb8f   : > { %6743 = vpow2.f32 %v6125_v4 }
 0xb90   : > { %6745 = vpow2.f32 %v6126_v8  ;;  %v7962_v8 = vld [vmem:[%s7190_s29] ss:$16 sps:$4 sm:$0xff]  }
 0xb91   : > { %6747 = vtanh.f32 %v3634_v9  ;;  %v7965_v9 = vld [vmem:[%s7190_s29 + $0x8] ss:$16 sps:$4 sm:$0xff]  }
 0xb98   : > { %v6742_v10 = vpop.eup %6741 }
 0xb99   : > { %v6744_v19 = vpop.eup %6743  ;;  %v3639_v58 = vadd.f32 1.0, %v6742_v10  ;;  %v7972_v10 = vld [vmem:[%s7190_s29 + $0x24] ss:$16 sps:$4 sm:$0xff]  }
 0xb9a   : > { %v3645_v59 = vadd.f32 1.0, %v6744_v19  ;;  %v6746_v61 = vpop.eup %6745  ;;  %v7975_v19 = vld [vmem:[%s7190_s29 + $0x2c] ss:$16 sps:$4 sm:$0xff]  }
 0xb9b   : > { %6749 = vrcp.f32 %v3639_v58  ;;  %v6748_v51 = vpop.eup %6747  ;;  %v3652_v32 = vadd.f32 1.0, %v6746_v61  ;;  %v7978_v58 = vld [vmem:[%s7190_s29 + $0x20] ss:$16 sps:$4 sm:$0xff]   ;;  %v7988_v61 = vld [vmem:[%s7190_s29 + $0x44] ss:$16 sps:$4 sm:$0xff]  }
 0xb9c   : > { %6751 = vrcp.f32 %v3645_v59  ;;  %v7981_v59 = vld [vmem:[%s7190_s29 + $0x28] ss:$16 sps:$4 sm:$0xff]  }
 0xb9d   : > { %6753 = vrcp.f32 %v3652_v32  ;;  %v8010_v32 = vld [vmem:[%s7190_s29 + $0x60] ss:$16 sps:$4 sm:$0xff]  }
 0xba5   : > { %v6750_v62 = vpop.eup %6749 }
 0xba6   : > { %v6752_v0 = vpop.eup %6751  ;;  %v3659_v1 = vmul.f32 %v6750_v62, %v6748_v51  ;;  %v7991_v51 = vld [vmem:[%s7190_s29 + $0x4c] ss:$16 sps:$4 sm:$0xff]   ;;  %v7994_v62 = vld [vmem:[%s7190_s29 + $0x40] ss:$16 sps:$4 sm:$0xff]  }
 0xba7   : > { %v3658_v15 = vmul.f32 %v6752_v0, %v3656_v63  ;;  %v6754_v17 = vpop.eup %6753  ;;  %v7997_v63 = vld [vmem:[%s7190_s29 + $0x48] ss:$16 sps:$4 sm:$0xff]   ;;  %v8004_v0 = vld [vmem:[%s7190_s29 + $0x64] ss:$16 sps:$4 sm:$0xff]  }
 0xba9   : > { %v7912_v16 = vadd.f32 %v3659_v1, %v3658_v15  ;;  %v8007_v1 = vld [vmem:[%s7190_s29 + $0x6c] ss:$16 sps:$4 sm:$0xff]   ;;  %v8013_v15 = vld [vmem:[%s7190_s29 + $0x68] ss:$16 sps:$4 sm:$0xff]  }
 0xbab   : > { %6755 = vtanh.f32 %v7912_v16  ;;  %v3982_v60 = vrot.slane %v7912_v16, 2  ;;  %v8020_v16 = vld [vmem:[%s7190_s29 + $0x80] ss:$16 sps:$4 sm:$0xff]  }
 0xbb5   : > { %v6756_v35 = vpop.eup %6755 }
 0xbb6   : > { %v3662_v25 = vmul.f32 %v6756_v35, %v6754_v17  ;;  %v8023_v17 = vld [vmem:[%s7190_s29 + $0x84] ss:$16 sps:$4 sm:$0xff]   ;;  %v8026_v35 = vld [vmem:[%s7190_s29 + $0x88] ss:$16 sps:$4 sm:$0xff]  }
 0xbb8   : > { %v3663_v26 = vpack.c.bf16 %v3662_v25, %v3662_v25  ;;  %v8029_v25 = vld [vmem:[%s7190_s29 + $0x8c] ss:$16 sps:$4 sm:$0xff]  }
 0xbba   : > { %3664 = vst [vmem:[%s7203_s15 + $0x4] sm:$0x4] %v3663_v26  ;;  %v3702_v27 = vrot.slane %v3663_v26, 2  ;;  %v8032_v26 = vld [vmem:[%s7190_s29 + $0xa4] ss:$16 sps:$4 sm:$0xff]  }
 0xbbc   : > { %3897 = vmatmul.mubr.bf16.vlgmr.msra.gmra.mrb[8].mxu0 %v3702_v27  ;;  %3938 = vmatmul.mubr.bf16.vlgmr.msra.gmra.mrb[8].mxu1 %v3702_v27  ;;  %v8036_v27 = vld [vmem:[%s7190_s29 + $0xac] ss:$16 sps:$4 sm:$0xff]  }
 0xbbd   : > { %4191 = vmatpush1.bf16.msra.mxu0 %v7709_v12  ;;  %4232 = vmatpush1.bf16.msra.mxu1 %v7729_v38  ;;  %v3665_v12 = vld [vmem:[#allocation2 + $0x20] sm:$0xc]  ;;  %v3666_v38 = vld [vmem:[#allocation2 + $0x28] sm:$0xc] }
 0xbbe   : > { %4192 = vmatprep.subr.bf16.mxu0 %v7715_v14  ;;  %4233 = vmatprep.subr.bf16.mxu1 %v7742_v42 }
 0xbbf   : > { %4222 = vmatprep.mubr.bf16.mxu0 %v6990_v13  ;;  %4263 = vmatprep.mubr.bf16.mxu1 %v6990_v13 }
 0xbc1   : > { %4193 = vmatpush1.bf16.msra.mxu0 %v7719_v34  ;;  %4234 = vmatpush1.bf16.msra.mxu1 %v7745_v43 }
 0xbc2   : > { %4194 = vmatprep.subr.bf16.mxu0 %v7723_v36  ;;  %4235 = vmatprep.subr.bf16.mxu1 %v7756_v57 }
 0xbc5   : > { %4195 = vmatpush1.bf16.msra.mxu0 %v7733_v40  ;;  %4236 = vmatpush1.bf16.msra.mxu1 %v7761_v18 }
 0xbc6   : > { %4196 = vmatprep.subr.bf16.mxu0 %v7738_v41  ;;  %4237 = vmatprep.subr.bf16.mxu1 %v7765_v20 }
 0xbc9   : > { %4197 = vmatpush1.bf16.msra.mxu0 %v7750_v44  ;;  %4238 = vmatpush1.bf16.msra.mxu1 %v7777_v33 }
 0xbca   : > { %4198 = vmatprep.subr.bf16.mxu0 %v7753_v45  ;;  %4239 = vmatprep.subr.bf16.mxu1 %v7781_v39  ;;  %v3668_v39 = vld [vmem:[#allocation2 + $0x38] sm:$0xc] }
 0xbcd   : > { %4199 = vmatpush1.bf16.msra.mxu0 %v7769_v21  ;;  %4240 = vmatpush1.bf16.msra.mxu1 %v7793_v23  ;;  %v3667_v23 = vld [vmem:[#allocation2 + $0x30] sm:$0xc] }
 0xbce   : > { %4200 = vmatprep.subr.bf16.mxu0 %v7773_v22  ;;  %4241 = vmatprep.subr.bf16.mxu1 %v7800_v49 }
 0xbd1   : > { %4201 = vmatpush1.bf16.msra.mxu0 %v7785_v46  ;;  %4242 = vmatpush1.bf16.msra.mxu1 %v7806_v50 }
 0xbd2   : > { %4202 = vmatprep.subr.bf16.mxu0 %v7788_v47  ;;  %4243 = vmatprep.subr.bf16.mxu1 %v7810_v52 }
 0xbd5   : > { %4203 = vmatpush1.bf16.msra.mxu0 %v7796_v24  ;;  %4244 = vmatpush1.bf16.msra.mxu1 %v7819_v54 }
 0xbd6   : > { %4204 = vmatprep.subr.bf16.mxu0 %v7803_v48  ;;  %4245 = vmatprep.subr.bf16.mxu1 %v7823_v55 }
 0xbd9   : > { %4205 = vmatpush1.bf16.msra.mxu0 %v7815_v53  ;;  %4246 = vmatpush1.bf16.msra.mxu1 %v7831_v56 }
 0xbda   : > { %4501 = vmatprep.subr.bf16.mxu0 %v7956_v6  ;;  %4542 = vmatprep.subr.bf16.mxu1 %v7959_v7 }
 0xc8f   : > { %v3898_v14 = vpop.f32.mrb[8].mxu0  ;;  %v3939_v34 = vpop.f32.mrb[8].mxu1 }
 0xc90   : > { %v3950_v36 = vrot.slane %v3898_v14, 6  ;;  %v3900_v40 = vpop.f32.mrb[9].mxu0  ;;  %v3941_v41 = vpop.f32.mrb[9].mxu1  ;;  %v3952_v47 = vrot.slane %v3939_v34, 6  ;;  %v8046_v14 = vld [vmem:[%s7190_s29 + $0xa8] ss:$16 sps:$4 sm:$0xff]  }
 0xc91   : > { %v3951_v42 = vrot.slane %v3900_v40, 6  ;;  %v3902_v43 = vpop.f32.mrb[10].mxu0  ;;  %v3943_v44 = vpop.f32.mrb[10].mxu1  ;;  %v3953_v33 = vrot.slane %v3941_v41, 6  ;;  %v8049_v34 = vld [vmem:[%s7190_s29 + $0xc4] ss:$16 sps:$4 sm:$0xff]  }
 0xc92   : > { %v3958_v45 = vadd.f32 %v3950_v36, %v3665_v12  ;;  %v3903_v57 = vpop.f32.mrb[11].mxu0  ;;  %v3944_v18 = vpop.f32.mrb[11].mxu1  ;;  %v3960_v49 = vadd.f32 %v3952_v47, %v3667_v23  ;;  %v8041_v12 = vld [vmem:[%s7190_s29 + $0xa0] ss:$16 sps:$4 sm:$0xff]   ;;  %v8053_v36 = vld [vmem:[%s7190_s29 + $0xcc] ss:$16 sps:$4 sm:$0xff]  }
 0xc93   : > { %v3959_v20 = vadd.f32 %v3951_v42, %v3666_v38  ;;  %v3961_v46 = vadd.f32 %v3953_v33, %v3668_v39  ;;  %v8057_v38 = vld [vmem:[%s7190_s29 + $0xc0] ss:$16 sps:$4 sm:$0xff]   ;;  %v8062_v40 = vld [vmem:[%s7190_s29 + $0xc8] ss:$16 sps:$4 sm:$0xff]   ;;  %v8065_v41 = vld [vmem:[%s7190_s29 + $0xe4] ss:$16 sps:$4 sm:$0xff]  }
 0xc94   : > { %v6159_v21 = vmul.f32 -1.442695, %v3958_v45  ;;  %v8069_v42 = vld [vmem:[%s7190_s29 + $0xec] ss:$16 sps:$4 sm:$0xff]   ;;  %v8073_v43 = vld [vmem:[%s7190_s29 + $0xe0] ss:$16 sps:$4 sm:$0xff]  }
 0xc95   : > { %v6160_v22 = vmul.f32 -1.442695, %v3959_v20  ;;  %v6161_v24 = vmul.f32 -1.442695, %v3961_v46  ;;  %v8078_v44 = vld [vmem:[%s7190_s29 + $0xe8] ss:$16 sps:$4 sm:$0xff]  }
 0xc96   : > { %6757 = vpow2.f32 %v6159_v21  ;;  %v3991_v45 = vld [vmem:[#allocation2 + $0x20] sm:$0x3]  ;;  %v3992_v57 = vld [vmem:[#allocation2 + $0x28] sm:$0x3] }
 0xc97   : > { %6759 = vpow2.f32 %v6160_v22 }
 0xc98   : > { %6761 = vpow2.f32 %v6161_v24 }
 0xc99   : > { %6763 = vtanh.f32 %v3960_v49 }
 0xca0   : > { %v6758_v48 = vpop.eup %6757 }
 0xca1   : > { %v6760_v50 = vpop.eup %6759  ;;  %v3965_v52 = vadd.f32 1.0, %v6758_v48 }
 0xca2   : > { %v3971_v53 = vadd.f32 1.0, %v6760_v50  ;;  %v6762_v54 = vpop.eup %6761  ;;  %v3994_v50 = vld [vmem:[#allocation2 + $0x38] sm:$0x3] }
 0xca3   : > { %6765 = vrcp.f32 %v3965_v52  ;;  %v6764_v55 = vpop.eup %6763  ;;  %v3978_v30 = vadd.f32 1.0, %v6762_v54 }
 0xca4   : > { %6767 = vrcp.f32 %v3971_v53  ;;  %v3993_v53 = vld [vmem:[#allocation2 + $0x30] sm:$0x3] }
 0xca5   : > { %6769 = vrcp.f32 %v3978_v30 }
 0xcad   : > { %v6766_v56 = vpop.eup %6765 }
 0xcae   : > { %v6768_v28 = vpop.eup %6767  ;;  %v3985_v29 = vmul.f32 %v6766_v56, %v6764_v55 }
 0xcaf   : > { %v3984_v31 = vmul.f32 %v6768_v28, %v3982_v60  ;;  %v6770_v3 = vpop.eup %6769 }
 0xcb1   : > { %v7949_v2 = vadd.f32 %v3985_v29, %v3984_v31 }
 0xcb3   : > { %6771 = vtanh.f32 %v7949_v2 }
 0xcbd   : > { %v6772_v4 = vpop.eup %6771 }
 0xcbe   : > { %v3988_v5 = vmul.f32 %v6772_v4, %v6770_v3  ;;  %v4296_v4 = vrot.slane %v7949_v2, 2  ;;  %v4305_v2 = vld [vmem:[#allocation2] sm:$0xc0] }
 0xcc0   : > { %v3989_v11 = vpack.c.bf16 %v3988_v5, %v3988_v5 }
 0xcc2   : > { %3990 = vst [vmem:[%s7203_s15 + $0x4] sm:$0x2] %v3989_v11  ;;  %v4028_v37 = vrot.slane %v3989_v11, 1 }
 0xcc4   : > { %4223 = vmatmul.mubr.bf16.vlgmr.msra.gmra.mrb[12].mxu0 %v4028_v37  ;;  %4264 = vmatmul.mubr.bf16.vlgmr.msra.gmra.mrb[12].mxu1 %v4028_v37 }
 0xcc5   : > { %4533 = vmatprep.mubr.bf16.mxu0 %v6990_v13  ;;  %4574 = vmatprep.mubr.bf16.mxu1 %v6990_v13 }
 0xcc6   : > { %4502 = vmatpush1.bf16.msra.mxu0 %v7962_v8  ;;  %4543 = vmatpush1.bf16.msra.mxu1 %v7965_v9 }
 0xcc7   : > { %4503 = vmatprep.subr.bf16.mxu0 %v7972_v10  ;;  %4544 = vmatprep.subr.bf16.mxu1 %v7975_v19 }
 0xcca   : > { %4504 = vmatpush1.bf16.msra.mxu0 %v7978_v58  ;;  %4545 = vmatpush1.bf16.msra.mxu1 %v7981_v59 }
 0xccb   : > { %4505 = vmatprep.subr.bf16.mxu0 %v7988_v61  ;;  %4546 = vmatprep.subr.bf16.mxu1 %v7991_v51 }
 0xcce   : > { %4506 = vmatpush1.bf16.msra.mxu0 %v7994_v62  ;;  %4547 = vmatpush1.bf16.msra.mxu1 %v7997_v63 }
 0xccf   : > { %4507 = vmatprep.subr.bf16.mxu0 %v8004_v0  ;;  %4548 = vmatprep.subr.bf16.mxu1 %v8007_v1 }
 0xcd2   : > { %4508 = vmatpush1.bf16.msra.mxu0 %v8010_v32  ;;  %4549 = vmatpush1.bf16.msra.mxu1 %v8013_v15 }
 0xcd3   : > { %4509 = vmatprep.subr.bf16.mxu0 %v8023_v17  ;;  %4550 = vmatprep.subr.bf16.mxu1 %v8029_v25 }
 0xcd6   : > { %4510 = vmatpush1.bf16.msra.mxu0 %v8020_v16  ;;  %4551 = vmatpush1.bf16.msra.mxu1 %v8026_v35 }
 0xcd7   : > { %4511 = vmatprep.subr.bf16.mxu0 %v8032_v26  ;;  %4552 = vmatprep.subr.bf16.mxu1 %v8036_v27 }
 0xcda   : > { %4512 = vmatpush1.bf16.msra.mxu0 %v8041_v12  ;;  %4553 = vmatpush1.bf16.msra.mxu1 %v8046_v14 }
 0xcdb   : > { %4513 = vmatprep.subr.bf16.mxu0 %v8049_v34  ;;  %4554 = vmatprep.subr.bf16.mxu1 %v8053_v36 }
 0xcde   : > { %4514 = vmatpush1.bf16.msra.mxu0 %v8057_v38  ;;  %4555 = vmatpush1.bf16.msra.mxu1 %v8062_v40 }
 0xcdf   : > { %4515 = vmatprep.subr.bf16.mxu0 %v8065_v41  ;;  %4556 = vmatprep.subr.bf16.mxu1 %v8069_v42 }
 0xce2   : > { %4516 = vmatpush1.bf16.msra.mxu0 %v8073_v43  ;;  %4557 = vmatpush1.bf16.msra.mxu1 %v8078_v44 }
 0xce3   : > { %4827 = vmatprep.subr.bf16.mxu0 %v7956_v6  ;;  %4868 = vmatprep.subr.bf16.mxu1 %v7959_v7 }
 0xd97   : > { %v4224_v18 = vpop.f32.mrb[12].mxu0  ;;  %v4265_v20 = vpop.f32.mrb[12].mxu1 }
 0xd98   : > { %v4272_v21 = vadd.f32 %v4224_v18, %v3991_v45  ;;  %v4226_v22 = vpop.f32.mrb[13].mxu0  ;;  %v4267_v33 = vpop.f32.mrb[13].mxu1  ;;  %v4274_v55 = vadd.f32 %v4265_v20, %v3993_v53 }
 0xd99   : > { %v4273_v39 = vadd.f32 %v4226_v22, %v3992_v57  ;;  %v4228_v46 = vpop.f32.mrb[14].mxu0  ;;  %v4269_v47 = vpop.f32.mrb[14].mxu1  ;;  %v4275_v52 = vadd.f32 %v4267_v33, %v3994_v50 }
 0xd9a   : > { %v6194_v23 = vmul.f32 -1.442695, %v4272_v21  ;;  %v4229_v24 = vpop.f32.mrb[15].mxu0  ;;  %v4270_v49 = vpop.f32.mrb[15].mxu1  ;;  %v4306_v47 = vld [vmem:[#allocation2 + $0x8] sm:$0xc0] }
 0xd9b   : > { %v6195_v48 = vmul.f32 -1.442695, %v4273_v39  ;;  %v6196_v54 = vmul.f32 -1.442695, %v4275_v52 }
 0xd9c   : > { %6773 = vpow2.f32 %v6194_v23 }
 0xd9d   : > { %6775 = vpow2.f32 %v6195_v48 }
 0xd9e   : > { %6777 = vpow2.f32 %v6196_v54 }
 0xd9f   : > { %6779 = vtanh.f32 %v4274_v55 }
 0xda6   : > { %v6774_v56 = vpop.eup %6773 }
 0xda7   : > { %v6776_v60 = vpop.eup %6775  ;;  %v4279_v28 = vadd.f32 1.0, %v6774_v56 }
 0xda8   : > { %v4285_v29 = vadd.f32 1.0, %v6776_v60  ;;  %v6778_v30 = vpop.eup %6777 }
 0xda9   : > { %6781 = vrcp.f32 %v4279_v28  ;;  %v6780_v31 = vpop.eup %6779  ;;  %v4292_v37 = vadd.f32 1.0, %v6778_v30 }
 0xdaa   : > { %6783 = vrcp.f32 %v4285_v29  ;;  %v4308_v29 = vld [vmem:[#allocation2 + $0x18] sm:$0xc0] }
 0xdab   : > { %6785 = vrcp.f32 %v4292_v37 }
 0xdb3   : > { %v6782_v3 = vpop.eup %6781 }
 0xdb4   : > { %v6784_v5 = vpop.eup %6783  ;;  %v4299_v11 = vmul.f32 %v6782_v3, %v6780_v31  ;;  %v4307_v3 = vld [vmem:[#allocation2 + $0x10] sm:$0xc0] }
 0xdb5   : > { %v4298_v45 = vmul.f32 %v6784_v5, %v4296_v4  ;;  %v6786_v18 = vpop.eup %6785 }
 0xdb7   : > { %v8086_v57 = vadd.f32 %v4299_v11, %v4298_v45 }
 0xdb9   : > { %6787 = vtanh.f32 %v8086_v57 }
 0xdc3   : > { %v6788_v20 = vpop.eup %6787 }
 0xdc4   : > { %v4302_v21 = vmul.f32 %v6788_v20, %v6786_v18 }
 0xdc6   : > { %v4303_v22 = vpack.c.bf16 %v4302_v21, %v4302_v21 }
 0xdc8   : > { %4304 = vst [vmem:[%s7203_s15 + $0x4] sm:$0x1] %v4303_v22  ;;  %4534 = vmatmul.mubr.bf16.vlgmr.msra.gmra.mrb[16].mxu0 %v4303_v22  ;;  %4575 = vmatmul.mubr.bf16.vlgmr.msra.gmra.mrb[16].mxu1 %v4303_v22 }
 0xdc9   : > { %4828 = vmatpush1.bf16.msra.mxu0 %v7962_v8  ;;  %4869 = vmatpush1.bf16.msra.mxu1 %v7965_v9 }
 0xdca   : > { %4829 = vmatprep.subr.bf16.mxu0 %v7972_v10  ;;  %4870 = vmatprep.subr.bf16.mxu1 %v7975_v19 }
 0xdcb   : > { %4859 = vmatprep.mubr.bf16.mxu0 %v6990_v13  ;;  %4900 = vmatprep.mubr.bf16.mxu1 %v6990_v13 }
 0xdcd   : > { %4830 = vmatpush1.bf16.msra.mxu0 %v7978_v58  ;;  %4871 = vmatpush1.bf16.msra.mxu1 %v7981_v59 }
 0xdce   : > { %4831 = vmatprep.subr.bf16.mxu0 %v7988_v61  ;;  %4872 = vmatprep.subr.bf16.mxu1 %v7991_v51 }
 0xdd1   : > { %4832 = vmatpush1.bf16.msra.mxu0 %v7994_v62  ;;  %4873 = vmatpush1.bf16.msra.mxu1 %v7997_v63 }
 0xdd2   : > { %4833 = vmatprep.subr.bf16.mxu0 %v8004_v0  ;;  %4874 = vmatprep.subr.bf16.mxu1 %v8007_v1 }
 0xdd5   : > { %4834 = vmatpush1.bf16.msra.mxu0 %v8010_v32  ;;  %4875 = vmatpush1.bf16.msra.mxu1 %v8013_v15 }
 0xdd6   : > { %4835 = vmatprep.subr.bf16.mxu0 %v8023_v17  ;;  %4876 = vmatprep.subr.bf16.mxu1 %v8029_v25 }
 0xdd9   : > { %4836 = vmatpush1.bf16.msra.mxu0 %v8020_v16  ;;  %4877 = vmatpush1.bf16.msra.mxu1 %v8026_v35 }
 0xdda   : > { %4837 = vmatprep.subr.bf16.mxu0 %v8032_v26  ;;  %4878 = vmatprep.subr.bf16.mxu1 %v8036_v27 }
 0xddd   : > { %4838 = vmatpush1.bf16.msra.mxu0 %v8041_v12  ;;  %4879 = vmatpush1.bf16.msra.mxu1 %v8046_v14 }
 0xdde   : > { %4839 = vmatprep.subr.bf16.mxu0 %v8049_v34  ;;  %4880 = vmatprep.subr.bf16.mxu1 %v8053_v36 }
 0xde1   : > { %4840 = vmatpush1.bf16.msra.mxu0 %v8057_v38  ;;  %4881 = vmatpush1.bf16.msra.mxu1 %v8062_v40 }
 0xde2   : > { %4841 = vmatprep.subr.bf16.mxu0 %v8065_v41  ;;  %4882 = vmatprep.subr.bf16.mxu1 %v8069_v42 }
 0xde5   : > { %4842 = vmatpush1.bf16.msra.mxu0 %v8073_v43  ;;  %4883 = vmatpush1.bf16.msra.mxu1 %v8078_v44 }
 0xde6   : > { %5153 = vmatprep.subr.bf16.mxu0 %v7956_v6  ;;  %5194 = vmatprep.subr.bf16.mxu1 %v7959_v7 }
 0xe9b   : > { %v4535_v33 = vpop.f32.mrb[16].mxu0  ;;  %v4576_v39 = vpop.f32.mrb[16].mxu1 }
 0xe9c   : > { %v4587_v46 = vrot.slane %v4535_v33, 2  ;;  %v4537_v23 = vpop.f32.mrb[17].mxu0  ;;  %v4578_v24 = vpop.f32.mrb[17].mxu1  ;;  %v4589_v31 = vrot.slane %v4576_v39, 2 }
 0xe9d   : > { %v4588_v49 = vrot.slane %v4537_v23, 2  ;;  %v4539_v48 = vpop.f32.mrb[18].mxu0  ;;  %v4580_v50 = vpop.f32.mrb[18].mxu1  ;;  %v4590_v28 = vrot.slane %v4578_v24, 2 }
 0xe9e   : > { %v4595_v52 = vadd.f32 %v4587_v46, %v4305_v2  ;;  %v4540_v53 = vpop.f32.mrb[19].mxu0  ;;  %v4581_v54 = vpop.f32.mrb[19].mxu1  ;;  %v4597_v5 = vadd.f32 %v4589_v31, %v4307_v3  ;;  %v4619_v2 = vrot.slane %v8086_v57, 2  ;;  %v4628_v57 = vld [vmem:[#allocation2] sm:$0x30] }
 0xe9f   : > { %v4596_v55 = vadd.f32 %v4588_v49, %v4306_v47  ;;  %v4598_v30 = vadd.f32 %v4590_v28, %v4308_v29 }
 0xea0   : > { %v6229_v56 = vmul.f32 -1.442695, %v4595_v52 }
 0xea1   : > { %v6230_v60 = vmul.f32 -1.442695, %v4596_v55  ;;  %v6231_v4 = vmul.f32 -1.442695, %v4598_v30 }
 0xea2   : > { %6789 = vpow2.f32 %v6229_v56  ;;  %v4629_v56 = vld [vmem:[#allocation2 + $0x8] sm:$0x30] }
 0xea3   : > { %6791 = vpow2.f32 %v6230_v60 }
 0xea4   : > { %6793 = vpow2.f32 %v6231_v4 }
 0xea5   : > { %6795 = vtanh.f32 %v4597_v5 }
 0xeac   : > { %v6790_v11 = vpop.eup %6789 }
 0xead   : > { %v6792_v37 = vpop.eup %6791  ;;  %v4602_v45 = vadd.f32 1.0, %v6790_v11 }
 0xeae   : > { %v4608_v18 = vadd.f32 1.0, %v6792_v37  ;;  %v6794_v20 = vpop.eup %6793 }
 0xeaf   : > { %6797 = vrcp.f32 %v4602_v45  ;;  %v6796_v21 = vpop.eup %6795  ;;  %v4615_v39 = vadd.f32 1.0, %v6794_v20 }
 0xeb0   : > { %6799 = vrcp.f32 %v4608_v18 }
 0xeb1   : > { %6801 = vrcp.f32 %v4615_v39 }
 0xeb9   : > { %v6798_v22 = vpop.eup %6797 }
 0xeba   : > { %v6800_v33 = vpop.eup %6799  ;;  %v4622_v46 = vmul.f32 %v6798_v22, %v6796_v21  ;;  %v4630_v21 = vld [vmem:[#allocation2 + $0x10] sm:$0x30] }
 0xebb   : > { %v4621_v47 = vmul.f32 %v6800_v33, %v4619_v2  ;;  %v6802_v24 = vpop.eup %6801 }
 0xebd   : > { %v8125_v23 = vadd.f32 %v4622_v46, %v4621_v47 }
 0xebf   : > { %6803 = vtanh.f32 %v8125_v23 }
 0xec9   : > { %v6804_v49 = vpop.eup %6803 }
 0xeca   : > { %v4625_v48 = vmul.f32 %v6804_v49, %v6802_v24 }
 0xecc   : > { %v4626_v50 = vpack.c.bf16 %v4625_v48, %v4625_v48 }
 0xece   : > { %4627 = vst [vmem:[%s7203_s15] sm:$0x8] %v4626_v50  ;;  %v4665_v52 = vrot.slane %v4626_v50, 3  ;;  %v4945_v50 = vrot.slane %v8125_v23, 2 }
 0xed0   : > { %4860 = vmatmul.mubr.bf16.vlgmr.msra.gmra.mrb[20].mxu0 %v4665_v52  ;;  %4901 = vmatmul.mubr.bf16.vlgmr.msra.gmra.mrb[20].mxu1 %v4665_v52 }
 0xed1   : > { %5154 = vmatpush1.bf16.msra.mxu0 %v7962_v8  ;;  %5195 = vmatpush1.bf16.msra.mxu1 %v7965_v9 }
 0xed2   : > { %5155 = vmatprep.subr.bf16.mxu0 %v7972_v10  ;;  %5196 = vmatprep.subr.bf16.mxu1 %v7975_v19 }
 0xed3   : > { %5185 = vmatprep.mubr.bf16.mxu0 %v6990_v13  ;;  %5226 = vmatprep.mubr.bf16.mxu1 %v6990_v13 }
 0xed5   : > { %5156 = vmatpush1.bf16.msra.mxu0 %v7978_v58  ;;  %5197 = vmatpush1.bf16.msra.mxu1 %v7981_v59 }
 0xed6   : > { %5157 = vmatprep.subr.bf16.mxu0 %v7988_v61  ;;  %5198 = vmatprep.subr.bf16.mxu1 %v7991_v51 }
 0xed9   : > { %5158 = vmatpush1.bf16.msra.mxu0 %v7994_v62  ;;  %5199 = vmatpush1.bf16.msra.mxu1 %v7997_v63 }
 0xeda   : > { %5159 = vmatprep.subr.bf16.mxu0 %v8004_v0  ;;  %5200 = vmatprep.subr.bf16.mxu1 %v8007_v1 }
 0xedd   : > { %5160 = vmatpush1.bf16.msra.mxu0 %v8010_v32  ;;  %5201 = vmatpush1.bf16.msra.mxu1 %v8013_v15 }
 0xede   : > { %5161 = vmatprep.subr.bf16.mxu0 %v8023_v17  ;;  %5202 = vmatprep.subr.bf16.mxu1 %v8029_v25 }
 0xee1   : > { %5162 = vmatpush1.bf16.msra.mxu0 %v8020_v16  ;;  %5203 = vmatpush1.bf16.msra.mxu1 %v8026_v35 }
 0xee2   : > { %5163 = vmatprep.subr.bf16.mxu0 %v8032_v26  ;;  %5204 = vmatprep.subr.bf16.mxu1 %v8036_v27 }
 0xee5   : > { %5164 = vmatpush1.bf16.msra.mxu0 %v8041_v12  ;;  %5205 = vmatpush1.bf16.msra.mxu1 %v8046_v14 }
 0xee6   : > { %5165 = vmatprep.subr.bf16.mxu0 %v8049_v34  ;;  %5206 = vmatprep.subr.bf16.mxu1 %v8053_v36 }
 0xee9   : > { %5166 = vmatpush1.bf16.msra.mxu0 %v8057_v38  ;;  %5207 = vmatpush1.bf16.msra.mxu1 %v8062_v40 }
 0xeea   : > { %5167 = vmatprep.subr.bf16.mxu0 %v8065_v41  ;;  %5208 = vmatprep.subr.bf16.mxu1 %v8069_v42 }
 0xeed   : > { %5168 = vmatpush1.bf16.msra.mxu0 %v8073_v43  ;;  %5209 = vmatpush1.bf16.msra.mxu1 %v8078_v44 }
 0xeee   : > { %5479 = vmatprep.subr.bf16.mxu0 %v7956_v6  ;;  %5520 = vmatprep.subr.bf16.mxu1 %v7959_v7  ;;  %v4631_v6 = vld [vmem:[#allocation2 + $0x18] sm:$0x30] }
 0xfa3   : > { %v4861_v53 = vpop.f32.mrb[20].mxu0  ;;  %v4902_v54 = vpop.f32.mrb[20].mxu1 }
 0xfa4   : > { %v4913_v55 = vrot.slane %v4861_v53, 4  ;;  %v4863_v60 = vpop.f32.mrb[21].mxu0  ;;  %v4904_v28 = vpop.f32.mrb[21].mxu1  ;;  %v4915_v20 = vrot.slane %v4902_v54, 4 }
 0xfa5   : > { %v4914_v29 = vrot.slane %v4863_v60, 4  ;;  %v4865_v30 = vpop.f32.mrb[22].mxu0  ;;  %v4906_v31 = vpop.f32.mrb[22].mxu1  ;;  %v4916_v18 = vrot.slane %v4904_v28, 4 }
 0xfa6   : > { %v4921_v3 = vadd.f32 %v4913_v55, %v4628_v57  ;;  %v4866_v4 = vpop.f32.mrb[23].mxu0  ;;  %v4907_v5 = vpop.f32.mrb[23].mxu1  ;;  %v4923_v2 = vadd.f32 %v4915_v20, %v4630_v21  ;;  %v5281_v20 = vld [vmem:[#allocation2 + $0x8] sm:$0x3] }
 0xfa7   : > { %v4922_v11 = vadd.f32 %v4914_v29, %v4629_v56  ;;  %v4924_v7 = vadd.f32 %v4916_v18, %v4631_v6 }
 0xfa8   : > { %v6264_v37 = vmul.f32 -1.442695, %v4921_v3 }
 0xfa9   : > { %v6265_v45 = vmul.f32 -1.442695, %v4922_v11  ;;  %v6266_v22 = vmul.f32 -1.442695, %v4924_v7  ;;  %v5280_v7 = vld [vmem:[#allocation2] sm:$0x3] }
 0xfaa   : > { %6805 = vpow2.f32 %v6264_v37 }
 0xfab   : > { %6807 = vpow2.f32 %v6265_v45 }
 0xfac   : > { %6809 = vpow2.f32 %v6266_v22 }
 0xfad   : > { %6811 = vtanh.f32 %v4923_v2 }
 0xfb4   : > { %v6806_v33 = vpop.eup %6805 }
 0xfb5   : > { %v6808_v46 = vpop.eup %6807  ;;  %v4928_v39 = vadd.f32 1.0, %v6806_v33 }
 0xfb6   : > { %v4934_v47 = vadd.f32 1.0, %v6808_v46  ;;  %v6810_v24 = vpop.eup %6809 }
 0xfb7   : > { %6813 = vrcp.f32 %v4928_v39  ;;  %v6812_v49 = vpop.eup %6811  ;;  %v4941_v53 = vadd.f32 1.0, %v6810_v24 }
 0xfb8   : > { %6815 = vrcp.f32 %v4934_v47 }
 0xfb9   : > { %6817 = vrcp.f32 %v4941_v53 }
 0xfc1   : > { %v6814_v48 = vpop.eup %6813 }
 0xfc2   : > { %v6816_v52 = vpop.eup %6815  ;;  %v4948_v57 = vmul.f32 %v6814_v48, %v6812_v49 }
 0xfc3   : > { %v4947_v54 = vmul.f32 %v6816_v52, %v4945_v50  ;;  %v6818_v56 = vpop.eup %6817 }
 0xfc5   : > { %v8164_v55 = vadd.f32 %v4948_v57, %v4947_v54  ;;  %v5283_v57 = vld [vmem:[#allocation2 + $0x18] sm:$0x3]  ;;  %v5282_v54 = vld [vmem:[#allocation2 + $0x10] sm:$0x3] }
 0xfc7   : > { %6819 = vtanh.f32 %v8164_v55 }
 0xfd1   : > { %v6820_v60 = vpop.eup %6819 }
 0xfd2   : > { %v4951_v28 = vmul.f32 %v6820_v60, %v6818_v56 }
 0xfd4   : > { %v4952_v29 = vpack.c.bf16 %v4951_v28, %v4951_v28 }
 0xfd6   : > { %4953 = vst [vmem:[%s7203_s15] sm:$0x4] %v4952_v29  ;;  %v4991_v30 = vrot.slane %v4952_v29, 2 }
 0xfd8   : > { %5186 = vmatmul.mubr.bf16.vlgmr.msra.gmra.mrb[24].mxu0 %v4991_v30  ;;  %5227 = vmatmul.mubr.bf16.vlgmr.msra.gmra.mrb[24].mxu1 %v4991_v30 }
 0xfd9   : > { %5480 = vmatpush1.bf16.msra.mxu0 %v7962_v8  ;;  %5521 = vmatpush1.bf16.msra.mxu1 %v7965_v9 }
 0xfda   : > { %5481 = vmatprep.subr.bf16.mxu0 %v7972_v10  ;;  %5522 = vmatprep.subr.bf16.mxu1 %v7975_v19  ;;  %v4955_v19 = vld [vmem:[#allocation2 + $0x8] sm:$0xc] }
 0xfdb   : > { %5511 = vmatprep.mubr.bf16.mxu0 %v6990_v13  ;;  %5552 = vmatprep.mubr.bf16.mxu1 %v6990_v13  ;;  %v4954_v13 = vld [vmem:[#allocation2] sm:$0xc] }
 0xfdd   : > { %5482 = vmatpush1.bf16.msra.mxu0 %v7978_v58  ;;  %5523 = vmatpush1.bf16.msra.mxu1 %v7981_v59 }
 0xfde   : > { %5483 = vmatprep.subr.bf16.mxu0 %v7988_v61  ;;  %5524 = vmatprep.subr.bf16.mxu1 %v7991_v51 }
 0xfe1   : > { %5484 = vmatpush1.bf16.msra.mxu0 %v7994_v62  ;;  %5525 = vmatpush1.bf16.msra.mxu1 %v7997_v63 }
 0xfe2   : > { %5485 = vmatprep.subr.bf16.mxu0 %v8004_v0  ;;  %5526 = vmatprep.subr.bf16.mxu1 %v8007_v1 }
 0xfe5   : > { %5486 = vmatpush1.bf16.msra.mxu0 %v8010_v32  ;;  %5527 = vmatpush1.bf16.msra.mxu1 %v8013_v15 }
 0xfe6   : > { %5487 = vmatprep.subr.bf16.mxu0 %v8023_v17  ;;  %5528 = vmatprep.subr.bf16.mxu1 %v8029_v25 }
 0xfe9   : > { %5488 = vmatpush1.bf16.msra.mxu0 %v8020_v16  ;;  %5529 = vmatpush1.bf16.msra.mxu1 %v8026_v35  ;;  %v4957_v35 = vld [vmem:[#allocation2 + $0x18] sm:$0xc] }
 0xfea   : > { %5489 = vmatprep.subr.bf16.mxu0 %v8032_v26  ;;  %5530 = vmatprep.subr.bf16.mxu1 %v8036_v27  ;;  %v4956_v27 = vld [vmem:[#allocation2 + $0x10] sm:$0xc] }
 0xfed   : > { %5490 = vmatpush1.bf16.msra.mxu0 %v8041_v12  ;;  %5531 = vmatpush1.bf16.msra.mxu1 %v8046_v14 }
 0xfee   : > { %5491 = vmatprep.subr.bf16.mxu0 %v8049_v34  ;;  %5532 = vmatprep.subr.bf16.mxu1 %v8053_v36 }
 0xff1   : > { %5492 = vmatpush1.bf16.msra.mxu0 %v8057_v38  ;;  %5533 = vmatpush1.bf16.msra.mxu1 %v8062_v40 }
 0xff2   : > { %5493 = vmatprep.subr.bf16.mxu0 %v8065_v41  ;;  %5534 = vmatprep.subr.bf16.mxu1 %v8069_v42 }
 0xff5   : > { %5494 = vmatpush1.bf16.msra.mxu0 %v8073_v43  ;;  %5535 = vmatpush1.bf16.msra.mxu1 %v8078_v44  ;;  %v5271_v44 = vrot.slane %v8164_v55, 2 }
0x10ab   : > { %v5187_v8 = vpop.f32.mrb[24].mxu0  ;;  %v5228_v9 = vpop.f32.mrb[24].mxu1 }
0x10ac   : > { %v5239_v10 = vrot.slane %v5187_v8, 6  ;;  %v5189_v58 = vpop.f32.mrb[25].mxu0  ;;  %v5230_v59 = vpop.f32.mrb[25].mxu1  ;;  %v5241_v26 = vrot.slane %v5228_v9, 6 }
0x10ad   : > { %v5240_v61 = vrot.slane %v5189_v58, 6  ;;  %v5191_v51 = vpop.f32.mrb[26].mxu0  ;;  %v5232_v62 = vpop.f32.mrb[26].mxu1  ;;  %v5242_v17 = vrot.slane %v5230_v59, 6 }
0x10ae   : > { %v5247_v63 = vadd.f32 %v5239_v10, %v4954_v13  ;;  %v5192_v0 = vpop.f32.mrb[27].mxu0  ;;  %v5233_v1 = vpop.f32.mrb[27].mxu1  ;;  %v5249_v14 = vadd.f32 %v5241_v26, %v4956_v27 }
0x10af   : > { %v5248_v32 = vadd.f32 %v5240_v61, %v4955_v19  ;;  %v5250_v25 = vadd.f32 %v5242_v17, %v4957_v35 }
0x10b0   : > { %v6299_v15 = vmul.f32 -1.442695, %v5247_v63 }
0x10b1   : > { %v6300_v16 = vmul.f32 -1.442695, %v5248_v32  ;;  %v6301_v12 = vmul.f32 -1.442695, %v5250_v25 }
0x10b2   : > { %6821 = vpow2.f32 %v6299_v15 }
0x10b3   : > { %6823 = vpow2.f32 %v6300_v16 }
0x10b4   : > { %6825 = vpow2.f32 %v6301_v12 }
0x10b5   : > { %6827 = vtanh.f32 %v5249_v14 }
0x10bc   : > { %v6822_v34 = vpop.eup %6821 }
0x10bd   : > { %v6824_v36 = vpop.eup %6823  ;;  %v5254_v38 = vadd.f32 1.0, %v6822_v34 }
0x10be   : > { %v5260_v40 = vadd.f32 1.0, %v6824_v36  ;;  %v6826_v41 = vpop.eup %6825 }
0x10bf   : > { %6829 = vrcp.f32 %v5254_v38  ;;  %v6828_v42 = vpop.eup %6827  ;;  %v5267_v3 = vadd.f32 1.0, %v6826_v41 }
0x10c0   : > { %6831 = vrcp.f32 %v5260_v40 }
0x10c1   : > { %6833 = vrcp.f32 %v5267_v3 }
0x10c9   : > { %v6830_v43 = vpop.eup %6829 }
0x10ca   : > { %v6832_v23 = vpop.eup %6831  ;;  %v5274_v31 = vmul.f32 %v6830_v43, %v6828_v42 }
0x10cb   : > { %v5273_v4 = vmul.f32 %v6832_v23, %v5271_v44  ;;  %v6834_v11 = vpop.eup %6833 }
0x10cd   : > { %v5275_v5 = vadd.f32 %v5274_v31, %v5273_v4 }
0x10cf   : > { %6835 = vtanh.f32 %v5275_v5  ;;  %v5585_v10 = vrot.slane %v5275_v5, 2 }
0x10d9   : > { %v6836_v37 = vpop.eup %6835 }
0x10da   : > { %v5277_v45 = vmul.f32 %v6836_v37, %v6834_v11 }
0x10dc   : > { %v5278_v18 = vpack.c.bf16 %v5277_v45, %v5277_v45 }
0x10de   : > { %5279 = vst [vmem:[%s7203_s15] sm:$0x2] %v5278_v18  ;;  %v5317_v6 = vrot.slane %v5278_v18, 1 }
0x10e0   : > { %5512 = vmatmul.mubr.bf16.vlgmr.msra.gmra.mrb[28].mxu0 %v5317_v6  ;;  %5553 = vmatmul.mubr.bf16.vlgmr.msra.gmra.mrb[28].mxu1 %v5317_v6 }
0x11b3   : > { %v5513_v21 = vpop.f32.mrb[28].mxu0  ;;  %v5554_v22 = vpop.f32.mrb[28].mxu1 }
0x11b4   : > { %v5561_v2 = vadd.f32 %v5513_v21, %v5280_v7  ;;  %v5515_v33 = vpop.f32.mrb[29].mxu0  ;;  %v5556_v46 = vpop.f32.mrb[29].mxu1  ;;  %v5563_v56 = vadd.f32 %v5554_v22, %v5282_v54 }
0x11b5   : > { %v5562_v39 = vadd.f32 %v5515_v33, %v5281_v20  ;;  %v5517_v47 = vpop.f32.mrb[30].mxu0  ;;  %v5558_v24 = vpop.f32.mrb[30].mxu1  ;;  %v5564_v53 = vadd.f32 %v5556_v46, %v5283_v57 }
0x11b6   : > { %v6334_v49 = vmul.f32 -1.442695, %v5561_v2  ;;  %v5518_v48 = vpop.f32.mrb[31].mxu0  ;;  %v5559_v50 = vpop.f32.mrb[31].mxu1 }
0x11b7   : > { %v6335_v52 = vmul.f32 -1.442695, %v5562_v39  ;;  %v6336_v55 = vmul.f32 -1.442695, %v5564_v53 }
0x11b8   : > { %6837 = vpow2.f32 %v6334_v49 }
0x11b9   : > { %6839 = vpow2.f32 %v6335_v52 }
0x11ba   : > { %6841 = vpow2.f32 %v6336_v55 }
0x11bb   : > { %6843 = vtanh.f32 %v5563_v56 }
0x11c2   : > { %v6838_v60 = vpop.eup %6837 }
0x11c3   : > { %v6840_v28 = vpop.eup %6839  ;;  %v5568_v29 = vadd.f32 1.0, %v6838_v60 }
0x11c4   : > { %v5574_v30 = vadd.f32 1.0, %v6840_v28  ;;  %v6842_v13 = vpop.eup %6841 }
0x11c5   : > { %6845 = vrcp.f32 %v5568_v29  ;;  %v6844_v8 = vpop.eup %6843  ;;  %v5581_v59 = vadd.f32 1.0, %v6842_v13 }
0x11c6   : > { %6847 = vrcp.f32 %v5574_v30 }
0x11c7   : > { %6849 = vrcp.f32 %v5581_v59 }
0x11cf   : > { %v6846_v9 = vpop.eup %6845 }
0x11d0   : > { %v6848_v19 = vpop.eup %6847  ;;  %v5588_v58 = vmul.f32 %v6846_v9, %v6844_v8 }
0x11d1   : > { %v5587_v61 = vmul.f32 %v6848_v19, %v5585_v10  ;;  %v6850_v62 = vpop.eup %6849 }
0x11d3   : > { %v5589_v51 = vadd.f32 %v5588_v58, %v5587_v61 }
0x11d5   : > { %6851 = vtanh.f32 %v5589_v51 }
0x11df   : > { %v6852_v63 = vpop.eup %6851 }
0x11e0   : > { %v5591_v0 = vmul.f32 %v6852_v63, %v6850_v62 }
0x11e2   : > { %v5592_v1 = vpack.c.bf16 %v5591_v0, %v5591_v0 }
0x11e4   : > { %5593 = vst [vmem:[%s7203_s15] sm:$0x1] %v5592_v1 }
0x11e5 PF: > { %p8250_p7 = scmp.ne.s32.totalorder %s8238_s25, 0 }
0x11e6   : > { %s6338_s21 = sshll.u32 (%p8250_p7), %s7035_s19, 2  ;;  %v5620_v15 = vld [vmem:[%s7203_s15 + $0x4] sm:$0xf] (%p8250_p7) }
0x11e7   : > { %5600 = sbr.rel (!%p8250_p7) target bundleno = 4590 (0x11ee), region = 60  ;;  %s5602_s28 = scalar_lea.vmem (%p8250_p7), %s8228_s4, %s6338_s21 }
0x11e8   : > { %5621 = vst [vmem:[%s5602_s28 + $0x8] sm:$0xf] (%p8250_p7), %v5620_v15 }
0x11eb   : > { %v5618_v32 = vld [vmem:[%s7203_s15] sm:$0xf] (%p8250_p7) }
0x11ec   : > { %5619 = vst [vmem:[%s5602_s28] sm:$0xf] (%p8250_p7), %v5618_v32 }
0x11ee PF: > { %s8251_s5 = sld [smem:[#allocation11_spill]]  ;;  %s8252_s17 = sld [smem:[#allocation12_spill]] }
0x11ef   : > { %p17_p9 = scmp.ge.s32.totalorder %s7038_s20, 4   ;;  %s8253_s15 = smov %s6973_s16 }
0x11f0   : > { %s8255_s18 = smov %s7038_s20 }
0x11f1   :  { %19 = sbr.rel (!%p17_p9) target bundleno = 8 (0x8), region = 149 }
0x11f4   : > { %s8254_s16 = smov %s8251_s5 }
0x11f8   :  { %5658 = vsyncpa [#allocation4], 1 }
0x11f9   :  { %5660 = vsyncpa [#allocation4 + $0x1], 1 }
0x11fa   :  { %5661 = vsyncpa [#allocation6], 1 }
0x11fb   :  { %5663 = vsyncpa [#allocation6 + $0x1], 1 }

</bundles_post_ra>
